<compile_context>
chip_gen: v6e
topology: v6e:2x2x1
jax: 0.10.0
libtpu: 0.0.40
codegen_flags: <defaults>
</compile_context>

<pallas_src>
import jax
import jax.numpy as jnp
from jax.experimental import pallas as pl
from jax.experimental.pallas import tpu as pltpu

LANE = 128


def _round_up(x, m):
    return (x + m - 1) // m * m


def _final_height(seq_len):
    """Height after conv_region + two convs + the repeated DPCNN blocks."""
    h = seq_len - 2
    while h > 2:
        h = ((h + 1) - 3) // 2 + 1        # padding2 + MaxPool((3,1), stride 2)
    return h


# ----------------------------------------------------------------------------
# Fused kernel: whole DPCNN forward for one batch tile per grid step.
# ----------------------------------------------------------------------------
def _dpcnn_kernel(ids_ref,                  # VMEM (TB*L, 1) int32
                  emb_ref,                  # VMEM (Vp, Cp)
                  wr_ref, br_ref,           # VMEM (3, Cp, Cp), (1, Cp)  conv_region
                  wc_ref, bc_ref,           # VMEM (3, Cp, Cp), (1, Cp)  conv
                  wfc_ref, bfc_ref,         # VMEM (Cp, NCp), (1, NCp)   fc
                  out_ref,                  # VMEM (TB, NCp)
                  pool_scr):                # VMEM scratch (TB, L, Cp)
    TB, L, Cp = pool_scr.shape
    Vp = emb_ref.shape[0]
    ML = TB * L

    # ---- embedding lookup as ONE one-hot MXU matmul -------------------------
    ids = ids_ref[...]                                           # (TB*L, 1)
    vocab_iota = jax.lax.broadcasted_iota(jnp.int32, (ML, Vp), 1)
    onehot = jnp.where(vocab_iota == ids, 1.0, 0.0).astype(jnp.float32)
    x = jnp.dot(onehot, emb_ref[...],
                preferred_element_type=jnp.float32).reshape(TB, L, Cp)

    zrow = jnp.zeros((TB, 1, Cp), jnp.float32)   # hoisted pad row (reused)

    def conv3(xv, w_ref, b_ref):
        # 3-tap conv over height as three accumulated MXU dots against the
        # per-tap (Cp, Cp) weight slabs; batch rows fold into the M dimension.
        tb, hin, cp = xv.shape
        hout = hin - 2
        acc = jnp.dot(xv[:, 0:hout, :].reshape(tb * hout, cp), w_ref[0],
                      preferred_element_type=jnp.float32)
        acc = acc + jnp.dot(xv[:, 1:hout + 1, :].reshape(tb * hout, cp),
                            w_ref[1], preferred_element_type=jnp.float32)
        acc = acc + jnp.dot(xv[:, 2:hout + 2, :].reshape(tb * hout, cp),
                            w_ref[2], preferred_element_type=jnp.float32)
        return (acc + b_ref[...]).reshape(tb, hout, cp)

    def same_conv(xv):
        # padding1 -> relu -> conv (height preserved); relu(0)==0 so the
        # pad/relu order matches the torch model exactly.
        xp = jnp.concatenate([zrow, jnp.maximum(xv, 0.0), zrow], axis=1)
        return conv3(xp, wc_ref, bc_ref)

    x = conv3(x, wr_ref, br_ref)              # conv_region : (TB, L-2, Cp)
    x = same_conv(x)
    x = same_conv(x)

    # ---- repeated block, fully unrolled at trace time (O(log L) iters) ------
    while x.shape[1] > 2:
        h = x.shape[1]
        # padding2 (one zero row at the bottom) + MaxPool((3,1), stride=2):
        # stage in the VMEM scratch, read back as three stride-2 row slices.
        pool_scr[:, 0:h, :] = x
        pool_scr[:, h:h + 1, :] = zrow
        ho = ((h + 1) - 3) // 2 + 1
        px = jnp.maximum(
            jnp.maximum(pool_scr[:, pl.ds(0, ho, 2), :],
                        pool_scr[:, pl.ds(1, ho, 2), :]),
            pool_scr[:, pl.ds(2, ho, 2), :])                 # (TB, ho, Cp)
        y = same_conv(px)
        y = same_conv(y)
        x = y + px                                            # residual

    # ---- squeeze + fc (classes padded to a full 128 lanes) -------------------
    feat = x.reshape(TB, Cp)                   # final height is 1 (asserted)
    out_ref[...] = (jnp.dot(feat, wfc_ref[...],
                            preferred_element_type=jnp.float32)
                    + bfc_ref[...])


# ----------------------------------------------------------------------------
# Parameter preparation (lane-dense, channels-last) and wrapper
# ----------------------------------------------------------------------------
def make_dpcnn_params(embedding, w_region3, b_region, w_conv3, b_conv,
                      w_fc, b_fc):
    """Pad channels-last weights into the kernel's lane-dense layout.

    embedding (V, E), w_region3 (3, E, F), w_conv3 (3, F, F), b_* (F,),
    w_fc (F, C), b_fc (C,).
    """
    V, E = embedding.shape
    F = w_conv3.shape[-1]
    C = w_fc.shape[-1]
    Cp = max(_round_up(E, LANE), _round_up(F, LANE))
    Vp = _round_up(V, LANE)
    NCp = _round_up(C, LANE)

    def pad_to(a, shape):
        return jnp.pad(a, [(0, s - d) for d, s in zip(a.shape, shape)])

    # TODO(synk): store these in bf16 (keep f32 accumulation in the kernel)
    # for realistic configs; kept f32 here so the self-check stays tight.
    return dict(
        emb=pad_to(embedding.astype(jnp.float32), (Vp, Cp)),
        w_region=pad_to(w_region3.astype(jnp.float32), (3, Cp, Cp)),
        b_region=pad_to(b_region.astype(jnp.float32), (Cp,)).reshape(1, Cp),
        w_conv=pad_to(w_conv3.astype(jnp.float32), (3, Cp, Cp)),
        b_conv=pad_to(b_conv.astype(jnp.float32), (Cp,)).reshape(1, Cp),
        w_fc=pad_to(w_fc.astype(jnp.float32), (Cp, NCp)),
        b_fc=pad_to(b_fc.astype(jnp.float32), (NCp,)).reshape(1, NCp),
    )


def dpcnn_forward(token_ids, params, num_classes, tile_batch=8):
    B, L = token_ids.shape
    assert _final_height(L) == 1, (
        "sequence length must reduce to height 1 before the final squeeze")
    Vp, Cp = params["emb"].shape
    NCp = params["w_fc"].shape[-1]

    # TB = 8 keeps the batch tile sublane-aligned; with B >= 2*TB the
    # "parallel" grid axis has >= 2 steps so v7x megacore can split tiles.
    # (Raise TB to 16-32 for large-batch serving to keep the matmul M big.)
    TB = tile_batch
    Bp = _round_up(B, TB)
    ids = token_ids.astype(jnp.int32)
    if Bp != B:
        ids = jnp.pad(ids, ((0, Bp - B), (0, 0)))
    ids_flat = ids.reshape(Bp * L, 1)          # lane-dense column of token ids
    nb = Bp // TB

    grid_spec = pltpu.PrefetchScalarGridSpec(
        num_scalar_prefetch=0,
        grid=(nb,),
        in_specs=[
            pl.BlockSpec((TB * L, 1), lambda i: (i, 0)),           # ids
            pl.BlockSpec(params["emb"].shape, lambda i: (0, 0)),
            pl.BlockSpec(params["w_region"].shape, lambda i: (0, 0, 0)),
            pl.BlockSpec(params["b_region"].shape, lambda i: (0, 0)),
            pl.BlockSpec(params["w_conv"].shape, lambda i: (0, 0, 0)),
            pl.BlockSpec(params["b_conv"].shape, lambda i: (0, 0)),
            pl.BlockSpec(params["w_fc"].shape, lambda i: (0, 0)),
            pl.BlockSpec(params["b_fc"].shape, lambda i: (0, 0)),
        ],
        out_specs=pl.BlockSpec((TB, NCp), lambda i: (i, 0)),
        scratch_shapes=[pltpu.VMEM((TB, L, Cp), jnp.float32)],
    )
    out = pl.pallas_call(
        _dpcnn_kernel,
        out_shape=jax.ShapeDtypeStruct((Bp, NCp), jnp.float32),
        grid_spec=grid_spec,
        compiler_params=pltpu.CompilerParams(
            dimension_semantics=("parallel",)),
    )(ids_flat, params["emb"], params["w_region"], params["b_region"],
      params["w_conv"], params["b_conv"], params["w_fc"], params["b_fc"])
    return out[:B, :num_classes]


# ----------------------------------------------------------------------------
# Pure-JAX reference (torch semantics, unpadded channels) for the self-check
# ----------------------------------------------------------------------------
def dpcnn_reference(token_ids, embedding, w_region3, b_region, w_conv3,
                    b_conv, w_fc, b_fc):
    hi = jax.lax.Precision.HIGHEST

    def conv3(x, w, b):
        hout = x.shape[1] - 2
        out = (jnp.einsum("bhc,cf->bhf", x[:, 0:hout], w[0], precision=hi)
               + jnp.einsum("bhc,cf->bhf", x[:, 1:hout + 1], w[1], precision=hi)
               + jnp.einsum("bhc,cf->bhf", x[:, 2:hout + 2], w[2], precision=hi))
        return out + b[None, None, :]

    def pad_h(x, top, bot):
        return jnp.pad(x, ((0, 0), (top, bot), (0, 0)))

    x = embedding[token_ids]                                  # (B, L, E)
    x = conv3(x, w_region3, b_region)
    x = conv3(jnp.maximum(pad_h(x, 1, 1), 0.0), w_conv3, b_conv)
    x = conv3(jnp.maximum(pad_h(x, 1, 1), 0.0), w_conv3, b_conv)
    while x.shape[1] > 2:
        xp = pad_h(x, 0, 1)
        ho = (xp.shape[1] - 3) // 2 + 1
        px = jnp.stack([jnp.max(xp[:, 2 * h:2 * h + 3], axis=1)
                        for h in range(ho)], axis=1)
        y = conv3(jnp.maximum(pad_h(px, 1, 1), 0.0), w_conv3, b_conv)
        y = conv3(jnp.maximum(pad_h(y, 1, 1), 0.0), w_conv3, b_conv)
        x = y + px
    x = x[:, 0, :]
    return jnp.dot(x, w_fc, precision=hi) + b_fc[None, :]


# ----------------------------------------------------------------------------
# Main
# ----------------------------------------------------------------------------
if __name__ == "__main__":
    # Small config (stands in for `config`):
    VOCAB, EMB_DIM, NUM_FILTERS, NUM_CLASSES = 50, 32, 32, 4
    # L=16 -> heights 14 -> 7 -> 3 -> 1; B=16 -> two batch tiles (v7x megacore)
    B, L = 16, 16

    key = jax.random.PRNGKey(0)
    ks = jax.random.split(key, 8)

    # Parameters in torch layouts.
    embedding = jax.random.normal(ks[0], (VOCAB, EMB_DIM), jnp.float32) * 0.1
    embedding = embedding.at[0].set(0.0)                      # padding_idx=0
    w_region_t = jax.random.normal(
        ks[1], (NUM_FILTERS, 1, 3, EMB_DIM), jnp.float32) * 0.05
    b_region = jax.random.normal(ks[2], (NUM_FILTERS,), jnp.float32) * 0.05
    w_conv_t = jax.random.normal(
        ks[3], (NUM_FILTERS, NUM_FILTERS, 3, 1), jnp.float32) * 0.05
    b_conv = jax.random.normal(ks[4], (NUM_FILTERS,), jnp.float32) * 0.05
    w_fc_t = jax.random.normal(
        ks[5], (NUM_CLASSES, NUM_FILTERS), jnp.float32) * 0.05
    b_fc = jax.random.normal(ks[6], (NUM_CLASSES,), jnp.float32) * 0.05

    token_ids = jax.random.randint(ks[7], (B, L), 0, VOCAB, dtype=jnp.int32)

    # Channels-last, unpadded conversions (shared by kernel prep & reference).
    w_region3 = jnp.transpose(w_region_t[:, 0], (1, 2, 0))       # (3, E, F)
    w_conv3 = jnp.transpose(w_conv_t[:, :, :, 0], (2, 1, 0))     # (3, F, F)
    w_fc = w_fc_t.T                                              # (F, C)

    pparams = make_dpcnn_params(embedding, w_region3, b_region,
                                w_conv3, b_conv, w_fc, b_fc)

    logits = dpcnn_forward(token_ids, pparams, NUM_CLASSES)
    logits = jax.block_until_ready(logits)

    logits_ref = dpcnn_reference(token_ids, embedding, w_region3, b_region,
                                 w_conv3, b_conv, w_fc, b_fc)
    logits_ref = jax.block_until_ready(logits_ref)

    assert logits.shape == (B, NUM_CLASSES)
    assert jnp.allclose(logits, logits_ref, atol=2e-4, rtol=2e-4), (
        logits, logits_ref)
    print("KERNEL_OK")
</pallas_src>

<mosaic_0001>
module attributes {stable_mosaic.version = 11 : i64} {
  func.func @_dpcnn_kernel(%arg0: i32, %arg1: memref<128x1xi32, #tpu.memory_space<vmem>>, %arg2: memref<128x128xf32, #tpu.memory_space<vmem>>, %arg3: memref<3x128x128xf32, #tpu.memory_space<vmem>>, %arg4: memref<1x128xf32, #tpu.memory_space<vmem>>, %arg5: memref<3x128x128xf32, #tpu.memory_space<vmem>>, %arg6: memref<1x128xf32, #tpu.memory_space<vmem>>, %arg7: memref<128x128xf32, #tpu.memory_space<vmem>>, %arg8: memref<1x128xf32, #tpu.memory_space<vmem>>, %arg9: memref<8x128xf32, #tpu.memory_space<vmem>>, %arg10: memref<8x16x128xf32, #tpu.memory_space<vmem>>) attributes {dimension_semantics = [#tpu.dimension_semantics<parallel>], iteration_bounds = array<i64: 2>, scalar_prefetch = 0 : i64, scratch_operands = 1 : i64, tpu.core_type = #tpu.core_type<tc>, window_params = [{transform_indices = @transform_0, window_bounds = array<i64: 128, 1>}, {pipeline_mode = #tpu.pipeline_mode<synchronous>, transform_indices = @transform_1, window_bounds = array<i64: 128, 128>}, {pipeline_mode = #tpu.pipeline_mode<synchronous>, transform_indices = @transform_2, window_bounds = array<i64: 3, 128, 128>}, {pipeline_mode = #tpu.pipeline_mode<synchronous>, transform_indices = @transform_3, window_bounds = array<i64: 1, 128>}, {pipeline_mode = #tpu.pipeline_mode<synchronous>, transform_indices = @transform_4, window_bounds = array<i64: 3, 128, 128>}, {pipeline_mode = #tpu.pipeline_mode<synchronous>, transform_indices = @transform_5, window_bounds = array<i64: 1, 128>}, {pipeline_mode = #tpu.pipeline_mode<synchronous>, transform_indices = @transform_6, window_bounds = array<i64: 128, 128>}, {pipeline_mode = #tpu.pipeline_mode<synchronous>, transform_indices = @transform_7, window_bounds = array<i64: 1, 128>}, {transform_indices = @transform_8, window_bounds = array<i64: 8, 128>}]} {
    %c0 = arith.constant 0 : index
    %c0_0 = arith.constant 0 : index
    %0 = vector.load %arg1[%c0, %c0_0] : memref<128x1xi32, #tpu.memory_space<vmem>>, vector<128x1xi32>
    %1 = tpu.iota {dimensions = array<i32: 1>} : vector<128x128xi32>
    %2 = vector.broadcast %0 : vector<128x1xi32> to vector<128x128xi32>
    %3 = arith.cmpi eq, %1, %2 : vector<128x128xi32>
    %cst = arith.constant 1.000000e+00 : f32
    %cst_1 = arith.constant 0.000000e+00 : f32
    %4 = vector.broadcast %cst : f32 to vector<128x128xf32>
    %5 = vector.broadcast %cst_1 : f32 to vector<128x128xf32>
    %6 = arith.select %3, %4, %5 : vector<128x128xi1>, vector<128x128xf32>
    %c0_2 = arith.constant 0 : index
    %c0_3 = arith.constant 0 : index
    %7 = vector.load %arg2[%c0_2, %c0_3] : memref<128x128xf32, #tpu.memory_space<vmem>>, vector<128x128xf32>
    %cst_4 = arith.constant dense<0.000000e+00> : vector<128x128xf32>
    %8 = tpu.matmul %6, %7, %cst_4 {dimension_numbers = #tpu.dot_dimension_numbers<[1], [0], [0], [1], [0, 0, 1, 1], [], []>} : vector<128x128xf32>, vector<128x128xf32>, vector<128x128xf32> -> vector<128x128xf32>
    %9 = vector.shape_cast %8 : vector<128x128xf32> to vector<8x16x128xf32>
    %cst_5 = arith.constant 0.000000e+00 : f32
    %10 = vector.broadcast %cst_5 : f32 to vector<8x1x128xf32>
    %11 = vector.extract_strided_slice %9 {offsets = [0, 0, 0], sizes = [8, 14, 128], strides = [1, 1, 1]} : vector<8x16x128xf32> to vector<8x14x128xf32>
    %12 = vector.shape_cast %11 : vector<8x14x128xf32> to vector<112x128xf32>
    %c0_6 = arith.constant 0 : index
    %c0_7 = arith.constant 0 : index
    %c0_8 = arith.constant 0 : index
    %13 = vector.load %arg3[%c0_6, %c0_7, %c0_8] : memref<3x128x128xf32, #tpu.memory_space<vmem>>, vector<1x128x128xf32>
    %14 = vector.shape_cast %13 : vector<1x128x128xf32> to vector<128x128xf32>
    %cst_9 = arith.constant dense<0.000000e+00> : vector<112x128xf32>
    %15 = tpu.matmul %12, %14, %cst_9 {dimension_numbers = #tpu.dot_dimension_numbers<[1], [0], [0], [1], [0, 0, 1, 1], [], []>} : vector<112x128xf32>, vector<128x128xf32>, vector<112x128xf32> -> vector<112x128xf32>
    %16 = vector.extract_strided_slice %9 {offsets = [0, 1, 0], sizes = [8, 14, 128], strides = [1, 1, 1]} : vector<8x16x128xf32> to vector<8x14x128xf32>
    %17 = vector.shape_cast %16 : vector<8x14x128xf32> to vector<112x128xf32>
    %c1 = arith.constant 1 : index
    %c0_10 = arith.constant 0 : index
    %c0_11 = arith.constant 0 : index
    %18 = vector.load %arg3[%c1, %c0_10, %c0_11] : memref<3x128x128xf32, #tpu.memory_space<vmem>>, vector<1x128x128xf32>
    %19 = vector.shape_cast %18 : vector<1x128x128xf32> to vector<128x128xf32>
    %cst_12 = arith.constant dense<0.000000e+00> : vector<112x128xf32>
    %20 = tpu.matmul %17, %19, %cst_12 {dimension_numbers = #tpu.dot_dimension_numbers<[1], [0], [0], [1], [0, 0, 1, 1], [], []>} : vector<112x128xf32>, vector<128x128xf32>, vector<112x128xf32> -> vector<112x128xf32>
    %21 = arith.addf %15, %20 : vector<112x128xf32>
    %22 = vector.extract_strided_slice %9 {offsets = [0, 2, 0], sizes = [8, 14, 128], strides = [1, 1, 1]} : vector<8x16x128xf32> to vector<8x14x128xf32>
    %23 = vector.shape_cast %22 : vector<8x14x128xf32> to vector<112x128xf32>
    %c2 = arith.constant 2 : index
    %c0_13 = arith.constant 0 : index
    %c0_14 = arith.constant 0 : index
    %24 = vector.load %arg3[%c2, %c0_13, %c0_14] : memref<3x128x128xf32, #tpu.memory_space<vmem>>, vector<1x128x128xf32>
    %25 = vector.shape_cast %24 : vector<1x128x128xf32> to vector<128x128xf32>
    %cst_15 = arith.constant dense<0.000000e+00> : vector<112x128xf32>
    %26 = tpu.matmul %23, %25, %cst_15 {dimension_numbers = #tpu.dot_dimension_numbers<[1], [0], [0], [1], [0, 0, 1, 1], [], []>} : vector<112x128xf32>, vector<128x128xf32>, vector<112x128xf32> -> vector<112x128xf32>
    %27 = arith.addf %21, %26 : vector<112x128xf32>
    %c0_16 = arith.constant 0 : index
    %c0_17 = arith.constant 0 : index
    %28 = vector.load %arg4[%c0_16, %c0_17] : memref<1x128xf32, #tpu.memory_space<vmem>>, vector<1x128xf32>
    %29 = vector.broadcast %28 : vector<1x128xf32> to vector<112x128xf32>
    %30 = arith.addf %27, %29 : vector<112x128xf32>
    %31 = vector.shape_cast %30 : vector<112x128xf32> to vector<8x14x128xf32>
    %cst_18 = arith.constant 0.000000e+00 : f32
    %32 = vector.broadcast %cst_18 : f32 to vector<8x14x128xf32>
    %33 = arith.maximumf %31, %32 : vector<8x14x128xf32>
    %34 = tpu.concatenate %10, %33, %10 in 1 : vector<8x1x128xf32>, vector<8x14x128xf32>, vector<8x1x128xf32> -> vector<8x16x128xf32>
    %35 = vector.extract_strided_slice %34 {offsets = [0, 0, 0], sizes = [8, 14, 128], strides = [1, 1, 1]} : vector<8x16x128xf32> to vector<8x14x128xf32>
    %36 = vector.shape_cast %35 : vector<8x14x128xf32> to vector<112x128xf32>
    %c0_19 = arith.constant 0 : index
    %c0_20 = arith.constant 0 : index
    %c0_21 = arith.constant 0 : index
    %37 = vector.load %arg5[%c0_19, %c0_20, %c0_21] : memref<3x128x128xf32, #tpu.memory_space<vmem>>, vector<1x128x128xf32>
    %38 = vector.shape_cast %37 : vector<1x128x128xf32> to vector<128x128xf32>
    %cst_22 = arith.constant dense<0.000000e+00> : vector<112x128xf32>
    %39 = tpu.matmul %36, %38, %cst_22 {dimension_numbers = #tpu.dot_dimension_numbers<[1], [0], [0], [1], [0, 0, 1, 1], [], []>} : vector<112x128xf32>, vector<128x128xf32>, vector<112x128xf32> -> vector<112x128xf32>
    %40 = vector.extract_strided_slice %34 {offsets = [0, 1, 0], sizes = [8, 14, 128], strides = [1, 1, 1]} : vector<8x16x128xf32> to vector<8x14x128xf32>
    %41 = vector.shape_cast %40 : vector<8x14x128xf32> to vector<112x128xf32>
    %c1_23 = arith.constant 1 : index
    %c0_24 = arith.constant 0 : index
    %c0_25 = arith.constant 0 : index
    %42 = vector.load %arg5[%c1_23, %c0_24, %c0_25] : memref<3x128x128xf32, #tpu.memory_space<vmem>>, vector<1x128x128xf32>
    %43 = vector.shape_cast %42 : vector<1x128x128xf32> to vector<128x128xf32>
    %cst_26 = arith.constant dense<0.000000e+00> : vector<112x128xf32>
    %44 = tpu.matmul %41, %43, %cst_26 {dimension_numbers = #tpu.dot_dimension_numbers<[1], [0], [0], [1], [0, 0, 1, 1], [], []>} : vector<112x128xf32>, vector<128x128xf32>, vector<112x128xf32> -> vector<112x128xf32>
    %45 = arith.addf %39, %44 : vector<112x128xf32>
    %46 = vector.extract_strided_slice %34 {offsets = [0, 2, 0], sizes = [8, 14, 128], strides = [1, 1, 1]} : vector<8x16x128xf32> to vector<8x14x128xf32>
    %47 = vector.shape_cast %46 : vector<8x14x128xf32> to vector<112x128xf32>
    %c2_27 = arith.constant 2 : index
    %c0_28 = arith.constant 0 : index
    %c0_29 = arith.constant 0 : index
    %48 = vector.load %arg5[%c2_27, %c0_28, %c0_29] : memref<3x128x128xf32, #tpu.memory_space<vmem>>, vector<1x128x128xf32>
    %49 = vector.shape_cast %48 : vector<1x128x128xf32> to vector<128x128xf32>
    %cst_30 = arith.constant dense<0.000000e+00> : vector<112x128xf32>
    %50 = tpu.matmul %47, %49, %cst_30 {dimension_numbers = #tpu.dot_dimension_numbers<[1], [0], [0], [1], [0, 0, 1, 1], [], []>} : vector<112x128xf32>, vector<128x128xf32>, vector<112x128xf32> -> vector<112x128xf32>
    %51 = arith.addf %45, %50 : vector<112x128xf32>
    %c0_31 = arith.constant 0 : index
    %c0_32 = arith.constant 0 : index
    %52 = vector.load %arg6[%c0_31, %c0_32] : memref<1x128xf32, #tpu.memory_space<vmem>>, vector<1x128xf32>
    %53 = vector.broadcast %52 : vector<1x128xf32> to vector<112x128xf32>
    %54 = arith.addf %51, %53 : vector<112x128xf32>
    %55 = vector.shape_cast %54 : vector<112x128xf32> to vector<8x14x128xf32>
    %cst_33 = arith.constant 0.000000e+00 : f32
    %56 = vector.broadcast %cst_33 : f32 to vector<8x14x128xf32>
    %57 = arith.maximumf %55, %56 : vector<8x14x128xf32>
    %58 = tpu.concatenate %10, %57, %10 in 1 : vector<8x1x128xf32>, vector<8x14x128xf32>, vector<8x1x128xf32> -> vector<8x16x128xf32>
    %59 = vector.extract_strided_slice %58 {offsets = [0, 0, 0], sizes = [8, 14, 128], strides = [1, 1, 1]} : vector<8x16x128xf32> to vector<8x14x128xf32>
    %60 = vector.shape_cast %59 : vector<8x14x128xf32> to vector<112x128xf32>
    %c0_34 = arith.constant 0 : index
    %c0_35 = arith.constant 0 : index
    %c0_36 = arith.constant 0 : index
    %61 = vector.load %arg5[%c0_34, %c0_35, %c0_36] : memref<3x128x128xf32, #tpu.memory_space<vmem>>, vector<1x128x128xf32>
    %62 = vector.shape_cast %61 : vector<1x128x128xf32> to vector<128x128xf32>
    %cst_37 = arith.constant dense<0.000000e+00> : vector<112x128xf32>
    %63 = tpu.matmul %60, %62, %cst_37 {dimension_numbers = #tpu.dot_dimension_numbers<[1], [0], [0], [1], [0, 0, 1, 1], [], []>} : vector<112x128xf32>, vector<128x128xf32>, vector<112x128xf32> -> vector<112x128xf32>
    %64 = vector.extract_strided_slice %58 {offsets = [0, 1, 0], sizes = [8, 14, 128], strides = [1, 1, 1]} : vector<8x16x128xf32> to vector<8x14x128xf32>
    %65 = vector.shape_cast %64 : vector<8x14x128xf32> to vector<112x128xf32>
    %c1_38 = arith.constant 1 : index
    %c0_39 = arith.constant 0 : index
    %c0_40 = arith.constant 0 : index
    %66 = vector.load %arg5[%c1_38, %c0_39, %c0_40] : memref<3x128x128xf32, #tpu.memory_space<vmem>>, vector<1x128x128xf32>
    %67 = vector.shape_cast %66 : vector<1x128x128xf32> to vector<128x128xf32>
    %cst_41 = arith.constant dense<0.000000e+00> : vector<112x128xf32>
    %68 = tpu.matmul %65, %67, %cst_41 {dimension_numbers = #tpu.dot_dimension_numbers<[1], [0], [0], [1], [0, 0, 1, 1], [], []>} : vector<112x128xf32>, vector<128x128xf32>, vector<112x128xf32> -> vector<112x128xf32>
    %69 = arith.addf %63, %68 : vector<112x128xf32>
    %70 = vector.extract_strided_slice %58 {offsets = [0, 2, 0], sizes = [8, 14, 128], strides = [1, 1, 1]} : vector<8x16x128xf32> to vector<8x14x128xf32>
    %71 = vector.shape_cast %70 : vector<8x14x128xf32> to vector<112x128xf32>
    %c2_42 = arith.constant 2 : index
    %c0_43 = arith.constant 0 : index
    %c0_44 = arith.constant 0 : index
    %72 = vector.load %arg5[%c2_42, %c0_43, %c0_44] : memref<3x128x128xf32, #tpu.memory_space<vmem>>, vector<1x128x128xf32>
    %73 = vector.shape_cast %72 : vector<1x128x128xf32> to vector<128x128xf32>
    %cst_45 = arith.constant dense<0.000000e+00> : vector<112x128xf32>
    %74 = tpu.matmul %71, %73, %cst_45 {dimension_numbers = #tpu.dot_dimension_numbers<[1], [0], [0], [1], [0, 0, 1, 1], [], []>} : vector<112x128xf32>, vector<128x128xf32>, vector<112x128xf32> -> vector<112x128xf32>
    %75 = arith.addf %69, %74 : vector<112x128xf32>
    %c0_46 = arith.constant 0 : index
    %c0_47 = arith.constant 0 : index
    %76 = vector.load %arg6[%c0_46, %c0_47] : memref<1x128xf32, #tpu.memory_space<vmem>>, vector<1x128xf32>
    %77 = vector.broadcast %76 : vector<1x128xf32> to vector<112x128xf32>
    %78 = arith.addf %75, %77 : vector<112x128xf32>
    %79 = vector.shape_cast %78 : vector<112x128xf32> to vector<8x14x128xf32>
    %c0_48 = arith.constant 0 : index
    %c0_49 = arith.constant 0 : index
    %c0_50 = arith.constant 0 : index
    %80 = vector.load %arg10[%c0_48, %c0_49, %c0_50] : memref<8x16x128xf32, #tpu.memory_space<vmem>>, vector<8x14x128xf32>
    tpu.vector_store %arg10[%c0_48, %c0_49, %c0_50], %79 {strides = array<i32>} : memref<8x16x128xf32, #tpu.memory_space<vmem>>, vector<8x14x128xf32>,
    %c0_51 = arith.constant 0 : index
    %c14 = arith.constant 14 : index
    %c0_52 = arith.constant 0 : index
    %81 = vector.load %arg10[%c0_51, %c14, %c0_52] : memref<8x16x128xf32, #tpu.memory_space<vmem>>, vector<8x1x128xf32>
    tpu.vector_store %arg10[%c0_51, %c14, %c0_52], %10 {strides = array<i32>} : memref<8x16x128xf32, #tpu.memory_space<vmem>>, vector<8x1x128xf32>,
    %c0_53 = arith.constant 0 : index
    %c0_54 = arith.constant 0 : index
    %c0_55 = arith.constant 0 : index
    %82 = tpu.strided_load %arg10[%c0_53, %c0_54, %c0_55] {strides = array<i32: 1, 2, 1>} : memref<8x16x128xf32, #tpu.memory_space<vmem>>, vector<8x7x128xf32>
    %c0_56 = arith.constant 0 : index
    %c1_57 = arith.constant 1 : index
    %c0_58 = arith.constant 0 : index
    %83 = tpu.strided_load %arg10[%c0_56, %c1_57, %c0_58] {strides = array<i32: 1, 2, 1>} : memref<8x16x128xf32, #tpu.memory_space<vmem>>, vector<8x7x128xf32>
    %84 = arith.maximumf %82, %83 : vector<8x7x128xf32>
    %c0_59 = arith.constant 0 : index
    %c2_60 = arith.constant 2 : index
    %c0_61 = arith.constant 0 : index
    %85 = tpu.strided_load %arg10[%c0_59, %c2_60, %c0_61] {strides = array<i32: 1, 2, 1>} : memref<8x16x128xf32, #tpu.memory_space<vmem>>, vector<8x7x128xf32>
    %86 = arith.maximumf %84, %85 : vector<8x7x128xf32>
    %cst_62 = arith.constant 0.000000e+00 : f32
    %87 = vector.broadcast %cst_62 : f32 to vector<8x7x128xf32>
    %88 = arith.maximumf %86, %87 : vector<8x7x128xf32>
    %89 = tpu.concatenate %10, %88, %10 in 1 : vector<8x1x128xf32>, vector<8x7x128xf32>, vector<8x1x128xf32> -> vector<8x9x128xf32>
    %90 = vector.extract_strided_slice %89 {offsets = [0, 0, 0], sizes = [8, 7, 128], strides = [1, 1, 1]} : vector<8x9x128xf32> to vector<8x7x128xf32>
    %91 = vector.shape_cast %90 : vector<8x7x128xf32> to vector<56x128xf32>
    %c0_63 = arith.constant 0 : index
    %c0_64 = arith.constant 0 : index
    %c0_65 = arith.constant 0 : index
    %92 = vector.load %arg5[%c0_63, %c0_64, %c0_65] : memref<3x128x128xf32, #tpu.memory_space<vmem>>, vector<1x128x128xf32>
    %93 = vector.shape_cast %92 : vector<1x128x128xf32> to vector<128x128xf32>
    %cst_66 = arith.constant dense<0.000000e+00> : vector<56x128xf32>
    %94 = tpu.matmul %91, %93, %cst_66 {dimension_numbers = #tpu.dot_dimension_numbers<[1], [0], [0], [1], [0, 0, 1, 1], [], []>} : vector<56x128xf32>, vector<128x128xf32>, vector<56x128xf32> -> vector<56x128xf32>
    %95 = vector.extract_strided_slice %89 {offsets = [0, 1, 0], sizes = [8, 7, 128], strides = [1, 1, 1]} : vector<8x9x128xf32> to vector<8x7x128xf32>
    %96 = vector.shape_cast %95 : vector<8x7x128xf32> to vector<56x128xf32>
    %c1_67 = arith.constant 1 : index
    %c0_68 = arith.constant 0 : index
    %c0_69 = arith.constant 0 : index
    %97 = vector.load %arg5[%c1_67, %c0_68, %c0_69] : memref<3x128x128xf32, #tpu.memory_space<vmem>>, vector<1x128x128xf32>
    %98 = vector.shape_cast %97 : vector<1x128x128xf32> to vector<128x128xf32>
    %cst_70 = arith.constant dense<0.000000e+00> : vector<56x128xf32>
    %99 = tpu.matmul %96, %98, %cst_70 {dimension_numbers = #tpu.dot_dimension_numbers<[1], [0], [0], [1], [0, 0, 1, 1], [], []>} : vector<56x128xf32>, vector<128x128xf32>, vector<56x128xf32> -> vector<56x128xf32>
    %100 = arith.addf %94, %99 : vector<56x128xf32>
    %101 = vector.extract_strided_slice %89 {offsets = [0, 2, 0], sizes = [8, 7, 128], strides = [1, 1, 1]} : vector<8x9x128xf32> to vector<8x7x128xf32>
    %102 = vector.shape_cast %101 : vector<8x7x128xf32> to vector<56x128xf32>
    %c2_71 = arith.constant 2 : index
    %c0_72 = arith.constant 0 : index
    %c0_73 = arith.constant 0 : index
    %103 = vector.load %arg5[%c2_71, %c0_72, %c0_73] : memref<3x128x128xf32, #tpu.memory_space<vmem>>, vector<1x128x128xf32>
    %104 = vector.shape_cast %103 : vector<1x128x128xf32> to vector<128x128xf32>
    %cst_74 = arith.constant dense<0.000000e+00> : vector<56x128xf32>
    %105 = tpu.matmul %102, %104, %cst_74 {dimension_numbers = #tpu.dot_dimension_numbers<[1], [0], [0], [1], [0, 0, 1, 1], [], []>} : vector<56x128xf32>, vector<128x128xf32>, vector<56x128xf32> -> vector<56x128xf32>
    %106 = arith.addf %100, %105 : vector<56x128xf32>
    %c0_75 = arith.constant 0 : index
    %c0_76 = arith.constant 0 : index
    %107 = vector.load %arg6[%c0_75, %c0_76] : memref<1x128xf32, #tpu.memory_space<vmem>>, vector<1x128xf32>
    %108 = vector.broadcast %107 : vector<1x128xf32> to vector<56x128xf32>
    %109 = arith.addf %106, %108 : vector<56x128xf32>
    %110 = vector.shape_cast %109 : vector<56x128xf32> to vector<8x7x128xf32>
    %cst_77 = arith.constant 0.000000e+00 : f32
    %111 = vector.broadcast %cst_77 : f32 to vector<8x7x128xf32>
    %112 = arith.maximumf %110, %111 : vector<8x7x128xf32>
    %113 = tpu.concatenate %10, %112, %10 in 1 : vector<8x1x128xf32>, vector<8x7x128xf32>, vector<8x1x128xf32> -> vector<8x9x128xf32>
    %114 = vector.extract_strided_slice %113 {offsets = [0, 0, 0], sizes = [8, 7, 128], strides = [1, 1, 1]} : vector<8x9x128xf32> to vector<8x7x128xf32>
    %115 = vector.shape_cast %114 : vector<8x7x128xf32> to vector<56x128xf32>
    %c0_78 = arith.constant 0 : index
    %c0_79 = arith.constant 0 : index
    %c0_80 = arith.constant 0 : index
    %116 = vector.load %arg5[%c0_78, %c0_79, %c0_80] : memref<3x128x128xf32, #tpu.memory_space<vmem>>, vector<1x128x128xf32>
    %117 = vector.shape_cast %116 : vector<1x128x128xf32> to vector<128x128xf32>
    %cst_81 = arith.constant dense<0.000000e+00> : vector<56x128xf32>
    %118 = tpu.matmul %115, %117, %cst_81 {dimension_numbers = #tpu.dot_dimension_numbers<[1], [0], [0], [1], [0, 0, 1, 1], [], []>} : vector<56x128xf32>, vector<128x128xf32>, vector<56x128xf32> -> vector<56x128xf32>
    %119 = vector.extract_strided_slice %113 {offsets = [0, 1, 0], sizes = [8, 7, 128], strides = [1, 1, 1]} : vector<8x9x128xf32> to vector<8x7x128xf32>
    %120 = vector.shape_cast %119 : vector<8x7x128xf32> to vector<56x128xf32>
    %c1_82 = arith.constant 1 : index
    %c0_83 = arith.constant 0 : index
    %c0_84 = arith.constant 0 : index
    %121 = vector.load %arg5[%c1_82, %c0_83, %c0_84] : memref<3x128x128xf32, #tpu.memory_space<vmem>>, vector<1x128x128xf32>
    %122 = vector.shape_cast %121 : vector<1x128x128xf32> to vector<128x128xf32>
    %cst_85 = arith.constant dense<0.000000e+00> : vector<56x128xf32>
    %123 = tpu.matmul %120, %122, %cst_85 {dimension_numbers = #tpu.dot_dimension_numbers<[1], [0], [0], [1], [0, 0, 1, 1], [], []>} : vector<56x128xf32>, vector<128x128xf32>, vector<56x128xf32> -> vector<56x128xf32>
    %124 = arith.addf %118, %123 : vector<56x128xf32>
    %125 = vector.extract_strided_slice %113 {offsets = [0, 2, 0], sizes = [8, 7, 128], strides = [1, 1, 1]} : vector<8x9x128xf32> to vector<8x7x128xf32>
    %126 = vector.shape_cast %125 : vector<8x7x128xf32> to vector<56x128xf32>
    %c2_86 = arith.constant 2 : index
    %c0_87 = arith.constant 0 : index
    %c0_88 = arith.constant 0 : index
    %127 = vector.load %arg5[%c2_86, %c0_87, %c0_88] : memref<3x128x128xf32, #tpu.memory_space<vmem>>, vector<1x128x128xf32>
    %128 = vector.shape_cast %127 : vector<1x128x128xf32> to vector<128x128xf32>
    %cst_89 = arith.constant dense<0.000000e+00> : vector<56x128xf32>
    %129 = tpu.matmul %126, %128, %cst_89 {dimension_numbers = #tpu.dot_dimension_numbers<[1], [0], [0], [1], [0, 0, 1, 1], [], []>} : vector<56x128xf32>, vector<128x128xf32>, vector<56x128xf32> -> vector<56x128xf32>
    %130 = arith.addf %124, %129 : vector<56x128xf32>
    %c0_90 = arith.constant 0 : index
    %c0_91 = arith.constant 0 : index
    %131 = vector.load %arg6[%c0_90, %c0_91] : memref<1x128xf32, #tpu.memory_space<vmem>>, vector<1x128xf32>
    %132 = vector.broadcast %131 : vector<1x128xf32> to vector<56x128xf32>
    %133 = arith.addf %130, %132 : vector<56x128xf32>
    %134 = vector.shape_cast %133 : vector<56x128xf32> to vector<8x7x128xf32>
    %135 = arith.addf %134, %86 : vector<8x7x128xf32>
    %c0_92 = arith.constant 0 : index
    %c0_93 = arith.constant 0 : index
    %c0_94 = arith.constant 0 : index
    %136 = vector.load %arg10[%c0_92, %c0_93, %c0_94] : memref<8x16x128xf32, #tpu.memory_space<vmem>>, vector<8x7x128xf32>
    tpu.vector_store %arg10[%c0_92, %c0_93, %c0_94], %135 {strides = array<i32>} : memref<8x16x128xf32, #tpu.memory_space<vmem>>, vector<8x7x128xf32>,
    %c0_95 = arith.constant 0 : index
    %c7 = arith.constant 7 : index
    %c0_96 = arith.constant 0 : index
    %137 = vector.load %arg10[%c0_95, %c7, %c0_96] : memref<8x16x128xf32, #tpu.memory_space<vmem>>, vector<8x1x128xf32>
    tpu.vector_store %arg10[%c0_95, %c7, %c0_96], %10 {strides = array<i32>} : memref<8x16x128xf32, #tpu.memory_space<vmem>>, vector<8x1x128xf32>,
    %c0_97 = arith.constant 0 : index
    %c0_98 = arith.constant 0 : index
    %c0_99 = arith.constant 0 : index
    %138 = tpu.strided_load %arg10[%c0_97, %c0_98, %c0_99] {strides = array<i32: 1, 2, 1>} : memref<8x16x128xf32, #tpu.memory_space<vmem>>, vector<8x3x128xf32>
    %c0_100 = arith.constant 0 : index
    %c1_101 = arith.constant 1 : index
    %c0_102 = arith.constant 0 : index
    %139 = tpu.strided_load %arg10[%c0_100, %c1_101, %c0_102] {strides = array<i32: 1, 2, 1>} : memref<8x16x128xf32, #tpu.memory_space<vmem>>, vector<8x3x128xf32>
    %140 = arith.maximumf %138, %139 : vector<8x3x128xf32>
    %c0_103 = arith.constant 0 : index
    %c2_104 = arith.constant 2 : index
    %c0_105 = arith.constant 0 : index
    %141 = tpu.strided_load %arg10[%c0_103, %c2_104, %c0_105] {strides = array<i32: 1, 2, 1>} : memref<8x16x128xf32, #tpu.memory_space<vmem>>, vector<8x3x128xf32>
    %142 = arith.maximumf %140, %141 : vector<8x3x128xf32>
    %cst_106 = arith.constant 0.000000e+00 : f32
    %143 = vector.broadcast %cst_106 : f32 to vector<8x3x128xf32>
    %144 = arith.maximumf %142, %143 : vector<8x3x128xf32>
    %145 = tpu.concatenate %10, %144, %10 in 1 : vector<8x1x128xf32>, vector<8x3x128xf32>, vector<8x1x128xf32> -> vector<8x5x128xf32>
    %146 = vector.extract_strided_slice %145 {offsets = [0, 0, 0], sizes = [8, 3, 128], strides = [1, 1, 1]} : vector<8x5x128xf32> to vector<8x3x128xf32>
    %147 = vector.shape_cast %146 : vector<8x3x128xf32> to vector<24x128xf32>
    %c0_107 = arith.constant 0 : index
    %c0_108 = arith.constant 0 : index
    %c0_109 = arith.constant 0 : index
    %148 = vector.load %arg5[%c0_107, %c0_108, %c0_109] : memref<3x128x128xf32, #tpu.memory_space<vmem>>, vector<1x128x128xf32>
    %149 = vector.shape_cast %148 : vector<1x128x128xf32> to vector<128x128xf32>
    %cst_110 = arith.constant dense<0.000000e+00> : vector<24x128xf32>
    %150 = tpu.matmul %147, %149, %cst_110 {dimension_numbers = #tpu.dot_dimension_numbers<[1], [0], [0], [1], [0, 0, 1, 1], [], []>} : vector<24x128xf32>, vector<128x128xf32>, vector<24x128xf32> -> vector<24x128xf32>
    %151 = vector.extract_strided_slice %145 {offsets = [0, 1, 0], sizes = [8, 3, 128], strides = [1, 1, 1]} : vector<8x5x128xf32> to vector<8x3x128xf32>
    %152 = vector.shape_cast %151 : vector<8x3x128xf32> to vector<24x128xf32>
    %c1_111 = arith.constant 1 : index
    %c0_112 = arith.constant 0 : index
    %c0_113 = arith.constant 0 : index
    %153 = vector.load %arg5[%c1_111, %c0_112, %c0_113] : memref<3x128x128xf32, #tpu.memory_space<vmem>>, vector<1x128x128xf32>
    %154 = vector.shape_cast %153 : vector<1x128x128xf32> to vector<128x128xf32>
    %cst_114 = arith.constant dense<0.000000e+00> : vector<24x128xf32>
    %155 = tpu.matmul %152, %154, %cst_114 {dimension_numbers = #tpu.dot_dimension_numbers<[1], [0], [0], [1], [0, 0, 1, 1], [], []>} : vector<24x128xf32>, vector<128x128xf32>, vector<24x128xf32> -> vector<24x128xf32>
    %156 = arith.addf %150, %155 : vector<24x128xf32>
    %157 = vector.extract_strided_slice %145 {offsets = [0, 2, 0], sizes = [8, 3, 128], strides = [1, 1, 1]} : vector<8x5x128xf32> to vector<8x3x128xf32>
    %158 = vector.shape_cast %157 : vector<8x3x128xf32> to vector<24x128xf32>
    %c2_115 = arith.constant 2 : index
    %c0_116 = arith.constant 0 : index
    %c0_117 = arith.constant 0 : index
    %159 = vector.load %arg5[%c2_115, %c0_116, %c0_117] : memref<3x128x128xf32, #tpu.memory_space<vmem>>, vector<1x128x128xf32>
    %160 = vector.shape_cast %159 : vector<1x128x128xf32> to vector<128x128xf32>
    %cst_118 = arith.constant dense<0.000000e+00> : vector<24x128xf32>
    %161 = tpu.matmul %158, %160, %cst_118 {dimension_numbers = #tpu.dot_dimension_numbers<[1], [0], [0], [1], [0, 0, 1, 1], [], []>} : vector<24x128xf32>, vector<128x128xf32>, vector<24x128xf32> -> vector<24x128xf32>
    %162 = arith.addf %156, %161 : vector<24x128xf32>
    %c0_119 = arith.constant 0 : index
    %c0_120 = arith.constant 0 : index
    %163 = vector.load %arg6[%c0_119, %c0_120] : memref<1x128xf32, #tpu.memory_space<vmem>>, vector<1x128xf32>
    %164 = vector.broadcast %163 : vector<1x128xf32> to vector<24x128xf32>
    %165 = arith.addf %162, %164 : vector<24x128xf32>
    %166 = vector.shape_cast %165 : vector<24x128xf32> to vector<8x3x128xf32>
    %cst_121 = arith.constant 0.000000e+00 : f32
    %167 = vector.broadcast %cst_121 : f32 to vector<8x3x128xf32>
    %168 = arith.maximumf %166, %167 : vector<8x3x128xf32>
    %169 = tpu.concatenate %10, %168, %10 in 1 : vector<8x1x128xf32>, vector<8x3x128xf32>, vector<8x1x128xf32> -> vector<8x5x128xf32>
    %170 = vector.extract_strided_slice %169 {offsets = [0, 0, 0], sizes = [8, 3, 128], strides = [1, 1, 1]} : vector<8x5x128xf32> to vector<8x3x128xf32>
    %171 = vector.shape_cast %170 : vector<8x3x128xf32> to vector<24x128xf32>
    %c0_122 = arith.constant 0 : index
    %c0_123 = arith.constant 0 : index
    %c0_124 = arith.constant 0 : index
    %172 = vector.load %arg5[%c0_122, %c0_123, %c0_124] : memref<3x128x128xf32, #tpu.memory_space<vmem>>, vector<1x128x128xf32>
    %173 = vector.shape_cast %172 : vector<1x128x128xf32> to vector<128x128xf32>
    %cst_125 = arith.constant dense<0.000000e+00> : vector<24x128xf32>
    %174 = tpu.matmul %171, %173, %cst_125 {dimension_numbers = #tpu.dot_dimension_numbers<[1], [0], [0], [1], [0, 0, 1, 1], [], []>} : vector<24x128xf32>, vector<128x128xf32>, vector<24x128xf32> -> vector<24x128xf32>
    %175 = vector.extract_strided_slice %169 {offsets = [0, 1, 0], sizes = [8, 3, 128], strides = [1, 1, 1]} : vector<8x5x128xf32> to vector<8x3x128xf32>
    %176 = vector.shape_cast %175 : vector<8x3x128xf32> to vector<24x128xf32>
    %c1_126 = arith.constant 1 : index
    %c0_127 = arith.constant 0 : index
    %c0_128 = arith.constant 0 : index
    %177 = vector.load %arg5[%c1_126, %c0_127, %c0_128] : memref<3x128x128xf32, #tpu.memory_space<vmem>>, vector<1x128x128xf32>
    %178 = vector.shape_cast %177 : vector<1x128x128xf32> to vector<128x128xf32>
    %cst_129 = arith.constant dense<0.000000e+00> : vector<24x128xf32>
    %179 = tpu.matmul %176, %178, %cst_129 {dimension_numbers = #tpu.dot_dimension_numbers<[1], [0], [0], [1], [0, 0, 1, 1], [], []>} : vector<24x128xf32>, vector<128x128xf32>, vector<24x128xf32> -> vector<24x128xf32>
    %180 = arith.addf %174, %179 : vector<24x128xf32>
    %181 = vector.extract_strided_slice %169 {offsets = [0, 2, 0], sizes = [8, 3, 128], strides = [1, 1, 1]} : vector<8x5x128xf32> to vector<8x3x128xf32>
    %182 = vector.shape_cast %181 : vector<8x3x128xf32> to vector<24x128xf32>
    %c2_130 = arith.constant 2 : index
    %c0_131 = arith.constant 0 : index
    %c0_132 = arith.constant 0 : index
    %183 = vector.load %arg5[%c2_130, %c0_131, %c0_132] : memref<3x128x128xf32, #tpu.memory_space<vmem>>, vector<1x128x128xf32>
    %184 = vector.shape_cast %183 : vector<1x128x128xf32> to vector<128x128xf32>
    %cst_133 = arith.constant dense<0.000000e+00> : vector<24x128xf32>
    %185 = tpu.matmul %182, %184, %cst_133 {dimension_numbers = #tpu.dot_dimension_numbers<[1], [0], [0], [1], [0, 0, 1, 1], [], []>} : vector<24x128xf32>, vector<128x128xf32>, vector<24x128xf32> -> vector<24x128xf32>
    %186 = arith.addf %180, %185 : vector<24x128xf32>
    %c0_134 = arith.constant 0 : index
    %c0_135 = arith.constant 0 : index
    %187 = vector.load %arg6[%c0_134, %c0_135] : memref<1x128xf32, #tpu.memory_space<vmem>>, vector<1x128xf32>
    %188 = vector.broadcast %187 : vector<1x128xf32> to vector<24x128xf32>
    %189 = arith.addf %186, %188 : vector<24x128xf32>
    %190 = vector.shape_cast %189 : vector<24x128xf32> to vector<8x3x128xf32>
    %191 = arith.addf %190, %142 : vector<8x3x128xf32>
    %c0_136 = arith.constant 0 : index
    %c0_137 = arith.constant 0 : index
    %c0_138 = arith.constant 0 : index
    %192 = vector.load %arg10[%c0_136, %c0_137, %c0_138] : memref<8x16x128xf32, #tpu.memory_space<vmem>>, vector<8x3x128xf32>
    tpu.vector_store %arg10[%c0_136, %c0_137, %c0_138], %191 {strides = array<i32>} : memref<8x16x128xf32, #tpu.memory_space<vmem>>, vector<8x3x128xf32>,
    %c0_139 = arith.constant 0 : index
    %c3 = arith.constant 3 : index
    %c0_140 = arith.constant 0 : index
    %193 = vector.load %arg10[%c0_139, %c3, %c0_140] : memref<8x16x128xf32, #tpu.memory_space<vmem>>, vector<8x1x128xf32>
    tpu.vector_store %arg10[%c0_139, %c3, %c0_140], %10 {strides = array<i32>} : memref<8x16x128xf32, #tpu.memory_space<vmem>>, vector<8x1x128xf32>,
    %c0_141 = arith.constant 0 : index
    %c0_142 = arith.constant 0 : index
    %c0_143 = arith.constant 0 : index
    %194 = tpu.strided_load %arg10[%c0_141, %c0_142, %c0_143] {strides = array<i32: 1, 2, 1>} : memref<8x16x128xf32, #tpu.memory_space<vmem>>, vector<8x1x128xf32>
    %c0_144 = arith.constant 0 : index
    %c1_145 = arith.constant 1 : index
    %c0_146 = arith.constant 0 : index
    %195 = tpu.strided_load %arg10[%c0_144, %c1_145, %c0_146] {strides = array<i32: 1, 2, 1>} : memref<8x16x128xf32, #tpu.memory_space<vmem>>, vector<8x1x128xf32>
    %196 = arith.maximumf %194, %195 : vector<8x1x128xf32>
    %c0_147 = arith.constant 0 : index
    %c2_148 = arith.constant 2 : index
    %c0_149 = arith.constant 0 : index
    %197 = tpu.strided_load %arg10[%c0_147, %c2_148, %c0_149] {strides = array<i32: 1, 2, 1>} : memref<8x16x128xf32, #tpu.memory_space<vmem>>, vector<8x1x128xf32>
    %198 = arith.maximumf %196, %197 : vector<8x1x128xf32>
    %cst_150 = arith.constant 0.000000e+00 : f32
    %199 = vector.broadcast %cst_150 : f32 to vector<8x1x128xf32>
    %200 = arith.maximumf %198, %199 : vector<8x1x128xf32>
    %201 = tpu.concatenate %10, %200, %10 in 1 : vector<8x1x128xf32>, vector<8x1x128xf32>, vector<8x1x128xf32> -> vector<8x3x128xf32>
    %202 = vector.extract_strided_slice %201 {offsets = [0, 0, 0], sizes = [8, 1, 128], strides = [1, 1, 1]} : vector<8x3x128xf32> to vector<8x1x128xf32>
    %203 = vector.shape_cast %202 : vector<8x1x128xf32> to vector<8x128xf32>
    %c0_151 = arith.constant 0 : index
    %c0_152 = arith.constant 0 : index
    %c0_153 = arith.constant 0 : index
    %204 = vector.load %arg5[%c0_151, %c0_152, %c0_153] : memref<3x128x128xf32, #tpu.memory_space<vmem>>, vector<1x128x128xf32>
    %205 = vector.shape_cast %204 : vector<1x128x128xf32> to vector<128x128xf32>
    %cst_154 = arith.constant dense<0.000000e+00> : vector<8x128xf32>
    %206 = tpu.matmul %203, %205, %cst_154 {dimension_numbers = #tpu.dot_dimension_numbers<[1], [0], [0], [1], [0, 0, 1, 1], [], []>} : vector<8x128xf32>, vector<128x128xf32>, vector<8x128xf32> -> vector<8x128xf32>
    %207 = vector.extract_strided_slice %201 {offsets = [0, 1, 0], sizes = [8, 1, 128], strides = [1, 1, 1]} : vector<8x3x128xf32> to vector<8x1x128xf32>
    %208 = vector.shape_cast %207 : vector<8x1x128xf32> to vector<8x128xf32>
    %c1_155 = arith.constant 1 : index
    %c0_156 = arith.constant 0 : index
    %c0_157 = arith.constant 0 : index
    %209 = vector.load %arg5[%c1_155, %c0_156, %c0_157] : memref<3x128x128xf32, #tpu.memory_space<vmem>>, vector<1x128x128xf32>
    %210 = vector.shape_cast %209 : vector<1x128x128xf32> to vector<128x128xf32>
    %cst_158 = arith.constant dense<0.000000e+00> : vector<8x128xf32>
    %211 = tpu.matmul %208, %210, %cst_158 {dimension_numbers = #tpu.dot_dimension_numbers<[1], [0], [0], [1], [0, 0, 1, 1], [], []>} : vector<8x128xf32>, vector<128x128xf32>, vector<8x128xf32> -> vector<8x128xf32>
    %212 = arith.addf %206, %211 : vector<8x128xf32>
    %213 = vector.extract_strided_slice %201 {offsets = [0, 2, 0], sizes = [8, 1, 128], strides = [1, 1, 1]} : vector<8x3x128xf32> to vector<8x1x128xf32>
    %214 = vector.shape_cast %213 : vector<8x1x128xf32> to vector<8x128xf32>
    %c2_159 = arith.constant 2 : index
    %c0_160 = arith.constant 0 : index
    %c0_161 = arith.constant 0 : index
    %215 = vector.load %arg5[%c2_159, %c0_160, %c0_161] : memref<3x128x128xf32, #tpu.memory_space<vmem>>, vector<1x128x128xf32>
    %216 = vector.shape_cast %215 : vector<1x128x128xf32> to vector<128x128xf32>
    %cst_162 = arith.constant dense<0.000000e+00> : vector<8x128xf32>
    %217 = tpu.matmul %214, %216, %cst_162 {dimension_numbers = #tpu.dot_dimension_numbers<[1], [0], [0], [1], [0, 0, 1, 1], [], []>} : vector<8x128xf32>, vector<128x128xf32>, vector<8x128xf32> -> vector<8x128xf32>
    %218 = arith.addf %212, %217 : vector<8x128xf32>
    %c0_163 = arith.constant 0 : index
    %c0_164 = arith.constant 0 : index
    %219 = vector.load %arg6[%c0_163, %c0_164] : memref<1x128xf32, #tpu.memory_space<vmem>>, vector<1x128xf32>
    %220 = vector.broadcast %219 : vector<1x128xf32> to vector<8x128xf32>
    %221 = arith.addf %218, %220 : vector<8x128xf32>
    %222 = vector.shape_cast %221 : vector<8x128xf32> to vector<8x1x128xf32>
    %cst_165 = arith.constant 0.000000e+00 : f32
    %223 = vector.broadcast %cst_165 : f32 to vector<8x1x128xf32>
    %224 = arith.maximumf %222, %223 : vector<8x1x128xf32>
    %225 = tpu.concatenate %10, %224, %10 in 1 : vector<8x1x128xf32>, vector<8x1x128xf32>, vector<8x1x128xf32> -> vector<8x3x128xf32>
    %226 = vector.extract_strided_slice %225 {offsets = [0, 0, 0], sizes = [8, 1, 128], strides = [1, 1, 1]} : vector<8x3x128xf32> to vector<8x1x128xf32>
    %227 = vector.shape_cast %226 : vector<8x1x128xf32> to vector<8x128xf32>
    %c0_166 = arith.constant 0 : index
    %c0_167 = arith.constant 0 : index
    %c0_168 = arith.constant 0 : index
    %228 = vector.load %arg5[%c0_166, %c0_167, %c0_168] : memref<3x128x128xf32, #tpu.memory_space<vmem>>, vector<1x128x128xf32>
    %229 = vector.shape_cast %228 : vector<1x128x128xf32> to vector<128x128xf32>
    %cst_169 = arith.constant dense<0.000000e+00> : vector<8x128xf32>
    %230 = tpu.matmul %227, %229, %cst_169 {dimension_numbers = #tpu.dot_dimension_numbers<[1], [0], [0], [1], [0, 0, 1, 1], [], []>} : vector<8x128xf32>, vector<128x128xf32>, vector<8x128xf32> -> vector<8x128xf32>
    %231 = vector.extract_strided_slice %225 {offsets = [0, 1, 0], sizes = [8, 1, 128], strides = [1, 1, 1]} : vector<8x3x128xf32> to vector<8x1x128xf32>
    %232 = vector.shape_cast %231 : vector<8x1x128xf32> to vector<8x128xf32>
    %c1_170 = arith.constant 1 : index
    %c0_171 = arith.constant 0 : index
    %c0_172 = arith.constant 0 : index
    %233 = vector.load %arg5[%c1_170, %c0_171, %c0_172] : memref<3x128x128xf32, #tpu.memory_space<vmem>>, vector<1x128x128xf32>
    %234 = vector.shape_cast %233 : vector<1x128x128xf32> to vector<128x128xf32>
    %cst_173 = arith.constant dense<0.000000e+00> : vector<8x128xf32>
    %235 = tpu.matmul %232, %234, %cst_173 {dimension_numbers = #tpu.dot_dimension_numbers<[1], [0], [0], [1], [0, 0, 1, 1], [], []>} : vector<8x128xf32>, vector<128x128xf32>, vector<8x128xf32> -> vector<8x128xf32>
    %236 = arith.addf %230, %235 : vector<8x128xf32>
    %237 = vector.extract_strided_slice %225 {offsets = [0, 2, 0], sizes = [8, 1, 128], strides = [1, 1, 1]} : vector<8x3x128xf32> to vector<8x1x128xf32>
    %238 = vector.shape_cast %237 : vector<8x1x128xf32> to vector<8x128xf32>
    %c2_174 = arith.constant 2 : index
    %c0_175 = arith.constant 0 : index
    %c0_176 = arith.constant 0 : index
    %239 = vector.load %arg5[%c2_174, %c0_175, %c0_176] : memref<3x128x128xf32, #tpu.memory_space<vmem>>, vector<1x128x128xf32>
    %240 = vector.shape_cast %239 : vector<1x128x128xf32> to vector<128x128xf32>
    %cst_177 = arith.constant dense<0.000000e+00> : vector<8x128xf32>
    %241 = tpu.matmul %238, %240, %cst_177 {dimension_numbers = #tpu.dot_dimension_numbers<[1], [0], [0], [1], [0, 0, 1, 1], [], []>} : vector<8x128xf32>, vector<128x128xf32>, vector<8x128xf32> -> vector<8x128xf32>
    %242 = arith.addf %236, %241 : vector<8x128xf32>
    %c0_178 = arith.constant 0 : index
    %c0_179 = arith.constant 0 : index
    %243 = vector.load %arg6[%c0_178, %c0_179] : memref<1x128xf32, #tpu.memory_space<vmem>>, vector<1x128xf32>
    %244 = vector.broadcast %243 : vector<1x128xf32> to vector<8x128xf32>
    %245 = arith.addf %242, %244 : vector<8x128xf32>
    %246 = vector.shape_cast %245 : vector<8x128xf32> to vector<8x1x128xf32>
    %247 = arith.addf %246, %198 : vector<8x1x128xf32>
    %248 = vector.shape_cast %247 : vector<8x1x128xf32> to vector<8x128xf32>
    %c0_180 = arith.constant 0 : index
    %c0_181 = arith.constant 0 : index
    %249 = vector.load %arg7[%c0_180, %c0_181] : memref<128x128xf32, #tpu.memory_space<vmem>>, vector<128x128xf32>
    %cst_182 = arith.constant dense<0.000000e+00> : vector<8x128xf32>
    %250 = tpu.matmul %248, %249, %cst_182 {dimension_numbers = #tpu.dot_dimension_numbers<[1], [0], [0], [1], [0, 0, 1, 1], [], []>} : vector<8x128xf32>, vector<128x128xf32>, vector<8x128xf32> -> vector<8x128xf32>
    %c0_183 = arith.constant 0 : index
    %c0_184 = arith.constant 0 : index
    %251 = vector.load %arg8[%c0_183, %c0_184] : memref<1x128xf32, #tpu.memory_space<vmem>>, vector<1x128xf32>
    %252 = vector.broadcast %251 : vector<1x128xf32> to vector<8x128xf32>
    %253 = arith.addf %250, %252 : vector<8x128xf32>
    %c0_185 = arith.constant 0 : index
    %c0_186 = arith.constant 0 : index
    %254 = vector.load %arg9[%c0_185, %c0_186] : memref<8x128xf32, #tpu.memory_space<vmem>>, vector<8x128xf32>
    tpu.vector_store %arg9[%c0_185, %c0_186], %253 {strides = array<i32>} : memref<8x128xf32, #tpu.memory_space<vmem>>, vector<8x128xf32>,
    return
  }
  func.func @transform_0(%arg0: i32) -> (i32, i32) {
    %c0_i32 = arith.constant 0 : i32
    %c0_i32_0 = arith.constant 0 : i32
    return %arg0, %c0_i32 : i32, i32
  }
  func.func @transform_1(%arg0: i32) -> (i32, i32) {
    %c0_i32 = arith.constant 0 : i32
    %c0_i32_0 = arith.constant 0 : i32
    %c0_i32_1 = arith.constant 0 : i32
    return %c0_i32, %c0_i32_0 : i32, i32
  }
  func.func @transform_2(%arg0: i32) -> (i32, i32, i32) {
    %c0_i32 = arith.constant 0 : i32
    %c0_i32_0 = arith.constant 0 : i32
    %c0_i32_1 = arith.constant 0 : i32
    %c0_i32_2 = arith.constant 0 : i32
    return %c0_i32, %c0_i32_0, %c0_i32_1 : i32, i32, i32
  }
  func.func @transform_3(%arg0: i32) -> (i32, i32) {
    %c0_i32 = arith.constant 0 : i32
    %c0_i32_0 = arith.constant 0 : i32
    %c0_i32_1 = arith.constant 0 : i32
    return %c0_i32, %c0_i32_0 : i32, i32
  }
  func.func @transform_4(%arg0: i32) -> (i32, i32, i32) {
    %c0_i32 = arith.constant 0 : i32
    %c0_i32_0 = arith.constant 0 : i32
    %c0_i32_1 = arith.constant 0 : i32
    %c0_i32_2 = arith.constant 0 : i32
    return %c0_i32, %c0_i32_0, %c0_i32_1 : i32, i32, i32
  }
  func.func @transform_5(%arg0: i32) -> (i32, i32) {
    %c0_i32 = arith.constant 0 : i32
    %c0_i32_0 = arith.constant 0 : i32
    %c0_i32_1 = arith.constant 0 : i32
    return %c0_i32, %c0_i32_0 : i32, i32
  }
  func.func @transform_6(%arg0: i32) -> (i32, i32) {
    %c0_i32 = arith.constant 0 : i32
    %c0_i32_0 = arith.constant 0 : i32
    %c0_i32_1 = arith.constant 0 : i32
    return %c0_i32, %c0_i32_0 : i32, i32
  }
  func.func @transform_7(%arg0: i32) -> (i32, i32) {
    %c0_i32 = arith.constant 0 : i32
    %c0_i32_0 = arith.constant 0 : i32
    %c0_i32_1 = arith.constant 0 : i32
    return %c0_i32, %c0_i32_0 : i32, i32
  }
  func.func @transform_8(%arg0: i32) -> (i32, i32) {
    %c0_i32 = arith.constant 0 : i32
    %c0_i32_0 = arith.constant 0 : i32
    return %arg0, %c0_i32 : i32, i32
  }
}

</mosaic_0001>

<bundles_post_ra>
// kernel: tpu_custom_call.1
= control target key start
LH: loop header
LB: loop body
LE: loop exit
PB: predicated region body
PF: predicated region fallthrough
CT: control target
= control target key end

     0   :  { %13 = vsyncpa [#allocation4], 0  ;;  %s26333_s0 = inlined_call_operand.vmem [shape: s32[256,1], index: 0, kind: input, shape index: {}]   ;;  %s26334_s1 = inlined_call_operand.vmem [shape: f32[128,128], index: 1, kind: input, shape index: {}]   ;;  %s26335_s2 = inlined_call_operand.hbm [shape: f32[3,128,128], index: 2, kind: input, shape index: {}]   ;;  %s26336_s3 = inlined_call_operand.vmem [shape: f32[1,128], index: 3, kind: input, shape index: {}]   ;;  %s26337_s4 = inlined_call_operand.hbm [shape: f32[3,128,128], index: 4, kind: input, shape index: {}]   ;;  %s26338_s5 = inlined_call_operand.vmem [shape: f32[1,128], index: 5, kind: input, shape index: {}]   ;;  %s26339_s6 = inlined_call_operand.vmem [shape: f32[128,128], index: 6, kind: input, shape index: {}]   ;;  %s26340_s7 = inlined_call_operand.vmem [shape: f32[1,128], index: 7, kind: input, shape index: {}]   ;;  %s26341_s8 = inlined_call_operand.hbm [shape: f32[16,128], index: 8, kind: output, shape index: {}]  }
   0x1   :  { %14 = vsyncpa [#allocation7], 0 }
   0x2   :  { %15 = vsyncpa [#allocation5], 0 }
   0x3   :  { %17 = vsyncpa [#allocation5 + $0x1], 0  ;;  %s20360_s27 = smov 0   ;;  %s20362_s28 = smov 0  }
   0x4   :  { %s20364_s29 = smov 0   ;;  %s20366_s30 = smov 0  }
   0x5 LB: > { %s20381_s9 = sadd.s32 4294967295, %s20302_s30   ;;  %s17846_s10 = sadd.s32 4294967294, %s20302_s30   ;;  %s20302_s30 = sphi %s20366_s30, %s26657_s30   ;;  %s20298_s29 = sphi %s20364_s29, %s26656_s29   ;;  %s20294_s28 = sphi %s20362_s28, %s26655_s28   ;;  %s20290_s27 = sphi %s20360_s27, %s26654_s27  }
   0x6   : > { %s20385_s11 = sadd.s32 1, %s20302_s30   ;;  %s203_s12 = sadd.s32 1, %s20298_s29 }
   0x7   : > { %s200_s13 = ssub.s32 %s20302_s30, %s20385_s11  ;;  %p213_p0 = scmp.ne.s32.totalorder %s20298_s29, %s20294_s28 }
   0x8   : > { %p201_p1 = scmp.eq.s32.totalorder %s200_s13, 0  ;;  %p214_p2 = scmp.eq.s32.totalorder %s20381_s9, 1 }
   0x9   : > { %p219_p3 = scmp.ne.s32.totalorder %s20294_s28, %s20290_s27  ;;  %p220_p4 = scmp.eq.s32.totalorder %s17846_s10, 1 }
   0xa   : > { %s20396_s14 = scalar_select %p201_p1, %s20298_s29, %s203_s12  }
   0xb   : > { %p20398_p5 = por %p214_p2, %p213_p0  ;;  %p20402_p6 = por %p220_p4, %p219_p3 }
   0xc   : > { %p17847_p7 = scmp.ge.s32.totalorder %s20302_s30, 1  ;;  %p227_p8 = scmp.lt.s32.totalorder %s20302_s30, 3 }
   0xd   : > { %s26432_s16 = scalar_select %p20402_p6, 1, 0 }
   0xe   : > { %p26342_p9 = scmp.eq.s32.totalorder %s20381_s9, 0  ;;  %p20409_p10 = pnand %p17847_p7, %p227_p8 }
   0xf   : > { %s20304_s18 = smov [#allocation3]   ;;  %s20305_s21 = smov [#allocation6]  }
  0x10   : > { %s242_s19 = sshll.u32 %s20304_s18, 4  ;;  %p20000_p11 = pneg %p20409_p10  ;;  %s243_s19 = int_to_ptr.vmem [resolvable:$true] %s242_s19 }
  0x11   : > { %s258_s22 = sshll.u32 %s20305_s21, 4  ;;  %s20193_s23 = scalar_lea.vmem %s243_s19, 6144  ;;  %s259_s22 = int_to_ptr.vmem [resolvable:$true] %s258_s22 }
  0x12   : > { %p20417_p12 = pnand %p26342_p9, %p20000_p11  ;;  %p20194_p0 = scmp.ne.s32.totalorder %s243_s19, %s20193_s23 }
  0x13   : > { %p20201_p3 = scmp.lt.s32.totalorder %s243_s19, %s243_s19  ;;  %p20202_p4 = scmp.lt.s32.totalorder %s20193_s23, %s20193_s23 }
  0x14   : > { %p20184_p13 = pneg %p20417_p12 }
  0x15   : > { %p20203_p7 = por %p20202_p4, %p20201_p3 }
  0x16   : > { %p20196_p1 = pnand %p20194_p0, %p20184_p13 }
  0x18   : > { %p20197_p2 = pneg %p20196_p1 }
  0x1a   : > { %p20204_p8 = pnand %p20203_p7, %p20197_p2 }
  0x1c   : > { %20207 = shalt.err (!%p20204_p8)
}
  0x1d   : > { %s20306_s24 = smov 128   ;;  %s20307_s25 = smov 8  }
  0x1e   : > { %20003 = dma.hbm_to_vmem [thread:$0]  (!%p20417_p12), %s26335_s2, 6144, %s243_s19, [#allocation4], %s20306_s24, %s20306_s24, %s20307_s25  }
  0x1f   : > { %s20219_s12 = scalar_lea.vmem %s259_s22, 6144  ;;  %p20227_p9 = scmp.lt.s32.totalorder %s259_s22, %s259_s22 }
  0x20   : > { %p20220_p11 = scmp.ne.s32.totalorder %s259_s22, %s20219_s12  ;;  %p20228_p6 = scmp.lt.s32.totalorder %s20219_s12, %s20219_s12 }
  0x22   : > { %p20222_p0 = pnand %p20220_p11, %p20184_p13  ;;  %p20229_p3 = por %p20228_p6, %p20227_p9 }
  0x24   : > { %p20223_p1 = pneg %p20222_p0 }
  0x26   : > { %p20230_p2 = pnand %p20229_p3, %p20223_p1 }
  0x28   : > { %20233 = shalt.err (!%p20230_p2)
}
  0x29   : > { %20006 = dma.hbm_to_vmem [thread:$0]  (!%p20417_p12), %s26337_s4, 6144, %s259_s22, [#allocation7], %s20306_s24, %s20306_s24, %s20307_s25  }
  0x2a   : > { %292 = sbr.rel (%p20409_p10) target bundleno = 3492 (0xda4), region = 52 }
  0x2f   : > { %p26435_p4 = scmp.eq.s32.totalorder %s20381_s9, 0 }
  0x31   : > { %20277 = dma.done.wait (%p26435_p4), [#allocation4], 6144   ;;  %p26436_p13 = pmov %p26435_p4 }
  0x32   : > { %p26437_p7 = pmov %p26435_p4 }
  0x33   : > { %20279 = vsyncadd (%p26436_p13), [#allocation4], 4294961152 }
  0x34   : > { %20281 = dma.done.wait (%p26437_p7), [#allocation7], 6144   ;;  %p26438_p6 = pmov %p26435_p4 }
  0x35   : > { %s17855_s19 = sshll.u32 %s20381_s9, 4  ;;  %v20308_v0 = vmov 0   ;;  %v449_v5 = vld [vmem:[%s26334_s1 + $0x78] sm:$0xff]  ;;  %v448_v6 = vld [vmem:[%s26334_s1 + $0x70] sm:$0xff]  ;;  %v447_v9 = vld [vmem:[%s26334_s1 + $0x68] sm:$0xff]  ;;  %v352_v40 = vlaneseq  ;;  %v20309_v44 = vmov 1.0  }
  0x36   : > { %20283 = vsyncadd (%p26438_p6), [#allocation7], 4294961152  ;;  %20059 = vset.pattern.permute.xlu1 %v20308_v0  ;;  %20058 = vset.pattern.permute.xlu0 %v20308_v0  ;;  %p331_p9 = scmp.lt.s32.totalorder %s17855_s19, 31  ;;  %v446_v12 = vld [vmem:[%s26334_s1 + $0x60] sm:$0xff]  ;;  %v445_v13 = vld [vmem:[%s26334_s1 + $0x58] sm:$0xff]  ;;  %s327_s26 = sand.u32 1, %s20294_s28  }
  0x37   : > { %18648 = vmatprep.subr.mxu0 %v449_v5  ;;  %v444_v16 = vld [vmem:[%s26334_s1 + $0x50] sm:$0xff]  ;;  %v443_v19 = vld [vmem:[%s26334_s1 + $0x48] sm:$0xff]  ;;  %v442_v20 = vld [vmem:[%s26334_s1 + $0x40] sm:$0xff]  ;;  %v20520_v41 = vand.u32 127, %v352_v40  ;;  %s17854_s10 = sshll.u32 %s327_s26, 3  ;;  %s17972_s18 = sshll.u32 %s20381_s9, 7 }
  0x38   : > { %s26659_s19 = smov (!%p331_p9, %s17855_s19), 31  ;;  %18649 = vmatpush3.msra.mxu0 %v449_v5  ;;  %v441_v23 = vld [vmem:[%s26334_s1 + $0x38] sm:$0xff]  ;;  %v440_v26 = vld [vmem:[%s26334_s1 + $0x30] sm:$0xff]  ;;  %v439_v27 = vld [vmem:[%s26334_s1 + $0x28] sm:$0xff]  ;;  %s17752_s23 = scalar_lea.sflag [#allocation5], %s327_s26 }
  0x39   : > { %s17856_s17 = sshll.u32 %s26659_s19, 3  ;;  %18650 = vmatprep.subr.mxu0 %v448_v6  ;;  %v1098_v28 = vld [vmem:[#allocation3 + $0xf8] sm:$0xff]  ;;  %v438_v29 = vld [vmem:[%s26334_s1 + $0x20] sm:$0xff]  ;;  %v1097_v30 = vld [vmem:[#allocation3 + $0xf0] sm:$0xff]  ;;  %s329_s19 = scalar_lea.vmem [#allocation8], %s17854_s10 }
  0x3a   : > { %s20453_s22 = scalar_lea.vmem %s26333_s0, %s17856_s17  ;;  %18651 = vmatpush3.msra.mxu0 %v448_v6  ;;  %18704 = vmatprep.subr.mxu1 %v1098_v28  ;;  %v1096_v31 = vld [vmem:[#allocation3 + $0xe8] sm:$0xff]  ;;  %v437_v32 = vld [vmem:[%s26334_s1 + $0x18] sm:$0xff]  ;;  %v1095_v33 = vld [vmem:[#allocation3 + $0xe0] sm:$0xff]  ;;  %s17765_s17 = sshll.u32 %s329_s19, 4  ;;  %s17766_s17 = int_to_ptr.vmem [resolvable:$true] %s17765_s17 }
  0x3b   : > { %v338_v1 = vld [vmem:[%s20453_s22 + $0x10] sm:$0xff]  ;;  %v336_v2 = vld [vmem:[%s20453_s22] sm:$0xff]  ;;  %v339_v3 = vld [vmem:[%s20453_s22 + $0x18] sm:$0xff]  ;;  %18652 = vmatprep.subr.mxu0 %v447_v9  ;;  %18705 = vmatpush3.msra.mxu1 %v1098_v28  ;;  %s20234_s24 = scalar_lea.vmem %s17766_s17, 128  ;;  %s20314_s25 = smov [#allocation8]  }
  0x3c   : > { %361 = vperm.xlu1 %20059, %v338_v1   ;;  %355 = vperm.xlu0 %20058, %v336_v2   ;;  %v337_v4 = vld [vmem:[%s20453_s22 + $0x8] sm:$0xff]  ;;  %v340_v8 = vld [vmem:[%s20453_s22 + $0x20] sm:$0xff]  ;;  %v343_v10 = vld [vmem:[%s20453_s22 + $0x38] sm:$0xff]  ;;  %p20235_p10 = scmp.ne.s32.totalorder %s17766_s17, %s20234_s24  ;;  %s20238_s9 = sshll.u32 %s20314_s25, 4  ;;  %s20239_s9 = int_to_ptr.vmem [resolvable:$false] %s20238_s9 }
  0x3d   : > { %v341_v7 = vld [vmem:[%s20453_s22 + $0x28] sm:$0xff]  ;;  %v342_v11 = vld [vmem:[%s20453_s22 + $0x30] sm:$0xff]  ;;  %18653 = vmatpush3.msra.mxu0 %v447_v9  ;;  %v344_v15 = vld [vmem:[%s20453_s22 + $0x40] sm:$0xff]  ;;  %18706 = vmatprep.subr.mxu1 %v1097_v30  ;;  %s20240_s10 = scalar_lea.vmem %s20239_s9, 256  ;;  %p20241_p11 = scmp.lt.s32.totalorder %s17766_s17, %s20239_s9 }
  0x3e   : > { %v345_v14 = vld [vmem:[%s20453_s22 + $0x48] sm:$0xff]  ;;  %18654 = vmatprep.subr.mxu0 %v446_v12  ;;  %v347_v17 = vld [vmem:[%s20453_s22 + $0x58] sm:$0xff]  ;;  %v346_v18 = vld [vmem:[%s20453_s22 + $0x50] sm:$0xff]  ;;  %18707 = vmatpush3.msra.mxu1 %v1097_v30  ;;  %p20236_p12 = pnand %p20235_p10, %p20398_p5  ;;  %p20242_p0 = scmp.lt.s32.totalorder %s20240_s10, %s20234_s24 }
  0x3f   : > { %18655 = vmatpush3.msra.mxu0 %v446_v12  ;;  %v349_v21 = vld [vmem:[%s20453_s22 + $0x68] sm:$0xff]  ;;  %v348_v22 = vld [vmem:[%s20453_s22 + $0x60] sm:$0xff]  ;;  %v351_v24 = vld [vmem:[%s20453_s22 + $0x78] sm:$0xff]  ;;  %18708 = vmatprep.subr.mxu1 %v1096_v31 }
  0x40   : > { %364 = vperm.xlu1 %20059, %v339_v3   ;;  %358 = vperm.xlu0 %20058, %v337_v4   ;;  %v350_v25 = vld [vmem:[%s20453_s22 + $0x70] sm:$0xff]  ;;  %v1094_v35 = vld [vmem:[#allocation3 + $0xd8] sm:$0xff]  ;;  %v435_v36 = vld [vmem:[%s26334_s1 + $0x8] sm:$0xff]  ;;  %s26298_s22 = scalar_lea.hbm %s26341_s8, %s17972_s18  ;;  %p20237_p8 = pneg %p20236_p12 }
  0x41   : > { %18656 = vmatprep.subr.mxu0 %v445_v13  ;;  %v436_v34 = vld [vmem:[%s26334_s1 + $0x10] sm:$0xff]  ;;  %18709 = vmatpush3.msra.mxu1 %v1096_v31  ;;  %v434_v38 = vld [vmem:[%s26334_s1] sm:$0xff]  ;;  %v890_v39 = vld [vmem:[#allocation3 + $0x78] sm:$0xff]  ;;  %p20243_p1 = por %p20242_p0, %p20241_p11 }
  0x42   : > { %18657 = vmatpush3.msra.mxu0 %v445_v13  ;;  %18710 = vmatprep.subr.mxu1 %v1095_v33  ;;  %v1093_v37 = vld [vmem:[#allocation3 + $0xd0] sm:$0xff]  ;;  %v888_v48 = vld [vmem:[#allocation3 + $0x68] sm:$0xff]  ;;  %v887_v51 = vld [vmem:[#allocation3 + $0x60] sm:$0xff] }
  0x43   : > { %18658 = vmatprep.subr.mxu0 %v444_v16  ;;  %18711 = vmatpush3.msra.mxu1 %v1095_v33  ;;  %v889_v47 = vld [vmem:[#allocation3 + $0x70] sm:$0xff]  ;;  %v886_v52 = vld [vmem:[#allocation3 + $0x58] sm:$0xff]  ;;  %v884_v56 = vld [vmem:[#allocation3 + $0x48] sm:$0xff]  ;;  %p20244_p3 = pnand %p20243_p1, %p20237_p8 }
  0x44   : > { %370 = vperm.xlu1 %20059, %v341_v7   ;;  %367 = vperm.xlu0 %20058, %v340_v8   ;;  %v885_v55 = vld [vmem:[#allocation3 + $0x50] sm:$0xff]  ;;  %v883_v59 = vld [vmem:[#allocation3 + $0x40] sm:$0xff]  ;;  %v1092_v2 = vld [vmem:[#allocation3 + $0xc8] sm:$0xff] }
  0x45   : > { %18659 = vmatpush3.msra.mxu0 %v444_v16  ;;  %18712 = vmatprep.subr.mxu1 %v1094_v35  ;;  %v882_v3 = vld [vmem:[#allocation3 + $0x38] sm:$0xff]  ;;  %v1091_v4 = vld [vmem:[#allocation3 + $0xc0] sm:$0xff]  ;;  %v881_v5 = vld [vmem:[#allocation3 + $0x30] sm:$0xff] }
  0x46   : > { %18660 = vmatprep.subr.mxu0 %v443_v19  ;;  %18713 = vmatpush3.msra.mxu1 %v1094_v35  ;;  %v1090_v6 = vld [vmem:[#allocation3 + $0xb8] sm:$0xff]  ;;  %v880_v7 = vld [vmem:[#allocation3 + $0x28] sm:$0xff]  ;;  %v1089_v8 = vld [vmem:[#allocation3 + $0xb0] sm:$0xff] }
  0x47   : > { %18661 = vmatpush3.msra.mxu0 %v443_v19  ;;  %18714 = vmatprep.subr.mxu1 %v1093_v37  ;;  %v879_v9 = vld [vmem:[#allocation3 + $0x20] sm:$0xff]  ;;  %v877_v13 = vld [vmem:[#allocation3 + $0x10] sm:$0xff] }
  0x48   : > { %376 = vperm.xlu1 %20059, %v343_v10   ;;  %373 = vperm.xlu0 %20058, %v342_v11   ;;  %v1088_v10 = vld [vmem:[#allocation3 + $0xa8] sm:$0xff]  ;;  %v878_v11 = vld [vmem:[#allocation3 + $0x18] sm:$0xff]  ;;  %v1087_v12 = vld [vmem:[#allocation3 + $0xa0] sm:$0xff] }
  0x49   : > { %18662 = vmatprep.subr.mxu0 %v442_v20  ;;  %18715 = vmatpush3.msra.mxu1 %v1093_v37  ;;  %v1085_v16 = vld [vmem:[#allocation3 + $0x90] sm:$0xff]  ;;  %v1083_v19 = vld [vmem:[#allocation3 + $0x80] sm:$0xff] }
  0x4a   : > { %18663 = vmatpush3.msra.mxu0 %v442_v20  ;;  %18716 = vmatprep.subr.mxu1 %v1092_v2  ;;  %v20554_v20 = vld [vmem:[#allocation3 + $0x178] sm:$0xff] }
  0x4b   : > { %18664 = vmatprep.subr.mxu0 %v441_v23  ;;  %18717 = vmatpush3.msra.mxu1 %v1092_v2 }
  0x4c   : > { %382 = vperm.xlu1 %20059, %v345_v14   ;;  %379 = vperm.xlu0 %20058, %v344_v15   ;;  %v1086_v14 = vld [vmem:[#allocation3 + $0x98] sm:$0xff]  ;;  %v876_v15 = vld [vmem:[#allocation3 + $0x8] sm:$0xff] }
  0x4d   : > { %18665 = vmatpush3.msra.mxu0 %v441_v23  ;;  %18718 = vmatprep.subr.mxu1 %v1091_v4 }
  0x4e   : > { %18666 = vmatprep.subr.mxu0 %v440_v26  ;;  %18719 = vmatpush3.msra.mxu1 %v1091_v4 }
  0x4f   : > { %18667 = vmatpush3.msra.mxu0 %v440_v26  ;;  %18720 = vmatprep.subr.mxu1 %v1090_v6 }
  0x50   : > { %388 = vperm.xlu1 %20059, %v347_v17   ;;  %385 = vperm.xlu0 %20058, %v346_v18   ;;  %v875_v17 = vld [vmem:[#allocation3] sm:$0xff]  ;;  %v1084_v18 = vld [vmem:[#allocation3 + $0x88] sm:$0xff] }
  0x51   : > { %18668 = vmatprep.subr.mxu0 %v439_v27  ;;  %18721 = vmatpush3.msra.mxu1 %v1090_v6 }
  0x52   : > { %18669 = vmatpush3.msra.mxu0 %v439_v27  ;;  %18722 = vmatprep.subr.mxu1 %v1089_v8 }
  0x53   : > { %18670 = vmatprep.subr.mxu0 %v438_v29  ;;  %18723 = vmatpush3.msra.mxu1 %v1089_v8 }
  0x54   : > { %394 = vperm.xlu1 %20059, %v349_v21   ;;  %391 = vperm.xlu0 %20058, %v348_v22   ;;  %v20310_v21 = vmov 1983009808  }
  0x55   : > { %18671 = vmatpush3.msra.mxu0 %v438_v29  ;;  %18724 = vmatprep.subr.mxu1 %v1088_v10  ;;  %v613_v22 = vunpack.c.l.s4 %v20310_v21 }
  0x56   : > { %18672 = vmatprep.subr.mxu0 %v437_v32  ;;  %18725 = vmatpush3.msra.mxu1 %v1088_v10 }
  0x57   : > { %18673 = vmatpush3.msra.mxu0 %v437_v32  ;;  %18726 = vmatprep.subr.mxu1 %v1087_v12  ;;  %v614_v23 = vunpack.c.0.s8 %v613_v22 }
  0x58   : > { %400 = vperm.xlu1 %20059, %v351_v24   ;;  %397 = vperm.xlu0 %20058, %v350_v25   ;;  %v20558_v24 = vshrl.u32 %v352_v40, 7 }
  0x59   : > { %18674 = vmatprep.subr.mxu0 %v436_v34  ;;  %18727 = vmatpush3.msra.mxu1 %v1087_v12 }
  0x5a   : > { %18675 = vmatpush3.msra.mxu0 %v436_v34  ;;  %18728 = vmatprep.subr.mxu1 %v1086_v14  ;;  %26439 = vst [vmem:[#allocation12_spill] sm:$0xff] %v20558_v24  ;;  %v20561_v25 = vsub.s32 %v614_v23, %v20558_v24 }
  0x5b   : > { %18676 = vmatprep.subr.mxu0 %v435_v36  ;;  %18729 = vmatpush3.msra.mxu1 %v1086_v14 }
  0x5c   : > { %18677 = vmatpush3.msra.mxu0 %v435_v36  ;;  %18730 = vmatprep.subr.mxu1 %v1085_v16 }
  0x5d   : > { %18678 = vmatprep.subr.mxu0 %v434_v38  ;;  %18731 = vmatpush3.msra.mxu1 %v1085_v16 }
  0x5e   : > { %18679 = vmatpush3.msra.mxu0 %v434_v38  ;;  %18732 = vmatprep.subr.mxu1 %v1084_v18 }
  0x5f   : > { %18757 = vmatprep.subr.mxu0 %v890_v39  ;;  %18733 = vmatpush3.msra.mxu1 %v1084_v18 }
  0x60   : > { %18734 = vmatprep.subr.mxu1 %v1083_v19 }
  0x61   : > { %18735 = vmatpush3.msra.mxu1 %v1083_v19 }
  0x62   : > { %18810 = vmatprep.subr.mxu1 %v20554_v20 }
  0xb7   : > { %v362_v42 = vpop.permute.xlu1 %361  ;;  %v356_v43 = vpop.permute.xlu0 %355 }
  0xb8   : > { %vm402_vm0 = vcmp.eq.s32.totalorder %v20520_v41, %v356_v43  ;;  %vm404_vm1 = vcmp.eq.s32.totalorder %v20520_v41, %v362_v42 }
  0xb9   : > { %18680 = vmatprep.mubr.msk.f32.mxu0 %vm402_vm0, %v20309_v44  ;;  %vm899_vm0 = vcmask 1040384  }
  0xbb   : > { %v365_v45 = vpop.permute.xlu1 %364  ;;  %v359_v46 = vpop.permute.xlu0 %358 }
  0xbc   : > { %vm403_vm2 = vcmp.eq.s32.totalorder %v20520_v41, %v359_v46  ;;  %vm405_vm3 = vcmp.eq.s32.totalorder %v20520_v41, %v365_v45 }
  0xbd   : > { %18681 = vmatmul.mubr.msk.f32.vlgmr.msra.gmra.mxu0 %vm403_vm2, %v20309_v44  ;;  %vm902_vm2 = vcmask 1044484  }
  0xbe   : > { %18683 = vmatprep.mubr.msk.f32.mxu0 %vm404_vm1, %v20309_v44  ;;  %18758 = vmatpush3.msra.mxu0 %v890_v39  ;;  %vm900_vm1 = vcmask 1042434  }
  0xbf   : > { %v371_v49 = vpop.permute.xlu1 %370  ;;  %v368_v50 = vpop.permute.xlu0 %367  ;;  %18759 = vmatprep.subr.mxu0 %v889_v47 }
  0xc0   : > { %vm406_vm4 = vcmp.eq.s32.totalorder %v20520_v41, %v368_v50  ;;  %18760 = vmatpush3.msra.mxu0 %v889_v47  ;;  %vm407_vm5 = vcmp.eq.s32.totalorder %v20520_v41, %v371_v49 }
  0xc1   : > { %18684 = vmatmul.mubr.msk.f32.gmra.mxu0 %vm405_vm3, %v20309_v44  ;;  %18761 = vmatprep.subr.mxu0 %v888_v48  ;;  %vm904_vm3 = vcmask 1046534  }
  0xc2   : > { %18686 = vmatprep.mubr.msk.f32.mxu0 %vm406_vm4, %v20309_v44  ;;  %18762 = vmatpush3.msra.mxu0 %v888_v48  ;;  %vm20681_vm4 = vmor %vm899_vm0, %vm900_vm1 }
  0xc3   : > { %v377_v53 = vpop.permute.xlu1 %376  ;;  %v374_v54 = vpop.permute.xlu0 %373  ;;  %18763 = vmatprep.subr.mxu0 %v887_v51 }
  0xc4   : > { %vm408_vm6 = vcmp.eq.s32.totalorder %v20520_v41, %v374_v54  ;;  %18764 = vmatpush3.msra.mxu0 %v887_v51  ;;  %vm409_vm7 = vcmp.eq.s32.totalorder %v20520_v41, %v377_v53 }
  0xc5   : > { %18687 = vmatmul.mubr.msk.f32.gmra.mxu0 %vm407_vm5, %v20309_v44  ;;  %18765 = vmatprep.subr.mxu0 %v886_v52  ;;  %vm20716_vm5 = vmor %vm20681_vm4, %vm902_vm2 }
  0xc6   : > { %18689 = vmatprep.mubr.msk.f32.mxu0 %vm408_vm6, %v20309_v44  ;;  %18766 = vmatpush3.msra.mxu0 %v886_v52  ;;  %vm20749_vm6 = vmor %vm20716_vm5, %vm904_vm3 }
  0xc7   : > { %v383_v57 = vpop.permute.xlu1 %382  ;;  %v380_v58 = vpop.permute.xlu0 %379  ;;  %18767 = vmatprep.subr.mxu0 %v885_v55 }
  0xc8   : > { %vm410_vm8 = vcmp.eq.s32.totalorder %v20520_v41, %v380_v58  ;;  %18768 = vmatpush3.msra.mxu0 %v885_v55  ;;  %vm411_vm9 = vcmp.eq.s32.totalorder %v20520_v41, %v383_v57 }
  0xc9   : > { %18690 = vmatmul.mubr.msk.f32.gmra.mxu0 %vm409_vm7, %v20309_v44  ;;  %18769 = vmatprep.subr.mxu0 %v884_v56  ;;  %vm3044_vm7 = vcmask 1046528  }
  0xca   : > { %18692 = vmatprep.mubr.msk.f32.mxu0 %vm410_vm8, %v20309_v44  ;;  %18770 = vmatpush3.msra.mxu0 %v884_v56  ;;  %vm20312_vm8 = vmmov 0  }
  0xcb   : > { %v389_v60 = vpop.permute.xlu1 %388  ;;  %v386_v61 = vpop.permute.xlu0 %385  ;;  %18771 = vmatprep.subr.mxu0 %v883_v59 }
  0xcc   : > { %vm412_vm10 = vcmp.eq.s32.totalorder %v20520_v41, %v386_v61  ;;  %18772 = vmatpush3.msra.mxu0 %v883_v59  ;;  %vm413_vm11 = vcmp.eq.s32.totalorder %v20520_v41, %v389_v60 }
  0xcd   : > { %18693 = vmatmul.mubr.msk.f32.gmra.mxu0 %vm411_vm9, %v20309_v44  ;;  %18773 = vmatprep.subr.mxu0 %v882_v3  ;;  %vm13545_vm9 = vcmask 1043456  }
  0xce   : > { %18695 = vmatprep.mubr.msk.f32.mxu0 %vm412_vm10, %v20309_v44  ;;  %18774 = vmatpush3.msra.mxu0 %v882_v3  ;;  %vm16805_vm10 = vcmask 1041408  }
  0xcf   : > { %v395_v62 = vpop.permute.xlu1 %394  ;;  %v392_v63 = vpop.permute.xlu0 %391  ;;  %18775 = vmatprep.subr.mxu0 %v881_v5 }
  0xd0   : > { %vm414_vm12 = vcmp.eq.s32.totalorder %v20520_v41, %v392_v63  ;;  %vm415_vm13 = vcmp.eq.s32.totalorder %v20520_v41, %v395_v62  ;;  %18776 = vmatpush3.msra.mxu0 %v881_v5 }
  0xd1   : > { %18696 = vmatmul.mubr.msk.f32.gmra.mxu0 %vm413_vm11, %v20309_v44  ;;  %18777 = vmatprep.subr.mxu0 %v880_v7  ;;  %vm16855_vm11 = vcmask 1041409  }
  0xd2   : > { %18698 = vmatprep.mubr.msk.f32.mxu0 %vm414_vm12, %v20309_v44  ;;  %18778 = vmatpush3.msra.mxu0 %v880_v7  ;;  %vm16860_vm12 = vcmask 1043459  }
  0xd3   : > { %v398_v0 = vpop.permute.xlu0 %397  ;;  %v401_v1 = vpop.permute.xlu1 %400  ;;  %18779 = vmatprep.subr.mxu0 %v879_v9 }
  0xd4   : > { %vm416_vm14 = vcmp.eq.s32.totalorder %v20520_v41, %v398_v0  ;;  %vm417_vm15 = vcmp.eq.s32.totalorder %v20520_v41, %v401_v1  ;;  %18780 = vmatpush3.msra.mxu0 %v879_v9 }
  0xd5   : > { %18699 = vmatmul.mubr.msk.f32.gmra.mxu0 %vm415_vm13, %v20309_v44  ;;  %18781 = vmatprep.subr.mxu0 %v878_v11  ;;  %vm16865_vm13 = vcmask 1045509  }
  0xd6   : > { %18701 = vmatprep.mubr.msk.f32.mxu0 %vm416_vm14, %v20309_v44  ;;  %18782 = vmatpush3.msra.mxu0 %v878_v11  ;;  %vm16870_vm14 = vcmask 1047559  }
  0xd7   : > { %18783 = vmatprep.subr.mxu0 %v877_v13 }
  0xd8   : > { %18784 = vmatpush3.msra.mxu0 %v877_v13 }
  0xd9   : > { %18702 = vmatmul.mubr.msk.f32.gmra.mxu0 %vm417_vm15, %v20309_v44  ;;  %18785 = vmatprep.subr.mxu0 %v876_v15 }
  0xda   : > { %18786 = vmatpush3.msra.mxu0 %v876_v15 }
  0xdb   : > { %18787 = vmatprep.subr.mxu0 %v875_v17 }
  0xdc   : > { %18788 = vmatpush3.msra.mxu0 %v875_v17 }
 0x17d   : > { %v18682_v26 = vpop.f32.mrf.mxu0 }
 0x17e   : > { %v628_v27 = vcombine.high %v18682_v26, %v18682_v26  ;;  %v20564_v28 = vrot.slane %v18682_v26, %v20561_v25 }
 0x17f   : > { %v516_v29 = vpop.f32.mrf.mxu0 }
 0x180   : > { %26440 = vst [vmem:[#allocation13_spill] sm:$0xff] %v20564_v28  ;;  %v20567_v30 = vrot.slane %v628_v27, %v20561_v25  ;;  %v20571_v31 = vcombine.high %v20564_v28, %v20564_v28  ;;  %v611_v32 = vcombine.high %v516_v29, %v516_v29  ;;  %v20574_v33 = vrot.slane %v516_v29, %v20561_v25 }
 0x181   : > { %v18685_v34 = vpop.f32.mrf.mxu0  ;;  %v917_v35 = vrot.slane %v20564_v28, 7 }
 0x182   : > { %26441 = vst [vmem:[#allocation14_spill] sm:$0xff] %v20571_v31  ;;  %v1503_v36 = vcombine.low %v20564_v28, %v20571_v31  ;;  %v20582_v38 = vrot.slane %v611_v32, %v20561_v25  ;;  %v20586_v39 = vcombine.high %v20574_v33, %v20574_v33  ;;  %v17873_v40 = vrot.slane %v20574_v33, 9  ;;  %v1886_v28 = vld [vmem:[#allocation3 + $0x160] sm:$0xff] }
 0x183   : > { %v661_v41 = vcombine.high %v18685_v34, %v18685_v34  ;;  %v20590_v42 = vrot.slane %v18685_v34, %v20561_v25  ;;  %v526_v43 = vpop.f32.mrf.mxu0  ;;  %v20600_v47 = vrot.slane %v917_v35, 2 }
 0x184   : > { %v20593_v44 = vrot.slane %v1503_v36, %v20561_v25  ;;  %v644_v45 = vcombine.high %v526_v43, %v526_v43  ;;  %v20596_v46 = vrot.slane %v526_v43, %v20561_v25  ;;  %v20608_v51 = vcombine.high %v20582_v38, %v20582_v38 }
 0x185   : > { %26442 = vst [vmem:[#allocation15_spill] sm:$0xff] %v20590_v42  ;;  %v20603_v48 = vrot.slane %v661_v41, %v20561_v25  ;;  %v26346_v49 = vrot.slane %v20590_v42, 7  ;;  %v18688_v50 = vpop.f32.mrf.mxu0  ;;  %v1486_v52 = vcombine.low %v20574_v33, %v20586_v39  ;;  %v20614_v53 = vcombine.high %v20590_v42, %v20590_v42 }
 0x186   : > { %26444 = vst [vmem:[#allocation17_spill] sm:$0xff] %v20608_v51  ;;  %v20617_v54 = vrot.slane %v644_v45, %v20561_v25  ;;  %v1504_v55 = vcombine.low %v20567_v30, %v20596_v46  ;;  %v17874_v59 = vrot.slane %v20596_v46, 9  ;;  %v694_v60 = vcombine.high %v18688_v50, %v18688_v50 }
 0x187   : > { %26443 = vst [vmem:[#allocation16_spill] sm:$0xff] %v20603_v48  ;;  %26445 = vst [vmem:[#allocation18_spill] sm:$0xff] %v20614_v53  ;;  %v20625_v57 = vcombine.high %v20603_v48, %v20603_v48  ;;  %v20629_v58 = vrot.slane %v26346_v49, 2  ;;  %v536_v61 = vpop.f32.mrf.mxu0  ;;  %v20635_v0 = vrot.slane %v18688_v50, %v20561_v25  ;;  %v1487_v5 = vcombine.low %v20582_v38, %v20608_v51 }
 0x188   : > { %26446 = vst [vmem:[#allocation19_spill] sm:$0xff] %v20617_v54  ;;  %v1518_v63 = vrot.slane %v1504_v55, %v20561_v25  ;;  %v677_v1 = vcombine.high %v536_v61, %v536_v61  ;;  %v20638_v2 = vrot.slane %v694_v60, %v20561_v25  ;;  %v20641_v3 = vrot.slane %v536_v61, %v20561_v25 }
 0x189   : > { %26447 = vst [vmem:[#allocation20_spill] sm:$0xff] %v20625_v57  ;;  %v18691_v4 = vpop.f32.mrf.mxu0  ;;  %v1494_v6 = vrot.slane %v1486_v52, %v20561_v25  ;;  %v20648_v7 = vcombine.high %v20635_v0, %v20635_v0  ;;  %v26345_v8 = vrot.slane %v20635_v0, 7  ;;  %v1501_v15 = vrot.slane %v1487_v5, %v20561_v25 }
 0x18a   : > { %26448 = vst [vmem:[#allocation21_spill] sm:$0xff] %v20638_v2  ;;  %v20652_v9 = vrot.slane %v677_v1, %v20561_v25  ;;  %v727_v10 = vcombine.high %v18691_v4, %v18691_v4  ;;  %v20656_v11 = vcombine.high %v20641_v3, %v20641_v3  ;;  %v20660_v13 = vrot.slane %v18691_v4, %v20561_v25 }
 0x18b   : > { %26449 = vst [vmem:[#allocation22_spill] sm:$0xff] %v20648_v7  ;;  %v546_v14 = vpop.f32.mrf.mxu0  ;;  %v20665_v16 = vrot.slane %v26345_v8, 2  ;;  %v1502_v26 = vcombine.low %v1494_v6, %v1501_v15  ;;  %v1519_v52 = vcombine.low %v20593_v44, %v1518_v63  ;;  %v20707_v1 = vcombine.high %v20596_v46, %v20596_v46 }
 0x18c   : > { %26450 = vst [vmem:[#allocation23_spill] sm:$0xff] %v20652_v9  ;;  %26451 = vst [vmem:[#allocation24_spill] sm:$0xff] %v20656_v11  ;;  %v20668_v17 = vrot.slane %v727_v10, %v20561_v25  ;;  %v710_v18 = vcombine.high %v546_v14, %v546_v14  ;;  %v20671_v19 = vrot.slane %v546_v14, %v20561_v25  ;;  %v26344_v23 = vrot.slane %v20660_v13, 7 }
 0x18d   : > { %v20676_v22 = vcombine.high %v20660_v13, %v20660_v13  ;;  %v18694_v27 = vpop.f32.mrf.mxu0  ;;  %18789 = vmatprep.mubr.f32.mxu0 %v1502_v26  ;;  %v20711_v4 = vcombine.high %v20617_v54, %v20617_v54  ;;  %v908_v14 = vrot.slane %v20586_v39, 7  ;;  %v911_v41 = vrot.slane %v20582_v38, 7 }
 0x18e   : > { %26452 = vst [vmem:[#allocation25_spill] sm:$0xff] %v20671_v19  ;;  %v20687_v32 = vcombine.high %v20668_v17, %v20668_v17  ;;  %v20691_v36 = vrot.slane %v710_v18, %v20561_v25  ;;  %v20696_v43 = vrot.slane %v26344_v23, 2  ;;  %v760_v45 = vcombine.high %v18694_v27, %v18694_v27  ;;  %18790 = vmatmul.mubr.f32.vlgmr.msra.gmra.mxu0 %v1519_v52 }
 0x18f   : > { %26453 = vst [vmem:[#allocation26_spill] sm:$0xff] %v20676_v22  ;;  %v20699_v50 = vrot.slane %v18694_v27, %v20561_v25  ;;  %v556_v55 = vpop.f32.mrf.mxu0  ;;  %26456 = vst [vmem:[#allocation27_spill] sm:$0xff] %v20711_v4  ;;  %v26348_v27 = vrot.slane %v20707_v1, 7  ;;  %v1521_v52 = vcombine.low %v20711_v4, %v20590_v42  ;;  %v910_v26 = vrot.slane %v908_v14, 2 }
 0x190   : > { %v743_v60 = vcombine.high %v556_v55, %v556_v55  ;;  %v20703_v61 = vrot.slane %v556_v55, %v20561_v25  ;;  %v20721_v44 = vrot.slane %v760_v45, %v20561_v25  ;;  %v1520_v45 = vcombine.low %v20707_v1, %v20617_v54 }
 0x191   : > { %v20725_v63 = vcombine.high %v20699_v50, %v20699_v50  ;;  %v26343_v6 = vrot.slane %v20699_v50, 7  ;;  %v18697_v10 = vpop.f32.mrf.mxu0  ;;  %v1535_v23 = vrot.slane %v1521_v52, %v20561_v25  ;;  %v914_v33 = vrot.slane %v20608_v51, 7 }
 0x192   : > { %v20730_v15 = vrot.slane %v743_v60, %v20561_v25  ;;  %v20734_v18 = vcombine.high %v20703_v61, %v20703_v61  ;;  %v793_v55 = vcombine.high %v18697_v10, %v18697_v10  ;;  %v20755_v56 = vrot.slane %v18697_v10, %v20561_v25 }
 0x193   : > { %v20740_v29 = vrot.slane %v26343_v6, 2  ;;  %v909_v6 = vsel %vm20749_vm6, %v17873_v40, %v908_v14  ;;  %v1528_v34 = vrot.slane %v1520_v45, %v20561_v25  ;;  %v891_v40 = vcombine.high %v20567_v30, %v20567_v30  ;;  %v566_v52 = vpop.f32.mrf.mxu0 }
 0x194   : > { %v20764_v5 = vrot.slane %v793_v55, %v20561_v25  ;;  %v20769_v37 = vcombine.high %v20755_v56, %v20755_v56  ;;  %v26347_v10 = vrot.slane %v20755_v56, 7  ;;  %v912_v55 = vsel %vm20749_vm6, %v910_v26, %v911_v41 }
 0x195   : > { %v1536_v14 = vcombine.low %v1528_v34, %v1535_v23  ;;  %v913_v12 = vrot.slane %v911_v41, 2  ;;  %v916_v21 = vrot.slane %v914_v33, 2  ;;  %v1099_v62 = vcombine.low %v909_v6, %v912_v55 }
 0x196   : > { %v20777_v45 = vcombine.high %v20764_v5, %v20764_v5  ;;  %v20784_v8 = vrot.slane %v26347_v10, 2  ;;  %v920_v49 = vrot.slane %v20571_v31, 7  ;;  %v923_v23 = vrot.slane %v20567_v30, 7 }
 0x197   : > { %18792 = vmatprep.mubr.f32.mxu0 %v1536_v14  ;;  %v926_v34 = vrot.slane %v891_v40, 7  ;;  %v931_v26 = vsel %vm20749_vm6, %v17874_v59, %v26348_v27  ;;  %v915_v10 = vsel %vm20749_vm6, %v913_v12, %v914_v33  ;;  %v918_v41 = vsel %vm20749_vm6, %v916_v21, %v917_v35 }
 0x198   : > { %v1107_v6 = vrot.slane %v1099_v62, %v20561_v25  ;;  %v1537_v40 = vcombine.low %v20614_v53, %v20603_v48  ;;  %v1100_v14 = vcombine.low %v915_v10, %v918_v41  ;;  %v921_v55 = vsel %vm20749_vm6, %v20600_v47, %v920_v49 }
 0x199   : > { %v922_v59 = vrot.slane %v920_v49, 2  ;;  %v925_v27 = vrot.slane %v923_v23, 2  ;;  %v1538_v12 = vcombine.low %v20641_v3, %v20656_v11  ;;  %v776_v24 = vcombine.high %v566_v52, %v566_v52  ;;  %v18700_v49 = vpop.f32.mrf.mxu0 }
 0x19a   : > { %v1545_v33 = vrot.slane %v1537_v40, %v20561_v25  ;;  %v20810_v35 = vrot.slane %v566_v52, %v20561_v25  ;;  %v1114_v62 = vrot.slane %v1100_v14, %v20561_v25  ;;  %v20819_v47 = vcombine.high %v20652_v9, %v20652_v9 }
 0x19b   : > { %v924_v21 = vsel %vm20749_vm6, %v922_v59, %v923_v23  ;;  %v927_v10 = vsel %vm20749_vm6, %v925_v27, %v926_v34  ;;  %v1552_v40 = vrot.slane %v1538_v12, %v20561_v25  ;;  %v20823_v52 = vrot.slane %v776_v24, %v20561_v25 }
 0x19c   : > { %26461 = vst [vmem:[#allocation28_spill] sm:$0xff] %v20819_v47  ;;  %v1116_v41 = vcombine.low %v921_v55, %v924_v21  ;;  %v1117_v31 = vcombine.low %v927_v10, %v931_v26  ;;  %v1115_v51 = vcombine.low %v1107_v6, %v1114_v62  ;;  %v1554_v23 = vcombine.low %v20652_v9, %v20819_v47 }
 0x19d   : > { %v1555_v27 = vcombine.low %v20635_v0, %v20648_v7  ;;  %v1553_v55 = vcombine.low %v1545_v33, %v1552_v40  ;;  %v826_v26 = vcombine.high %v18700_v49, %v18700_v49  ;;  %v20835_v6 = vrot.slane %v18700_v49, %v20561_v25 }
 0x19e   : > { %v1124_v34 = vrot.slane %v1116_v41, %v20561_v25  ;;  %v1131_v59 = vrot.slane %v1117_v31, %v20561_v25  ;;  %18736 = vmatprep.mubr.f32.mxu1 %v1115_v51  ;;  %v1562_v12 = vrot.slane %v1554_v23, %v20561_v25  ;;  %v26462_v62 = vrot.slane %v20707_v1, 7  ;;  %v576_v51 = vpop.f32.mrf.mxu0  ;;  %v1888_v41 = vld [vmem:[#allocation3 + $0x170] sm:$0xff] }
 0x19f   : > { %v1569_v24 = vrot.slane %v1555_v27, %v20561_v25  ;;  %18793 = vmatmul.mubr.f32.gmra.mxu0 %v1553_v55  ;;  %v20840_v14 = vrot.slane %v826_v26, %v20561_v25  ;;  %v933_v31 = vrot.slane %v20617_v54, 7  ;;  %v936_v33 = vrot.slane %v20711_v4, 7 }
 0x1a0   : > { %v932_v21 = vrot.slane %v26462_v62, 2  ;;  %v1132_v10 = vcombine.low %v1124_v34, %v1131_v59  ;;  %v20846_v23 = vcombine.high %v20835_v6, %v20835_v6  ;;  %v26353_v49 = vrot.slane %v20835_v6, 7 }
 0x1a1   : > { %v1570_v40 = vcombine.low %v1562_v12, %v1569_v24  ;;  %v942_v1 = vrot.slane %v20614_v53, 7  ;;  %v935_v34 = vrot.slane %v933_v31, 2  ;;  %v938_v59 = vrot.slane %v936_v33, 2  ;;  %v1887_v24 = vld [vmem:[#allocation3 + $0x168] sm:$0xff] }
 0x1a2   : > { %18737 = vmatmul.mubr.f32.vlgmr.msra.gmra.mxu1 %v1132_v10  ;;  %v934_v27 = vsel %vm20749_vm6, %v932_v21, %v933_v31  ;;  %v20854_v55 = vcombine.high %v20671_v19, %v20671_v19  ;;  %v20859_v26 = vrot.slane %v26353_v49, 2  ;;  %v1571_v62 = vcombine.low %v20638_v2, %v20671_v19 }
 0x1a3   : > { %18811 = vmatpush3.msra.mxu1 %v20554_v20  ;;  %18795 = vmatprep.mubr.f32.mxu0 %v1570_v40  ;;  %v943_v12 = vsel %vm20749_vm6, %v20629_v58, %v942_v1  ;;  %v809_v21 = vcombine.high %v576_v51, %v576_v51  ;;  %v937_v10 = vsel %vm20749_vm6, %v935_v34, %v936_v33  ;;  %v26463_v20 = vrot.slane %v20590_v42, 7 }
 0x1a4   : > { %18812 = vmatprep.subr.mxu1 %v1888_v41  ;;  %v1572_v49 = vcombine.low %v20854_v55, %v20691_v36  ;;  %v1133_v58 = vcombine.low %v934_v27, %v937_v10  ;;  %v1579_v54 = vrot.slane %v1571_v62, %v20561_v25  ;;  %v20877_v4 = vrot.slane %v576_v51, %v20561_v25  ;;  %v18703_v62 = vpop.f32.mrf.mxu0 }
 0x1a5   : > { %v940_v31 = vsel %vm20749_vm6, %v938_v59, %v26463_v20  ;;  %18813 = vmatpush3.msra.mxu1 %v1888_v41  ;;  %v20881_v34 = vrot.slane %v809_v21, %v20561_v25  ;;  %v944_v59 = vrot.slane %v942_v1, 2  ;;  %v26464_v20 = vrot.slane %v20603_v48, 7 }
 0x1a6   : > { %v1134_v53 = vcombine.low %v940_v31, %v943_v12  ;;  %18814 = vmatprep.subr.mxu1 %v1887_v24  ;;  %v1586_v33 = vrot.slane %v1572_v49, %v20561_v25  ;;  %v1141_v41 = vrot.slane %v1133_v58, %v20561_v25  ;;  %v20889_v51 = vcombine.high %v20877_v4, %v20877_v4  ;;  %v1885_v58 = vld [vmem:[#allocation3 + $0x158] sm:$0xff] }
 0x1a7   : > { %v947_v40 = vrot.slane %v26464_v20, 2  ;;  %18815 = vmatpush3.msra.mxu1 %v1887_v24  ;;  %v26465_v21 = vmov %v26464_v20  ;;  %v948_v10 = vrot.slane %v20625_v57, 7  ;;  %v26466_v31 = vrot.slane %v20656_v11, 7 }
 0x1a8   : > { %v1148_v27 = vrot.slane %v1134_v53, %v20561_v25  ;;  %v1587_v49 = vcombine.low %v1579_v54, %v1586_v33  ;;  %v946_v1 = vsel %vm20749_vm6, %v944_v59, %v26465_v21  ;;  %v26467_v53 = vrot.slane %v20641_v3, 9  ;;  %18816 = vmatprep.subr.mxu1 %v1886_v28 }
 0x1a9   : > { %v26468_v54 = vmov %v26466_v31  ;;  %v955_v48 = vrot.slane %v20652_v9, 7  ;;  %18817 = vmatpush3.msra.mxu1 %v1886_v28  ;;  %v949_v59 = vsel %vm20749_vm6, %v947_v40, %v948_v10  ;;  %v20911_v3 = vcombine.high %v20691_v36, %v20691_v36 }
 0x1aa   : > { %v953_v24 = vsel %vm20749_vm6, %v26467_v53, %v26466_v31  ;;  %v1149_v20 = vcombine.low %v1141_v41, %v1148_v27  ;;  %v954_v33 = vrot.slane %v26468_v54, 2  ;;  %18796 = vmatmul.mubr.f32.gmra.mxu0 %v1587_v49  ;;  %v1589_v21 = vcombine.low %v20676_v22, %v20668_v17  ;;  %v1884_v27 = vld [vmem:[#allocation3 + $0x150] sm:$0xff]  ;;  %18818 = vmatprep.subr.mxu1 %v1885_v58 }
 0x1ab   : > { %v859_v41 = vcombine.high %v18703_v62, %v18703_v62  ;;  %v1150_v53 = vcombine.low %v946_v1, %v949_v59  ;;  %v20918_v28 = vrot.slane %v18703_v62, %v20561_v25  ;;  %v957_v49 = vrot.slane %v955_v48, 2  ;;  %18819 = vmatpush3.msra.mxu1 %v1885_v58 }
 0x1ac   : > { %18739 = vmatprep.mubr.f32.mxu1 %v1149_v20  ;;  %v956_v31 = vsel %vm20749_vm6, %v954_v33, %v955_v48  ;;  %v1588_v10 = vcombine.low %v20911_v3, %v20660_v13  ;;  %v1603_v54 = vrot.slane %v1589_v21, %v20561_v25  ;;  %v1883_v20 = vld [vmem:[#allocation3 + $0x148] sm:$0xff]  ;;  %v958_v62 = vrot.slane %v20819_v47, 7  ;;  %18820 = vmatprep.subr.mxu1 %v1884_v27 }
 0x1ad   : > { %v1151_v40 = vcombine.low %v953_v24, %v956_v31  ;;  %v20924_v12 = vrot.slane %v859_v41, %v20561_v25  ;;  %v1158_v57 = vrot.slane %v1150_v53, %v20561_v25  ;;  %v20929_v1 = vcombine.high %v20918_v28, %v20918_v28  ;;  %v586_v24 = vpop.f32.mrf.mxu0  ;;  %18821 = vmatpush3.msra.mxu1 %v1884_v27  ;;  %v1882_v41 = vld [vmem:[#allocation3 + $0x140] sm:$0xff] }
 0x1ae   : > { %v26364_v48 = vrot.slane %v20918_v28, 7  ;;  %v1596_v59 = vrot.slane %v1588_v10, %v20561_v25  ;;  %v959_v53 = vsel %vm20749_vm6, %v957_v49, %v958_v62  ;;  %v960_v47 = vrot.slane %v958_v62, 2  ;;  %18822 = vmatprep.subr.mxu1 %v1883_v20 }
 0x1af   : > { %v1165_v33 = vrot.slane %v1151_v40, %v20561_v25  ;;  %v20937_v58 = vcombine.high %v20924_v12, %v20924_v12  ;;  %v964_v40 = vrot.slane %v20648_v7, 7  ;;  %v967_v9 = vrot.slane %v20638_v2, 7  ;;  %18823 = vmatpush3.msra.mxu1 %v1883_v20 }
 0x1b0   : > { %v20942_v31 = vrot.slane %v26364_v48, 2  ;;  %v1604_v11 = vcombine.low %v1596_v59, %v1603_v54  ;;  %v842_v42 = vcombine.high %v586_v24, %v586_v24  ;;  %v26469_v27 = vrot.slane %v20635_v0, 7  ;;  %18824 = vmatprep.subr.mxu1 %v1882_v41 }
 0x1b1   : > { %v1166_v10 = vcombine.low %v1158_v57, %v1165_v33  ;;  %v965_v48 = vsel %vm20749_vm6, %v20665_v16, %v964_v40  ;;  %v966_v49 = vrot.slane %v964_v40, 2  ;;  %v20956_v62 = vrot.slane %v586_v24, %v20561_v25  ;;  %v1881_v57 = vld [vmem:[#allocation3 + $0x138] sm:$0xff]  ;;  %18825 = vmatpush3.msra.mxu1 %v1882_v41  ;;  %v1879_v41 = vld [vmem:[#allocation3 + $0x128] sm:$0xff] }
 0x1b2   : > { %v962_v21 = vsel %vm20749_vm6, %v960_v47, %v26469_v27  ;;  %18798 = vmatprep.mubr.f32.mxu0 %v1604_v11  ;;  %v20959_v20 = vrot.slane %v842_v42, %v20561_v25  ;;  %v893_v33 = vcombine.high %v20638_v2, %v20638_v2  ;;  %v969_v47 = vrot.slane %v967_v9, 2  ;;  %18826 = vmatprep.subr.mxu1 %v1881_v57 }
 0x1b3   : > { %18740 = vmatmul.mubr.f32.gmra.mxu1 %v1166_v10  ;;  %v1167_v54 = vcombine.low %v959_v53, %v962_v21  ;;  %v968_v59 = vsel %vm20749_vm6, %v966_v49, %v967_v9  ;;  %v26470_v24 = vrot.slane %v20854_v55, 7  ;;  %v26471_v40 = vrot.slane %v20671_v19, 9  ;;  %v1880_v53 = vld [vmem:[#allocation3 + $0x130] sm:$0xff] }
 0x1b4   : > { %v1168_v10 = vcombine.low %v965_v48, %v968_v59  ;;  %v970_v7 = vrot.slane %v893_v33, 7  ;;  %v977_v9 = vrot.slane %v20691_v36, 7  ;;  %v980_v49 = vrot.slane %v20911_v3, 7  ;;  %18827 = vmatpush3.msra.mxu1 %v1881_v57  ;;  %v1878_v57 = vld [vmem:[#allocation3 + $0x120] sm:$0xff] }
 0x1b5   : > { %v975_v11 = vsel %vm20749_vm6, %v26471_v40, %v26470_v24  ;;  %v26472_v21 = vmov %v26470_v24  ;;  %v1175_v27 = vrot.slane %v1167_v54, %v20561_v25  ;;  %v20979_v16 = vcombine.high %v20730_v15, %v20730_v15  ;;  %18828 = vmatprep.subr.mxu1 %v1880_v53 }
 0x1b6   : > { %v976_v42 = vrot.slane %v26472_v21, 2  ;;  %v1605_v24 = vcombine.low %v20703_v61, %v20734_v18  ;;  %v986_v55 = vrot.slane %v20676_v22, 7  ;;  %v1182_v48 = vrot.slane %v1168_v10, %v20561_v25  ;;  %18829 = vmatpush3.msra.mxu1 %v1880_v53 }
 0x1b7   : > { %v971_v54 = vsel %vm20749_vm6, %v969_v47, %v970_v7  ;;  %v979_v59 = vrot.slane %v977_v9, 2  ;;  %v1606_v21 = vcombine.low %v20730_v15, %v20979_v16  ;;  %v982_v2 = vrot.slane %v980_v49, 2  ;;  %18830 = vmatprep.subr.mxu1 %v1879_v41 }
 0x1b8   : > { %v978_v33 = vsel %vm20749_vm6, %v976_v42, %v977_v9  ;;  %v1184_v40 = vcombine.low %v971_v54, %v975_v11  ;;  %v1613_v19 = vrot.slane %v1605_v24, %v20561_v25  ;;  %v1183_v22 = vcombine.low %v1175_v27, %v1182_v48  ;;  %18831 = vmatpush3.msra.mxu1 %v1879_v41  ;;  %v1877_v27 = vld [vmem:[#allocation3 + $0x118] sm:$0xff] }
 0x1b9   : > { %v981_v10 = vsel %vm20749_vm6, %v979_v59, %v980_v49  ;;  %v987_v7 = vsel %vm20749_vm6, %v20696_v43, %v986_v55  ;;  %v988_v47 = vrot.slane %v986_v55, 2  ;;  %v1620_v9 = vrot.slane %v1606_v21, %v20561_v25  ;;  %18832 = vmatprep.subr.mxu1 %v1878_v57 }
 0x1ba   : > { %v1185_v42 = vcombine.low %v978_v33, %v981_v10  ;;  %v1192_v11 = vrot.slane %v1184_v40, %v20561_v25  ;;  %v26473_v24 = vrot.slane %v20660_v13, 7  ;;  %18742 = vmatprep.mubr.f32.mxu1 %v1183_v22  ;;  %v26474_v49 = vrot.slane %v20668_v17, 7  ;;  %18833 = vmatpush3.msra.mxu1 %v1878_v57 }
 0x1bb   : > { %v992_v54 = vrot.slane %v20687_v32, 7  ;;  %v1621_v40 = vcombine.low %v1613_v19, %v1620_v9  ;;  %v1623_v22 = vcombine.low %v20721_v44, %v20810_v35  ;;  %v21020_v10 = vcombine.high %v20810_v35, %v20810_v35  ;;  %18834 = vmatprep.subr.mxu1 %v1877_v27  ;;  %v1876_v19 = vld [vmem:[#allocation3 + $0x110] sm:$0xff] }
 0x1bc   : > { %v984_v53 = vsel %vm20749_vm6, %v982_v2, %v26473_v24  ;;  %v990_v43 = vsel %vm20749_vm6, %v988_v47, %v26474_v49  ;;  %v26475_v55 = vmov %v26474_v49  ;;  %v1199_v59 = vrot.slane %v1185_v42, %v20561_v25  ;;  %18835 = vmatpush3.msra.mxu1 %v1877_v27 }
 0x1bd   : > { %v991_v48 = vrot.slane %v26475_v55, 2  ;;  %v1201_v33 = vcombine.low %v984_v53, %v987_v7  ;;  %v1622_v2 = vcombine.low %v20699_v50, %v20725_v63  ;;  %v21024_v7 = vcombine.high %v20823_v52, %v20823_v52  ;;  %18799 = vmatmul.mubr.f32.gmra.mxu0 %v1621_v40  ;;  %18836 = vmatprep.subr.mxu1 %v1876_v19 }
 0x1be   : > { %v1200_v47 = vcombine.low %v1192_v11, %v1199_v59  ;;  %v1637_v9 = vrot.slane %v1623_v22, %v20561_v25  ;;  %v1018_v24 = vrot.slane %v21020_v10, 7  ;;  %v1639_v53 = vcombine.low %v21020_v10, %v20823_v52  ;;  %18837 = vmatpush3.msra.mxu1 %v1876_v19  ;;  %v1874_v10 = vld [vmem:[#allocation3 + $0x100] sm:$0xff] }
 0x1bf   : > { %v993_v41 = vsel %vm20749_vm6, %v991_v48, %v992_v54  ;;  %v1209_v21 = vrot.slane %v1201_v33, %v20561_v25  ;;  %v1630_v57 = vrot.slane %v1622_v2, %v20561_v25  ;;  %v1640_v49 = vcombine.low %v21024_v7, %v20755_v56 }
 0x1c0   : > { %v1202_v42 = vcombine.low %v990_v43, %v993_v41  ;;  %v26476_v55 = vrot.slane %v20734_v18, 7  ;;  %v26477_v48 = vrot.slane %v20703_v61, 9  ;;  %v1875_v43 = vld [vmem:[#allocation3 + $0x108] sm:$0xff]  ;;  %18743 = vmatmul.mubr.f32.gmra.mxu1 %v1200_v47  ;;  %v999_v2 = vrot.slane %v20730_v15, 7 }
 0x1c1   : > { %v1638_v33 = vcombine.low %v1630_v57, %v1637_v9  ;;  %v1647_v22 = vrot.slane %v1639_v53, %v20561_v25  ;;  %v1654_v41 = vrot.slane %v1640_v49, %v20561_v25  ;;  %v1002_v61 = vrot.slane %v20979_v16, 7  ;;  %18838 = vmatprep.subr.mxu1 %v1875_v43 }
 0x1c2   : > { %v997_v11 = vsel %vm20749_vm6, %v26477_v48, %v26476_v55  ;;  %v1216_v54 = vrot.slane %v1202_v42, %v20561_v25  ;;  %v26478_v59 = vmov %v26476_v55  ;;  %v895_v27 = vcombine.high %v20721_v44, %v20721_v44  ;;  %18839 = vmatpush3.msra.mxu1 %v1875_v43 }
 0x1c3   : > { %v998_v40 = vrot.slane %v26478_v59, 2  ;;  %18801 = vmatprep.mubr.f32.mxu0 %v1638_v33  ;;  %v1001_v57 = vrot.slane %v999_v2, 2  ;;  %v1008_v9 = vrot.slane %v20725_v63, 7  ;;  %v1655_v55 = vcombine.low %v1647_v22, %v1654_v41  ;;  %18840 = vmatprep.subr.mxu1 %v1874_v10 }
 0x1c4   : > { %v1217_v47 = vcombine.low %v1209_v21, %v1216_v54  ;;  %v1004_v53 = vrot.slane %v1002_v61, 2  ;;  %v1011_v49 = vrot.slane %v20721_v44, 7  ;;  %v1014_v33 = vrot.slane %v895_v27, 7  ;;  %18841 = vmatpush3.msra.mxu1 %v1874_v10 }
 0x1c5   : > { %v1000_v42 = vsel %vm20749_vm6, %v998_v40, %v999_v2  ;;  %v1003_v19 = vsel %vm20749_vm6, %v1001_v57, %v1002_v61  ;;  %v1009_v21 = vsel %vm20749_vm6, %v20740_v29, %v1008_v9  ;;  %v1010_v54 = vrot.slane %v1008_v9, 2  ;;  %18802 = vmatmul.mubr.f32.gmra.mxu0 %v1655_v55 }
 0x1c6   : > { %v1218_v48 = vcombine.low %v997_v11, %v1000_v42  ;;  %18745 = vmatprep.mubr.f32.mxu1 %v1217_v47  ;;  %v26479_v59 = vrot.slane %v20699_v50, 7  ;;  %v1013_v43 = vrot.slane %v1011_v49, 2  ;;  %v26480_v2 = vrot.slane %v20810_v35, 9 }
 0x1c7   : > { %v1012_v29 = vsel %vm20749_vm6, %v1010_v54, %v1011_v49  ;;  %v1656_v61 = vcombine.low %v20769_v37, %v20764_v5  ;;  %v1657_v27 = vcombine.low %v20877_v4, %v20889_v51  ;;  %v21076_v57 = vcombine.high %v20881_v34, %v20881_v34 }
 0x1c8   : > { %v1006_v11 = vsel %vm20749_vm6, %v1004_v53, %v26479_v59  ;;  %v1226_v40 = vrot.slane %v1218_v48, %v20561_v25  ;;  %v1019_v22 = vsel %vm20749_vm6, %v26480_v2, %v1018_v24  ;;  %v1015_v47 = vsel %vm20749_vm6, %v1013_v43, %v1014_v33 }
 0x1c9   : > { %v1219_v41 = vcombine.low %v1003_v19, %v1006_v11  ;;  %v1235_v42 = vcombine.low %v1009_v21, %v1012_v29  ;;  %v1674_v10 = vcombine.low %v20835_v6, %v20846_v23  ;;  %v1236_v55 = vcombine.low %v1015_v47, %v1019_v22 }
 0x1ca   : > { %v1664_v53 = vrot.slane %v1656_v61, %v20561_v25  ;;  %v1671_v48 = vrot.slane %v1657_v27, %v20561_v25  ;;  %v1673_v19 = vcombine.low %v20881_v34, %v21076_v57  ;;  %v1020_v54 = vrot.slane %v1018_v24, 2 }
 0x1cb   : > { %v1233_v9 = vrot.slane %v1219_v41, %v20561_v25  ;;  %v1243_v49 = vrot.slane %v1235_v42, %v20561_v25  ;;  %v1688_v21 = vrot.slane %v1674_v10, %v20561_v25  ;;  %v1250_v59 = vrot.slane %v1236_v55, %v20561_v25 }
 0x1cc   : > { %v1672_v11 = vcombine.low %v1664_v53, %v1671_v48  ;;  %v1021_v43 = vrot.slane %v20823_v52, 7  ;;  %v1681_v2 = vrot.slane %v1673_v19, %v20561_v25  ;;  %v1024_v22 = vrot.slane %v21024_v7, 7 }
 0x1cd   : > { %v1234_v33 = vcombine.low %v1226_v40, %v1233_v9  ;;  %v1030_v41 = vrot.slane %v20769_v37, 7  ;;  %v857_v29 = vcombine.high %v20956_v62, %v20956_v62  ;;  %v1251_v61 = vcombine.low %v1243_v49, %v1250_v59 }
 0x1ce   : > { %18804 = vmatprep.mubr.f32.mxu0 %v1672_v11  ;;  %v1022_v24 = vsel %vm20749_vm6, %v1020_v54, %v1021_v43  ;;  %v1023_v40 = vrot.slane %v1021_v43, 2  ;;  %v1690_v27 = vcombine.low %v20840_v14, %v20956_v62  ;;  %v1689_v47 = vcombine.low %v1681_v2, %v1688_v21 }
 0x1cf   : > { %18746 = vmatmul.mubr.f32.gmra.mxu1 %v1234_v33  ;;  %v1026_v42 = vrot.slane %v1024_v22, 2  ;;  %v1031_v10 = vsel %vm20749_vm6, %v20784_v8, %v1030_v41  ;;  %v1062_v9 = vrot.slane %v857_v29, 7  ;;  %v1691_v53 = vcombine.low %v857_v29, %v20959_v20 }
 0x1d0   : > { %18748 = vmatprep.mubr.f32.mxu1 %v1251_v61  ;;  %v1025_v55 = vsel %vm20749_vm6, %v1023_v40, %v1024_v22  ;;  %v1698_v48 = vrot.slane %v1690_v27, %v20561_v25  ;;  %v1032_v49 = vrot.slane %v1030_v41, 2  ;;  %18805 = vmatmul.mubr.f32.gmra.mxu0 %v1689_v47  ;;  %v26481_v19 = vrot.slane %v20755_v56, 7 }
 0x1d1   : > { %v1252_v54 = vcombine.low %v1022_v24, %v1025_v55  ;;  %v26482_v33 = vrot.slane %v20764_v5, 7  ;;  %v1036_v59 = vrot.slane %v20777_v45, 7  ;;  %v1705_v43 = vrot.slane %v1691_v53, %v20561_v25 }
 0x1d2   : > { %v1028_v21 = vsel %vm20749_vm6, %v1026_v42, %v26481_v19  ;;  %v26484_v41 = vrot.slane %v20889_v51, 7  ;;  %v26485_v29 = vrot.slane %v20877_v4, 9  ;;  %v1043_v42 = vrot.slane %v20881_v34, 7 }
 0x1d3   : > { %v1035_v8 = vrot.slane %v26482_v33, 2  ;;  %v1253_v11 = vcombine.low %v1028_v21, %v1031_v10  ;;  %v26483_v2 = vmov %v26482_v33  ;;  %v1260_v24 = vrot.slane %v1252_v54, %v20561_v25 }
 0x1d4   : > { %v1034_v22 = vsel %vm20749_vm6, %v1032_v49, %v26483_v2  ;;  %v1041_v61 = vsel %vm20749_vm6, %v26485_v29, %v26484_v41  ;;  %v26486_v27 = vmov %v26484_v41  ;;  %v1706_v55 = vcombine.low %v1698_v48, %v1705_v43 }
 0x1d5   : > { %v1037_v40 = vsel %vm20749_vm6, %v1035_v8, %v1036_v59  ;;  %v1042_v47 = vrot.slane %v26486_v27, 2  ;;  %v1267_v10 = vrot.slane %v1253_v11, %v20561_v25  ;;  %v21132_v4 = vcombine.high %v20959_v20, %v20959_v20 }
 0x1d6   : > { %v1269_v53 = vcombine.low %v1034_v22, %v1037_v40  ;;  %v1708_v19 = vcombine.low %v20929_v1, %v20924_v12  ;;  %v1045_v21 = vrot.slane %v1043_v42, 2  ;;  %v1046_v54 = vrot.slane %v21076_v57, 7  ;;  %18807 = vmatprep.mubr.f32.mxu0 %v1706_v55 }
 0x1d7   : > { %v1044_v49 = vsel %vm20749_vm6, %v1042_v47, %v1043_v42  ;;  %v1268_v33 = vcombine.low %v1260_v24, %v1267_v10  ;;  %v1707_v48 = vcombine.low %v21132_v4, %v20918_v28  ;;  %v1052_v22 = vrot.slane %v20846_v23, 7 }
 0x1d8   : > { %v1270_v8 = vcombine.low %v1041_v61, %v1044_v49  ;;  %v1277_v59 = vrot.slane %v1269_v53, %v20561_v25  ;;  %v1722_v11 = vrot.slane %v1708_v19, %v20561_v25  ;;  %v1047_v43 = vsel %vm20749_vm6, %v1045_v21, %v1046_v54 }
 0x1d9   : > { %v1048_v2 = vrot.slane %v1046_v54, 2  ;;  %18749 = vmatmul.mubr.f32.gmra.mxu1 %v1268_v33  ;;  %v1715_v29 = vrot.slane %v1707_v48, %v20561_v25  ;;  %v1055_v61 = vrot.slane %v20840_v14, 7  ;;  %v897_v24 = vcombine.high %v20840_v14, %v20840_v14 }
 0x1da   : > { %v1284_v41 = vrot.slane %v1270_v8, %v20561_v25  ;;  %v26487_v40 = vrot.slane %v20835_v6, 7  ;;  %v1053_v47 = vsel %vm20749_vm6, %v20859_v26, %v1052_v22  ;;  %v1054_v42 = vrot.slane %v1052_v22, 2 }
 0x1db   : > { %v26488_v10 = vrot.slane %v20956_v62, 9  ;;  %v1723_v49 = vcombine.low %v1715_v29, %v1722_v11  ;;  %v1057_v21 = vrot.slane %v1055_v61, 2  ;;  %v1058_v33 = vrot.slane %v897_v24, 7 }
 0x1dc   : > { %v1050_v27 = vsel %vm20749_vm6, %v1048_v2, %v26487_v40  ;;  %v1285_v53 = vcombine.low %v1277_v59, %v1284_v41  ;;  %v1056_v54 = vsel %vm20749_vm6, %v1054_v42, %v1055_v61  ;;  %v1064_v8 = vrot.slane %v1062_v9, 2 }
 0x1dd   : > { %v1063_v55 = vsel %vm20749_vm6, %v26488_v10, %v1062_v9  ;;  %v1286_v19 = vcombine.low %v1047_v43, %v1050_v27  ;;  %v1065_v48 = vrot.slane %v20959_v20, 7  ;;  %18808 = vmatmul.mubr.f32.gmra.mxu0 %v1723_v49  ;;  %v1287_v26 = vcombine.low %v1053_v47, %v1056_v54 }
 0x1de   : > { %18751 = vmatprep.mubr.f32.mxu1 %v1285_v53  ;;  %v1068_v22 = vrot.slane %v21132_v4, 7  ;;  %v1074_v40 = vrot.slane %v20929_v1, 7  ;;  %v1059_v59 = vsel %vm20749_vm6, %v1057_v21, %v1058_v33  ;;  %v26489_v9 = vrot.slane %v20924_v12, 7 }
 0x1df   : > { %v1294_v2 = vrot.slane %v1286_v19, %v20561_v25  ;;  %v1066_v11 = vsel %vm20749_vm6, %v1064_v8, %v1065_v48  ;;  %v1067_v43 = vrot.slane %v1065_v48, 2  ;;  %v26490_v29 = vcombine.high %v20567_v30, %v20596_v46 }
 0x1e0   : > { %v1079_v41 = vrot.slane %v26489_v9, 2  ;;  %v1301_v24 = vrot.slane %v1287_v26, %v20561_v25  ;;  %v1303_v27 = vcombine.low %v1059_v59, %v1063_v55  ;;  %v1070_v47 = vrot.slane %v1068_v22, 2  ;;  %v26493_v26 = vld [vmem:[#allocation13_spill] sm:$0xff] }
 0x1e1   : > { %v1922_v61 = vrot.slane %v26490_v29, %v20561_v25  ;;  %v1069_v42 = vsel %vm20749_vm6, %v1067_v43, %v1068_v22  ;;  %v1075_v10 = vsel %vm20749_vm6, %v20942_v31, %v1074_v40  ;;  %v1076_v53 = vrot.slane %v1074_v40, 2 }
 0x1e2   : > { %v1080_v49 = vrot.slane %v20937_v58, 7  ;;  %v1302_v19 = vcombine.low %v1294_v2, %v1301_v24  ;;  %v1304_v21 = vcombine.low %v1066_v11, %v1069_v42  ;;  %v26491_v54 = vrot.slane %v20918_v28, 7  ;;  %v26494_v2 = vld [vmem:[#allocation17_spill] sm:$0xff]  ;;  %v26498_v24 = vld [vmem:[#allocation19_spill] sm:$0xff] }
 0x1e3   : > { %v1890_v55 = vcombine.low %v20586_v39, %v20582_v38  ;;  %v26492_v33 = vmov %v26489_v9  ;;  %v1891_v22 = vcombine.low %v26494_v2, %v26493_v26  ;;  %v1311_v40 = vrot.slane %v1303_v27, %v20561_v25  ;;  %v26495_v38 = vld [vmem:[#allocation14_spill] sm:$0xff] }
 0x1e4   : > { %v1072_v46 = vsel %vm20749_vm6, %v1070_v47, %v26491_v54  ;;  %v1078_v8 = vsel %vm20749_vm6, %v1076_v53, %v26492_v33  ;;  %v1081_v31 = vsel %vm20749_vm6, %v1079_v41, %v1080_v49  ;;  %18752 = vmatmul.mubr.f32.gmra.mxu1 %v1302_v19  ;;  %v1318_v59 = vrot.slane %v1304_v21, %v20561_v25  ;;  %v26497_v41 = vld [vmem:[#allocation27_spill] sm:$0xff]  ;;  %v26499_v49 = vld [vmem:[#allocation18_spill] sm:$0xff] }
 0x1e5   : > { %v1320_v48 = vcombine.low %v1072_v46, %v1075_v10  ;;  %v1321_v11 = vcombine.low %v1078_v8, %v1081_v31  ;;  %v26496_v39 = vcombine.low %v26495_v38, %v20567_v30  ;;  %v1905_v29 = vrot.slane %v1891_v22, %v20561_v25  ;;  %v26500_v19 = vld [vmem:[#allocation15_spill] sm:$0xff]  ;;  %v26502_v46 = vld [vmem:[#allocation24_spill] sm:$0xff] }
 0x1e6   : > { %v1924_v47 = vcombine.low %v26498_v24, %v26497_v41  ;;  %v1319_v42 = vcombine.low %v1311_v40, %v1318_v59  ;;  %v1898_v27 = vrot.slane %v1890_v55, %v20561_v25  ;;  %v1925_v21 = vcombine.low %v26500_v19, %v26499_v49  ;;  %v26501_v30 = vld [vmem:[#allocation23_spill] sm:$0xff]  ;;  %v26505_v55 = vld [vmem:[#allocation16_spill] sm:$0xff]  ;;  %v26506_v40 = vld [vmem:[#allocation26_spill] sm:$0xff] }
 0x1e7   : > { %v1915_v43 = vrot.slane %v26496_v39, %v20561_v25  ;;  %v1328_v9 = vrot.slane %v1320_v48, %v20561_v25  ;;  %v1335_v10 = vrot.slane %v1321_v11, %v20561_v25  ;;  %v1942_v33 = vcombine.low %v26502_v46, %v26501_v30  ;;  %v26503_v48 = vld [vmem:[#allocation28_spill] sm:$0xff]  ;;  %v26507_v39 = vld [vmem:[#allocation21_spill] sm:$0xff] }
 0x1e8   : > { %18754 = vmatprep.mubr.f32.mxu1 %v1319_v42  ;;  %v1906_v8 = vcombine.low %v1898_v27, %v1905_v29  ;;  %v1932_v31 = vrot.slane %v1924_v47, %v20561_v25  ;;  %v1958_v26 = vcombine.low %v26503_v48, %v20635_v0  ;;  %v1976_v2 = vcombine.low %v20691_v36, %v20911_v3  ;;  %v26509_v24 = vld [vmem:[#allocation25_spill] sm:$0xff] }
 0x1e9   : > { %v1923_v53 = vcombine.low %v1915_v43, %v1922_v61  ;;  %v1336_v54 = vcombine.low %v1328_v9, %v1335_v10  ;;  %v26504_v61 = vld [vmem:[#allocation20_spill] sm:$0xff]  ;;  %v1992_v59 = vcombine.low %v20660_v13, %v26506_v40  ;;  %v1993_v11 = vcombine.low %v20668_v17, %v20687_v32  ;;  %v26508_v43 = vld [vmem:[#allocation22_spill] sm:$0xff] }
 0x1ea   : > { %v1941_v22 = vcombine.low %v26505_v55, %v26504_v61  ;;  %v1939_v38 = vrot.slane %v1925_v21, %v20561_v25  ;;  %v1959_v9 = vcombine.low %v26508_v43, %v26507_v39  ;;  %v1956_v0 = vrot.slane %v1942_v33, %v20561_v25  ;;  %v3347_v55 = vld [vmem:[#allocation6 + $0x70] sm:$0xff]  ;;  %v3345_v40 = vld [vmem:[#allocation6 + $0x60] sm:$0xff]  ;;  %v21295_v43 = vld [vmem:[#allocation6 + $0xd8] sm:$0xff] }
 0x1eb   : > { %18755 = vmatmul.mubr.f32.gmra.mxu1 %v1336_v54  ;;  %v2000_v36 = vrot.slane %v1992_v59, %v20561_v25  ;;  %v2007_v3 = vrot.slane %v1993_v11, %v20561_v25  ;;  %v1966_v41 = vrot.slane %v1958_v26, %v20561_v25  ;;  %v17882_v17 = vcombine.high %v26507_v39, %v26509_v24  ;;  %v21289_v59 = vld [vmem:[#allocation6 + $0xe8] sm:$0xff]  ;;  %v3344_v11 = vld [vmem:[#allocation6 + $0x58] sm:$0xff]  ;;  %v3343_v39 = vld [vmem:[#allocation6 + $0x50] sm:$0xff] }
 0x1ec   : > { %18842 = vmatprep.mubr.f32.mxu1 %v1906_v8  ;;  %v1940_v29 = vcombine.low %v1932_v31, %v1939_v38  ;;  %v1949_v13 = vrot.slane %v1941_v22, %v20561_v25  ;;  %v1973_v47 = vrot.slane %v1959_v9, %v20561_v25  ;;  %v1990_v10 = vrot.slane %v1976_v2, %v20561_v25  ;;  %v21281_v22 = vld [vmem:[#allocation6 + $0xf8] sm:$0xff]  ;;  %v21293_v38 = vld [vmem:[#allocation6 + $0xe0] sm:$0xff]  ;;  %v3342_v9 = vld [vmem:[#allocation6 + $0x48] sm:$0xff] }
 0x1ed   : > { %v2008_v32 = vcombine.low %v2000_v36, %v2007_v3  ;;  %v2010_v27 = vcombine.low %v20979_v16, %v20699_v50  ;;  %v17883_v19 = vcombine.high %v20721_v44, %v20810_v35  ;;  %v2009_v21 = vcombine.low %v20734_v18, %v20730_v15  ;;  %18863 = vmatprep.subr.mxu0 %v21281_v22  ;;  %v3341_v36 = vld [vmem:[#allocation6 + $0x40] sm:$0xff]  ;;  %v21305_v3 = vld [vmem:[#allocation6 + $0xc8] sm:$0xff]  ;;  %v21313_v24 = vld [vmem:[#allocation6 + $0xb8] sm:$0xff] }
 0x1ee   : > { %v1957_v42 = vcombine.low %v1949_v13, %v1956_v0  ;;  %v1974_v49 = vcombine.low %v1966_v41, %v1973_v47  ;;  %v2026_v54 = vcombine.low %v20725_v63, %v20721_v44  ;;  %v2043_v50 = vcombine.low %v20823_v52, %v21024_v7  ;;  %18864 = vmatpush3.msra.mxu0 %v21281_v22  ;;  %v21301_v0 = vld [vmem:[#allocation6 + $0xd0] sm:$0xff]  ;;  %v21309_v41 = vld [vmem:[#allocation6 + $0xc0] sm:$0xff] }
 0x1ef   : > { %18843 = vmatmul.mubr.f32.vlgmr.msra.gmra.mxu1 %v1923_v53  ;;  %v1983_v53 = vrot.slane %v17882_v17, %v20561_v25  ;;  %v2024_v46 = vrot.slane %v2010_v27, %v20561_v25  ;;  %v2041_v16 = vrot.slane %v17883_v19, %v20561_v25  ;;  %v2061_v35 = vcombine.low %v20889_v51, %v20881_v34  ;;  %v3339_v13 = vld [vmem:[#allocation6 + $0x30] sm:$0xff]  ;;  %v3338_v17 = vld [vmem:[#allocation6 + $0x28] sm:$0xff]  ;;  %v3337_v47 = vld [vmem:[#allocation6 + $0x20] sm:$0xff] }
 0x1f0   : > { %18845 = vmatprep.mubr.f32.mxu1 %v1940_v29  ;;  %v2017_v33 = vrot.slane %v2009_v21, %v20561_v25  ;;  %v2044_v15 = vcombine.low %v20755_v56, %v20769_v37  ;;  %v2034_v44 = vrot.slane %v2026_v54, %v20561_v25  ;;  %v2060_v63 = vcombine.low %v20764_v5, %v20777_v45  ;;  %v3340_v29 = vld [vmem:[#allocation6 + $0x38] sm:$0xff]  ;;  %v3538_v27 = vld [vmem:[#allocation6 + $0xa0] sm:$0xff]  ;;  %v3536_v21 = vld [vmem:[#allocation6 + $0x90] sm:$0xff] }
 0x1f1   : > { %v1991_v30 = vcombine.low %v1983_v53, %v1990_v10  ;;  %v2051_v52 = vrot.slane %v2043_v50, %v20561_v25  ;;  %v2077_v7 = vcombine.low %v21076_v57, %v20835_v6  ;;  %v2075_v34 = vrot.slane %v2061_v35, %v20561_v25  ;;  %v3336_v10 = vld [vmem:[#allocation6 + $0x18] sm:$0xff]  ;;  %v3334_v53 = vld [vmem:[#allocation6 + $0x8] sm:$0xff]  ;;  %v3333_v54 = vld [vmem:[#allocation6] sm:$0xff] }
 0x1f2   : > { %v2025_v18 = vcombine.low %v2017_v33, %v2024_v46  ;;  %v2042_v8 = vcombine.low %v2034_v44, %v2041_v16  ;;  %v2095_v51 = vcombine.low %v20959_v20, %v21132_v4  ;;  %v2058_v37 = vrot.slane %v2044_v15, %v20561_v25  ;;  %v3537_v19 = vld [vmem:[#allocation6 + $0x98] sm:$0xff]  ;;  %v3534_v50 = vld [vmem:[#allocation6 + $0x80] sm:$0xff] }
 0x1f3   : > { %18846 = vmatmul.mubr.f32.gmra.mxu1 %v1957_v42  ;;  %v2078_v56 = vcombine.low %v20846_v23, %v20840_v14  ;;  %v2068_v5 = vrot.slane %v2060_v63, %v20561_v25  ;;  %v17884_v45 = vcombine.high %v20840_v14, %v20956_v62  ;;  %v2085_v6 = vrot.slane %v2077_v7, %v20561_v25  ;;  %v3539_v42 = vld [vmem:[#allocation6 + $0xa8] sm:$0xff] }
 0x1f4   : > { %18848 = vmatprep.mubr.f32.mxu1 %v1974_v49  ;;  %v2059_v31 = vcombine.low %v2051_v52, %v2058_v37  ;;  %v2112_v57 = vcombine.low %v20924_v12, %v20937_v58  ;;  %v2109_v20 = vrot.slane %v2095_v51, %v20561_v25  ;;  %v2111_v23 = vcombine.low %v20918_v28, %v20929_v1  ;;  %v3348_v58 = vld [vmem:[#allocation6 + $0x78] sm:$0xff]  ;;  %v3346_v28 = vld [vmem:[#allocation6 + $0x68] sm:$0xff]  ;;  %v21285_v1 = vld [vmem:[#allocation6 + $0xf0] sm:$0xff] }
 0x1f5   : > { %v2076_v48 = vcombine.low %v2068_v5, %v2075_v34  ;;  %v2092_v4 = vrot.slane %v2078_v56, %v20561_v25  ;;  %v2102_v26 = vrot.slane %v17884_v45, %v20561_v25  ;;  %18916 = vmatprep.subr.mxu1 %v3348_v58  ;;  %18865 = vmatprep.subr.mxu0 %v21285_v1  ;;  %v3335_v49 = vld [vmem:[#allocation6 + $0x10] sm:$0xff] }
 0x1f6   : > { %v2126_v14 = vrot.slane %v2112_v57, %v20561_v25  ;;  %v2119_v61 = vrot.slane %v2111_v23, %v20561_v25  ;;  %18917 = vmatpush3.msra.mxu1 %v3348_v58  ;;  %18866 = vmatpush3.msra.mxu0 %v21285_v1 }
 0x1f7   : > { %18849 = vmatmul.mubr.f32.gmra.mxu1 %v1991_v30  ;;  %v2093_v2 = vcombine.low %v2085_v6, %v2092_v4  ;;  %v2110_v62 = vcombine.low %v2102_v26, %v2109_v20  ;;  %18918 = vmatprep.subr.mxu1 %v3347_v55  ;;  %v3535_v30 = vld [vmem:[#allocation6 + $0x88] sm:$0xff] }
 0x1f8   : > { %18851 = vmatprep.mubr.f32.mxu1 %v2008_v32  ;;  %v2127_v12 = vcombine.low %v2119_v61, %v2126_v14  ;;  %18919 = vmatpush3.msra.mxu1 %v3347_v55  ;;  %v3540_v32 = vld [vmem:[#allocation6 + $0xb0] sm:$0xff] }
 0x1f9   : > { %18920 = vmatprep.subr.mxu1 %v3346_v28  ;;  %18867 = vmatprep.subr.mxu0 %v21289_v59 }
 0x1fa   : > { %18921 = vmatpush3.msra.mxu1 %v3346_v28  ;;  %18868 = vmatpush3.msra.mxu0 %v21289_v59 }
 0x1fb   : > { %18852 = vmatmul.mubr.f32.gmra.mxu1 %v2025_v18  ;;  %18922 = vmatprep.subr.mxu1 %v3345_v40  ;;  %v21318_v18 = vld [vmem:[#allocation6 + $0x178] sm:$0xff] }
 0x1fc   : > { %18854 = vmatprep.mubr.f32.mxu1 %v2042_v8  ;;  %18923 = vmatpush3.msra.mxu1 %v3345_v40 }
 0x1fd   : > { %18924 = vmatprep.subr.mxu1 %v3344_v11  ;;  %18869 = vmatprep.subr.mxu0 %v21293_v38 }
 0x1fe   : > { %18925 = vmatpush3.msra.mxu1 %v3344_v11  ;;  %18870 = vmatpush3.msra.mxu0 %v21293_v38 }
 0x1ff   : > { %18855 = vmatmul.mubr.f32.gmra.mxu1 %v2059_v31  ;;  %18926 = vmatprep.subr.mxu1 %v3343_v39 }
 0x200   : > { %18857 = vmatprep.mubr.f32.mxu1 %v2076_v48  ;;  %18927 = vmatpush3.msra.mxu1 %v3343_v39 }
 0x201   : > { %18871 = vmatprep.subr.mxu0 %v21295_v43  ;;  %18928 = vmatprep.subr.mxu1 %v3342_v9 }
 0x202   : > { %18872 = vmatpush3.msra.mxu0 %v21295_v43  ;;  %18929 = vmatpush3.msra.mxu1 %v3342_v9 }
 0x203   : > { %18858 = vmatmul.mubr.f32.gmra.mxu1 %v2093_v2  ;;  %18873 = vmatprep.subr.mxu0 %v21301_v0 }
 0x204   : > { %18860 = vmatprep.mubr.f32.mxu1 %v2110_v62  ;;  %18930 = vmatprep.subr.mxu1 %v3341_v36 }
 0x205   : > { %18874 = vmatpush3.msra.mxu0 %v21301_v0  ;;  %18931 = vmatpush3.msra.mxu1 %v3341_v36 }
 0x206   : > { %18875 = vmatprep.subr.mxu0 %v21305_v3  ;;  %18932 = vmatprep.subr.mxu1 %v3340_v29 }
 0x207   : > { %18861 = vmatmul.mubr.f32.gmra.mxu1 %v2127_v12  ;;  %18876 = vmatpush3.msra.mxu0 %v21305_v3  ;;  %v21324_v12 = vld [vmem:[%s26336_s3] ss:$0 sm:$0xff] }
 0x208   : > { %18933 = vmatpush3.msra.mxu1 %v3340_v29  ;;  %18877 = vmatprep.subr.mxu0 %v21309_v41 }
 0x209   : > { %18934 = vmatprep.subr.mxu1 %v3339_v13  ;;  %18878 = vmatpush3.msra.mxu0 %v21309_v41 }
 0x20a   : > { %18935 = vmatpush3.msra.mxu1 %v3339_v13  ;;  %18879 = vmatprep.subr.mxu0 %v21313_v24 }
 0x20b   : > { %18936 = vmatprep.subr.mxu1 %v3338_v17  ;;  %18880 = vmatpush3.msra.mxu0 %v21313_v24 }
 0x20c   : > { %18937 = vmatpush3.msra.mxu1 %v3338_v17  ;;  %18881 = vmatprep.subr.mxu0 %v3540_v32 }
 0x20d   : > { %18938 = vmatprep.subr.mxu1 %v3337_v47  ;;  %18882 = vmatpush3.msra.mxu0 %v3540_v32 }
 0x20e   : > { %18939 = vmatpush3.msra.mxu1 %v3337_v47  ;;  %18883 = vmatprep.subr.mxu0 %v3539_v42 }
 0x20f   : > { %18940 = vmatprep.subr.mxu1 %v3336_v10  ;;  %18884 = vmatpush3.msra.mxu0 %v3539_v42 }
 0x210   : > { %18941 = vmatpush3.msra.mxu1 %v3336_v10  ;;  %18885 = vmatprep.subr.mxu0 %v3538_v27 }
 0x211   : > { %18942 = vmatprep.subr.mxu1 %v3335_v49  ;;  %18886 = vmatpush3.msra.mxu0 %v3538_v27 }
 0x212   : > { %18943 = vmatpush3.msra.mxu1 %v3335_v49  ;;  %18887 = vmatprep.subr.mxu0 %v3537_v19 }
 0x213   : > { %18944 = vmatprep.subr.mxu1 %v3334_v53  ;;  %18888 = vmatpush3.msra.mxu0 %v3537_v19 }
 0x214   : > { %18945 = vmatpush3.msra.mxu1 %v3334_v53  ;;  %18889 = vmatprep.subr.mxu0 %v3536_v21 }
 0x215   : > { %18946 = vmatprep.subr.mxu1 %v3333_v54  ;;  %18890 = vmatpush3.msra.mxu0 %v3536_v21 }
 0x216   : > { %18947 = vmatpush3.msra.mxu1 %v3333_v54  ;;  %18891 = vmatprep.subr.mxu0 %v3535_v30 }
 0x217   : > { %19022 = vmatprep.subr.mxu1 %v21281_v22  ;;  %18892 = vmatpush3.msra.mxu0 %v3535_v30 }
 0x218   : > { %18893 = vmatprep.subr.mxu0 %v3534_v50 }
 0x219   : > { %18894 = vmatpush3.msra.mxu0 %v3534_v50 }
 0x21a   : > { %18969 = vmatprep.subr.mxu0 %v21318_v18 }
 0x24e   : > { %v18791_v16 = vpop.f32.mrf.mxu0 }
 0x250   : > { %v1804_v33 = vpop.f32.mrf.mxu0 }
 0x25f   : > { %v18794_v44 = vpop.f32.mrf.mxu0 }
 0x261   : > { %v1814_v52 = vpop.f32.mrf.mxu0 }
 0x262   : > { %v18738_v46 = vpop.f32.mrf.mxu1 }
 0x263   : > { %v1810_v62 = vadd.f32 %v18791_v16, %v18738_v46 }
 0x264   : > { %v1417_v35 = vpop.f32.mrf.mxu1 }
 0x265   : > { %v1805_v58 = vadd.f32 %v1804_v33, %v1417_v35 }
 0x26a   : > { %v18797_v8 = vpop.f32.mrf.mxu0 }
 0x26c   : > { %v1824_v37 = vpop.f32.mrf.mxu0 }
 0x273   : > { %v18741_v15 = vpop.f32.mrf.mxu1 }
 0x274   : > { %v1820_v28 = vadd.f32 %v18794_v44, %v18741_v15 }
 0x275   : > { %v1427_v63 = vpop.f32.mrf.mxu1 }
 0x276   : > { %v1815_v39 = vadd.f32 %v1814_v52, %v1427_v63 }
 0x27d   : > { %v18800_v56 = vpop.f32.mrf.mxu0 }
 0x27f   : > { %v1834_v45 = vpop.f32.mrf.mxu0 }
 0x280   : > { %v18744_v7 = vpop.f32.mrf.mxu1 }
 0x281   : > { %v1830_v9 = vadd.f32 %v18797_v8, %v18744_v7 }
 0x282   : > { %v1437_v34 = vpop.f32.mrf.mxu1 }
 0x283   : > { %v21327_v13 = vadd.f32 %v1824_v37, %v1437_v34 }
 0x285   : > { %v18803_v6 = vpop.f32.mrf.mxu0 }
 0x287   : > { %v1844_v48 = vpop.f32.mrf.mxu0 }
 0x28f   : > { %v18747_v51 = vpop.f32.mrf.mxu1 }
 0x290   : > { %v18806_v23 = vpop.f32.mrf.mxu0  ;;  %v21329_v17 = vadd.f32 %v18800_v56, %v18747_v51 }
 0x291   : > { %v1447_v5 = vpop.f32.mrf.mxu1 }
 0x292   : > { %v1854_v2 = vpop.f32.mrf.mxu0  ;;  %v21331_v32 = vadd.f32 %v1834_v45, %v1447_v5 }
 0x299   : > { %v18750_v31 = vpop.f32.mrf.mxu1 }
 0x29a   : > { %v21333_v47 = vadd.f32 %v18803_v6, %v18750_v31 }
 0x29b   : > { %v1457_v57 = vpop.f32.mrf.mxu1 }
 0x29c   : > { %v21337_v53 = vadd.f32 %v1844_v48, %v1457_v57 }
 0x29d   : > { %v18809_v40 = vpop.f32.mrf.mxu0 }
 0x29f   : > { %v1864_v54 = vpop.f32.mrf.mxu0 }
 0x2a4   : > { %v18753_v20 = vpop.f32.mrf.mxu1 }
 0x2a5   : > { %v21339_v21 = vadd.f32 %v18806_v23, %v18753_v20 }
 0x2a6   : > { %v1467_v4 = vpop.f32.mrf.mxu1 }
 0x2a7   : > { %v21341_v30 = vadd.f32 %v1854_v2, %v1467_v4 }
 0x2ab   : > { %v18756_v26 = vpop.f32.mrf.mxu1 }
 0x2ac   : > { %v21343_v46 = vadd.f32 %v18809_v40, %v18756_v26 }
 0x2ad   : > { %v1477_v14 = vpop.f32.mrf.mxu1 }
 0x2ae   : > { %v21345_v16 = vadd.f32 %v1864_v54, %v1477_v14 }
 0x2af   : > { %v18844_v61 = vpop.f32.mrf.mxu1 }
 0x2b0   : > { %v2278_v55 = vadd.f32 %v18844_v61, %v1810_v62 }
 0x2b1   : > { %v2208_v11 = vpop.f32.mrf.mxu1 }
 0x2b2   : > { %v2299_v36 = vadd.f32 %v21324_v12, %v2278_v55  ;;  %v2277_v29 = vadd.f32 %v2208_v11, %v1805_v58 }
 0x2b3   : > { %v18847_v42 = vpop.f32.mrf.mxu1 }
 0x2b4   : > { %v2343_v10 = vcombine.high %v2299_v36, %v2299_v36  ;;  %v2350_v27 = vrot.slane %v2299_v36, %v20561_v25  ;;  %v2298_v49 = vadd.f32 %v21324_v12, %v2277_v29  ;;  %v2280_v19 = vadd.f32 %v18847_v42, %v1820_v28 }
 0x2b5   : > { %v2218_v50 = vpop.f32.mrf.mxu1 }
 0x2b6   : > { %v2357_v35 = vrot.slane %v2343_v10, %v20561_v25  ;;  %v2358_v33 = vcombine.high %v2350_v27, %v2350_v27  ;;  %v2326_v15 = vcombine.high %v2298_v49, %v2298_v49  ;;  %v2624_v44 = vmax.f32 %v2350_v27, 0.0 }
 0x2b7   : > { %v2333_v63 = vrot.slane %v2298_v49, %v20561_v25  ;;  %v2301_v52 = vadd.f32 %v21324_v12, %v2280_v19  ;;  %v2279_v7 = vadd.f32 %v2218_v50, %v1815_v39  ;;  %v18850_v8 = vpop.f32.mrf.mxu1 }
 0x2b8   : > { %v2359_v34 = vcombine.high %v2357_v35, %v2357_v35  ;;  %v2625_v51 = vmax.f32 %v2358_v33, 0.0  ;;  %v2626_v37 = vmax.f32 %v2357_v35, 0.0  ;;  %v2340_v56 = vrot.slane %v2326_v15, %v20561_v25 }
 0x2b9   : > { %v2341_v5 = vcombine.high %v2333_v63, %v2333_v63  ;;  %v2620_v45 = vmax.f32 %v2333_v63, 0.0  ;;  %v2377_v31 = vcombine.high %v2301_v52, %v2301_v52  ;;  %v2384_v6 = vrot.slane %v2301_v52, %v20561_v25  ;;  %v2228_v57 = vpop.f32.mrf.mxu1 }
 0x2ba   : > { %v2627_v48 = vmax.f32 %v2359_v34, 0.0  ;;  %v2749_v20 = vcombine.low %v2624_v44, %v2625_v51  ;;  %v2763_v4 = vrot.slane %v2626_v37, %v20561_v25  ;;  %v2342_v23 = vcombine.high %v2340_v56, %v2340_v56 }
 0x2bb   : > { %v2621_v26 = vmax.f32 %v2341_v5, 0.0  ;;  %v2622_v2 = vmax.f32 %v2340_v56, 0.0  ;;  %v2391_v14 = vrot.slane %v2377_v31, %v20561_v25  ;;  %v2392_v62 = vcombine.high %v2384_v6, %v2384_v6  ;;  %v21356_v40 = vpop.f32.mrf.mxu1 }
 0x2bc   : > { %v2756_v61 = vrot.slane %v2749_v20, %v20561_v25  ;;  %v2623_v58 = vmax.f32 %v2342_v23, 0.0  ;;  %v2632_v55 = vmax.f32 %v2384_v6, 0.0  ;;  %v2300_v28 = vadd.f32 %v21324_v12, %v2279_v7 }
 0x2bd   : > { %v2732_v11 = vcombine.low %v2620_v45, %v2621_v26  ;;  %v2393_v39 = vcombine.high %v2391_v14, %v2391_v14  ;;  %v2633_v36 = vmax.f32 %v2392_v62, 0.0  ;;  %v2634_v29 = vmax.f32 %v2391_v14, 0.0  ;;  %v2238_v52 = vpop.f32.mrf.mxu1 }
 0x2be   : > { %v2764_v42 = vcombine.low %v2756_v61, %v2763_v4  ;;  %v2733_v10 = vcombine.low %v2622_v2, %v2623_v58  ;;  %v2360_v27 = vcombine.high %v2300_v28, %v2300_v28  ;;  %v2367_v49 = vrot.slane %v2300_v28, %v20561_v25 }
 0x2bf   : > { %v2740_v19 = vrot.slane %v2732_v11, %v20561_v25  ;;  %v2635_v54 = vmax.f32 %v2393_v39, 0.0  ;;  %v2796_v50 = vrot.slane %v2633_v36, %v20561_v25  ;;  %v2282_v35 = vadd.f32 %v18850_v8, %v1830_v9  ;;  %v18856_v14 = vpop.f32.mrf.mxu1 }
 0x2c0   : > { %v2997_v33 = vrot.slane %v2764_v42, 7  ;;  %v2747_v15 = vrot.slane %v2733_v10, %v20561_v25  ;;  %v2374_v44 = vrot.slane %v2360_v27, %v20561_v25  ;;  %v2375_v63 = vcombine.high %v2367_v49, %v2367_v49 }
 0x2c1   : > { %v21363_v7 = vcombine.low %v2634_v29, %v2635_v54  ;;  %v2628_v34 = vmax.f32 %v2367_v49, 0.0  ;;  %v2303_v51 = vadd.f32 %v21324_v12, %v2282_v35  ;;  %v2281_v37 = vadd.f32 %v2228_v57, %v21327_v13  ;;  %v2248_v54 = vpop.f32.mrf.mxu1 }
 0x2c2   : > { %v21367_v56 = vcombine.low %v2740_v19, %v2747_v15  ;;  %v2376_v5 = vcombine.high %v2374_v44, %v2374_v44  ;;  %v2629_v45 = vmax.f32 %v2375_v63, 0.0  ;;  %v2630_v31 = vmax.f32 %v2374_v44, 0.0 }
 0x2c3   : > { %v2806_v9 = vrot.slane %v21363_v7, %v20561_v25  ;;  %v2765_v8 = vcombine.low %v2627_v48, %v2628_v34  ;;  %v2411_v6 = vcombine.high %v2303_v51, %v2303_v51  ;;  %v2418_v20 = vrot.slane %v2303_v51, %v20561_v25 }
 0x2c4   : > { %v2996_v4 = vrot.slane %v21367_v56, 7  ;;  %v2631_v23 = vmax.f32 %v2376_v5, 0.0  ;;  %v2766_v26 = vcombine.low %v2629_v45, %v2630_v31  ;;  %v2302_v2 = vadd.f32 %v21324_v12, %v2281_v37 }
 0x2c5   : > { %v2773_v13 = vrot.slane %v2765_v8, %v20561_v25  ;;  %v2425_v57 = vrot.slane %v2411_v6, %v20561_v25  ;;  %v2426_v62 = vcombine.high %v2418_v20, %v2418_v20  ;;  %v2640_v61 = vmax.f32 %v2418_v20, 0.0 }
 0x2c6   : > { %v2998_v48 = vsel %vm899_vm0, %v2996_v4, %v2997_v33  ;;  %v2780_v58 = vrot.slane %v2766_v26, %v20561_v25  ;;  %v2782_v28 = vcombine.low %v2631_v23, %v2632_v55  ;;  %v2394_v11 = vcombine.high %v2302_v2, %v2302_v2  ;;  %v18859_v23 = vpop.f32.mrf.mxu1 }
 0x2c7   : > { %v3045_v39 = vsel %vm3044_vm7, %v2998_v48, 0.0  ;;  %v2427_v36 = vcombine.high %v2425_v57, %v2425_v57  ;;  %v2641_v29 = vmax.f32 %v2426_v62, 0.0  ;;  %v2642_v42 = vmax.f32 %v2425_v57, 0.0 }
 0x2c8   : > { %v3086_v10 = vcombine.high %v3045_v39, %v3045_v39  ;;  %v21382_v27 = vrot.slane %v3045_v39, %v20561_v25  ;;  %v21384_v49 = vcombine.low %v2773_v13, %v2780_v58  ;;  %v2789_v19 = vrot.slane %v2782_v28, %v20561_v25 }
 0x2c9   : > { %v2643_v35 = vmax.f32 %v2427_v36, 0.0  ;;  %v2829_v33 = vrot.slane %v2640_v61, %v20561_v25  ;;  %v21388_v15 = vcombine.low %v2641_v29, %v2642_v42  ;;  %v2401_v55 = vrot.slane %v2302_v2, %v20561_v25 }
 0x2ca   : > { %v21392_v44 = vrot.slane %v3086_v10, %v20561_v25  ;;  %v21394_v63 = vcombine.low %v2789_v19, %v2796_v50  ;;  %v2999_v34 = vrot.slane %v21384_v49, 7  ;;  %v2408_v51 = vrot.slane %v2394_v11, %v20561_v25 }
 0x2cb   : > { %v2839_v37 = vrot.slane %v21388_v15, %v20561_v25  ;;  %v2409_v5 = vcombine.high %v2401_v55, %v2401_v55  ;;  %v2636_v45 = vmax.f32 %v2401_v55, 0.0  ;;  %v2284_v31 = vadd.f32 %v21356_v40, %v21329_v17 }
 0x2cc   : > { %v3000_v8 = vrot.slane %v21394_v63, 7  ;;  %v21406_v6 = vsel %vm899_vm0, 0.0, %v2999_v34  ;;  %v2410_v50 = vcombine.high %v2408_v51, %v2408_v51  ;;  %v2638_v20 = vmax.f32 %v2408_v51, 0.0 }
 0x2cd   : > { %v3102_v26 = vcombine.high %v21406_v6, %v21406_v6  ;;  %v21412_v2 = vrot.slane %v21406_v6, %v20561_v25  ;;  %v2637_v13 = vmax.f32 %v2409_v5, 0.0  ;;  %v2305_v17 = vadd.f32 %v21324_v12, %v2284_v31 }
 0x2ce   : > { %v2639_v40 = vmax.f32 %v2410_v50, 0.0  ;;  %v2283_v57 = vadd.f32 %v2238_v52, %v21331_v32  ;;  %v2286_v62 = vadd.f32 %v18856_v14, %v21333_v47  ;;  %v2285_v61 = vadd.f32 %v2248_v54, %v21337_v53 }
 0x2cf   : > { %v2799_v48 = vcombine.low %v2636_v45, %v2637_v13  ;;  %v2445_v58 = vcombine.high %v2305_v17, %v2305_v17  ;;  %v2452_v28 = vrot.slane %v2305_v17, %v20561_v25  ;;  %v2288_v11 = vadd.f32 %v18859_v23, %v21339_v21 }
 0x2d0   : > { %v2815_v39 = vcombine.low %v2638_v20, %v2639_v40  ;;  %v2304_v36 = vadd.f32 %v21324_v12, %v2283_v57  ;;  %v2307_v29 = vadd.f32 %v21324_v12, %v2286_v62  ;;  %v2306_v42 = vadd.f32 %v21324_v12, %v2285_v61 }
 0x2d1   : > { %v2813_v10 = vrot.slane %v2799_v48, %v20561_v25  ;;  %v2459_v32 = vrot.slane %v2445_v58, %v20561_v25  ;;  %v2460_v47 = vcombine.high %v2452_v28, %v2452_v28  ;;  %v2648_v52 = vmax.f32 %v2452_v28, 0.0  ;;  %v2258_v28 = vpop.f32.mrf.mxu1 }
 0x2d2   : > { %v2822_v53 = vrot.slane %v2815_v39, %v20561_v25  ;;  %v2428_v14 = vcombine.high %v2304_v36, %v2304_v36  ;;  %v2435_v19 = vrot.slane %v2304_v36, %v20561_v25  ;;  %v2479_v54 = vcombine.high %v2307_v29, %v2307_v29 }
 0x2d3   : > { %v21430_v21 = vcombine.low %v2806_v9, %v2813_v10  ;;  %v2461_v55 = vcombine.high %v2459_v32, %v2459_v32  ;;  %v2649_v51 = vmax.f32 %v2460_v47, 0.0  ;;  %v2650_v5 = vmax.f32 %v2459_v32, 0.0 }
 0x2d4   : > { %v21432_v45 = vcombine.low %v2822_v53, %v2829_v33  ;;  %v2442_v31 = vrot.slane %v2428_v14, %v20561_v25  ;;  %v2443_v50 = vcombine.high %v2435_v19, %v2435_v19  ;;  %v2644_v20 = vmax.f32 %v2435_v19, 0.0 }
 0x2d5   : > { %v3002_v23 = vrot.slane %v21430_v21, 7  ;;  %v2651_v13 = vmax.f32 %v2461_v55, 0.0  ;;  %v2864_v17 = vcombine.low %v2648_v52, %v2649_v51  ;;  %v2486_v40 = vrot.slane %v2307_v29, %v20561_v25 }
 0x2d6   : > { %v3003_v57 = vrot.slane %v21432_v45, 7  ;;  %v2444_v7 = vcombine.high %v2442_v31, %v2442_v31  ;;  %v2645_v9 = vmax.f32 %v2443_v50, 0.0  ;;  %v2646_v62 = vmax.f32 %v2442_v31, 0.0  ;;  %v18862_v50 = vpop.f32.mrf.mxu1 }
 0x2d7   : > { %v2865_v61 = vcombine.low %v2650_v5, %v2651_v13  ;;  %v2872_v48 = vrot.slane %v2864_v17, %v20561_v25  ;;  %v2832_v33 = vcombine.low %v2643_v35, %v2644_v20  ;;  %v2493_v58 = vrot.slane %v2479_v54, %v20561_v25 }
 0x2d8   : > { %v2647_v39 = vmax.f32 %v2444_v7, 0.0  ;;  %v2848_v36 = vcombine.low %v2645_v9, %v2646_v62  ;;  %v2494_v10 = vcombine.high %v2486_v40, %v2486_v40  ;;  %v2656_v32 = vmax.f32 %v2486_v40, 0.0 }
 0x2d9   : > { %v2879_v47 = vrot.slane %v2865_v61, %v20561_v25  ;;  %v2846_v29 = vrot.slane %v2832_v33, %v20561_v25  ;;  %v2495_v52 = vcombine.high %v2493_v58, %v2493_v58  ;;  %v2658_v53 = vmax.f32 %v2493_v58, 0.0 }
 0x2da   : > { %v2855_v14 = vrot.slane %v2848_v36, %v20561_v25  ;;  %v2862_v19 = vrot.slane %v2647_v39, %v20561_v25  ;;  %v2657_v55 = vmax.f32 %v2494_v10, 0.0  ;;  %v2462_v51 = vcombine.high %v2306_v42, %v2306_v42  ;;  %v2268_v36 = vpop.f32.mrf.mxu1 }
 0x2db   : > { %v21444_v35 = vcombine.low %v2872_v48, %v2879_v47  ;;  %v21449_v54 = vcombine.low %v2839_v37, %v2846_v29  ;;  %v2659_v5 = vmax.f32 %v2495_v52, 0.0  ;;  %v2469_v31 = vrot.slane %v2306_v42, %v20561_v25 }
 0x2dc   : > { %v21452_v20 = vcombine.low %v2855_v14, %v2862_v19  ;;  %v2898_v13 = vcombine.low %v2657_v55, %v2658_v53  ;;  %v2476_v17 = vrot.slane %v2462_v51, %v20561_v25  ;;  %v2309_v40 = vadd.f32 %v21324_v12, %v2288_v11 }
 0x2dd   : > { %v26370_v9 = vrot.slane %v21449_v54, 7  ;;  %v2477_v62 = vcombine.high %v2469_v31, %v2469_v31  ;;  %v2652_v61 = vmax.f32 %v2469_v31, 0.0  ;;  %v2287_v52 = vadd.f32 %v2258_v28, %v21341_v30 }
 0x2de   : > { %v3006_v15 = vrot.slane %v21452_v20, 7  ;;  %v2912_v37 = vrot.slane %v2898_v13, %v20561_v25  ;;  %v2478_v48 = vcombine.high %v2476_v17, %v2476_v17  ;;  %v2654_v42 = vmax.f32 %v2476_v17, 0.0 }
 0x2df   : > { %v21463_v33 = vsel %vm899_vm0, 0.0, %v26370_v9  ;;  %v2653_v58 = vmax.f32 %v2477_v62, 0.0  ;;  %v2513_v39 = vcombine.high %v2309_v40, %v2309_v40  ;;  %v2520_v11 = vrot.slane %v2309_v40, %v20561_v25 }
 0x2e0   : > { %v3168_v10 = vcombine.high %v21463_v33, %v21463_v33  ;;  %v2655_v47 = vmax.f32 %v2478_v48, 0.0  ;;  %v2895_v29 = vrot.slane %v2654_v42, %v20561_v25  ;;  %v2308_v31 = vadd.f32 %v21324_v12, %v2287_v52 }
 0x2e1   : > { %v2881_v53 = vcombine.low %v2652_v61, %v2653_v58  ;;  %v2527_v14 = vrot.slane %v2513_v39, %v20561_v25  ;;  %v2528_v19 = vcombine.high %v2520_v11, %v2520_v11  ;;  %v2664_v55 = vmax.f32 %v2520_v11, 0.0 }
 0x2e2   : > { %v2897_v51 = vcombine.low %v2655_v47, %v2656_v32  ;;  %v2290_v13 = vadd.f32 %v18862_v50, %v21343_v46  ;;  %v2289_v17 = vadd.f32 %v2268_v36, %v21345_v16  ;;  %v2496_v30 = vcombine.high %v2308_v31, %v2308_v31 }
 0x2e3   : > { %v2888_v40 = vrot.slane %v2881_v53, %v20561_v25  ;;  %v2529_v62 = vcombine.high %v2527_v14, %v2527_v14  ;;  %v2665_v48 = vmax.f32 %v2528_v19, 0.0  ;;  %v2666_v7 = vmax.f32 %v2527_v14, 0.0 }
 0x2e4   : > { %v2905_v42 = vrot.slane %v2897_v51, %v20561_v25  ;;  %v2503_v28 = vrot.slane %v2308_v31, %v20561_v25  ;;  %v2311_v61 = vadd.f32 %v21324_v12, %v2290_v13  ;;  %v2310_v46 = vadd.f32 %v21324_v12, %v2289_v17 }
 0x2e5   : > { %v21478_v58 = vcombine.low %v2888_v40, %v2895_v29  ;;  %v2667_v32 = vmax.f32 %v2529_v62, 0.0  ;;  %v2931_v39 = vcombine.low %v2664_v55, %v2665_v48  ;;  %v2510_v16 = vrot.slane %v2496_v30, %v20561_v25 }
 0x2e6   : > { %v21481_v50 = vcombine.low %v2905_v42, %v2912_v37  ;;  %v2511_v11 = vcombine.high %v2503_v28, %v2503_v28  ;;  %v2660_v36 = vmax.f32 %v2503_v28, 0.0  ;;  %v2547_v14 = vcombine.high %v2311_v61, %v2311_v61 }
 0x2e7   : > { %v2945_v52 = vrot.slane %v2931_v39, %v20561_v25  ;;  %v2947_v53 = vcombine.low %v2666_v7, %v2667_v32  ;;  %v2512_v29 = vcombine.high %v2510_v16, %v2510_v16  ;;  %v2662_v31 = vmax.f32 %v2510_v16, 0.0 }
 0x2e8   : > { %v26373_v19 = vrot.slane %v21481_v50, 7  ;;  %v2661_v51 = vmax.f32 %v2511_v11, 0.0  ;;  %v2914_v55 = vcombine.low %v2659_v5, %v2660_v36  ;;  %v2554_v12 = vrot.slane %v2311_v61, %v20561_v25 }
 0x2e9   : > { %v2561_v37 = vrot.slane %v2547_v14, %v20561_v25  ;;  %v2530_v13 = vcombine.high %v2310_v46, %v2310_v46  ;;  %v2663_v17 = vmax.f32 %v2512_v29, 0.0  ;;  %v2537_v62 = vrot.slane %v2310_v46, %v20561_v25 }
 0x2ea   : > { %v2928_v40 = vrot.slane %v2661_v51, %v20561_v25  ;;  %v2954_v48 = vrot.slane %v2947_v53, %v20561_v25  ;;  %v2921_v7 = vrot.slane %v2914_v55, %v20561_v25  ;;  %v2562_v42 = vcombine.high %v2554_v12, %v2554_v12 }
 0x2eb   : > { %v2563_v30 = vcombine.high %v2561_v37, %v2561_v37  ;;  %v2672_v28 = vmax.f32 %v2554_v12, 0.0  ;;  %v2930_v32 = vcombine.low %v2662_v31, %v2663_v17  ;;  %v2674_v39 = vmax.f32 %v2561_v37, 0.0 }
 0x2ec   : > { %v2544_v5 = vrot.slane %v2530_v13, %v20561_v25  ;;  %v2545_v61 = vcombine.high %v2537_v62, %v2537_v62  ;;  %v2929_v16 = vcombine.low %v2921_v7, %v2928_v40  ;;  %v2673_v11 = vmax.f32 %v2562_v42, 0.0 }
 0x2ed   : > { %v2675_v36 = vmax.f32 %v2563_v30, 0.0  ;;  %v2668_v14 = vmax.f32 %v2537_v62, 0.0  ;;  %v2938_v29 = vrot.slane %v2930_v32, %v20561_v25  ;;  %v3036_v17 = vsel %vm899_vm0, 0.0, %v2996_v4 }
 0x2ee   : > { %v2546_v51 = vcombine.high %v2544_v5, %v2544_v5  ;;  %v2669_v46 = vmax.f32 %v2545_v61, 0.0  ;;  %v2670_v47 = vmax.f32 %v2544_v5, 0.0  ;;  %v3012_v53 = vrot.slane %v2929_v16, 7 }
 0x2ef   : > { %v2980_v9 = vcombine.low %v2673_v11, %v2674_v39  ;;  %v2994_v55 = vrot.slane %v2675_v36, %v20561_v25  ;;  %v2961_v12 = vrot.slane %v2668_v14, %v20561_v25  ;;  %v21497_v31 = vcombine.low %v2938_v29, %v2945_v52 }
 0x2f0   : > { %v2671_v37 = vmax.f32 %v2546_v51, 0.0  ;;  %v2963_v13 = vcombine.low %v2669_v46, %v2670_v47  ;;  %v21505_v40 = vsel %vm899_vm0, %v26373_v19, %v3012_v53  ;;  %v3069_v42 = vcombine.high %v3036_v17, %v3036_v17 }
 0x2f1   : > { %v2987_v62 = vrot.slane %v2980_v9, %v20561_v25  ;;  %v2962_v7 = vcombine.low %v2954_v48, %v2961_v12  ;;  %v26372_v30 = vrot.slane %v21497_v31, 7  ;;  %v3076_v47 = vrot.slane %v3036_v17, %v20561_v25 }
 0x2f2   : > { %v2964_v32 = vcombine.low %v2671_v37, %v2672_v28  ;;  %v2971_v52 = vrot.slane %v2963_v13, %v20561_v25  ;;  %v21514_v4 = vrot.slane %v3069_v42, %v20561_v25  ;;  %v21518_v5 = vcombine.high %v21382_v27, %v21382_v27 }
 0x2f3   : > { %v21511_v39 = vcombine.low %v2987_v62, %v2994_v55  ;;  %v3015_v56 = vrot.slane %v2962_v7, 7  ;;  %v21521_v48 = vcombine.high %v3076_v47, %v3076_v47  ;;  %v3955_v28 = vcombine.low %v21392_v44, %v21412_v2 }
 0x2f4   : > { %v2978_v9 = vrot.slane %v2964_v32, %v20561_v25  ;;  %v3001_v61 = vsel %vm899_vm0, %v2999_v34, %v3000_v8  ;;  %v21536_v36 = vcombine.high %v21514_v4, %v21514_v4  ;;  %v3954_v14 = vcombine.low %v21382_v27, %v21518_v5 }
 0x2f5   : > { %v3016_v11 = vsel %vm899_vm0, %v26372_v30, %v3015_v56  ;;  %v3937_v49 = vcombine.low %v3076_v47, %v21521_v48  ;;  %v3969_v34 = vrot.slane %v3955_v28, %v20561_v25  ;;  %v3046_v53 = vsel %vm3044_vm7, %v3001_v61, 0.0 }
 0x2f6   : > { %v21540_v29 = vcombine.low %v2971_v52, %v2978_v9  ;;  %v21543_v63 = vsel %vm3044_vm7, %v3016_v11, 0.0  ;;  %v3938_v51 = vcombine.low %v21514_v4, %v21536_v36  ;;  %v3962_v46 = vrot.slane %v3954_v14, %v20561_v25 }
 0x2f7   : > { %v3284_v8 = vcombine.high %v21543_v63, %v21543_v63  ;;  %v3945_v12 = vrot.slane %v3937_v49, %v20561_v25  ;;  %v21559_v37 = vrot.slane %v3102_v26, %v20561_v25  ;;  %v3117_v13 = vcombine.high %v21412_v2, %v21412_v2 }
 0x2f8   : > { %v26371_v55 = vrot.slane %v21540_v29, 7  ;;  %v3952_v62 = vrot.slane %v3938_v51, %v20561_v25  ;;  %v3970_v7 = vcombine.low %v3962_v46, %v3969_v34  ;;  %v21568_v42 = vrot.slane %v3046_v53, %v20561_v25 }
 0x2f9   : > { %v21564_v17 = vrot.slane %v3284_v8, %v20561_v25  ;;  %v21577_v6 = vcombine.high %v21559_v37, %v21559_v37  ;;  %v17887_v26 = vrot.slane %v21412_v2, 9  ;;  %v3381_v52 = vrot.slane %v3117_v13, 7 }
 0x2fa   : > { %v21573_v32 = vsel %vm899_vm0, 0.0, %v26371_v55  ;;  %v3953_v9 = vcombine.low %v3945_v12, %v3952_v62  ;;  %v3971_v28 = vcombine.low %v3117_v13, %v21559_v37  ;;  %v17886_v61 = vrot.slane %v3076_v47, 9 }
 0x2fb   : > { %26510 = vst [vmem:[#allocation13_spill] sm:$0xff] %v21564_v17  ;;  %v3382_v11 = vsel %vm20749_vm6, %v17887_v26, %v3381_v52  ;;  %v3972_v14 = vcombine.low %v21577_v6, %v21568_v42  ;;  %v3359_v49 = vrot.slane %v21521_v48, 7  ;;  %v3362_v34 = vrot.slane %v21514_v4, 7 }
 0x2fc   : > { %18948 = vmatprep.mubr.f32.mxu1 %v3953_v9  ;;  %v3979_v8 = vrot.slane %v3971_v28, %v20561_v25  ;;  %v3365_v51 = vrot.slane %v21536_v36, 7  ;;  %v3368_v46 = vrot.slane %v21382_v27, 7  ;;  %v21595_v47 = vsel %vm899_vm0, 0.0, %v3002_v23 }
 0x2fd   : > { %18949 = vmatmul.mubr.f32.vlgmr.msra.gmra.mxu1 %v3970_v7  ;;  %v3986_v12 = vrot.slane %v3972_v14, %v20561_v25  ;;  %v3360_v13 = vsel %vm20749_vm6, %v17886_v61, %v3359_v49  ;;  %v3361_v62 = vrot.slane %v3359_v49, 2  ;;  %v3364_v26 = vrot.slane %v3362_v34, 2 }
 0x2fe   : > { %v3367_v9 = vrot.slane %v3365_v51, 2  ;;  %v3370_v55 = vrot.slane %v3368_v46, 2  ;;  %v3119_v28 = vcombine.high %v3046_v53, %v3046_v53  ;;  %v21602_v16 = vcombine.high %v21568_v42, %v21568_v42  ;;  %19023 = vmatpush3.msra.mxu1 %v21281_v22 }
 0x2ff   : > { %v3987_v56 = vcombine.low %v3979_v8, %v3986_v12  ;;  %v3363_v7 = vsel %vm20749_vm6, %v3361_v62, %v3362_v34  ;;  %v3366_v14 = vsel %vm20749_vm6, %v3364_v26, %v3365_v51  ;;  %v3135_v61 = vcombine.high %v21595_v47, %v21595_v47  ;;  %19024 = vmatprep.subr.mxu1 %v21285_v1 }
 0x300   : > { %v3369_v53 = vsel %vm20749_vm6, %v3367_v9, %v3368_v46  ;;  %v3550_v49 = vcombine.low %v3360_v13, %v3363_v7  ;;  %v21615_v30 = vrot.slane %v3119_v28, %v20561_v25  ;;  %v21619_v22 = vrot.slane %v21595_v47, %v20561_v25  ;;  %19025 = vmatpush3.msra.mxu1 %v21285_v1 }
 0x301   : > { %18951 = vmatprep.mubr.f32.mxu1 %v3987_v56  ;;  %v3551_v34 = vcombine.low %v3366_v14, %v3369_v53  ;;  %v3349_v8 = vcombine.high %v21392_v44, %v21392_v44  ;;  %v3371_v51 = vrot.slane %v21518_v5, 7  ;;  %v3374_v12 = vrot.slane %v21392_v44, 7  ;;  %19026 = vmatprep.subr.mxu1 %v21289_v59 }
 0x302   : > { %v3558_v46 = vrot.slane %v3550_v49, %v20561_v25  ;;  %v21630_v13 = vcombine.high %v21619_v22, %v21619_v22  ;;  %v3988_v1 = vcombine.low %v21602_v16, %v21615_v30  ;;  %v3383_v56 = vrot.slane %v3381_v52, 2  ;;  %19027 = vmatpush3.msra.mxu1 %v21289_v59 }
 0x303   : > { %v3565_v47 = vrot.slane %v3551_v34, %v20561_v25  ;;  %v3372_v62 = vsel %vm20749_vm6, %v3370_v55, %v3371_v51  ;;  %v3373_v26 = vrot.slane %v3371_v51, 2  ;;  %v3376_v9 = vrot.slane %v3374_v12, 2  ;;  %19028 = vmatprep.subr.mxu1 %v21293_v38 }
 0x304   : > { %v3989_v28 = vcombine.low %v21619_v22, %v21630_v13  ;;  %v3996_v7 = vrot.slane %v3988_v1, %v20561_v25  ;;  %v3377_v14 = vrot.slane %v3349_v8, 7  ;;  %v3384_v53 = vrot.slane %v21559_v37, 7  ;;  %19029 = vmatpush3.msra.mxu1 %v21293_v38 }
 0x305   : > { %v3566_v59 = vcombine.low %v3558_v46, %v3565_v47  ;;  %v3375_v52 = vsel %vm20749_vm6, %v3373_v26, %v3374_v12  ;;  %v3387_v55 = vrot.slane %v21577_v6, 7  ;;  %v3390_v49 = vrot.slane %v21568_v42, 7  ;;  %19030 = vmatprep.subr.mxu1 %v21295_v43 }
 0x306   : > { %v4003_v34 = vrot.slane %v3989_v28, %v20561_v25  ;;  %v3378_v51 = vsel %vm20749_vm6, %v3376_v9, %v3377_v14  ;;  %v3567_v8 = vcombine.low %v3372_v62, %v3375_v52  ;;  %v3385_v1 = vsel %vm20749_vm6, %v3383_v56, %v3384_v53  ;;  %19031 = vmatpush3.msra.mxu1 %v21295_v43 }
 0x307   : > { %18895 = vmatprep.mubr.f32.mxu0 %v3566_v59  ;;  %v3568_v38 = vcombine.low %v3378_v51, %v3382_v11  ;;  %v3386_v12 = vrot.slane %v3384_v53, 2  ;;  %v3389_v46 = vrot.slane %v3387_v55, 2  ;;  %v3392_v47 = vrot.slane %v3390_v49, 2  ;;  %19032 = vmatprep.subr.mxu1 %v21301_v0 }
 0x308   : > { %v4004_v26 = vcombine.low %v3996_v7, %v4003_v34  ;;  %v3575_v19 = vrot.slane %v3567_v8, %v20561_v25  ;;  %v3393_v28 = vrot.slane %v21602_v16, 7  ;;  %v3004_v56 = vsel %vm899_vm0, %v3002_v23, %v3003_v57  ;;  %19033 = vmatpush3.msra.mxu1 %v21301_v0  ;;  %v4338_v8 = vld [vmem:[#allocation6 + $0x168] sm:$0xff] }
 0x309   : > { %v3582_v43 = vrot.slane %v3568_v38, %v20561_v25  ;;  %v3388_v11 = vsel %vm20749_vm6, %v3386_v12, %v3387_v55  ;;  %v3391_v62 = vsel %vm20749_vm6, %v3389_v46, %v3390_v49  ;;  %v3047_v9 = vsel %vm3044_vm7, %v3004_v56, 0.0  ;;  %19034 = vmatprep.subr.mxu1 %v21305_v3 }
 0x30a   : > { %18952 = vmatmul.mubr.f32.gmra.mxu1 %v4004_v26  ;;  %v3394_v21 = vsel %vm20749_vm6, %v3392_v47, %v3393_v28  ;;  %v3584_v45 = vcombine.low %v3385_v1, %v3388_v11  ;;  %v21674_v23 = vrot.slane %v3135_v61, %v20561_v25  ;;  %v3152_v0 = vcombine.high %v3047_v9, %v3047_v9 }
 0x30b   : > { %v3583_v57 = vcombine.low %v3575_v19, %v3582_v43  ;;  %v3585_v7 = vcombine.low %v3391_v62, %v3394_v21  ;;  %v21677_v14 = vrot.slane %v3047_v9, %v20561_v25  ;;  %v21681_v53 = vrot.slane %v21463_v33, %v20561_v25  ;;  %19035 = vmatpush3.msra.mxu1 %v21305_v3  ;;  %v4339_v19 = vld [vmem:[#allocation6 + $0x170] sm:$0xff]  ;;  %v4337_v43 = vld [vmem:[#allocation6 + $0x160] sm:$0xff] }
 0x30c   : > { %v3592_v59 = vrot.slane %v3584_v45, %v20561_v25  ;;  %v21687_v52 = vcombine.high %v21674_v23, %v21674_v23  ;;  %v21690_v61 = vrot.slane %v3152_v0, %v20561_v25  ;;  %v21696_v55 = vrot.slane %v3168_v10, %v20561_v25  ;;  %19036 = vmatprep.subr.mxu1 %v21309_v41 }
 0x30d   : > { %18896 = vmatmul.mubr.f32.vlgmr.msra.gmra.mxu0 %v3583_v57  ;;  %v3599_v3 = vrot.slane %v3585_v7, %v20561_v25  ;;  %v21702_v49 = vcombine.high %v21677_v14, %v21677_v14  ;;  %v21706_v34 = vcombine.high %v21681_v53, %v21681_v53  ;;  %v21710_v51 = vcombine.high %v21615_v30, %v21615_v30 }
 0x30e   : > { %18970 = vmatpush3.msra.mxu0 %v21318_v18  ;;  %v4005_v33 = vcombine.low %v21674_v23, %v21687_v52  ;;  %v4022_v10 = vcombine.low %v21690_v61, %v21681_v53  ;;  %v3395_v1 = vrot.slane %v3393_v28, 2  ;;  %v3396_v38 = vrot.slane %v21615_v30, 7  ;;  %19037 = vmatpush3.msra.mxu1 %v21309_v41 }
 0x30f   : > { %v3600_v12 = vcombine.low %v3592_v59, %v3599_v3  ;;  %v4006_v46 = vcombine.low %v21677_v14, %v21702_v49  ;;  %18971 = vmatprep.subr.mxu0 %v4339_v19  ;;  %v3425_v47 = vrot.slane %v21706_v34, 7  ;;  %v4023_v18 = vcombine.low %v21706_v34, %v21696_v55  ;;  %19038 = vmatprep.subr.mxu1 %v21313_v24  ;;  %v4336_v59 = vld [vmem:[#allocation6 + $0x158] sm:$0xff] }
 0x310   : > { %v4013_v26 = vrot.slane %v4005_v33, %v20561_v25  ;;  %18972 = vmatpush3.msra.mxu0 %v4339_v19  ;;  %v4030_v28 = vrot.slane %v4022_v10, %v20561_v25  ;;  %v3397_v41 = vsel %vm20749_vm6, %v3395_v1, %v3396_v38  ;;  %v3398_v56 = vrot.slane %v3396_v38, 2  ;;  %19039 = vmatpush3.msra.mxu1 %v21313_v24  ;;  %v20060_v19 = vld [vmem:[#allocation6 + $0xb0] sm:$0xff]  ;;  %v20061_v38 = vld [vmem:[#allocation6 + $0xa8] sm:$0xff] }
 0x311   : > { %18898 = vmatprep.mubr.f32.mxu0 %v3600_v12  ;;  %v4020_v11 = vrot.slane %v4006_v46, %v20561_v25  ;;  %v4037_v62 = vrot.slane %v4023_v18, %v20561_v25  ;;  %18973 = vmatprep.subr.mxu0 %v4338_v8  ;;  %v3399_v9 = vrot.slane %v21710_v51, 7  ;;  %v17888_v21 = vrot.slane %v21619_v22, 9 }
 0x312   : > { %v3403_v45 = vrot.slane %v21630_v13, 7  ;;  %v3406_v0 = vrot.slane %v21674_v23, 7  ;;  %v26511_v57 = vrot.slane %v21449_v54, 7  ;;  %v21743_v7 = vcombine.high %v21696_v55, %v21696_v55  ;;  %18974 = vmatpush3.msra.mxu0 %v4338_v8  ;;  %19040 = vmatprep.subr.mxu1 %v20060_v19  ;;  %v4335_v8 = vld [vmem:[#allocation6 + $0x150] sm:$0xff] }
 0x313   : > { %v4021_v3 = vcombine.low %v4013_v26, %v4020_v11  ;;  %v4038_v22 = vcombine.low %v4030_v28, %v4037_v62  ;;  %v3400_v33 = vsel %vm20749_vm6, %v3398_v56, %v3399_v9  ;;  %18975 = vmatprep.subr.mxu0 %v4337_v43  ;;  %19041 = vmatpush3.msra.mxu1 %v20060_v19  ;;  %v3409_v18 = vrot.slane %v21687_v52, 7  ;;  %v4334_v11 = vld [vmem:[#allocation6 + $0x148] sm:$0xff] }
 0x314   : > { %v3007_v24 = vsel %vm899_vm0, %v26511_v57, %v3006_v15  ;;  %v3404_v54 = vsel %vm20749_vm6, %v17888_v21, %v3403_v45  ;;  %v3405_v20 = vrot.slane %v3403_v45, 2  ;;  %v3601_v15 = vcombine.low %v3397_v41, %v3400_v33  ;;  %18976 = vmatpush3.msra.mxu0 %v4337_v43  ;;  %19042 = vmatprep.subr.mxu1 %v20061_v38 }
 0x315   : > { %v3048_v10 = vsel %vm3044_vm7, %v3007_v24, 0.0  ;;  %18954 = vmatprep.mubr.f32.mxu1 %v4021_v3  ;;  %v3408_v46 = vrot.slane %v3406_v0, 2  ;;  %v3412_v26 = vrot.slane %v21677_v14, 7  ;;  %18977 = vmatprep.subr.mxu0 %v4336_v59  ;;  %v3415_v43 = vrot.slane %v21702_v49, 7 }
 0x316   : > { %v3185_v1 = vcombine.high %v3048_v10, %v3048_v10  ;;  %v21751_v12 = vrot.slane %v3048_v10, %v20561_v25  ;;  %18955 = vmatmul.mubr.f32.gmra.mxu1 %v4038_v22  ;;  %v3407_v28 = vsel %vm20749_vm6, %v3405_v20, %v3406_v0  ;;  %v3609_v41 = vrot.slane %v3601_v15, %v20561_v25  ;;  %v20062_v20 = vld [vmem:[#allocation6 + $0xa0] sm:$0xff] }
 0x317   : > { %18978 = vmatpush3.msra.mxu0 %v4336_v59  ;;  %v3602_v62 = vcombine.low %v3404_v54, %v3407_v28  ;;  %v3410_v45 = vsel %vm20749_vm6, %v3408_v46, %v3409_v18  ;;  %v3411_v0 = vrot.slane %v3409_v18, 2  ;;  %v3414_v57 = vrot.slane %v3412_v26, 2  ;;  %v4333_v59 = vld [vmem:[#allocation6 + $0x140] sm:$0xff]  ;;  %19043 = vmatpush3.msra.mxu1 %v20061_v38  ;;  %v4332_v46 = vld [vmem:[#allocation6 + $0x138] sm:$0xff] }
 0x318   : > { %26512 = vst [vmem:[#allocation17_spill] sm:$0xff] %v21751_v12  ;;  %v21759_v56 = vrot.slane %v3185_v1, %v20561_v25  ;;  %v21764_v9 = vcombine.high %v21751_v12, %v21751_v12  ;;  %v4039_v21 = vcombine.low %v21743_v7, %v21751_v12  ;;  %18979 = vmatprep.subr.mxu0 %v4335_v8  ;;  %v3417_v24 = vrot.slane %v3415_v43, 2 }
 0x319   : > { %v3418_v19 = vrot.slane %v21690_v61, 7  ;;  %18980 = vmatpush3.msra.mxu0 %v4335_v8  ;;  %v3616_v3 = vrot.slane %v3602_v62, %v20561_v25  ;;  %v26514_v10 = vrot.slane %v21444_v35, 7  ;;  %19044 = vmatprep.subr.mxu1 %v20062_v20  ;;  %v3413_v15 = vsel %vm20749_vm6, %v3411_v0, %v3412_v26 }
 0x31a   : > { %26513 = vst [vmem:[#allocation14_spill] sm:$0xff] %v21764_v9  ;;  %v4040_v22 = vcombine.low %v21764_v9, %v21759_v56  ;;  %v4047_v33 = vrot.slane %v4039_v21, %v20561_v25  ;;  %18981 = vmatprep.subr.mxu0 %v4334_v11  ;;  %v3416_v1 = vsel %vm20749_vm6, %v3414_v57, %v3415_v43  ;;  %v4331_v57 = vld [vmem:[#allocation6 + $0x130] sm:$0xff]  ;;  %v26516_v34 = vrot.slane %v21444_v35, 7 }
 0x31b   : > { %v3040_v54 = vsel %vm899_vm0, 0.0, %v26514_v10  ;;  %v3419_v8 = vsel %vm20749_vm6, %v3417_v24, %v3418_v19  ;;  %18982 = vmatpush3.msra.mxu0 %v4334_v11  ;;  %v3617_v18 = vcombine.low %v3609_v41, %v3616_v3  ;;  %v3618_v62 = vcombine.low %v3410_v45, %v3413_v15  ;;  %19045 = vmatpush3.msra.mxu1 %v20062_v20 }
 0x31c   : > { %v3201_v38 = vcombine.high %v3040_v54, %v3040_v54  ;;  %v4054_v28 = vrot.slane %v4040_v22, %v20561_v25  ;;  %v3619_v21 = vcombine.low %v3416_v1, %v3419_v8  ;;  %18983 = vmatprep.subr.mxu0 %v4333_v59  ;;  %v21786_v10 = vrot.slane %v3040_v54, %v20561_v25  ;;  %v20063_v54 = vld [vmem:[#allocation6 + $0x98] sm:$0xff] }
 0x31d   : > { %v3351_v43 = vcombine.high %v21690_v61, %v21690_v61  ;;  %v3420_v0 = vrot.slane %v3418_v19, 2  ;;  %18984 = vmatpush3.msra.mxu0 %v4333_v59  ;;  %v3626_v11 = vrot.slane %v3618_v62, %v20561_v25  ;;  %v17889_v24 = vrot.slane %v21681_v53, 9  ;;  %19046 = vmatprep.subr.mxu1 %v20063_v54  ;;  %v4329_v62 = vld [vmem:[#allocation6 + $0x120] sm:$0xff] }
 0x31e   : > { %v21789_v26 = vrot.slane %v3201_v38, %v20561_v25  ;;  %18899 = vmatmul.mubr.f32.gmra.mxu0 %v3617_v18  ;;  %v4055_v41 = vcombine.low %v4047_v33, %v4054_v28  ;;  %v3633_v45 = vrot.slane %v3619_v21, %v20561_v25  ;;  %18985 = vmatprep.subr.mxu0 %v4332_v46  ;;  %v3427_v59 = vrot.slane %v3425_v47, 2  ;;  %v4330_v33 = vld [vmem:[#allocation6 + $0x128] sm:$0xff] }
 0x31f   : > { %v21798_v3 = vcombine.high %v21786_v10, %v21786_v10  ;;  %v3421_v19 = vrot.slane %v3351_v43, 7  ;;  %18986 = vmatpush3.msra.mxu0 %v4332_v46  ;;  %v3426_v15 = vsel %vm20749_vm6, %v17889_v24, %v3425_v47  ;;  %v3428_v1 = vrot.slane %v21696_v55, 7  ;;  %v4328_v24 = vld [vmem:[#allocation6 + $0x118] sm:$0xff]  ;;  %19047 = vmatpush3.msra.mxu1 %v20063_v54  ;;  %v20064_v54 = vld [vmem:[#allocation6 + $0x90] sm:$0xff] }
 0x320   : > { %v21802_v22 = vcombine.high %v21789_v26, %v21789_v26  ;;  %18957 = vmatprep.mubr.f32.mxu1 %v4055_v41  ;;  %v3634_v20 = vcombine.low %v3626_v11, %v3633_v45  ;;  %v3431_v8 = vrot.slane %v21743_v7, 7  ;;  %18987 = vmatprep.subr.mxu0 %v4331_v57  ;;  %v26515_v28 = vrot.slane %v21478_v58, 7 }
 0x321   : > { %v4056_v38 = vcombine.low %v21786_v10, %v21798_v3  ;;  %v3422_v18 = vsel %vm20749_vm6, %v3420_v0, %v3421_v19  ;;  %18988 = vmatpush3.msra.mxu0 %v4331_v57  ;;  %v3429_v21 = vsel %vm20749_vm6, %v3427_v59, %v3428_v1  ;;  %v3430_v43 = vrot.slane %v3428_v1, 2  ;;  %19048 = vmatprep.subr.mxu1 %v20064_v54 }
 0x322   : > { %v4057_v46 = vcombine.low %v21789_v26, %v21802_v22  ;;  %v3010_v47 = vsel %vm899_vm0, %v26516_v34, %v26515_v28  ;;  %18901 = vmatprep.mubr.f32.mxu0 %v3634_v20  ;;  %v3635_v41 = vcombine.low %v3422_v18, %v3426_v15  ;;  %v26517_v11 = vrot.slane %v21481_v50, 7  ;;  %18989 = vmatprep.subr.mxu0 %v4330_v33 }
 0x323   : > { %v4064_v0 = vrot.slane %v4056_v38, %v20561_v25  ;;  %v3049_v35 = vsel %vm3044_vm7, %v3010_v47, 0.0  ;;  %18990 = vmatpush3.msra.mxu0 %v4330_v33  ;;  %v3432_v19 = vsel %vm20749_vm6, %v3430_v43, %v3431_v8  ;;  %v21842_v38 = vcombine.high %v21759_v56, %v21759_v56  ;;  %v4327_v33 = vld [vmem:[#allocation6 + $0x110] sm:$0xff]  ;;  %19049 = vmatpush3.msra.mxu1 %v20064_v54 }
 0x324   : > { %v3041_v45 = vsel %vm899_vm0, 0.0, %v26517_v11  ;;  %v4071_v58 = vrot.slane %v4057_v46, %v20561_v25  ;;  %v3643_v50 = vrot.slane %v3635_v41, %v20561_v25  ;;  %v3218_v59 = vcombine.high %v3049_v35, %v3049_v35  ;;  %18991 = vmatprep.subr.mxu0 %v4329_v62  ;;  %v4326_v41 = vld [vmem:[#allocation6 + $0x108] sm:$0xff] }
 0x325   : > { %v21832_v57 = vrot.slane %v3041_v45, %v20561_v25  ;;  %v21838_v20 = vrot.slane %v3049_v35, %v20561_v25  ;;  %v3636_v1 = vcombine.low %v3429_v21, %v3432_v19  ;;  %v3433_v46 = vrot.slane %v3431_v8, 2  ;;  %18992 = vmatpush3.msra.mxu0 %v4329_v62  ;;  %v20065_v19 = vld [vmem:[#allocation6 + $0x88] sm:$0xff] }
 0x326   : > { %v4072_v15 = vcombine.low %v4064_v0, %v4071_v58  ;;  %v21845_v18 = vrot.slane %v3218_v59, %v20561_v25  ;;  %v3434_v34 = vrot.slane %v21751_v12, 7  ;;  %v3437_v47 = vrot.slane %v21764_v9, 7  ;;  %18993 = vmatprep.subr.mxu0 %v4328_v24  ;;  %19050 = vmatprep.subr.mxu1 %v20065_v19 }
 0x327   : > { %v21849_v28 = vcombine.high %v21838_v20, %v21838_v20  ;;  %v3650_v8 = vrot.slane %v3636_v1, %v20561_v25  ;;  %v3440_v62 = vrot.slane %v21759_v56, 7  ;;  %v3443_v21 = vrot.slane %v21842_v38, 7  ;;  %18994 = vmatpush3.msra.mxu0 %v4328_v24  ;;  %19051 = vmatpush3.msra.mxu1 %v20065_v19  ;;  %v20066_v19 = vld [vmem:[#allocation6 + $0x80] sm:$0xff] }
 0x328   : > { %26518 = vst [vmem:[#allocation27_spill] sm:$0xff] %v21845_v18  ;;  %18958 = vmatmul.mubr.f32.gmra.mxu1 %v4072_v15  ;;  %v21858_v43 = vsel %vm3044_vm7, %v21505_v40, 0.0  ;;  %v4074_v0 = vcombine.low %v21845_v18, %v21832_v57  ;;  %v3435_v58 = vsel %vm20749_vm6, %v3433_v46, %v3434_v34  ;;  %v3436_v35 = vrot.slane %v3434_v34, 2  ;;  %18995 = vmatprep.subr.mxu0 %v4327_v33  ;;  %v4325_v34 = vld [vmem:[#allocation6 + $0x100] sm:$0xff] }
 0x329   : > { %26519 = vst [vmem:[#allocation19_spill] sm:$0xff] %v21849_v28  ;;  %v4073_v11 = vcombine.low %v21838_v20, %v21849_v28  ;;  %v3651_v59 = vcombine.low %v3643_v50, %v3650_v8  ;;  %v3439_v15 = vrot.slane %v3437_v47, 2  ;;  %v3442_v1 = vrot.slane %v3440_v62, 2  ;;  %18996 = vmatpush3.msra.mxu0 %v4327_v33  ;;  %19052 = vmatprep.subr.mxu1 %v20066_v19 }
 0x32a   : > { %v3234_v40 = vcombine.high %v3041_v45, %v3041_v45  ;;  %v4088_v54 = vrot.slane %v4074_v0, %v20561_v25  ;;  %v3438_v12 = vsel %vm20749_vm6, %v3436_v35, %v3437_v47  ;;  %v21872_v46 = vcombine.high %v21832_v57, %v21832_v57  ;;  %18997 = vmatprep.subr.mxu0 %v4326_v41 }
 0x32b   : > { %v4081_v24 = vrot.slane %v4073_v11, %v20561_v25  ;;  %18902 = vmatmul.mubr.f32.gmra.mxu0 %v3651_v59  ;;  %v3441_v50 = vsel %vm20749_vm6, %v3439_v15, %v3440_v62  ;;  %v3444_v45 = vsel %vm20749_vm6, %v3442_v1, %v3443_v21  ;;  %v3652_v33 = vcombine.low %v3435_v58, %v3438_v12 }
 0x32c   : > { %v21879_v8 = vrot.slane %v3234_v40, %v20561_v25  ;;  %v3653_v0 = vcombine.low %v3441_v50, %v3444_v45  ;;  %v21883_v47 = vrot.slane %v21858_v43, %v20561_v25  ;;  %18998 = vmatpush3.msra.mxu0 %v4326_v41  ;;  %v17890_v58 = vrot.slane %v21786_v10, 9  ;;  %19053 = vmatpush3.msra.mxu1 %v20066_v19  ;;  %v21905_v45 = vld [vmem:[#allocation6 + $0x78] sm:$0xff] }
 0x32d   : > { %v4089_v11 = vcombine.low %v4081_v24, %v4088_v54  ;;  %v3660_v62 = vrot.slane %v3652_v33, %v20561_v25  ;;  %18999 = vmatprep.subr.mxu0 %v4325_v34  ;;  %v3447_v41 = vrot.slane %v21798_v3, 7  ;;  %v3450_v15 = vrot.slane %v21789_v26, 7  ;;  %26522 = vst [vmem:[#allocation15_spill] sm:$0xff] %v21905_v45  ;;  %v20068_v33 = vld [vmem:[#allocation6 + $0x178] sm:$0xff] }
 0x32e   : > { %26520 = vst [vmem:[#allocation18_spill] sm:$0xff] %v21883_v47  ;;  %v21889_v21 = vcombine.high %v21879_v8, %v21879_v8  ;;  %v4090_v12 = vcombine.low %v21872_v46, %v21879_v8  ;;  %v3667_v59 = vrot.slane %v3653_v0, %v20561_v25  ;;  %v3453_v1 = vrot.slane %v21802_v22, 7  ;;  %19000 = vmatpush3.msra.mxu0 %v4325_v34 }
 0x32f   : > { %18960 = vmatprep.mubr.f32.mxu1 %v4089_v11  ;;  %v3456_v54 = vrot.slane %v21838_v20, 7  ;;  %v26521_v10 = vrot.slane %v21497_v31, 7  ;;  %19075 = vmatprep.subr.mxu0 %v21905_v45  ;;  %v3448_v34 = vsel %vm20749_vm6, %v17890_v58, %v3447_v41  ;;  %v3449_v0 = vrot.slane %v3447_v41, 2 }
 0x330   : > { %v4091_v40 = vcombine.low %v21889_v21, %v21883_v47  ;;  %v4098_v24 = vrot.slane %v4090_v12, %v20561_v25  ;;  %19128 = vmatprep.subr.mxu1 %v20068_v33  ;;  %v3668_v11 = vcombine.low %v3660_v62, %v3667_v59  ;;  %v3452_v19 = vrot.slane %v3450_v15, 2 }
 0x331   : > { %v3042_v50 = vsel %vm899_vm0, 0.0, %v26521_v10  ;;  %v3455_v35 = vrot.slane %v3453_v1, 2  ;;  %v3251_v31 = vcombine.high %v21858_v43, %v21858_v43  ;;  %v21915_v10 = vcombine.high %v21883_v47, %v21883_v47 }
 0x332   : > { %v4105_v12 = vrot.slane %v4091_v40, %v20561_v25  ;;  %18904 = vmatprep.mubr.f32.mxu0 %v3668_v11  ;;  %v3451_v33 = vsel %vm20749_vm6, %v3449_v0, %v3450_v15  ;;  %v3454_v62 = vsel %vm20749_vm6, %v3452_v19, %v3453_v1  ;;  %v3267_v58 = vcombine.high %v3042_v50, %v3042_v50 }
 0x333   : > { %v21922_v59 = vrot.slane %v3042_v50, %v20561_v25  ;;  %v3457_v40 = vsel %vm20749_vm6, %v3455_v35, %v3456_v54  ;;  %v3669_v43 = vcombine.low %v3448_v34, %v3451_v33  ;;  %v21927_v45 = vrot.slane %v3251_v31, %v20561_v25 }
 0x334   : > { %v4106_v41 = vcombine.low %v4098_v24, %v4105_v12  ;;  %v3670_v9 = vcombine.low %v3454_v62, %v3457_v40  ;;  %v3353_v15 = vcombine.high %v21845_v18, %v21845_v18  ;;  %v3458_v1 = vrot.slane %v3456_v54, 2 }
 0x335   : > { %26523 = vst [vmem:[#allocation23_spill] sm:$0xff] %v21927_v45  ;;  %v21931_v11 = vcombine.high %v21922_v59, %v21922_v59  ;;  %v3677_v50 = vrot.slane %v3669_v43, %v20561_v25  ;;  %v4107_v24 = vcombine.low %v21915_v10, %v21927_v45  ;;  %v3459_v35 = vrot.slane %v21849_v28, 7 }
 0x336   : > { %18961 = vmatmul.mubr.f32.gmra.mxu1 %v4106_v41  ;;  %v3462_v34 = vrot.slane %v21845_v18, 7  ;;  %v3684_v0 = vrot.slane %v3670_v9, %v20561_v25  ;;  %v3465_v12 = vrot.slane %v3353_v15, 7  ;;  %v17891_v31 = vrot.slane %v21832_v57, 9 }
 0x337   : > { %26524 = vst [vmem:[#allocation24_spill] sm:$0xff] %v21931_v11  ;;  %v4108_v19 = vcombine.low %v21922_v59, %v21931_v11  ;;  %v4115_v54 = vrot.slane %v4107_v24, %v20561_v25  ;;  %v3460_v33 = vsel %vm20749_vm6, %v3458_v1, %v3459_v35  ;;  %v3461_v62 = vrot.slane %v3459_v35, 2 }
 0x338   : > { %v3464_v41 = vrot.slane %v3462_v34, 2  ;;  %v3685_v40 = vcombine.low %v3677_v50, %v3684_v0  ;;  %v26525_v28 = vrot.slane %v21872_v46, 7  ;;  %v21953_v18 = vrot.slane %v3267_v58, %v20561_v25 }
 0x339   : > { %v4122_v43 = vrot.slane %v4108_v19, %v20561_v25  ;;  %v3463_v15 = vsel %vm20749_vm6, %v3461_v62, %v3462_v34  ;;  %v21961_v1 = vrot.slane %v21543_v63, %v20561_v25  ;;  %v3475_v63 = vrot.slane %v21889_v21, 7 }
 0x33a   : > { %v3470_v9 = vsel %vm20749_vm6, %v17891_v31, %v26525_v28  ;;  %26526 = vst [vmem:[#allocation28_spill] sm:$0xff] %v21953_v18  ;;  %v3466_v24 = vsel %vm20749_vm6, %v3464_v41, %v3465_v12  ;;  %v26527_v50 = vmov %v26525_v28  ;;  %18905 = vmatmul.mubr.f32.gmra.mxu0 %v3685_v40  ;;  %v3686_v19 = vcombine.low %v3460_v33, %v3463_v15 }
 0x33b   : > { %v3471_v35 = vrot.slane %v26527_v50, 2  ;;  %v4123_v0 = vcombine.low %v4115_v54, %v4122_v43  ;;  %v3687_v28 = vcombine.low %v3466_v24, %v3470_v9  ;;  %v21967_v58 = vcombine.high %v21953_v18, %v21953_v18 }
 0x33c   : > { %v21971_v34 = vcombine.high %v21961_v1, %v21961_v1  ;;  %v3472_v12 = vrot.slane %v21879_v8, 7  ;;  %v3478_v31 = vrot.slane %v21883_v47, 7  ;;  %v3694_v46 = vrot.slane %v3686_v19, %v20561_v25 }
 0x33d   : > { %26528 = vst [vmem:[#allocation20_spill] sm:$0xff] %v21967_v58  ;;  %18963 = vmatprep.mubr.f32.mxu1 %v4123_v0  ;;  %v3701_v54 = vrot.slane %v3687_v28, %v20561_v25  ;;  %v4124_v33 = vcombine.low %v21953_v18, %v21967_v58  ;;  %v3481_v62 = vrot.slane %v21915_v10, 7  ;;  %v3477_v9 = vrot.slane %v3475_v63, 2 }
 0x33e   : > { %26529 = vst [vmem:[#allocation16_spill] sm:$0xff] %v21971_v34  ;;  %v4125_v41 = vcombine.low %v21961_v1, %v21971_v34  ;;  %v3473_v40 = vsel %vm20749_vm6, %v3471_v35, %v3472_v12  ;;  %v3474_v43 = vrot.slane %v3472_v12, 2  ;;  %v3480_v50 = vrot.slane %v3478_v31, 2 }
 0x33f   : > { %v3702_v15 = vcombine.low %v3694_v46, %v3701_v54  ;;  %v4132_v24 = vrot.slane %v4124_v33, %v20561_v25  ;;  %v21988_v0 = vrot.slane %v21573_v32, %v20561_v25  ;;  %v3479_v47 = vsel %vm20749_vm6, %v3477_v9, %v3478_v31 }
 0x340   : > { %v4139_v19 = vrot.slane %v4125_v41, %v20561_v25  ;;  %v3476_v28 = vsel %vm20749_vm6, %v3474_v43, %v3475_v63  ;;  %v26530_v35 = vcombine.high %v21573_v32, %v21573_v32  ;;  %v3482_v46 = vsel %vm20749_vm6, %v3480_v50, %v3481_v62 }
 0x341   : > { %18907 = vmatprep.mubr.f32.mxu0 %v3702_v15  ;;  %v3703_v54 = vcombine.low %v3473_v40, %v3476_v28  ;;  %v22005_v33 = vcombine.high %v21988_v0, %v21988_v0  ;;  %v4141_v63 = vcombine.low %v21564_v17, %v21988_v0  ;;  %v3704_v31 = vcombine.low %v3479_v47, %v3482_v46 }
 0x342   : > { %v21999_v12 = vrot.slane %v26530_v35, %v20561_v25  ;;  %v4140_v41 = vcombine.low %v4132_v24, %v4139_v19  ;;  %v22011_v43 = vcombine.high %v21927_v45, %v21927_v45  ;;  %v3483_v32 = vrot.slane %v3481_v62, 2 }
 0x343   : > { %v3711_v9 = vrot.slane %v3703_v54, %v20561_v25  ;;  %v3513_v15 = vrot.slane %v22005_v33, 7  ;;  %v4149_v50 = vrot.slane %v4141_v63, %v20561_v25  ;;  %v3718_v28 = vrot.slane %v3704_v31, %v20561_v25 }
 0x344   : > { %26531 = vst [vmem:[#allocation26_spill] sm:$0xff] %v22011_v43  ;;  %v4142_v40 = vcombine.low %v22005_v33, %v21999_v12  ;;  %18964 = vmatmul.mubr.f32.gmra.mxu1 %v4140_v41  ;;  %v3484_v24 = vrot.slane %v21927_v45, 7  ;;  %v3487_v47 = vrot.slane %v22011_v43, 7  ;;  %v17892_v19 = vrot.slane %v21922_v59, 9 }
 0x345   : > { %v3491_v35 = vrot.slane %v21931_v11, 7  ;;  %v3494_v46 = vrot.slane %v21953_v18, 7  ;;  %v26532_v54 = vrot.slane %v21511_v39, 7  ;;  %v26533_v33 = vrot.slane %v21540_v29, 7 }
 0x346   : > { %v4156_v62 = vrot.slane %v4142_v40, %v20561_v25  ;;  %v3719_v41 = vcombine.low %v3711_v9, %v3718_v28  ;;  %v3485_v31 = vsel %vm20749_vm6, %v3483_v32, %v3484_v24  ;;  %v3486_v45 = vrot.slane %v3484_v24, 2 }
 0x347   : > { %v3019_v63 = vsel %vm899_vm0, %v26533_v33, %v26532_v54  ;;  %v3492_v40 = vsel %vm20749_vm6, %v17892_v19, %v3491_v35  ;;  %v3493_v11 = vrot.slane %v3491_v35, 2  ;;  %v22037_v18 = vcombine.high %v21999_v12, %v21999_v12 }
 0x348   : > { %v3052_v43 = vsel %vm3044_vm7, %v3019_v63, 0.0  ;;  %v4157_v59 = vcombine.low %v4149_v50, %v4156_v62  ;;  %18908 = vmatmul.mubr.f32.gmra.mxu0 %v3719_v41  ;;  %v3488_v39 = vsel %vm20749_vm6, %v3486_v45, %v3487_v47  ;;  %v3496_v32 = vrot.slane %v3494_v46, 2 }
 0x349   : > { %v3317_v29 = vcombine.high %v3052_v43, %v3052_v43  ;;  %v22042_v9 = vrot.slane %v3052_v43, %v20561_v25  ;;  %v3495_v50 = vsel %vm20749_vm6, %v3493_v11, %v3494_v46  ;;  %v3720_v28 = vcombine.low %v3485_v31, %v3488_v39 }
 0x34a   : > { %18966 = vmatprep.mubr.f32.mxu1 %v4157_v59  ;;  %v3497_v24 = vrot.slane %v21967_v58, 7  ;;  %v3500_v19 = vrot.slane %v21961_v1, 7  ;;  %v3721_v62 = vcombine.low %v3492_v40, %v3495_v50  ;;  %v3503_v31 = vrot.slane %v21971_v34, 7 }
 0x34b   : > { %v22049_v35 = vrot.slane %v3317_v29, %v20561_v25  ;;  %v22053_v45 = vcombine.high %v22042_v9, %v22042_v9  ;;  %v4158_v43 = vcombine.low %v22037_v18, %v22042_v9  ;;  %v3728_v47 = vrot.slane %v3720_v28, %v20561_v25 }
 0x34c   : > { %v3498_v11 = vsel %vm20749_vm6, %v3496_v32, %v3497_v24  ;;  %v3499_v46 = vrot.slane %v3497_v24, 2  ;;  %v3502_v54 = vrot.slane %v3500_v19, 2  ;;  %v3735_v33 = vrot.slane %v3721_v62, %v20561_v25 }
 0x34d   : > { %v4159_v63 = vcombine.low %v22053_v45, %v22049_v35  ;;  %v4166_v41 = vrot.slane %v4158_v43, %v20561_v25  ;;  %v3506_v40 = vrot.slane %v21564_v17, 7  ;;  %v3355_v39 = vcombine.high %v21564_v17, %v21564_v17 }
 0x34e   : > { %v3501_v59 = vsel %vm20749_vm6, %v3499_v46, %v3500_v19  ;;  %v17893_v29 = vrot.slane %v21988_v0, 9  ;;  %v3736_v32 = vcombine.low %v3728_v47, %v3735_v33  ;;  %v3504_v28 = vsel %vm20749_vm6, %v3502_v54, %v3503_v31 }
 0x34f   : > { %v4173_v50 = vrot.slane %v4159_v63, %v20561_v25  ;;  %v3505_v24 = vrot.slane %v3503_v31, 2  ;;  %v3737_v62 = vcombine.low %v3498_v11, %v3501_v59  ;;  %v3508_v43 = vrot.slane %v3506_v40, 2 }
 0x350   : > { %v3509_v34 = vrot.slane %v3355_v39, 7  ;;  %v3514_v19 = vsel %vm20749_vm6, %v17893_v29, %v3513_v15  ;;  %18910 = vmatprep.mubr.f32.mxu0 %v3736_v32  ;;  %v3515_v58 = vrot.slane %v3513_v15, 2  ;;  %v3516_v47 = vrot.slane %v21999_v12, 7 }
 0x351   : > { %v4174_v46 = vcombine.low %v4166_v41, %v4173_v50  ;;  %v3507_v17 = vsel %vm20749_vm6, %v3505_v24, %v3506_v40  ;;  %v3745_v63 = vrot.slane %v3737_v62, %v20561_v25  ;;  %v3519_v11 = vrot.slane %v22037_v18, 7 }
 0x352   : > { %v3738_v33 = vcombine.low %v3504_v28, %v3507_v17  ;;  %v3510_v54 = vsel %vm20749_vm6, %v3508_v43, %v3509_v34  ;;  %v3517_v31 = vsel %vm20749_vm6, %v3515_v58, %v3516_v47  ;;  %v3518_v59 = vrot.slane %v3516_v47, 2 }
 0x353   : > { %18967 = vmatmul.mubr.f32.gmra.mxu1 %v4174_v46  ;;  %v3754_v41 = vcombine.low %v3510_v54, %v3514_v19  ;;  %v22087_v40 = vcombine.high %v22049_v35, %v22049_v35  ;;  %v3521_v17 = vrot.slane %v3519_v11, 2  ;;  %v3522_v39 = vrot.slane %v22042_v9, 7 }
 0x354   : > { %v3752_v15 = vrot.slane %v3738_v33, %v20561_v25  ;;  %v3525_v29 = vrot.slane %v22053_v45, 7  ;;  %v3520_v34 = vsel %vm20749_vm6, %v3518_v59, %v3519_v11  ;;  %v3528_v32 = vrot.slane %v22049_v35, 7 }
 0x355   : > { %v3531_v58 = vrot.slane %v22087_v40, 7  ;;  %v3755_v28 = vcombine.low %v3517_v31, %v3520_v34  ;;  %v3523_v24 = vsel %vm20749_vm6, %v3521_v17, %v3522_v39  ;;  %v3524_v62 = vrot.slane %v3522_v39, 2 }
 0x356   : > { %v3753_v50 = vcombine.low %v3745_v63, %v3752_v15  ;;  %v3762_v43 = vrot.slane %v3754_v41, %v20561_v25  ;;  %v3527_v19 = vrot.slane %v3525_v29, 2  ;;  %v3530_v46 = vrot.slane %v3528_v32, 2 }
 0x357   : > { %v4342_v47 = vcombine.low %v21536_v36, %v21382_v27  ;;  %v3769_v33 = vrot.slane %v3755_v28, %v20561_v25  ;;  %v3526_v54 = vsel %vm20749_vm6, %v3524_v62, %v3525_v29  ;;  %v4358_v63 = vcombine.low %v21518_v5, %v21392_v44 }
 0x358   : > { %18911 = vmatmul.mubr.f32.gmra.mxu0 %v3753_v50  ;;  %v17894_v11 = vcombine.high %v21392_v44, %v21412_v2  ;;  %v3529_v31 = vsel %vm20749_vm6, %v3527_v19, %v3528_v32  ;;  %v3532_v59 = vsel %vm20749_vm6, %v3530_v46, %v3531_v58  ;;  %v3771_v41 = vcombine.low %v3523_v24, %v3526_v54 }
 0x359   : > { %v4341_v27 = vcombine.low %v21521_v48, %v21514_v4  ;;  %v3770_v36 = vcombine.low %v3762_v43, %v3769_v33  ;;  %v3772_v15 = vcombine.low %v3529_v31, %v3532_v59  ;;  %v4356_v17 = vrot.slane %v4342_v47, %v20561_v25  ;;  %v26536_v47 = vld [vmem:[#allocation27_spill] sm:$0xff] }
 0x35a   : > { %v3779_v39 = vrot.slane %v3771_v41, %v20561_v25  ;;  %v4366_v5 = vrot.slane %v4358_v63, %v20561_v25  ;;  %v4375_v44 = vcombine.low %v21559_v37, %v21577_v6  ;;  %v4376_v2 = vcombine.low %v21568_v42, %v21602_v16  ;;  %v26537_v33 = vld [vmem:[#allocation19_spill] sm:$0xff] }
 0x35b   : > { %18913 = vmatprep.mubr.f32.mxu0 %v3770_v36  ;;  %v3786_v29 = vrot.slane %v3772_v15, %v20561_v25  ;;  %v4373_v34 = vrot.slane %v17894_v11, %v20561_v25  ;;  %v4392_v4 = vcombine.low %v21615_v30, %v21710_v51  ;;  %v4393_v48 = vcombine.low %v21630_v13, %v21674_v23  ;;  %v26538_v11 = vld [vmem:[#allocation18_spill] sm:$0xff]  ;;  %v26540_v36 = vld [vmem:[#allocation23_spill] sm:$0xff] }
 0x35c   : > { %v4349_v32 = vrot.slane %v4341_v27, %v20561_v25  ;;  %v4383_v58 = vrot.slane %v4375_v44, %v20561_v25  ;;  %v4390_v37 = vrot.slane %v4376_v2, %v20561_v25  ;;  %v4409_v16 = vcombine.low %v21687_v52, %v21677_v14  ;;  %v26539_v27 = vld [vmem:[#allocation26_spill] sm:$0xff]  ;;  %v26543_v2 = vld [vmem:[#allocation20_spill] sm:$0xff] }
 0x35d   : > { %v3787_v42 = vcombine.low %v3779_v39, %v3786_v29  ;;  %v4400_v6 = vrot.slane %v4392_v4, %v20561_v25  ;;  %v4407_v50 = vrot.slane %v4393_v48, %v20561_v25  ;;  %v4410_v30 = vcombine.low %v21702_v49, %v21690_v61  ;;  %v26545_v29 = vld [vmem:[#allocation16_spill] sm:$0xff] }
 0x35e   : > { %v4357_v51 = vcombine.low %v4349_v32, %v4356_v17  ;;  %v4417_v13 = vrot.slane %v4409_v16, %v20561_v25  ;;  %v17895_v23 = vcombine.high %v21690_v61, %v21681_v53  ;;  %v4427_v28 = vcombine.low %v21696_v55, %v21743_v7  ;;  %v26534_v55 = vld [vmem:[#allocation14_spill] sm:$0xff]  ;;  %v26535_v7 = vld [vmem:[#allocation17_spill] sm:$0xff]  ;;  %v26541_v17 = vld [vmem:[#allocation28_spill] sm:$0xff] }
 0x35f   : > { %18914 = vmatmul.mubr.f32.gmra.mxu0 %v3787_v42  ;;  %v4374_v24 = vcombine.low %v4366_v5, %v4373_v34  ;;  %v4424_v14 = vrot.slane %v4410_v30, %v20561_v25  ;;  %v4444_v52 = vcombine.low %v21759_v56, %v21842_v38  ;;  %v4391_v62 = vcombine.low %v4383_v58, %v4390_v37  ;;  %v26546_v34 = vld [vmem:[#allocation15_spill] sm:$0xff]  ;;  %v20069_v37 = vld [vmem:[#allocation6 + $0x70] sm:$0xff] }
 0x360   : > { %19001 = vmatprep.mubr.f32.mxu0 %v4357_v51  ;;  %v4408_v43 = vcombine.low %v4400_v6, %v4407_v50  ;;  %v4460_v49 = vcombine.low %v21798_v3, %v21789_v26  ;;  %v4461_v19 = vcombine.low %v21802_v22, %v21838_v20  ;;  %v4434_v53 = vrot.slane %v17895_v23, %v20561_v25 }
 0x361   : > { %v4441_v61 = vrot.slane %v4427_v28, %v20561_v25  ;;  %v4443_v46 = vcombine.low %v26535_v7, %v26534_v55  ;;  %v4477_v54 = vcombine.low %v26537_v33, %v26536_v47  ;;  %v4425_v56 = vcombine.low %v4417_v13, %v4424_v14  ;;  %v20077_v55 = vld [vmem:[#allocation6 + $0x30] sm:$0xff]  ;;  %v20080_v7 = vld [vmem:[#allocation6 + $0x18] sm:$0xff]  ;;  %v20083_v33 = vld [vmem:[#allocation6] sm:$0xff] }
 0x362   : > { %v4468_v38 = vrot.slane %v4460_v49, %v20561_v25  ;;  %v4475_v63 = vrot.slane %v4461_v19, %v20561_v25  ;;  %v17896_v26 = vcombine.high %v26536_v47, %v21832_v57  ;;  %v4458_v3 = vrot.slane %v4444_v52, %v20561_v25  ;;  %v26542_v57 = vld [vmem:[#allocation24_spill] sm:$0xff]  ;;  %v20071_v52 = vld [vmem:[#allocation6 + $0x60] sm:$0xff]  ;;  %v20074_v49 = vld [vmem:[#allocation6 + $0x48] sm:$0xff] }
 0x363   : > { %19002 = vmatmul.mubr.f32.vlgmr.msra.gmra.mxu0 %v4374_v24  ;;  %v4485_v22 = vrot.slane %v4477_v54, %v20561_v25  ;;  %v4494_v20 = vcombine.low %v21879_v8, %v21889_v21  ;;  %v4495_v31 = vcombine.low %v26538_v11, %v21915_v10  ;;  %v4511_v15 = vcombine.low %v26540_v36, %v26539_v27  ;;  %v26544_v21 = vld [vmem:[#allocation13_spill] sm:$0xff]  ;;  %v20070_v24 = vld [vmem:[#allocation6 + $0x68] sm:$0xff] }
 0x364   : > { %19004 = vmatprep.mubr.f32.mxu0 %v4391_v62  ;;  %v4476_v59 = vcombine.low %v4468_v38, %v4475_v63  ;;  %v4492_v41 = vrot.slane %v17896_v26, %v20561_v25  ;;  %v4512_v39 = vcombine.low %v26542_v57, %v26541_v17  ;;  %v4528_v8 = vcombine.low %v26543_v2, %v21961_v1  ;;  %v20073_v62 = vld [vmem:[#allocation6 + $0x50] sm:$0xff]  ;;  %v20082_v47 = vld [vmem:[#allocation6 + $0x8] sm:$0xff] }
 0x365   : > { %v4502_v5 = vrot.slane %v4494_v20, %v20561_v25  ;;  %v4509_v44 = vrot.slane %v4495_v31, %v20561_v25  ;;  %v4529_v10 = vcombine.low %v26545_v29, %v26544_v21  ;;  %19076 = vmatpush3.msra.mxu0 %v26546_v34  ;;  %v4519_v48 = vrot.slane %v4511_v15, %v20561_v25 }
 0x366   : > { %v4493_v4 = vcombine.low %v4485_v22, %v4492_v41  ;;  %v4526_v32 = vrot.slane %v4512_v39, %v20561_v25  ;;  %v17897_v58 = vcombine.high %v26544_v21, %v21988_v0  ;;  %19077 = vmatprep.subr.mxu0 %v20069_v37  ;;  %v4536_v42 = vrot.slane %v4528_v8, %v20561_v25 }
 0x367   : > { %19005 = vmatmul.mubr.f32.gmra.mxu0 %v4408_v43  ;;  %v4510_v16 = vcombine.low %v4502_v5, %v4509_v44  ;;  %v4543_v1 = vrot.slane %v4529_v10, %v20561_v25  ;;  %v4546_v6 = vcombine.low %v21999_v12, %v22037_v18  ;;  %v4451_v50 = vrot.slane %v4443_v46, %v20561_v25  ;;  %v20072_v18 = vld [vmem:[#allocation6 + $0x58] sm:$0xff]  ;;  %v20081_v46 = vld [vmem:[#allocation6 + $0x10] sm:$0xff] }
 0x368   : > { %19007 = vmatprep.mubr.f32.mxu0 %v4425_v56  ;;  %v4527_v30 = vcombine.low %v4519_v48, %v4526_v32  ;;  %v4442_v51 = vcombine.low %v4434_v53, %v4441_v61  ;;  %v4553_v23 = vrot.slane %v17897_v58, %v20561_v25  ;;  %19078 = vmatpush3.msra.mxu0 %v20069_v37  ;;  %v20075_v53 = vld [vmem:[#allocation6 + $0x40] sm:$0xff] }
 0x369   : > { %v4544_v13 = vcombine.low %v4536_v42, %v4543_v1  ;;  %v4560_v0 = vrot.slane %v4546_v6, %v20561_v25  ;;  %v4459_v28 = vcombine.low %v4451_v50, %v4458_v3  ;;  %19079 = vmatprep.subr.mxu0 %v20070_v24  ;;  %v4563_v12 = vcombine.low %v22049_v35, %v22087_v40  ;;  %v20076_v35 = vld [vmem:[#allocation6 + $0x38] sm:$0xff]  ;;  %v22196_v32 = vld [vmem:[%s26338_s5] ss:$0 sm:$0xff] }
 0x36a   : > { %19080 = vmatpush3.msra.mxu0 %v20070_v24  ;;  %v4562_v43 = vcombine.low %v22042_v9, %v22053_v45  ;;  %v20078_v9 = vld [vmem:[#allocation6 + $0x28] sm:$0xff]  ;;  %v20079_v45 = vld [vmem:[#allocation6 + $0x20] sm:$0xff] }
 0x36b   : > { %19008 = vmatmul.mubr.f32.gmra.mxu0 %v4442_v51  ;;  %v4561_v14 = vcombine.low %v4553_v23, %v4560_v0  ;;  %19081 = vmatprep.subr.mxu0 %v20071_v52  ;;  %v4577_v19 = vrot.slane %v4563_v12, %v20561_v25 }
 0x36c   : > { %19010 = vmatprep.mubr.f32.mxu0 %v4459_v28  ;;  %19082 = vmatpush3.msra.mxu0 %v20071_v52  ;;  %v4570_v61 = vrot.slane %v4562_v43, %v20561_v25 }
 0x36d   : > { %19083 = vmatprep.subr.mxu0 %v20072_v18 }
 0x36e   : > { %19084 = vmatpush3.msra.mxu0 %v20072_v18  ;;  %v4578_v40 = vcombine.low %v4570_v61, %v4577_v19 }
 0x36f   : > { %19011 = vmatmul.mubr.f32.gmra.mxu0 %v4476_v59  ;;  %19085 = vmatprep.subr.mxu0 %v20073_v62 }
 0x370   : > { %19013 = vmatprep.mubr.f32.mxu0 %v4493_v4  ;;  %19086 = vmatpush3.msra.mxu0 %v20073_v62 }
 0x371   : > { %19087 = vmatprep.subr.mxu0 %v20074_v49 }
 0x372   : > { %19088 = vmatpush3.msra.mxu0 %v20074_v49 }
 0x373   : > { %19014 = vmatmul.mubr.f32.gmra.mxu0 %v4510_v16  ;;  %19089 = vmatprep.subr.mxu0 %v20075_v53 }
 0x374   : > { %19016 = vmatprep.mubr.f32.mxu0 %v4527_v30  ;;  %19090 = vmatpush3.msra.mxu0 %v20075_v53 }
 0x375   : > { %19091 = vmatprep.subr.mxu0 %v20076_v35 }
 0x376   : > { %19092 = vmatpush3.msra.mxu0 %v20076_v35 }
 0x377   : > { %19017 = vmatmul.mubr.f32.gmra.mxu0 %v4544_v13  ;;  %19093 = vmatprep.subr.mxu0 %v20077_v55 }
 0x378   : > { %19019 = vmatprep.mubr.f32.mxu0 %v4561_v14  ;;  %19094 = vmatpush3.msra.mxu0 %v20077_v55 }
 0x379   : > { %19095 = vmatprep.subr.mxu0 %v20078_v9 }
 0x37a   : > { %19096 = vmatpush3.msra.mxu0 %v20078_v9 }
 0x37b   : > { %19020 = vmatmul.mubr.f32.gmra.mxu0 %v4578_v40  ;;  %19097 = vmatprep.subr.mxu0 %v20079_v45 }
 0x37c   : > { %19098 = vmatpush3.msra.mxu0 %v20079_v45 }
 0x37d   : > { %19099 = vmatprep.subr.mxu0 %v20080_v7 }
 0x37e   : > { %19100 = vmatpush3.msra.mxu0 %v20080_v7 }
 0x37f   : > { %19101 = vmatprep.subr.mxu0 %v20081_v46 }
 0x380   : > { %19102 = vmatpush3.msra.mxu0 %v20081_v46 }
 0x381   : > { %19103 = vmatprep.subr.mxu0 %v20082_v47 }
 0x382   : > { %19104 = vmatpush3.msra.mxu0 %v20082_v47 }
 0x383   : > { %19105 = vmatprep.subr.mxu0 %v20083_v33 }
 0x384   : > { %19106 = vmatpush3.msra.mxu0 %v20083_v33 }
 0x3bd   : > { %v18950_v38 = vpop.f32.mrf.mxu1 }
 0x3bf   : > { %v4255_v26 = vpop.f32.mrf.mxu1 }
 0x3ca   : > { %v18953_v22 = vpop.f32.mrf.mxu1 }
 0x3cc   : > { %v4265_v11 = vpop.f32.mrf.mxu1 }
 0x3cd   : > { %v18897_v54 = vpop.f32.mrf.mxu0 }
 0x3ce   : > { %v4261_v4 = vadd.f32 %v18950_v38, %v18897_v54 }
 0x3cf   : > { %v3868_v56 = vpop.f32.mrf.mxu0 }
 0x3d0   : > { %v4256_v58 = vadd.f32 %v4255_v26, %v3868_v56 }
 0x3d6   : > { %v18956_v59 = vpop.f32.mrf.mxu1 }
 0x3d8   : > { %v4275_v27 = vpop.f32.mrf.mxu1 }
 0x3de   : > { %v18900_v63 = vpop.f32.mrf.mxu0 }
 0x3df   : > { %v4271_v16 = vadd.f32 %v18953_v22, %v18900_v63 }
 0x3e0   : > { %v3878_v3 = vpop.f32.mrf.mxu0 }
 0x3e1   : > { %v4266_v6 = vadd.f32 %v4265_v11, %v3878_v3 }
 0x3e8   : > { %v18959_v15 = vpop.f32.mrf.mxu1 }
 0x3ea   : > { %v4285_v57 = vpop.f32.mrf.mxu1 }
 0x3eb   : > { %v18903_v20 = vpop.f32.mrf.mxu0 }
 0x3ec   : > { %v4281_v50 = vadd.f32 %v18956_v59, %v18903_v20 }
 0x3ed   : > { %v3888_v31 = vpop.f32.mrf.mxu0 }
 0x3ee   : > { %v22199_v13 = vadd.f32 %v4275_v27, %v3888_v31 }
 0x3f6   : > { %v18962_v5 = vpop.f32.mrf.mxu1 }
 0x3f8   : > { %v4295_v2 = vpop.f32.mrf.mxu1 }
 0x3fa   : > { %v18906_v41 = vpop.f32.mrf.mxu0 }
 0x3fb   : > { %v22201_v23 = vadd.f32 %v18959_v15, %v18906_v41 }
 0x3fc   : > { %v3898_v36 = vpop.f32.mrf.mxu0 }
 0x3fd   : > { %v22203_v0 = vadd.f32 %v4285_v57, %v3898_v36 }
 0x404   : > { %v18965_v21 = vpop.f32.mrf.mxu1 }
 0x406   : > { %v4305_v10 = vpop.f32.mrf.mxu1 }
 0x408   : > { %v18909_v17 = vpop.f32.mrf.mxu0 }
 0x409   : > { %v22205_v28 = vadd.f32 %v18962_v5, %v18909_v17 }
 0x40a   : > { %v3908_v39 = vpop.f32.mrf.mxu0 }
 0x40b   : > { %v22209_v62 = vadd.f32 %v4295_v2, %v3908_v39 }
 0x413   : > { %v18968_v42 = vpop.f32.mrf.mxu1 }
 0x415   : > { %v4315_v49 = vpop.f32.mrf.mxu1 }
 0x418   : > { %v18912_v44 = vpop.f32.mrf.mxu0 }
 0x419   : > { %v22211_v43 = vadd.f32 %v18965_v21, %v18912_v44 }
 0x41a   : > { %v3918_v8 = vpop.f32.mrf.mxu0 }
 0x41b   : > { %v22213_v19 = vadd.f32 %v4305_v10, %v3918_v8 }
 0x41f   : > { %v18915_v29 = vpop.f32.mrf.mxu0 }
 0x420   : > { %v22215_v53 = vadd.f32 %v18968_v42, %v18915_v29 }
 0x421   : > { %v3928_v34 = vpop.f32.mrf.mxu0 }
 0x422   : > { %v22217_v35 = vadd.f32 %v4315_v49, %v3928_v34 }
 0x423   : > { %v19003_v48 = vpop.f32.mrf.mxu0 }
 0x424   : > { %v4729_v37 = vadd.f32 %v19003_v48, %v4261_v4 }
 0x425   : > { %v4659_v1 = vpop.f32.mrf.mxu0 }
 0x426   : > { %v4750_v30 = vadd.f32 %v22196_v32, %v4729_v37  ;;  %v4728_v51 = vadd.f32 %v4659_v1, %v4256_v58 }
 0x427   : > { %v19006_v24 = vpop.f32.mrf.mxu0 }
 0x428   : > { %v4794_v14 = vcombine.high %v4750_v30, %v4750_v30  ;;  %v4801_v52 = vrot.slane %v4750_v30, %v20561_v25  ;;  %v4749_v18 = vadd.f32 %v22196_v32, %v4728_v51  ;;  %v4731_v12 = vadd.f32 %v19006_v24, %v4271_v16 }
 0x429   : > { %v4669_v61 = vpop.f32.mrf.mxu0 }
 0x42a   : > { %v4808_v40 = vrot.slane %v4794_v14, %v20561_v25  ;;  %v4809_v55 = vcombine.high %v4801_v52, %v4801_v52  ;;  %v4777_v9 = vcombine.high %v4749_v18, %v4749_v18  ;;  %v5075_v45 = vmax.f32 %v4801_v52, 0.0 }
 0x42b   : > { %v4784_v7 = vrot.slane %v4749_v18, %v20561_v25  ;;  %v4752_v46 = vadd.f32 %v22196_v32, %v4731_v12  ;;  %v4730_v47 = vadd.f32 %v4669_v61, %v4266_v6  ;;  %v19009_v33 = vpop.f32.mrf.mxu0 }
 0x42c   : > { %v4810_v54 = vcombine.high %v4808_v40, %v4808_v40  ;;  %v5076_v56 = vmax.f32 %v4809_v55, 0.0  ;;  %v5077_v38 = vmax.f32 %v4808_v40, 0.0  ;;  %v4791_v63 = vrot.slane %v4777_v9, %v20561_v25 }
 0x42d   : > { %v4792_v26 = vcombine.high %v4784_v7, %v4784_v7  ;;  %v5071_v3 = vmax.f32 %v4784_v7, 0.0  ;;  %v4828_v22 = vcombine.high %v4752_v46, %v4752_v46  ;;  %v4835_v20 = vrot.slane %v4752_v46, %v20561_v25  ;;  %v4679_v11 = vpop.f32.mrf.mxu0 }
 0x42e   : > { %v5078_v31 = vmax.f32 %v4810_v54, 0.0  ;;  %v5200_v59 = vcombine.low %v5075_v45, %v5076_v56  ;;  %v5214_v41 = vrot.slane %v5077_v38, %v20561_v25  ;;  %v4793_v27 = vcombine.high %v4791_v63, %v4791_v63 }
 0x42f   : > { %v5072_v36 = vmax.f32 %v4792_v26, 0.0  ;;  %v5073_v15 = vmax.f32 %v4791_v63, 0.0  ;;  %v4842_v17 = vrot.slane %v4828_v22, %v20561_v25  ;;  %v4843_v57 = vcombine.high %v4835_v20, %v4835_v20  ;;  %v19012_v34 = vpop.f32.mrf.mxu0 }
 0x430   : > { %v5207_v39 = vrot.slane %v5200_v59, %v20561_v25  ;;  %v5074_v5 = vmax.f32 %v4793_v27, 0.0  ;;  %v5083_v44 = vmax.f32 %v4835_v20, 0.0  ;;  %v4751_v2 = vadd.f32 %v22196_v32, %v4730_v47 }
 0x431   : > { %v5183_v8 = vcombine.low %v5071_v3, %v5072_v36  ;;  %v4844_v21 = vcombine.high %v4842_v17, %v4842_v17  ;;  %v5084_v29 = vmax.f32 %v4843_v57, 0.0  ;;  %v5085_v10 = vmax.f32 %v4842_v17, 0.0  ;;  %v4689_v61 = vpop.f32.mrf.mxu0 }
 0x432   : > { %v5215_v4 = vcombine.low %v5207_v39, %v5214_v41  ;;  %v5184_v48 = vcombine.low %v5073_v15, %v5074_v5  ;;  %v4811_v58 = vcombine.high %v4751_v2, %v4751_v2  ;;  %v4818_v37 = vrot.slane %v4751_v2, %v20561_v25 }
 0x433   : > { %v5191_v16 = vrot.slane %v5183_v8, %v20561_v25  ;;  %v5086_v42 = vmax.f32 %v4844_v21, 0.0  ;;  %v5247_v1 = vrot.slane %v5084_v29, %v20561_v25  ;;  %v4733_v6 = vadd.f32 %v19009_v33, %v4281_v50  ;;  %v19015_v22 = vpop.f32.mrf.mxu0 }
 0x434   : > { %v5448_v30 = vrot.slane %v5215_v4, 7  ;;  %v5198_v51 = vrot.slane %v5184_v48, %v20561_v25  ;;  %v4825_v24 = vrot.slane %v4811_v58, %v20561_v25  ;;  %v4826_v14 = vcombine.high %v4818_v37, %v4818_v37 }
 0x435   : > { %v22233_v52 = vcombine.low %v5085_v10, %v5086_v42  ;;  %v5079_v18 = vmax.f32 %v4818_v37, 0.0  ;;  %v4754_v12 = vadd.f32 %v22196_v32, %v4733_v6  ;;  %v4732_v49 = vadd.f32 %v4679_v11, %v22199_v13  ;;  %v4699_v29 = vpop.f32.mrf.mxu0 }
 0x436   : > { %v22237_v40 = vcombine.low %v5191_v16, %v5198_v51  ;;  %v4827_v55 = vcombine.high %v4825_v24, %v4825_v24  ;;  %v5080_v9 = vmax.f32 %v4826_v14, 0.0  ;;  %v5081_v45 = vmax.f32 %v4825_v24, 0.0 }
 0x437   : > { %v5257_v50 = vrot.slane %v22233_v52, %v20561_v25  ;;  %v5216_v7 = vcombine.low %v5078_v31, %v5079_v18  ;;  %v4862_v46 = vcombine.high %v4754_v12, %v4754_v12  ;;  %v4869_v47 = vrot.slane %v4754_v12, %v20561_v25 }
 0x438   : > { %v5447_v33 = vrot.slane %v22237_v40, 7  ;;  %v5082_v54 = vmax.f32 %v4827_v55, 0.0  ;;  %v5217_v56 = vcombine.low %v5080_v9, %v5081_v45  ;;  %v4753_v38 = vadd.f32 %v22196_v32, %v4732_v49  ;;  %v19018_v55 = vpop.f32.mrf.mxu0 }
 0x439   : > { %v5224_v13 = vrot.slane %v5216_v7, %v20561_v25  ;;  %v4876_v63 = vrot.slane %v4862_v46, %v20561_v25  ;;  %v4877_v26 = vcombine.high %v4869_v47, %v4869_v47  ;;  %v5091_v3 = vmax.f32 %v4869_v47, 0.0 }
 0x43a   : > { %v5449_v20 = vsel %vm899_vm0, %v5447_v33, %v5448_v30  ;;  %v5231_v11 = vrot.slane %v5217_v56, %v20561_v25  ;;  %v5233_v31 = vcombine.low %v5082_v54, %v5083_v44  ;;  %v4845_v59 = vcombine.high %v4753_v38, %v4753_v38 }
 0x43b   : > { %v5495_v41 = vsel %vm3044_vm7, %v5449_v20, 0.0  ;;  %v4878_v27 = vcombine.high %v4876_v63, %v4876_v63  ;;  %v5092_v36 = vmax.f32 %v4877_v26, 0.0  ;;  %v5093_v15 = vmax.f32 %v4876_v63, 0.0 }
 0x43c   : > { %v5536_v17 = vcombine.high %v5495_v41, %v5495_v41  ;;  %v22252_v57 = vrot.slane %v5495_v41, %v20561_v25  ;;  %v5232_v39 = vcombine.low %v5224_v13, %v5231_v11  ;;  %v5240_v5 = vrot.slane %v5233_v31, %v20561_v25 }
 0x43d   : > { %v5094_v2 = vmax.f32 %v4878_v27, 0.0  ;;  %v5280_v8 = vrot.slane %v5091_v3, %v20561_v25  ;;  %v22256_v21 = vcombine.low %v5092_v36, %v5093_v15  ;;  %v4852_v44 = vrot.slane %v4753_v38, %v20561_v25 }
 0x43e   : > { %v22260_v10 = vrot.slane %v5536_v17, %v20561_v25  ;;  %v5248_v4 = vcombine.low %v5240_v5, %v5247_v1  ;;  %v5450_v48 = vrot.slane %v5232_v39, 7  ;;  %v4859_v58 = vrot.slane %v4845_v59, %v20561_v25 }
 0x43f   : > { %v5290_v37 = vrot.slane %v22256_v21, %v20561_v25  ;;  %v4860_v16 = vcombine.high %v4852_v44, %v4852_v44  ;;  %v5087_v42 = vmax.f32 %v4852_v44, 0.0  ;;  %v4735_v6 = vadd.f32 %v19012_v34, %v22201_v23 }
 0x440   : > { %v5451_v30 = vrot.slane %v5248_v4, 7  ;;  %v22267_v51 = vsel %vm899_vm0, 0.0, %v5450_v48  ;;  %v4861_v24 = vcombine.high %v4859_v58, %v4859_v58  ;;  %v5089_v14 = vmax.f32 %v4859_v58, 0.0 }
 0x441   : > { %v5552_v18 = vcombine.high %v22267_v51, %v22267_v51  ;;  %v22273_v1 = vrot.slane %v22267_v51, %v20561_v25  ;;  %v5088_v12 = vmax.f32 %v4860_v16, 0.0  ;;  %v4756_v49 = vadd.f32 %v22196_v32, %v4735_v6 }
 0x442   : > { %v22277_v9 = vsel %vm899_vm0, %v5450_v48, %v5451_v30  ;;  %v5090_v23 = vmax.f32 %v4861_v24, 0.0  ;;  %v4734_v34 = vadd.f32 %v4689_v61, %v22203_v0  ;;  %v4737_v45 = vadd.f32 %v19015_v22, %v22205_v28 }
 0x443   : > { %v5250_v7 = vcombine.low %v5087_v42, %v5088_v12  ;;  %v4896_v46 = vcombine.high %v4756_v49, %v4756_v49  ;;  %v4903_v47 = vrot.slane %v4756_v49, %v20561_v25  ;;  %v4736_v54 = vadd.f32 %v4699_v29, %v22209_v62 }
 0x444   : > { %v5266_v56 = vcombine.low %v5089_v14, %v5090_v23  ;;  %v4755_v38 = vadd.f32 %v22196_v32, %v4734_v34  ;;  %v4758_v13 = vadd.f32 %v22196_v32, %v4737_v45  ;;  %v4739_v63 = vadd.f32 %v19018_v55, %v22211_v43 }
 0x445   : > { %v5264_v26 = vrot.slane %v5250_v7, %v20561_v25  ;;  %v4910_v3 = vrot.slane %v4896_v46, %v20561_v25  ;;  %v4911_v0 = vcombine.high %v4903_v47, %v4903_v47  ;;  %v5099_v61 = vmax.f32 %v4903_v47, 0.0 }
 0x446   : > { %v5273_v28 = vrot.slane %v5266_v56, %v20561_v25  ;;  %v4879_v22 = vcombine.high %v4755_v38, %v4755_v38  ;;  %v4886_v20 = vrot.slane %v4755_v38, %v20561_v25  ;;  %v4930_v11 = vcombine.high %v4758_v13, %v4758_v13 }
 0x447   : > { %v22293_v62 = vcombine.low %v5257_v50, %v5264_v26  ;;  %v4912_v31 = vcombine.high %v4910_v3, %v4910_v3  ;;  %v5100_v59 = vmax.f32 %v4911_v0, 0.0  ;;  %v5101_v43 = vmax.f32 %v4910_v3, 0.0 }
 0x448   : > { %v5281_v41 = vcombine.low %v5273_v28, %v5280_v8  ;;  %v4893_v27 = vrot.slane %v4879_v22, %v20561_v25  ;;  %v4894_v36 = vcombine.high %v4886_v20, %v4886_v20  ;;  %v5095_v15 = vmax.f32 %v4886_v20, 0.0 }
 0x449   : > { %v5453_v17 = vrot.slane %v22293_v62, 7  ;;  %v5102_v39 = vmax.f32 %v4912_v31, 0.0  ;;  %v5315_v5 = vcombine.low %v5099_v61, %v5100_v59  ;;  %v22298_v44 = vrot.slane %v4758_v13, %v20561_v25 }
 0x44a   : > { %v5454_v29 = vrot.slane %v5281_v41, 7  ;;  %v4895_v4 = vcombine.high %v4893_v27, %v4893_v27  ;;  %v5096_v52 = vmax.f32 %v4894_v36, 0.0  ;;  %v5097_v50 = vmax.f32 %v4893_v27, 0.0 }
 0x44b   : > { %v5316_v48 = vcombine.low %v5101_v43, %v5102_v39  ;;  %v5323_v58 = vrot.slane %v5315_v5, %v20561_v25  ;;  %v5283_v16 = vcombine.low %v5094_v2, %v5095_v15  ;;  %v4944_v8 = vrot.slane %v4930_v11, %v20561_v25  ;;  %v4709_v2 = vpop.f32.mrf.mxu0 }
 0x44c   : > { %v22305_v42 = vsel %vm899_vm0, %v5453_v17, %v5454_v29  ;;  %v5098_v6 = vmax.f32 %v4895_v4, 0.0  ;;  %v5299_v30 = vcombine.low %v5096_v52, %v5097_v50  ;;  %v4945_v24 = vcombine.high %v22298_v44, %v22298_v44 }
 0x44d   : > { %v5330_v14 = vrot.slane %v5316_v48, %v20561_v25  ;;  %v5297_v12 = vrot.slane %v5283_v16, %v20561_v25  ;;  %v4946_v49 = vcombine.high %v4944_v8, %v4944_v8  ;;  %v5107_v55 = vmax.f32 %v22298_v44, 0.0  ;;  %v19021_v59 = vpop.f32.mrf.mxu0 }
 0x44e   : > { %v5306_v23 = vrot.slane %v5299_v30, %v20561_v25  ;;  %v5313_v34 = vrot.slane %v5098_v6, %v20561_v25  ;;  %v5108_v45 = vmax.f32 %v4945_v24, 0.0  ;;  %v5109_v7 = vmax.f32 %v4944_v8, 0.0 }
 0x44f   : > { %v22314_v46 = vcombine.low %v5323_v58, %v5330_v14  ;;  %v5298_v47 = vcombine.low %v5290_v37, %v5297_v12  ;;  %v5110_v56 = vmax.f32 %v4946_v49, 0.0  ;;  %v4757_v38 = vadd.f32 %v22196_v32, %v4736_v54  ;;  %v4719_v58 = vpop.f32.mrf.mxu0 }
 0x450   : > { %v5314_v13 = vcombine.low %v5306_v23, %v5313_v34  ;;  %v5349_v26 = vcombine.low %v5108_v45, %v5109_v7  ;;  %v4760_v3 = vadd.f32 %v22196_v32, %v4739_v63  ;;  %v4738_v0 = vadd.f32 %v4709_v2, %v22213_v19 }
 0x451   : > { %v5459_v61 = vrot.slane %v22314_v46, 7  ;;  %v5456_v28 = vrot.slane %v5298_v47, 7  ;;  %v4913_v22 = vcombine.high %v4757_v38, %v4757_v38  ;;  %v4920_v20 = vrot.slane %v4757_v38, %v20561_v25 }
 0x452   : > { %v5457_v11 = vrot.slane %v5314_v13, 7  ;;  %v5363_v31 = vrot.slane %v5349_v26, %v20561_v25  ;;  %v4964_v21 = vcombine.high %v4760_v3, %v4760_v3  ;;  %v4971_v37 = vrot.slane %v4760_v3, %v20561_v25 }
 0x453   : > { %v22327_v54 = vsel %vm899_vm0, 0.0, %v5456_v28  ;;  %v4927_v63 = vrot.slane %v4913_v22, %v20561_v25  ;;  %v4928_v43 = vcombine.high %v4920_v20, %v4920_v20  ;;  %v5103_v19 = vmax.f32 %v4920_v20, 0.0 }
 0x454   : > { %v22331_v41 = vsel %vm899_vm0, %v5456_v28, %v5457_v11  ;;  %v5618_v27 = vcombine.high %v22327_v54, %v22327_v54  ;;  %v4978_v36 = vrot.slane %v4964_v21, %v20561_v25  ;;  %v4979_v15 = vcombine.high %v4971_v37, %v4971_v37 }
 0x455   : > { %v4929_v39 = vcombine.high %v4927_v63, %v4927_v63  ;;  %v5104_v5 = vmax.f32 %v4928_v43, 0.0  ;;  %v5105_v44 = vmax.f32 %v4927_v63, 0.0  ;;  %v5115_v29 = vmax.f32 %v4971_v37, 0.0 }
 0x456   : > { %v4980_v4 = vcombine.high %v4978_v36, %v4978_v36  ;;  %v5116_v52 = vmax.f32 %v4979_v15, 0.0  ;;  %v5117_v50 = vmax.f32 %v4978_v36, 0.0  ;;  %v4759_v48 = vadd.f32 %v22196_v32, %v4738_v0 }
 0x457   : > { %v5106_v16 = vmax.f32 %v4929_v39, 0.0  ;;  %v5332_v8 = vcombine.low %v5103_v19, %v5104_v5  ;;  %v5346_v6 = vrot.slane %v5105_v44, %v20561_v25  ;;  %v4741_v30 = vadd.f32 %v19021_v59, %v22215_v53 }
 0x458   : > { %v5118_v24 = vmax.f32 %v4980_v4, 0.0  ;;  %v5382_v14 = vcombine.low %v5115_v29, %v5116_v52  ;;  %v4947_v12 = vcombine.high %v4759_v48, %v4759_v48  ;;  %v4954_v49 = vrot.slane %v4759_v48, %v20561_v25 }
 0x459   : > { %v5339_v2 = vrot.slane %v5332_v8, %v20561_v25  ;;  %v5348_v23 = vcombine.low %v5106_v16, %v5107_v55  ;;  %v4762_v34 = vadd.f32 %v22196_v32, %v4741_v30  ;;  %v4740_v45 = vadd.f32 %v4719_v58, %v22217_v35 }
 0x45a   : > { %v5396_v7 = vrot.slane %v5382_v14, %v20561_v25  ;;  %v5398_v47 = vcombine.low %v5117_v50, %v5118_v24  ;;  %v4961_v38 = vrot.slane %v4947_v12, %v20561_v25  ;;  %v4962_v13 = vcombine.high %v4954_v49, %v4954_v49 }
 0x45b   : > { %v5347_v26 = vcombine.low %v5339_v2, %v5346_v6  ;;  %v5356_v53 = vrot.slane %v5348_v23, %v20561_v25  ;;  %v5111_v3 = vmax.f32 %v4954_v49, 0.0  ;;  %v4998_v0 = vcombine.high %v4762_v34, %v4762_v34 }
 0x45c   : > { %v4963_v28 = vcombine.high %v4961_v38, %v4961_v38  ;;  %v5112_v22 = vmax.f32 %v4962_v13, 0.0  ;;  %v5113_v20 = vmax.f32 %v4961_v38, 0.0  ;;  %v5005_v55 = vrot.slane %v4762_v34, %v20561_v25 }
 0x45d   : > { %v22347_v11 = vcombine.low %v5356_v53, %v5363_v31  ;;  %v5460_v21 = vrot.slane %v5347_v26, 7  ;;  %v5365_v35 = vcombine.low %v5110_v56, %v5111_v3  ;;  %v5012_v37 = vrot.slane %v4998_v0, %v20561_v25 }
 0x45e   : > { %v5114_v59 = vmax.f32 %v4963_v28, 0.0  ;;  %v5379_v63 = vrot.slane %v5112_v22, %v20561_v25  ;;  %v5013_v43 = vcombine.high %v5005_v55, %v5005_v55  ;;  %v5123_v19 = vmax.f32 %v5005_v55, 0.0 }
 0x45f   : > { %v22354_v36 = vsel %vm899_vm0, %v5459_v61, %v5460_v21  ;;  %v5462_v15 = vrot.slane %v22347_v11, 7  ;;  %v5372_v39 = vrot.slane %v5365_v35, %v20561_v25  ;;  %v5014_v31 = vcombine.high %v5012_v37, %v5012_v37 }
 0x460   : > { %v5381_v5 = vcombine.low %v5113_v20, %v5114_v59  ;;  %v5124_v44 = vmax.f32 %v5013_v43, 0.0  ;;  %v5125_v56 = vmax.f32 %v5012_v37, 0.0  ;;  %v4761_v29 = vadd.f32 %v22196_v32, %v4740_v45 }
 0x461   : > { %v5380_v4 = vcombine.low %v5372_v39, %v5379_v63  ;;  %v5126_v52 = vmax.f32 %v5014_v31, 0.0  ;;  %v5405_v50 = vrot.slane %v5398_v47, %v20561_v25  ;;  %v5487_v48 = vsel %vm899_vm0, 0.0, %v5447_v33 }
 0x462   : > { %v5389_v58 = vrot.slane %v5381_v5, %v20561_v25  ;;  %v5431_v16 = vcombine.low %v5124_v44, %v5125_v56  ;;  %v4981_v8 = vcombine.high %v4761_v29, %v4761_v29  ;;  %v4988_v6 = vrot.slane %v4761_v29, %v20561_v25 }
 0x463   : > { %v5463_v30 = vrot.slane %v5380_v4, 7  ;;  %v5445_v24 = vrot.slane %v5126_v52, %v20561_v25  ;;  %v5519_v14 = vcombine.high %v5487_v48, %v5487_v48  ;;  %v5526_v32 = vrot.slane %v5487_v48, %v20561_v25 }
 0x464   : > { %v22367_v12 = vcombine.low %v5389_v58, %v5396_v7  ;;  %v5438_v49 = vrot.slane %v5431_v16, %v20561_v25  ;;  %v4995_v40 = vrot.slane %v4981_v8, %v20561_v25  ;;  %v4996_v2 = vcombine.high %v4988_v6, %v4988_v6 }
 0x465   : > { %v22374_v33 = vsel %vm899_vm0, %v5462_v15, %v5463_v30  ;;  %v5119_v23 = vmax.f32 %v4988_v6, 0.0  ;;  %v22377_v34 = vrot.slane %v5519_v14, %v20561_v25  ;;  %v22379_v45 = vcombine.high %v5526_v32, %v5526_v32 }
 0x466   : > { %v26390_v47 = vrot.slane %v22367_v12, 7  ;;  %v22382_v7 = vcombine.low %v5438_v49, %v5445_v24  ;;  %v4997_v38 = vcombine.high %v4995_v40, %v4995_v40  ;;  %v5120_v13 = vmax.f32 %v4996_v2, 0.0 }
 0x467   : > { %v5121_v26 = vmax.f32 %v4995_v40, 0.0  ;;  %v5412_v53 = vrot.slane %v5119_v23, %v20561_v25  ;;  %v22387_v3 = vcombine.high %v22377_v34, %v22377_v34  ;;  %v6354_v0 = vcombine.low %v5526_v32, %v22379_v45 }
 0x468   : > { %v5122_v22 = vmax.f32 %v4997_v38, 0.0  ;;  %v22393_v20 = vcombine.high %v22252_v57, %v22252_v57  ;;  %v6372_v55 = vcombine.low %v22260_v10, %v22273_v1  ;;  %v5496_v31 = vsel %vm3044_vm7, %v22277_v9, 0.0 }
 0x469   : > { %v5413_v21 = vcombine.low %v5405_v50, %v5412_v53  ;;  %v5414_v35 = vcombine.low %v5120_v13, %v5121_v26  ;;  %v6355_v37 = vcombine.low %v22377_v34, %v22387_v3  ;;  %v6362_v59 = vrot.slane %v6354_v0, %v20561_v25 }
 0x46a   : > { %v5415_v63 = vcombine.low %v5122_v22, %v5123_v19  ;;  %v6371_v43 = vcombine.low %v22252_v57, %v22393_v20  ;;  %v6386_v39 = vrot.slane %v6372_v55, %v20561_v25  ;;  %v22411_v29 = vrot.slane %v5552_v18, %v20561_v25 }
 0x46b   : > { %v5422_v5 = vrot.slane %v5414_v35, %v20561_v25  ;;  %v5466_v44 = vrot.slane %v5413_v21, 7  ;;  %v6369_v56 = vrot.slane %v6355_v37, %v20561_v25  ;;  %v5567_v52 = vcombine.high %v22273_v1, %v22273_v1 }
 0x46c   : > { %v5429_v19 = vrot.slane %v5415_v63, %v20561_v25  ;;  %v6379_v4 = vrot.slane %v6371_v43, %v20561_v25  ;;  %v22418_v9 = vrot.slane %v5496_v31, %v20561_v25  ;;  %v22425_v51 = vcombine.high %v22411_v29, %v22411_v29 }
 0x46d   : > { %v5467_v50 = vsel %vm899_vm0, %v26390_v47, %v5466_v44  ;;  %v6370_v48 = vcombine.low %v6362_v59, %v6369_v56  ;;  %v17900_v18 = vrot.slane %v22273_v1, 9  ;;  %v5815_v6 = vrot.slane %v5567_v52, 7 }
 0x46e   : > { %v22428_v58 = vcombine.low %v5422_v5, %v5429_v19  ;;  %v22431_v16 = vsel %vm3044_vm7, %v5467_v50, 0.0  ;;  %v6387_v8 = vcombine.low %v6379_v4, %v6386_v39  ;;  %v6388_v24 = vcombine.low %v5567_v52, %v22411_v29 }
 0x46f   : > { %v5734_v30 = vcombine.high %v22431_v16, %v22431_v16  ;;  %19107 = vmatprep.mubr.f32.mxu0 %v6370_v48  ;;  %v6389_v14 = vcombine.low %v22425_v51, %v22418_v9  ;;  %v17899_v49 = vrot.slane %v5526_v32, 9  ;;  %v5816_v2 = vsel %vm20749_vm6, %v17900_v18, %v5815_v6 }
 0x470   : > { %v26389_v40 = vrot.slane %v22428_v58, 7  ;;  %19108 = vmatmul.mubr.f32.vlgmr.msra.gmra.mxu0 %v6387_v8  ;;  %v5793_v23 = vrot.slane %v22379_v45, 7  ;;  %v5796_v38 = vrot.slane %v22377_v34, 7  ;;  %v6396_v26 = vrot.slane %v6388_v24, %v20561_v25 }
 0x471   : > { %v22444_v13 = vrot.slane %v5734_v30, %v20561_v25  ;;  %v6403_v53 = vrot.slane %v6389_v14, %v20561_v25  ;;  %v5799_v0 = vrot.slane %v22387_v3, 7  ;;  %v5802_v63 = vrot.slane %v22252_v57, 7 }
 0x472   : > { %v22452_v32 = vsel %vm899_vm0, 0.0, %v26389_v40  ;;  %v5794_v22 = vsel %vm20749_vm6, %v17899_v49, %v5793_v23  ;;  %v5795_v55 = vrot.slane %v5793_v23, 2  ;;  %v5798_v21 = vrot.slane %v5796_v38, 2 }
 0x473   : > { %26547 = vst [vmem:[#allocation21_spill] sm:$0xff] %v22444_v13  ;;  %v6404_v37 = vcombine.low %v6396_v26, %v6403_v53  ;;  %v5801_v59 = vrot.slane %v5799_v0, 2  ;;  %v5489_v5 = vsel %vm899_vm0, 0.0, %v5453_v17  ;;  %v5569_v44 = vcombine.high %v5496_v31, %v5496_v31 }
 0x474   : > { %v5797_v43 = vsel %vm20749_vm6, %v5795_v55, %v5796_v38  ;;  %v5800_v39 = vsel %vm20749_vm6, %v5798_v21, %v5799_v0  ;;  %v5804_v19 = vrot.slane %v5802_v63, 2  ;;  %v22470_v52 = vcombine.high %v22418_v9, %v22418_v9 }
 0x475   : > { %19110 = vmatprep.mubr.f32.mxu0 %v6404_v37  ;;  %v5803_v56 = vsel %vm20749_vm6, %v5801_v59, %v5802_v63  ;;  %v5967_v4 = vcombine.low %v5794_v22, %v5797_v43  ;;  %v22473_v48 = vrot.slane %v5569_v44, %v20561_v25  ;;  %v5585_v18 = vcombine.high %v5489_v5, %v5489_v5 }
 0x476   : > { %v5968_v50 = vcombine.low %v5800_v39, %v5803_v56  ;;  %v22476_v62 = vrot.slane %v5489_v5, %v20561_v25  ;;  %v5783_v31 = vcombine.high %v22260_v10, %v22260_v10  ;;  %v5805_v8 = vrot.slane %v22393_v20, 7 }
 0x477   : > { %v5975_v17 = vrot.slane %v5967_v4, %v20561_v25  ;;  %v5808_v30 = vrot.slane %v22260_v10, 7  ;;  %v6405_v49 = vcombine.low %v22470_v52, %v22473_v48  ;;  %v5817_v23 = vrot.slane %v5815_v6, 2 }
 0x478   : > { %v5982_v24 = vrot.slane %v5968_v50, %v20561_v25  ;;  %v22486_v14 = vcombine.high %v22476_v62, %v22476_v62  ;;  %v5806_v38 = vsel %vm20749_vm6, %v5804_v19, %v5805_v8  ;;  %v5807_v26 = vrot.slane %v5805_v8, 2 }
 0x479   : > { %v5810_v53 = vrot.slane %v5808_v30, 2  ;;  %v5811_v0 = vrot.slane %v5783_v31, 7  ;;  %v6413_v21 = vrot.slane %v6405_v49, %v20561_v25  ;;  %v5818_v37 = vrot.slane %v22411_v29, 7 }
 0x47a   : > { %v5983_v22 = vcombine.low %v5975_v17, %v5982_v24  ;;  %v6406_v55 = vcombine.low %v22476_v62, %v22486_v14  ;;  %v5809_v59 = vsel %vm20749_vm6, %v5807_v26, %v5808_v30  ;;  %v5821_v63 = vrot.slane %v22425_v51, 7 }
 0x47b   : > { %v5812_v6 = vsel %vm20749_vm6, %v5810_v53, %v5811_v0  ;;  %v5824_v43 = vrot.slane %v22418_v9, 7  ;;  %v5984_v5 = vcombine.low %v5806_v38, %v5809_v59  ;;  %v5819_v56 = vsel %vm20749_vm6, %v5817_v23, %v5818_v37 }
 0x47c   : > { %19054 = vmatprep.mubr.f32.mxu1 %v5983_v22  ;;  %v6420_v39 = vrot.slane %v6406_v55, %v20561_v25  ;;  %v5985_v44 = vcombine.low %v5812_v6, %v5816_v2  ;;  %v5820_v19 = vrot.slane %v5818_v37, 2  ;;  %v5823_v4 = vrot.slane %v5821_v63, 2 }
 0x47d   : > { %v5826_v50 = vrot.slane %v5824_v43, 2  ;;  %v5827_v17 = vrot.slane %v22470_v52, 7  ;;  %v5992_v8 = vrot.slane %v5984_v5, %v20561_v25  ;;  %v5497_v24 = vsel %vm3044_vm7, %v22305_v42, 0.0 }
 0x47e   : > { %v6421_v31 = vcombine.low %v6413_v21, %v6420_v39  ;;  %v5999_v30 = vrot.slane %v5985_v44, %v20561_v25  ;;  %v5822_v49 = vsel %vm20749_vm6, %v5820_v19, %v5821_v63  ;;  %v5825_v2 = vsel %vm20749_vm6, %v5823_v4, %v5824_v43  ;;  %v20084_v43 = vld [vmem:[#allocation6 + $0x178] sm:$0xff] }
 0x47f   : > { %v5828_v23 = vsel %vm20749_vm6, %v5826_v50, %v5827_v17  ;;  %v22517_v38 = vrot.slane %v5585_v18, %v20561_v25  ;;  %v6001_v53 = vcombine.low %v5819_v56, %v5822_v49  ;;  %v5602_v22 = vcombine.high %v5497_v24, %v5497_v24  ;;  %v20085_v56 = vld [vmem:[#allocation6 + $0x170] sm:$0xff]  ;;  %v20086_v49 = vld [vmem:[#allocation6 + $0x168] sm:$0xff] }
 0x480   : > { %19111 = vmatmul.mubr.f32.gmra.mxu0 %v6421_v31  ;;  %v6000_v26 = vcombine.low %v5992_v8, %v5999_v30  ;;  %v6002_v0 = vcombine.low %v5825_v2, %v5828_v23  ;;  %v22524_v55 = vrot.slane %v5497_v24, %v20561_v25  ;;  %v22528_v21 = vrot.slane %v22327_v54, %v20561_v25 }
 0x481   : > { %v22521_v42 = vcombine.high %v22517_v38, %v22517_v38  ;;  %v22534_v18 = vrot.slane %v5618_v27, %v20561_v25  ;;  %v6009_v37 = vrot.slane %v6001_v53, %v20561_v25  ;;  %v22539_v6 = vrot.slane %v5602_v22, %v20561_v25 }
 0x482   : > { %19055 = vmatmul.mubr.f32.vlgmr.msra.gmra.mxu1 %v6000_v26  ;;  %v6016_v59 = vrot.slane %v6002_v0, %v20561_v25  ;;  %v22543_v63 = vcombine.high %v22473_v48, %v22473_v48  ;;  %v22547_v39 = vcombine.high %v22524_v55, %v22524_v55  ;;  %v22553_v27 = vcombine.high %v22528_v21, %v22528_v21 }
 0x483   : > { %19129 = vmatpush3.msra.mxu1 %v20084_v43  ;;  %v6422_v54 = vcombine.low %v22517_v38, %v22521_v42  ;;  %v5829_v5 = vrot.slane %v5827_v17, 2  ;;  %v6439_v19 = vcombine.low %v22539_v6, %v22528_v21  ;;  %v5830_v4 = vrot.slane %v22473_v48, 7 }
 0x484   : > { %v6017_v44 = vcombine.low %v6009_v37, %v6016_v59  ;;  %19130 = vmatprep.subr.mxu1 %v20085_v56  ;;  %v5833_v50 = vrot.slane %v22543_v63, 7  ;;  %v6423_v31 = vcombine.low %v22524_v55, %v22547_v39  ;;  %v5859_v30 = vrot.slane %v22553_v27, 7 }
 0x485   : > { %v6430_v8 = vrot.slane %v6422_v54, %v20561_v25  ;;  %19131 = vmatpush3.msra.mxu1 %v20085_v56  ;;  %v6440_v17 = vcombine.low %v22553_v27, %v22534_v18  ;;  %v6447_v24 = vrot.slane %v6439_v19, %v20561_v25  ;;  %v5831_v2 = vsel %vm20749_vm6, %v5829_v5, %v5830_v4 }
 0x486   : > { %19057 = vmatprep.mubr.f32.mxu1 %v6017_v44  ;;  %19132 = vmatprep.subr.mxu1 %v20086_v49  ;;  %v5832_v23 = vrot.slane %v5830_v4, 2  ;;  %v17901_v26 = vrot.slane %v22476_v62, 9  ;;  %v6437_v53 = vrot.slane %v6423_v31, %v20561_v25  ;;  %v5837_v22 = vrot.slane %v22486_v14, 7  ;;  %v20087_v62 = vld [vmem:[#allocation6 + $0x160] sm:$0xff] }
 0x487   : > { %v6454_v0 = vrot.slane %v6440_v17, %v20561_v25  ;;  %v5840_v37 = vrot.slane %v22517_v38, 7  ;;  %19133 = vmatpush3.msra.mxu1 %v20086_v49  ;;  %v5498_v43 = vsel %vm3044_vm7, %v22331_v41, 0.0  ;;  %v22579_v54 = vcombine.high %v22534_v18, %v22534_v18  ;;  %v20088_v49 = vld [vmem:[#allocation6 + $0x158] sm:$0xff] }
 0x488   : > { %v5834_v59 = vsel %vm20749_vm6, %v5832_v23, %v5833_v50  ;;  %19134 = vmatprep.subr.mxu1 %v20087_v62  ;;  %v5843_v5 = vrot.slane %v22521_v42, 7  ;;  %v6438_v44 = vcombine.low %v6430_v8, %v6437_v53  ;;  %v5838_v19 = vsel %vm20749_vm6, %v17901_v26, %v5837_v22 }
 0x489   : > { %v6455_v56 = vcombine.low %v6447_v24, %v6454_v0  ;;  %v5839_v4 = vrot.slane %v5837_v22, 2  ;;  %19135 = vmatpush3.msra.mxu1 %v20087_v62  ;;  %v6018_v31 = vcombine.low %v5831_v2, %v5834_v59  ;;  %v5635_v50 = vcombine.high %v5498_v43, %v5498_v43  ;;  %v20089_v62 = vld [vmem:[#allocation6 + $0x150] sm:$0xff] }
 0x48a   : > { %v22585_v17 = vrot.slane %v5498_v43, %v20561_v25  ;;  %v5842_v41 = vrot.slane %v5840_v37, 2  ;;  %19136 = vmatprep.subr.mxu1 %v20088_v49  ;;  %19113 = vmatprep.mubr.f32.mxu0 %v6438_v44  ;;  %v5845_v40 = vrot.slane %v5843_v5, 2  ;;  %v5846_v8 = vrot.slane %v22524_v55, 7 }
 0x48b   : > { %v5841_v23 = vsel %vm20749_vm6, %v5839_v4, %v5840_v37  ;;  %v5849_v24 = vrot.slane %v22547_v39, 7  ;;  %19137 = vmatpush3.msra.mxu1 %v20088_v49  ;;  %19114 = vmatmul.mubr.f32.gmra.mxu0 %v6455_v56  ;;  %v6026_v2 = vrot.slane %v6018_v31, %v20561_v25  ;;  %v22593_v53 = vrot.slane %v5635_v50, %v20561_v25 }
 0x48c   : > { %26548 = vst [vmem:[#allocation22_spill] sm:$0xff] %v22585_v17  ;;  %v6019_v26 = vcombine.low %v5838_v19, %v5841_v23  ;;  %v22597_v0 = vcombine.high %v22585_v17, %v22585_v17  ;;  %v6456_v22 = vcombine.low %v22579_v54, %v22585_v17  ;;  %v5844_v37 = vsel %vm20749_vm6, %v5842_v41, %v5843_v5  ;;  %v20090_v41 = vld [vmem:[#allocation6 + $0x148] sm:$0xff] }
 0x48d   : > { %v5847_v59 = vsel %vm20749_vm6, %v5845_v40, %v5846_v8  ;;  %v5848_v43 = vrot.slane %v5846_v8, 2  ;;  %19138 = vmatprep.subr.mxu1 %v20089_v62  ;;  %v5851_v19 = vrot.slane %v5849_v24, 2  ;;  %v5852_v4 = vrot.slane %v22539_v6, 7 }
 0x48e   : > { %v6033_v44 = vrot.slane %v6019_v26, %v20561_v25  ;;  %v6457_v56 = vcombine.low %v22597_v0, %v22593_v53  ;;  %19139 = vmatpush3.msra.mxu1 %v20089_v62  ;;  %v6464_v31 = vrot.slane %v6456_v22, %v20561_v25  ;;  %v6035_v50 = vcombine.low %v5844_v37, %v5847_v59 }
 0x48f   : > { %v5850_v5 = vsel %vm20749_vm6, %v5848_v43, %v5849_v24  ;;  %v5491_v40 = vsel %vm899_vm0, 0.0, %v5459_v61  ;;  %19140 = vmatprep.subr.mxu1 %v20090_v41  ;;  %v5853_v8 = vsel %vm20749_vm6, %v5851_v19, %v5852_v4  ;;  %v5785_v46 = vcombine.high %v22539_v6, %v22539_v6  ;;  %v20091_v61 = vld [vmem:[#allocation6 + $0x140] sm:$0xff] }
 0x490   : > { %v6034_v49 = vcombine.low %v6026_v2, %v6033_v44  ;;  %v6471_v23 = vrot.slane %v6457_v56, %v20561_v25  ;;  %v5651_v26 = vcombine.high %v5491_v40, %v5491_v40  ;;  %19141 = vmatpush3.msra.mxu1 %v20090_v41  ;;  %v6036_v62 = vcombine.low %v5850_v5, %v5853_v8  ;;  %v20092_v41 = vld [vmem:[#allocation6 + $0x138] sm:$0xff] }
 0x491   : > { %v6043_v22 = vrot.slane %v6035_v50, %v20561_v25  ;;  %v22620_v24 = vrot.slane %v5491_v40, %v20561_v25  ;;  %19142 = vmatprep.subr.mxu1 %v20091_v61  ;;  %v5854_v59 = vrot.slane %v5852_v4, 2  ;;  %v17902_v43 = vrot.slane %v22528_v21, 9 }
 0x492   : > { %19058 = vmatmul.mubr.f32.gmra.mxu1 %v6034_v49  ;;  %v6472_v2 = vcombine.low %v6464_v31, %v6471_v23  ;;  %v22625_v37 = vrot.slane %v5651_v26, %v20561_v25  ;;  %v6050_v44 = vrot.slane %v6036_v62, %v20561_v25  ;;  %v5855_v19 = vrot.slane %v5785_v46, 7  ;;  %v20093_v46 = vld [vmem:[#allocation6 + $0x130] sm:$0xff] }
 0x493   : > { %v22631_v56 = vcombine.high %v22620_v24, %v22620_v24  ;;  %v5861_v5 = vrot.slane %v5859_v30, 2  ;;  %19143 = vmatpush3.msra.mxu1 %v20091_v61  ;;  %v5860_v4 = vsel %vm20749_vm6, %v17902_v43, %v5859_v30  ;;  %v5862_v50 = vrot.slane %v22534_v18, 7 }
 0x494   : > { %19116 = vmatprep.mubr.f32.mxu0 %v6472_v2  ;;  %v22637_v31 = vcombine.high %v22625_v37, %v22625_v37  ;;  %v5865_v40 = vrot.slane %v22579_v54, 7  ;;  %19144 = vmatprep.subr.mxu1 %v20092_v41  ;;  %v6051_v49 = vcombine.low %v6043_v22, %v6050_v44  ;;  %v5856_v8 = vsel %vm20749_vm6, %v5854_v59, %v5855_v19 }
 0x495   : > { %v6473_v23 = vcombine.low %v22620_v24, %v22631_v56  ;;  %v22652_v27 = vsel %vm899_vm0, 0.0, %v5462_v15  ;;  %19145 = vmatpush3.msra.mxu1 %v20092_v41  ;;  %v5863_v26 = vsel %vm20749_vm6, %v5861_v5, %v5862_v50  ;;  %v5864_v62 = vrot.slane %v5862_v50, 2  ;;  %v20094_v5 = vld [vmem:[#allocation6 + $0x128] sm:$0xff] }
 0x496   : > { %v6474_v30 = vcombine.low %v22625_v37, %v22637_v31  ;;  %v6052_v22 = vcombine.low %v5856_v8, %v5860_v4  ;;  %19146 = vmatprep.subr.mxu1 %v20093_v46  ;;  %19060 = vmatprep.mubr.f32.mxu1 %v6051_v49  ;;  %v5499_v11 = vsel %vm3044_vm7, %v22354_v36, 0.0  ;;  %v22663_v15 = vrot.slane %v22652_v27, %v20561_v25 }
 0x497   : > { %v6481_v61 = vrot.slane %v6473_v23, %v20561_v25  ;;  %v22667_v2 = vcombine.high %v22593_v53, %v22593_v53  ;;  %19147 = vmatpush3.msra.mxu1 %v20093_v46  ;;  %v5866_v43 = vsel %vm20749_vm6, %v5864_v62, %v5865_v40  ;;  %v5668_v19 = vcombine.high %v5499_v11, %v5499_v11  ;;  %v20095_v62 = vld [vmem:[#allocation6 + $0x120] sm:$0xff] }
 0x498   : > { %v6488_v59 = vrot.slane %v6474_v30, %v20561_v25  ;;  %v6060_v44 = vrot.slane %v6052_v22, %v20561_v25  ;;  %19148 = vmatprep.subr.mxu1 %v20094_v5  ;;  %v6053_v36 = vcombine.low %v5863_v26, %v5866_v43  ;;  %v22674_v4 = vrot.slane %v5499_v11, %v20561_v25 }
 0x499   : > { %v5867_v50 = vrot.slane %v5865_v40, 2  ;;  %v5868_v41 = vrot.slane %v22585_v17, 7  ;;  %19149 = vmatpush3.msra.mxu1 %v20094_v5  ;;  %v22678_v23 = vrot.slane %v5668_v19, %v20561_v25  ;;  %v5871_v8 = vrot.slane %v22597_v0, 7  ;;  %v20096_v19 = vld [vmem:[#allocation6 + $0x118] sm:$0xff] }
 0x49a   : > { %v6489_v49 = vcombine.low %v6481_v61, %v6488_v59  ;;  %v5874_v30 = vrot.slane %v22593_v53, 7  ;;  %19150 = vmatprep.subr.mxu1 %v20095_v62  ;;  %v6067_v22 = vrot.slane %v6053_v36, %v20561_v25  ;;  %v22685_v26 = vcombine.high %v22674_v4, %v22674_v4 }
 0x49b   : > { %26549 = vst [vmem:[#allocation25_spill] sm:$0xff] %v22678_v23  ;;  %v5869_v40 = vsel %vm20749_vm6, %v5867_v50, %v5868_v41  ;;  %v5870_v46 = vrot.slane %v5868_v41, 2  ;;  %19151 = vmatpush3.msra.mxu1 %v20095_v62  ;;  %v6491_v61 = vcombine.low %v22678_v23, %v22663_v15  ;;  %v5873_v11 = vrot.slane %v5871_v8, 2 }
 0x49c   : > { %26550 = vst [vmem:[#allocation14_spill] sm:$0xff] %v22685_v26  ;;  %19117 = vmatmul.mubr.f32.gmra.mxu0 %v6489_v49  ;;  %v5876_v59 = vrot.slane %v5874_v30, 2  ;;  %v5877_v43 = vrot.slane %v22667_v2, 7  ;;  %19152 = vmatprep.subr.mxu1 %v20096_v19  ;;  %v6068_v5 = vcombine.low %v6060_v44, %v6067_v22  ;;  %v6490_v36 = vcombine.low %v22674_v4, %v22685_v26  ;;  %v20097_v44 = vld [vmem:[#allocation6 + $0x110] sm:$0xff] }
 0x49d   : > { %v5872_v28 = vsel %vm20749_vm6, %v5870_v46, %v5871_v8  ;;  %v5500_v50 = vsel %vm3044_vm7, %v22374_v33, 0.0  ;;  %19153 = vmatpush3.msra.mxu1 %v20096_v19  ;;  %v6505_v41 = vrot.slane %v6491_v61, %v20561_v25  ;;  %v5875_v49 = vsel %vm20749_vm6, %v5873_v11, %v5874_v30 }
 0x49e   : > { %v5878_v62 = vsel %vm20749_vm6, %v5876_v59, %v5877_v43  ;;  %v6069_v35 = vcombine.low %v5869_v40, %v5872_v28  ;;  %19154 = vmatprep.subr.mxu1 %v20097_v44  ;;  %19061 = vmatmul.mubr.f32.gmra.mxu1 %v6068_v5  ;;  %v6498_v22 = vrot.slane %v6490_v36, %v20561_v25  ;;  %v17903_v28 = vrot.slane %v22620_v24, 9  ;;  %v20098_v43 = vld [vmem:[#allocation6 + $0x108] sm:$0xff] }
 0x49f   : > { %v6070_v47 = vcombine.low %v5875_v49, %v5878_v62  ;;  %v5684_v8 = vcombine.high %v22652_v27, %v22652_v27  ;;  %v22708_v33 = vcombine.high %v22663_v15, %v22663_v15  ;;  %v22712_v30 = vrot.slane %v5500_v50, %v20561_v25  ;;  %19155 = vmatpush3.msra.mxu1 %v20097_v44  ;;  %v20099_v62 = vld [vmem:[#allocation6 + $0x100] sm:$0xff] }
 0x4a0   : > { %v6077_v46 = vrot.slane %v6069_v35, %v20561_v25  ;;  %v5881_v40 = vrot.slane %v22631_v56, 7  ;;  %v6506_v61 = vcombine.low %v6498_v22, %v6505_v41  ;;  %19156 = vmatprep.subr.mxu1 %v20098_v43  ;;  %v5884_v5 = vrot.slane %v22625_v37, 7 }
 0x4a1   : > { %26551 = vst [vmem:[#allocation17_spill] sm:$0xff] %v22712_v30  ;;  %v6084_v11 = vrot.slane %v6070_v47, %v20561_v25  ;;  %v22718_v59 = vrot.slane %v5684_v8, %v20561_v25  ;;  %v5903_v27 = vrot.slane %v22708_v33, 7  ;;  %v5887_v24 = vrot.slane %v22637_v31, 7  ;;  %19157 = vmatpush3.msra.mxu1 %v20098_v43 }
 0x4a2   : > { %v5882_v35 = vsel %vm20749_vm6, %v17903_v28, %v5881_v40  ;;  %v5883_v19 = vrot.slane %v5881_v40, 2  ;;  %19119 = vmatprep.mubr.f32.mxu0 %v6506_v61  ;;  %v5890_v49 = vrot.slane %v22674_v4, 7  ;;  %19158 = vmatprep.subr.mxu1 %v20099_v62  ;;  %v5886_v22 = vrot.slane %v5884_v5, 2 }
 0x4a3   : > { %26552 = vst [vmem:[#allocation27_spill] sm:$0xff] %v22718_v59  ;;  %v6085_v36 = vcombine.low %v6077_v46, %v6084_v11  ;;  %v22727_v47 = vcombine.high %v22718_v59, %v22718_v59  ;;  %v6507_v41 = vcombine.low %v22708_v33, %v22718_v59  ;;  %v5889_v8 = vrot.slane %v5887_v24, 2  ;;  %19159 = vmatpush3.msra.mxu1 %v20099_v62 }
 0x4a4   : > { %v5885_v44 = vsel %vm20749_vm6, %v5883_v19, %v5884_v5  ;;  %v26553_v28 = vrot.slane %v22367_v12, 7  ;;  %v5701_v11 = vcombine.high %v5500_v50, %v5500_v50  ;;  %v5888_v43 = vsel %vm20749_vm6, %v5886_v22, %v5887_v24 }
 0x4a5   : > { %19063 = vmatprep.mubr.f32.mxu1 %v6085_v36  ;;  %v6508_v40 = vcombine.low %v22727_v47, %v22712_v30  ;;  %v6515_v33 = vrot.slane %v6507_v41, %v20561_v25  ;;  %v6086_v61 = vcombine.low %v5882_v35, %v5885_v44  ;;  %v5891_v19 = vsel %vm20749_vm6, %v5889_v8, %v5890_v49 }
 0x4a6   : > { %v5493_v46 = vsel %vm899_vm0, 0.0, %v26553_v28  ;;  %v22746_v12 = vcombine.high %v22712_v30, %v22712_v30  ;;  %v6087_v62 = vcombine.low %v5888_v43, %v5891_v19  ;;  %v22751_v41 = vrot.slane %v5701_v11, %v20561_v25 }
 0x4a7   : > { %v5717_v5 = vcombine.high %v5493_v46, %v5493_v46  ;;  %v6522_v36 = vrot.slane %v6508_v40, %v20561_v25  ;;  %v6094_v28 = vrot.slane %v6086_v61, %v20561_v25  ;;  %v22754_v50 = vrot.slane %v5493_v46, %v20561_v25 }
 0x4a8   : > { %26554 = vst [vmem:[#allocation19_spill] sm:$0xff] %v22751_v41  ;;  %v5787_v35 = vcombine.high %v22678_v23, %v22678_v23  ;;  %v5892_v24 = vrot.slane %v5890_v49, 2  ;;  %v5893_v44 = vrot.slane %v22685_v26, 7  ;;  %v6101_v8 = vrot.slane %v6087_v62, %v20561_v25 }
 0x4a9   : > { %v6523_v22 = vcombine.low %v6515_v33, %v6522_v36  ;;  %v6524_v40 = vcombine.low %v22746_v12, %v22751_v41  ;;  %v5896_v61 = vrot.slane %v22678_v23, 7  ;;  %v22765_v11 = vcombine.high %v22754_v50, %v22754_v50 }
 0x4aa   : > { %v5894_v46 = vsel %vm20749_vm6, %v5892_v24, %v5893_v44  ;;  %v5895_v43 = vrot.slane %v5893_v44, 2  ;;  %v5899_v19 = vrot.slane %v5787_v35, 7  ;;  %v6102_v49 = vcombine.low %v6094_v28, %v6101_v8 }
 0x4ab   : > { %26555 = vst [vmem:[#allocation18_spill] sm:$0xff] %v22765_v11  ;;  %19120 = vmatmul.mubr.f32.gmra.mxu0 %v6523_v22  ;;  %v6532_v33 = vrot.slane %v6524_v40, %v20561_v25  ;;  %v5898_v36 = vrot.slane %v5896_v61, 2  ;;  %v17904_v62 = vrot.slane %v22663_v15, 9  ;;  %v6525_v26 = vcombine.low %v22754_v50, %v22765_v11 }
 0x4ac   : > { %v5897_v23 = vsel %vm20749_vm6, %v5895_v43, %v5896_v61  ;;  %v22776_v17 = vrot.slane %v5717_v5, %v20561_v25  ;;  %v22780_v24 = vrot.slane %v22431_v16, %v20561_v25  ;;  %19064 = vmatmul.mubr.f32.gmra.mxu1 %v6102_v49  ;;  %v5905_v22 = vrot.slane %v5903_v27, 2 }
 0x4ad   : > { %v5900_v28 = vsel %vm20749_vm6, %v5898_v36, %v5899_v19  ;;  %v5904_v35 = vsel %vm20749_vm6, %v17904_v62, %v5903_v27  ;;  %v6103_v44 = vcombine.low %v5894_v46, %v5897_v23  ;;  %v6539_v8 = vrot.slane %v6525_v26, %v20561_v25 }
 0x4ae   : > { %26556 = vst [vmem:[#allocation26_spill] sm:$0xff] %v22780_v24  ;;  %v6104_v40 = vcombine.low %v5900_v28, %v5904_v35  ;;  %v22789_v5 = vcombine.high %v22776_v17, %v22776_v17  ;;  %v22793_v16 = vcombine.high %v22780_v24, %v22780_v24  ;;  %v5906_v43 = vrot.slane %v22718_v59, 7 }
 0x4af   : > { %v6111_v61 = vrot.slane %v6103_v44, %v20561_v25  ;;  %v5909_v19 = vrot.slane %v22727_v47, 7  ;;  %v5912_v23 = vrot.slane %v22712_v30, 7  ;;  %v6540_v27 = vcombine.low %v6532_v33, %v6539_v8 }
 0x4b0   : > { %26557 = vst [vmem:[#allocation23_spill] sm:$0xff] %v22789_v5  ;;  %26558 = vst [vmem:[#allocation28_spill] sm:$0xff] %v22793_v16  ;;  %v6118_v26 = vrot.slane %v6104_v40, %v20561_v25  ;;  %v6541_v46 = vcombine.low %v22776_v17, %v22789_v5  ;;  %v6542_v49 = vcombine.low %v22780_v24, %v22793_v16  ;;  %v5908_v62 = vrot.slane %v5906_v43, 2 }
 0x4b1   : > { %v5907_v36 = vsel %vm20749_vm6, %v5905_v22, %v5906_v43  ;;  %v5911_v28 = vrot.slane %v5909_v19, 2  ;;  %v5914_v35 = vrot.slane %v5912_v23, 2  ;;  %19122 = vmatprep.mubr.f32.mxu0 %v6540_v27  ;;  %v5915_v8 = vrot.slane %v22746_v12, 7 }
 0x4b2   : > { %v6119_v44 = vcombine.low %v6111_v61, %v6118_v26  ;;  %v6549_v59 = vrot.slane %v6541_v46, %v20561_v25  ;;  %v6556_v33 = vrot.slane %v6542_v49, %v20561_v25  ;;  %v5910_v40 = vsel %vm20749_vm6, %v5908_v62, %v5909_v19 }
 0x4b3   : > { %v5913_v30 = vsel %vm20749_vm6, %v5911_v28, %v5912_v23  ;;  %v22815_v22 = vrot.slane %v22452_v32, %v20561_v25  ;;  %v26559_v61 = vcombine.high %v22452_v32, %v22452_v32  ;;  %v5916_v26 = vsel %vm20749_vm6, %v5914_v35, %v5915_v8 }
 0x4b4   : > { %19066 = vmatprep.mubr.f32.mxu1 %v6119_v44  ;;  %v6557_v27 = vcombine.low %v6549_v59, %v6556_v33  ;;  %v6120_v46 = vcombine.low %v5907_v36, %v5910_v40  ;;  %v22827_v19 = vcombine.high %v22751_v41, %v22751_v41  ;;  %v6121_v23 = vcombine.low %v5913_v30, %v5916_v26 }
 0x4b5   : > { %v22821_v43 = vrot.slane %v26559_v61, %v20561_v25  ;;  %v5765_v49 = vcombine.high %v22815_v22, %v22815_v22  ;;  %v6558_v62 = vcombine.low %v22444_v13, %v22815_v22  ;;  %v5917_v32 = vrot.slane %v5915_v8, 2 }
 0x4b6   : > { %26560 = vst [vmem:[#allocation24_spill] sm:$0xff] %v22827_v19  ;;  %19123 = vmatmul.mubr.f32.gmra.mxu0 %v6557_v27  ;;  %v6128_v28 = vrot.slane %v6120_v46, %v20561_v25  ;;  %v5918_v59 = vrot.slane %v22751_v41, 7  ;;  %v5921_v35 = vrot.slane %v22827_v19, 7  ;;  %v17905_v36 = vrot.slane %v22754_v50, 9 }
 0x4b7   : > { %v6135_v44 = vrot.slane %v6121_v23, %v20561_v25  ;;  %v5947_v33 = vrot.slane %v5765_v49, 7  ;;  %v6559_v30 = vcombine.low %v5765_v49, %v22821_v43  ;;  %v6566_v40 = vrot.slane %v6558_v62, %v20561_v25 }
 0x4b8   : > { %v5919_v61 = vsel %vm20749_vm6, %v5917_v32, %v5918_v59  ;;  %v5920_v8 = vrot.slane %v5918_v59, 2  ;;  %v5925_v27 = vrot.slane %v22765_v11, 7  ;;  %v5928_v26 = vrot.slane %v22776_v17, 7 }
 0x4b9   : > { %v6136_v46 = vcombine.low %v6128_v28, %v6135_v44  ;;  %v6573_v41 = vrot.slane %v6559_v30, %v20561_v25  ;;  %v26561_v50 = vrot.slane %v22382_v7, 7  ;;  %v26562_v23 = vrot.slane %v22428_v58, 7 }
 0x4ba   : > { %v22852_v49 = vcombine.high %v22821_v43, %v22821_v43  ;;  %v5922_v62 = vsel %vm20749_vm6, %v5920_v8, %v5921_v35  ;;  %v5926_v32 = vsel %vm20749_vm6, %v17905_v36, %v5925_v27  ;;  %v5927_v59 = vrot.slane %v5925_v27, 2 }
 0x4bb   : > { %v5470_v19 = vsel %vm899_vm0, %v26562_v23, %v26561_v50  ;;  %19067 = vmatmul.mubr.f32.gmra.mxu1 %v6136_v46  ;;  %v6574_v44 = vcombine.low %v6566_v40, %v6573_v41  ;;  %v6137_v7 = vcombine.low %v5919_v61, %v5922_v62  ;;  %v5930_v23 = vrot.slane %v5928_v26, 2 }
 0x4bc   : > { %v5502_v28 = vsel %vm3044_vm7, %v5470_v19, 0.0  ;;  %v5929_v50 = vsel %vm20749_vm6, %v5927_v59, %v5928_v26  ;;  %v5931_v11 = vrot.slane %v22789_v5, 7  ;;  %v5934_v35 = vrot.slane %v22780_v24, 7 }
 0x4bd   : > { %v5767_v30 = vcombine.high %v5502_v28, %v5502_v28  ;;  %v22860_v58 = vrot.slane %v5502_v28, %v20561_v25  ;;  %19125 = vmatprep.mubr.f32.mxu0 %v6574_v44  ;;  %v6138_v36 = vcombine.low %v5926_v32, %v5929_v50  ;;  %v6145_v8 = vrot.slane %v6137_v7, %v20561_v25 }
 0x4be   : > { %v5932_v61 = vsel %vm20749_vm6, %v5930_v23, %v5931_v11  ;;  %v5933_v27 = vrot.slane %v5931_v11, 2  ;;  %v5936_v26 = vrot.slane %v5934_v35, 2  ;;  %v5937_v32 = vrot.slane %v22793_v16, 7 }
 0x4bf   : > { %v22868_v19 = vrot.slane %v5767_v30, %v20561_v25  ;;  %v22872_v41 = vcombine.high %v22860_v58, %v22860_v58  ;;  %v6575_v40 = vcombine.low %v22852_v49, %v22860_v58  ;;  %v6152_v46 = vrot.slane %v6138_v36, %v20561_v25 }
 0x4c0   : > { %v5940_v59 = vrot.slane %v22444_v13, 7  ;;  %v5935_v44 = vsel %vm20749_vm6, %v5933_v27, %v5934_v35  ;;  %v5789_v7 = vcombine.high %v22444_v13, %v22444_v13  ;;  %v17906_v11 = vrot.slane %v22815_v22, 9 }
 0x4c1   : > { %v6576_v62 = vcombine.low %v22872_v41, %v22868_v19  ;;  %v6583_v28 = vrot.slane %v6575_v40, %v20561_v25  ;;  %v6153_v30 = vcombine.low %v6145_v8, %v6152_v46  ;;  %v5938_v23 = vsel %vm20749_vm6, %v5936_v26, %v5937_v32 }
 0x4c2   : > { %v5939_v36 = vrot.slane %v5937_v32, 2  ;;  %v6154_v16 = vcombine.low %v5932_v61, %v5935_v44  ;;  %v5942_v5 = vrot.slane %v5940_v59, 2  ;;  %v5943_v24 = vrot.slane %v5789_v7, 7 }
 0x4c3   : > { %v6590_v50 = vrot.slane %v6576_v62, %v20561_v25  ;;  %v5948_v40 = vsel %vm20749_vm6, %v17906_v11, %v5947_v33  ;;  %19069 = vmatprep.mubr.f32.mxu1 %v6153_v30  ;;  %v5949_v13 = vrot.slane %v5947_v33, 2  ;;  %v5950_v8 = vrot.slane %v22821_v43, 7 }
 0x4c4   : > { %v5941_v27 = vsel %vm20749_vm6, %v5939_v36, %v5940_v59  ;;  %v6162_v62 = vrot.slane %v6154_v16, %v20561_v25  ;;  %v5944_v26 = vsel %vm20749_vm6, %v5942_v5, %v5943_v24  ;;  %v5953_v61 = vrot.slane %v22852_v49, 7 }
 0x4c5   : > { %v6591_v35 = vcombine.low %v6583_v28, %v6590_v50  ;;  %v6155_v46 = vcombine.low %v5938_v23, %v5941_v27  ;;  %v5951_v32 = vsel %vm20749_vm6, %v5949_v13, %v5950_v8  ;;  %v5952_v44 = vrot.slane %v5950_v8, 2 }
 0x4c6   : > { %v6171_v28 = vcombine.low %v5944_v26, %v5948_v40  ;;  %v22905_v59 = vcombine.high %v22868_v19, %v22868_v19  ;;  %v5955_v7 = vrot.slane %v5953_v61, 2  ;;  %v5956_v16 = vrot.slane %v22860_v58, 7 }
 0x4c7   : > { %19126 = vmatmul.mubr.f32.gmra.mxu0 %v6591_v35  ;;  %v6169_v33 = vrot.slane %v6155_v46, %v20561_v25  ;;  %v5959_v11 = vrot.slane %v22872_v41, 7  ;;  %v5954_v24 = vsel %vm20749_vm6, %v5952_v44, %v5953_v61  ;;  %v5962_v5 = vrot.slane %v22868_v19, 7 }
 0x4c8   : > { %v5965_v13 = vrot.slane %v22905_v59, 7  ;;  %v6172_v50 = vcombine.low %v5951_v32, %v5954_v24  ;;  %v5957_v23 = vsel %vm20749_vm6, %v5955_v7, %v5956_v16  ;;  %v5958_v36 = vrot.slane %v5956_v16, 2 }
 0x4c9   : > { %v6170_v30 = vcombine.low %v6162_v62, %v6169_v33  ;;  %v6179_v40 = vrot.slane %v6171_v28, %v20561_v25  ;;  %v5961_v35 = vrot.slane %v5959_v11, 2  ;;  %v5964_v27 = vrot.slane %v5962_v5, 2 }
 0x4ca   : > { %v6742_v8 = vcombine.low %v22387_v3, %v22252_v57  ;;  %v6186_v46 = vrot.slane %v6172_v50, %v20561_v25  ;;  %v5960_v26 = vsel %vm20749_vm6, %v5958_v36, %v5959_v11  ;;  %v6758_v62 = vcombine.low %v22393_v20, %v22260_v10 }
 0x4cb   : > { %19070 = vmatmul.mubr.f32.gmra.mxu1 %v6170_v30  ;;  %v17907_v61 = vcombine.high %v22260_v10, %v22273_v1  ;;  %v5963_v32 = vsel %vm20749_vm6, %v5961_v35, %v5962_v5  ;;  %v5966_v44 = vsel %vm20749_vm6, %v5964_v27, %v5965_v13  ;;  %v6188_v28 = vcombine.low %v5957_v23, %v5960_v26  ;;  %v26564_v35 = vld [vmem:[#allocation25_spill] sm:$0xff]  ;;  %v26565_v27 = vld [vmem:[#allocation14_spill] sm:$0xff] }
 0x4cc   : > { %v6741_v57 = vcombine.low %v22379_v45, %v22377_v34  ;;  %v6187_v3 = vcombine.low %v6179_v40, %v6186_v46  ;;  %v6189_v33 = vcombine.low %v5963_v32, %v5966_v44  ;;  %v6756_v7 = vrot.slane %v6742_v8, %v20561_v25  ;;  %v26568_v44 = vld [vmem:[#allocation24_spill] sm:$0xff] }
 0x4cd   : > { %v6196_v16 = vrot.slane %v6188_v28, %v20561_v25  ;;  %v6766_v20 = vrot.slane %v6758_v62, %v20561_v25  ;;  %v6775_v10 = vcombine.low %v22411_v29, %v22425_v51  ;;  %v6776_v1 = vcombine.low %v22418_v9, %v22470_v52  ;;  %v26569_v28 = vld [vmem:[#allocation19_spill] sm:$0xff] }
 0x4ce   : > { %19072 = vmatprep.mubr.f32.mxu1 %v6187_v3  ;;  %v6203_v60 = vrot.slane %v6189_v33, %v20561_v25  ;;  %v6773_v11 = vrot.slane %v17907_v61, %v20561_v25  ;;  %v6792_v34 = vcombine.low %v22473_v48, %v22543_v63  ;;  %v6793_v45 = vcombine.low %v22486_v14, %v22517_v38 }
 0x4cf   : > { %v6749_v24 = vrot.slane %v6741_v57, %v20561_v25  ;;  %v6783_v5 = vrot.slane %v6775_v10, %v20561_v25  ;;  %v6790_v29 = vrot.slane %v6776_v1, %v20561_v25  ;;  %v6809_v9 = vcombine.low %v22521_v42, %v22524_v55  ;;  %v26573_v10 = vld [vmem:[#allocation21_spill] sm:$0xff]  ;;  %v26574_v1 = vld [vmem:[#allocation28_spill] sm:$0xff] }
 0x4d0   : > { %v6204_v51 = vcombine.low %v6196_v16, %v6203_v60  ;;  %v6800_v52 = vrot.slane %v6792_v34, %v20561_v25  ;;  %v6807_v13 = vrot.slane %v6793_v45, %v20561_v25  ;;  %v6810_v48 = vcombine.low %v22547_v39, %v22539_v6  ;;  %v26571_v16 = vld [vmem:[#allocation26_spill] sm:$0xff] }
 0x4d1   : > { %v6757_v63 = vcombine.low %v6749_v24, %v6756_v7  ;;  %v6817_v14 = vrot.slane %v6809_v9, %v20561_v25  ;;  %v17908_v38 = vcombine.high %v22539_v6, %v22528_v21  ;;  %v6827_v30 = vcombine.low %v22534_v18, %v22579_v54  ;;  %v26563_v6 = vld [vmem:[#allocation22_spill] sm:$0xff] }
 0x4d2   : > { %19073 = vmatmul.mubr.f32.gmra.mxu1 %v6204_v51  ;;  %v6774_v50 = vcombine.low %v6766_v20, %v6773_v11  ;;  %v6824_v42 = vrot.slane %v6810_v48, %v20561_v25  ;;  %v6844_v55 = vcombine.low %v22593_v53, %v22667_v2  ;;  %v6791_v23 = vcombine.low %v6783_v5, %v6790_v29  ;;  %v26572_v20 = vld [vmem:[#allocation23_spill] sm:$0xff] }
 0x4d3   : > { %19160 = vmatprep.mubr.f32.mxu1 %v6757_v63  ;;  %v6808_v36 = vcombine.low %v6800_v52, %v6807_v13  ;;  %v6860_v39 = vcombine.low %v22631_v56, %v22625_v37  ;;  %v6861_v40 = vcombine.low %v22637_v31, %v22674_v4  ;;  %v6834_v21 = vrot.slane %v17908_v38, %v20561_v25  ;;  %v26566_v4 = vld [vmem:[#allocation27_spill] sm:$0xff] }
 0x4d4   : > { %v6841_v18 = vrot.slane %v6827_v30, %v20561_v25  ;;  %v6843_v54 = vcombine.low %v26563_v6, %v22597_v0  ;;  %v6877_v8 = vcombine.low %v26565_v27, %v26564_v35  ;;  %v6825_v53 = vcombine.low %v6817_v14, %v6824_v42  ;;  %v26567_v0 = vld [vmem:[#allocation17_spill] sm:$0xff]  ;;  %v8241_v6 = vld [vmem:[#allocation6 + $0xd0] sm:$0xff]  ;;  %v8215_v27 = vld [vmem:[#allocation6 + $0x40] sm:$0xff] }
 0x4d5   : > { %v6868_v2 = vrot.slane %v6860_v39, %v20561_v25  ;;  %v6875_v46 = vrot.slane %v6861_v40, %v20561_v25  ;;  %v17909_v37 = vcombine.high %v26564_v35, %v22663_v15  ;;  %v6858_v56 = vrot.slane %v6844_v55, %v20561_v25  ;;  %v26570_v15 = vld [vmem:[#allocation18_spill] sm:$0xff]  ;;  %v8220_v55 = vld [vmem:[#allocation6 + $0x68] sm:$0xff]  ;;  %v8218_v40 = vld [vmem:[#allocation6 + $0x58] sm:$0xff] }
 0x4d6   : > { %19161 = vmatmul.mubr.f32.vlgmr.msra.gmra.mxu1 %v6774_v50  ;;  %v6885_v31 = vrot.slane %v6877_v8, %v20561_v25  ;;  %v6894_v26 = vcombine.low %v26566_v4, %v22727_v47  ;;  %v6895_v62 = vcombine.low %v26567_v0, %v22746_v12  ;;  %v6911_v57 = vcombine.low %v26569_v28, %v26568_v44  ;;  %v8243_v39 = vld [vmem:[#allocation6 + $0xe0] sm:$0xff]  ;;  %v8240_v35 = vld [vmem:[#allocation6 + $0xc8] sm:$0xff]  ;;  %v8233_v28 = vld [vmem:[#allocation6 + $0x90] sm:$0xff] }
 0x4d7   : > { %19163 = vmatprep.mubr.f32.mxu1 %v6791_v23  ;;  %v6876_v61 = vcombine.low %v6868_v2, %v6875_v46  ;;  %v6892_v32 = vrot.slane %v17909_v37, %v20561_v25  ;;  %v6912_v3 = vcombine.low %v26570_v15, %v22776_v17  ;;  %v6928_v47 = vcombine.low %v26572_v20, %v26571_v16  ;;  %v8244_v23 = vld [vmem:[#allocation6 + $0xe8] sm:$0xff]  ;;  %v8239_v8 = vld [vmem:[#allocation6 + $0xc0] sm:$0xff]  ;;  %v8238_v2 = vld [vmem:[#allocation6 + $0xb8] sm:$0xff] }
 0x4d8   : > { %v6902_v33 = vrot.slane %v6894_v26, %v20561_v25  ;;  %v6909_v7 = vrot.slane %v6895_v62, %v20561_v25  ;;  %v6929_v12 = vcombine.low %v26574_v1, %v26573_v10  ;;  %v6919_v11 = vrot.slane %v6911_v57, %v20561_v25  ;;  %v8213_v46 = vld [vmem:[#allocation6 + $0x30] sm:$0xff]  ;;  %v8211_v4 = vld [vmem:[#allocation6 + $0x20] sm:$0xff]  ;;  %v8210_v62 = vld [vmem:[#allocation6 + $0x18] sm:$0xff] }
 0x4d9   : > { %v6893_v60 = vcombine.low %v6885_v31, %v6892_v32  ;;  %v6926_v34 = vrot.slane %v6912_v3, %v20561_v25  ;;  %v17910_v45 = vcombine.high %v26573_v10, %v22815_v22  ;;  %v6936_v24 = vrot.slane %v6928_v47, %v20561_v25  ;;  %v8237_v37 = vld [vmem:[#allocation6 + $0xb0] sm:$0xff]  ;;  %v8236_v31 = vld [vmem:[#allocation6 + $0xa8] sm:$0xff]  ;;  %v8235_v0 = vld [vmem:[#allocation6 + $0xa0] sm:$0xff] }
 0x4da   : > { %19164 = vmatmul.mubr.f32.gmra.mxu1 %v6808_v36  ;;  %v6910_v17 = vcombine.low %v6902_v33, %v6909_v7  ;;  %v6943_v5 = vrot.slane %v6929_v12, %v20561_v25  ;;  %v6946_v29 = vcombine.low %v22821_v43, %v22852_v49  ;;  %v6851_v9 = vrot.slane %v6843_v54, %v20561_v25  ;;  %v8219_v36 = vld [vmem:[#allocation6 + $0x60] sm:$0xff]  ;;  %v8216_v54 = vld [vmem:[#allocation6 + $0x48] sm:$0xff]  ;;  %v8209_v32 = vld [vmem:[#allocation6 + $0x10] sm:$0xff] }
 0x4db   : > { %19166 = vmatprep.mubr.f32.mxu1 %v6825_v53  ;;  %v6927_v51 = vcombine.low %v6919_v11, %v6926_v34  ;;  %v6842_v52 = vcombine.low %v6834_v21, %v6841_v18  ;;  %v6953_v48 = vrot.slane %v17910_v45, %v20561_v25  ;;  %v6963_v38 = vcombine.low %v22868_v19, %v22905_v59  ;;  %v23021_v19 = vld [vmem:[#allocation6 + $0xf8] sm:$0xff]  ;;  %v8245_v59 = vld [vmem:[#allocation6 + $0xf0] sm:$0xff]  ;;  %v8208_v57 = vld [vmem:[#allocation6 + $0x8] sm:$0xff] }
 0x4dc   : > { %v6944_v13 = vcombine.low %v6936_v24, %v6943_v5  ;;  %v6960_v63 = vrot.slane %v6946_v29, %v20561_v25  ;;  %v6859_v22 = vcombine.low %v6851_v9, %v6858_v56  ;;  %v6962_v43 = vcombine.low %v22860_v58, %v22872_v41  ;;  %v8222_v58 = vld [vmem:[#allocation6 + $0x78] sm:$0xff]  ;;  %v8221_v41 = vld [vmem:[#allocation6 + $0x70] sm:$0xff]  ;;  %v8212_v56 = vld [vmem:[#allocation6 + $0x28] sm:$0xff] }
 0x4dd   : > { %v6977_v49 = vrot.slane %v6963_v38, %v20561_v25  ;;  %v26405_v42 = vmov 0.0   ;;  %v8242_v21 = vld [vmem:[#allocation6 + $0xd8] sm:$0xff]  ;;  %v8217_v18 = vld [vmem:[#allocation6 + $0x50] sm:$0xff]  ;;  %v8232_v15 = vld [vmem:[#allocation6 + $0x88] sm:$0xff] }
 0x4de   : > { %19167 = vmatmul.mubr.f32.gmra.mxu1 %v6842_v52  ;;  %v6961_v14 = vcombine.low %v6953_v48, %v6960_v63  ;;  %v6970_v30 = vrot.slane %v6962_v43, %v20561_v25  ;;  %7704 = vst [vmem:[#allocation2 + $0xe] sm:$0x1] %v26405_v42  ;;  %7705 = vst [vmem:[#allocation2 + $0x1e] sm:$0x1] %v26405_v42  ;;  %19234 = vmatprep.subr.mxu1 %v26405_v42  ;;  %v8214_v53 = vld [vmem:[#allocation6 + $0x38] sm:$0xff]  ;;  %v8207_v33 = vld [vmem:[#allocation6] sm:$0xff] }
 0x4df   : > { %19169 = vmatprep.mubr.f32.mxu1 %v6859_v22  ;;  %7706 = vst [vmem:[#allocation2 + $0x2e] sm:$0x1] %v26405_v42  ;;  %7707 = vst [vmem:[#allocation2 + $0x3e] sm:$0x1] %v26405_v42  ;;  %19181 = vmatprep.subr.mxu0 %v26405_v42  ;;  %v8231_v16 = vld [vmem:[#allocation6 + $0x80] sm:$0xff] }
 0x4e0   : > { %v6978_v50 = vcombine.low %v6970_v30, %v6977_v49  ;;  %7708 = vst [vmem:[#allocation2 + $0x4e] sm:$0x1] %v26405_v42  ;;  %7709 = vst [vmem:[#allocation2 + $0x5e] sm:$0x1] %v26405_v42  ;;  %19235 = vmatpush3.msra.mxu1 %v8222_v58  ;;  %19182 = vmatpush3.msra.mxu0 %v23021_v19  ;;  %v20313_v63 = vmov 1966171168  }
 0x4e1   : > { %7710 = vst [vmem:[#allocation2 + $0x6e] sm:$0x1] %v26405_v42  ;;  %7711 = vst [vmem:[#allocation2 + $0x7e] sm:$0x1] %v26405_v42  ;;  %19236 = vmatprep.subr.mxu1 %v26405_v42  ;;  %19183 = vmatprep.subr.mxu0 %v26405_v42  ;;  %v7825_v22 = vunpack.c.l.s4 %v20313_v63 }
 0x4e2   : > { %19170 = vmatmul.mubr.f32.gmra.mxu1 %v6876_v61  ;;  %19184 = vmatpush3.msra.mxu0 %v8245_v59  ;;  %v8234_v61 = vld [vmem:[#allocation6 + $0x98] sm:$0xff] }
 0x4e3   : > { %19172 = vmatprep.mubr.f32.mxu1 %v6893_v60  ;;  %19237 = vmatpush3.msra.mxu1 %v8221_v41  ;;  %v7826_v43 = vunpack.c.0.s8 %v7825_v22 }
 0x4e4   : > { %19238 = vmatprep.subr.mxu1 %v26405_v42  ;;  %19185 = vmatprep.subr.mxu0 %v26405_v42 }
 0x4e5   : > { %19239 = vmatpush3.msra.mxu1 %v8220_v55  ;;  %19186 = vmatpush3.msra.mxu0 %v8244_v23  ;;  %v26575_v55 = vld [vmem:[#allocation12_spill] sm:$0xff] }
 0x4e6   : > { %19173 = vmatmul.mubr.f32.gmra.mxu1 %v6910_v17  ;;  %19240 = vmatprep.subr.mxu1 %v26405_v42  ;;  %v23063_v23 = vsub.s32 %v7826_v43, %v26575_v55 }
 0x4e7   : > { %19175 = vmatprep.mubr.f32.mxu1 %v6927_v51  ;;  %19187 = vmatprep.subr.mxu0 %v26405_v42 }
 0x4e8   : > { %19241 = vmatpush3.msra.mxu1 %v8219_v36  ;;  %19188 = vmatpush3.msra.mxu0 %v8243_v39 }
 0x4e9   : > { %19242 = vmatprep.subr.mxu1 %v26405_v42  ;;  %19189 = vmatprep.subr.mxu0 %v26405_v42 }
 0x4ea   : > { %19176 = vmatmul.mubr.f32.gmra.mxu1 %v6944_v13  ;;  %19190 = vmatpush3.msra.mxu0 %v8242_v21 }
 0x4eb   : > { %19178 = vmatprep.mubr.f32.mxu1 %v6961_v14  ;;  %19243 = vmatpush3.msra.mxu1 %v8218_v40 }
 0x4ec   : > { %19244 = vmatprep.subr.mxu1 %v26405_v42  ;;  %19191 = vmatprep.subr.mxu0 %v26405_v42 }
 0x4ed   : > { %19245 = vmatpush3.msra.mxu1 %v8217_v18  ;;  %19192 = vmatpush3.msra.mxu0 %v8241_v6  ;;  %v23068_v6 = vld [vmem:[%s26338_s5] ss:$0 sm:$0xff] }
 0x4ee   : > { %19179 = vmatmul.mubr.f32.gmra.mxu1 %v6978_v50  ;;  %19246 = vmatprep.subr.mxu1 %v26405_v42 }
 0x4ef   : > { %19193 = vmatprep.subr.mxu0 %v26405_v42  ;;  %19247 = vmatpush3.msra.mxu1 %v8216_v54 }
 0x4f0   : > { %19194 = vmatpush3.msra.mxu0 %v8240_v35  ;;  %19248 = vmatprep.subr.mxu1 %v26405_v42 }
 0x4f1   : > { %19195 = vmatprep.subr.mxu0 %v26405_v42  ;;  %19249 = vmatpush3.msra.mxu1 %v8215_v27 }
 0x4f2   : > { %19196 = vmatpush3.msra.mxu0 %v8239_v8  ;;  %19250 = vmatprep.subr.mxu1 %v26405_v42 }
 0x4f3   : > { %19197 = vmatprep.subr.mxu0 %v26405_v42  ;;  %19251 = vmatpush3.msra.mxu1 %v8214_v53 }
 0x4f4   : > { %19198 = vmatpush3.msra.mxu0 %v8238_v2  ;;  %19252 = vmatprep.subr.mxu1 %v26405_v42 }
 0x4f5   : > { %19199 = vmatprep.subr.mxu0 %v26405_v42  ;;  %19253 = vmatpush3.msra.mxu1 %v8213_v46  ;;  %v23077_v46 = vrot.slane %v26405_v42, %v23063_v23 }
 0x4f6   : > { %19200 = vmatpush3.msra.mxu0 %v8237_v37  ;;  %19254 = vmatprep.subr.mxu1 %v26405_v42 }
 0x4f7   : > { %19201 = vmatprep.subr.mxu0 %v26405_v42  ;;  %19255 = vmatpush3.msra.mxu1 %v8212_v56 }
 0x4f8   : > { %19202 = vmatpush3.msra.mxu0 %v8236_v31  ;;  %19256 = vmatprep.subr.mxu1 %v26405_v42 }
 0x4f9   : > { %19203 = vmatprep.subr.mxu0 %v26405_v42  ;;  %19257 = vmatpush3.msra.mxu1 %v8211_v4 }
 0x4fa   : > { %19204 = vmatpush3.msra.mxu0 %v8235_v0  ;;  %19258 = vmatprep.subr.mxu1 %v26405_v42 }
 0x4fb   : > { %19205 = vmatprep.subr.mxu0 %v26405_v42  ;;  %19259 = vmatpush3.msra.mxu1 %v8210_v62 }
 0x4fc   : > { %19206 = vmatpush3.msra.mxu0 %v8234_v61  ;;  %19260 = vmatprep.subr.mxu1 %v26405_v42 }
 0x4fd   : > { %19207 = vmatprep.subr.mxu0 %v26405_v42  ;;  %19261 = vmatpush3.msra.mxu1 %v8209_v32 }
 0x4fe   : > { %19208 = vmatpush3.msra.mxu0 %v8233_v28  ;;  %19262 = vmatprep.subr.mxu1 %v26405_v42 }
 0x4ff   : > { %19209 = vmatprep.subr.mxu0 %v26405_v42  ;;  %19263 = vmatpush3.msra.mxu1 %v8208_v57 }
 0x500   : > { %19210 = vmatpush3.msra.mxu0 %v8232_v15  ;;  %19264 = vmatprep.subr.mxu1 %v26405_v42 }
 0x501   : > { %19211 = vmatprep.subr.mxu0 %v26405_v42  ;;  %19265 = vmatpush3.msra.mxu1 %v8207_v33 }
 0x502   : > { %19266 = vmatprep.mubr.msk.f32.mxu1 %vm20312_vm8, %v26405_v42  ;;  %19212 = vmatpush3.msra.mxu0 %v8231_v16 }
 0x503   : > { %19213 = vmatprep.mubr.msk.f32.mxu0 %vm20312_vm8, %v26405_v42  ;;  %19287 = vmatprep.subr.mxu0 %v26405_v42 }
 0x504   : > { %19340 = vmatprep.subr.mxu1 %v26405_v42 }
 0x530   : > { %v19109_v3 = vpop.f32.mrf.mxu0 }
 0x532   : > { %v6672_v20 = vpop.f32.mrf.mxu0 }
 0x540   : > { %v19112_v10 = vpop.f32.mrf.mxu0 }
 0x542   : > { %v23042_v26 = vpop.f32.mrf.mxu1  ;;  %v6682_v12 = vpop.f32.mrf.mxu0 }
 0x543   : > { %v6678_v30 = vadd.f32 %v19109_v3, %v23042_v26 }
 0x544   : > { %v6285_v44 = vpop.f32.mrf.mxu1 }
 0x545   : > { %v6673_v41 = vadd.f32 %v6672_v20, %v6285_v44 }
 0x54b   : > { %v19115_v11 = vpop.f32.mrf.mxu0 }
 0x54d   : > { %v6692_v45 = vpop.f32.mrf.mxu0 }
 0x552   : > { %v19059_v7 = vpop.f32.mrf.mxu1 }
 0x553   : > { %v6688_v36 = vadd.f32 %v19112_v10, %v19059_v7 }
 0x554   : > { %v6295_v47 = vpop.f32.mrf.mxu1 }
 0x555   : > { %v6683_v40 = vadd.f32 %v6682_v12, %v6295_v47 }
 0x55c   : > { %v19118_v24 = vpop.f32.mrf.mxu0 }
 0x55e   : > { %v19062_v1 = vpop.f32.mrf.mxu1  ;;  %v6702_v29 = vpop.f32.mrf.mxu0 }
 0x55f   : > { %v6698_v21 = vadd.f32 %v19115_v11, %v19062_v1 }
 0x560   : > { %v6305_v60 = vpop.f32.mrf.mxu1 }
 0x561   : > { %v6693_v27 = vadd.f32 %v6692_v45, %v6305_v60 }
 0x56b   : > { %v19121_v51 = vpop.f32.mrf.mxu0 }
 0x56c   : > { %v19065_v34 = vpop.f32.mrf.mxu1 }
 0x56d   : > { %v6712_v13 = vpop.f32.mrf.mxu0  ;;  %v23071_v8 = vadd.f32 %v19118_v24, %v19065_v34 }
 0x56e   : > { %v6315_v17 = vpop.f32.mrf.mxu1 }
 0x56f   : > { %v23073_v53 = vadd.f32 %v6702_v29, %v6315_v17 }
 0x576   : > { %v19124_v14 = vpop.f32.mrf.mxu0 }
 0x578   : > { %v6722_v50 = vpop.f32.mrf.mxu0 }
 0x57b   : > { %v19068_v5 = vpop.f32.mrf.mxu1 }
 0x57c   : > { %v23081_v26 = vadd.f32 %v19121_v51, %v19068_v5 }
 0x57d   : > { %v6325_v9 = vpop.f32.mrf.mxu1 }
 0x57e   : > { %v23083_v0 = vadd.f32 %v6712_v13, %v6325_v9 }
 0x587   : > { %v19127_v18 = vpop.f32.mrf.mxu0 }
 0x589   : > { %v6732_v44 = vpop.f32.mrf.mxu0 }
 0x58b   : > { %v19071_v52 = vpop.f32.mrf.mxu1 }
 0x58c   : > { %v23085_v62 = vadd.f32 %v19124_v14, %v19071_v52 }
 0x58d   : > { %v6335_v48 = vpop.f32.mrf.mxu1 }
 0x58e   : > { %v23087_v61 = vadd.f32 %v6722_v50, %v6335_v48 }
 0x592   : > { %v19074_v38 = vpop.f32.mrf.mxu1 }
 0x593   : > { %v23091_v33 = vadd.f32 %v19127_v18, %v19074_v38 }
 0x594   : > { %v6345_v49 = vpop.f32.mrf.mxu1 }
 0x595   : > { %v23093_v7 = vadd.f32 %v6732_v44, %v6345_v49 }
 0x596   : > { %v19162_v58 = vpop.f32.mrf.mxu1 }
 0x597   : > { %v7129_v59 = vadd.f32 %v19162_v58, %v6678_v30 }
 0x598   : > { %v7059_v39 = vpop.f32.mrf.mxu1 }
 0x599   : > { %v7143_v54 = vadd.f32 %v23068_v6, %v7129_v59  ;;  %v7128_v35 = vadd.f32 %v7059_v39, %v6673_v41 }
 0x59a   : > { %v19165_v2 = vpop.f32.mrf.mxu1 }
 0x59b   : > { %v7187_v37 = vcombine.high %v7143_v54, %v7143_v54  ;;  %v7194_v56 = vrot.slane %v7143_v54, %v20561_v25  ;;  %v7142_v31 = vadd.f32 %v23068_v6, %v7128_v35  ;;  %v7131_v4 = vadd.f32 %v19165_v2, %v6688_v36 }
 0x59c   : > { %v7069_v32 = vpop.f32.mrf.mxu1 }
 0x59d   : > { %v7201_v28 = vrot.slane %v7187_v37, %v20561_v25  ;;  %v7202_v57 = vcombine.high %v7194_v56, %v7194_v56  ;;  %v7170_v15 = vcombine.high %v7142_v31, %v7142_v31  ;;  %v7177_v3 = vrot.slane %v7142_v31, %v20561_v25 }
 0x59e   : > { %v7145_v16 = vadd.f32 %v23068_v6, %v7131_v4  ;;  %v7130_v20 = vadd.f32 %v7069_v32, %v6683_v40  ;;  %v19168_v47 = vpop.f32.mrf.mxu1 }
 0x59f   : > { %v7425_v10 = vcombine.low %v7194_v56, %v7202_v57  ;;  %v7439_v1 = vrot.slane %v7201_v28, %v20561_v25  ;;  %v7184_v12 = vrot.slane %v7170_v15, %v20561_v25  ;;  %v7185_v60 = vcombine.high %v7177_v3, %v7177_v3 }
 0x5a0   : > { %v7221_v11 = vcombine.high %v7145_v16, %v7145_v16  ;;  %v7228_v34 = vrot.slane %v7145_v16, %v20561_v25  ;;  %v7144_v45 = vadd.f32 %v23068_v6, %v7130_v20  ;;  %v7203_v17 = vcombine.high %v7201_v28, %v7201_v28  ;;  %v7079_v24 = vpop.f32.mrf.mxu1 }
 0x5a1   : > { %v7432_v5 = vrot.slane %v7425_v10, %v20561_v25  ;;  %v7186_v29 = vcombine.high %v7184_v12, %v7184_v12  ;;  %v7408_v9 = vcombine.low %v7177_v3, %v7185_v60  ;;  %v7133_v51 = vadd.f32 %v19168_v47, %v6698_v21 }
 0x5a2   : > { %v7235_v52 = vrot.slane %v7221_v11, %v20561_v25  ;;  %v7236_v13 = vcombine.high %v7228_v34, %v7228_v34  ;;  %v7204_v48 = vcombine.high %v7144_v45, %v7144_v45  ;;  %v7211_v63 = vrot.slane %v7144_v45, %v20561_v25  ;;  %v19171_v22 = vpop.f32.mrf.mxu1 }
 0x5a3   : > { %v7440_v14 = vcombine.low %v7432_v5, %v7439_v1  ;;  %v7409_v38 = vcombine.low %v7184_v12, %v7186_v29  ;;  %v7416_v43 = vrot.slane %v7408_v9, %v20561_v25  ;;  %v7147_v49 = vadd.f32 %v23068_v6, %v7133_v51 }
 0x5a4   : > { %v7237_v30 = vcombine.high %v7235_v52, %v7235_v52  ;;  %v7472_v50 = vrot.slane %v7236_v13, %v20561_v25  ;;  %v7218_v58 = vrot.slane %v7204_v48, %v20561_v25  ;;  %v7219_v41 = vcombine.high %v7211_v63, %v7211_v63  ;;  %v7089_v59 = vpop.f32.mrf.mxu1 }
 0x5a5   : > { %7689 = vst [vmem:[#allocation2 + $0x8] sm:$0x3f] %v7440_v14  ;;  %v7423_v36 = vrot.slane %v7409_v38, %v20561_v25  ;;  %v7441_v39 = vcombine.low %v7203_v17, %v7211_v63  ;;  %v7255_v40 = vcombine.high %v7147_v49, %v7147_v49  ;;  %v23109_v21 = vrot.slane %v7147_v49, %v20561_v25 }
 0x5a6   : > { %v23111_v18 = vcombine.low %v7235_v52, %v7237_v30  ;;  %v7220_v54 = vcombine.high %v7218_v58, %v7218_v58  ;;  %v7442_v35 = vcombine.low %v7219_v41, %v7218_v58  ;;  %v7132_v2 = vadd.f32 %v7079_v24, %v6693_v27  ;;  %v19174_v37 = vpop.f32.mrf.mxu1 }
 0x5a7   : > { %v7424_v56 = vcombine.low %v7416_v43, %v7423_v36  ;;  %v7449_v31 = vrot.slane %v7441_v39, %v20561_v25  ;;  %v7269_v4 = vrot.slane %v7255_v40, %v20561_v25  ;;  %v7270_v32 = vcombine.high %v23109_v21, %v23109_v21 }
 0x5a8   : > { %v7482_v44 = vrot.slane %v23111_v18, %v20561_v25  ;;  %v7456_v28 = vrot.slane %v7442_v35, %v20561_v25  ;;  %v7458_v57 = vcombine.low %v7220_v54, %v7228_v34  ;;  %v7505_v15 = vrot.slane %v23109_v21, %v20561_v25  ;;  %v7099_v47 = vpop.f32.mrf.mxu1 }
 0x5a9   : > { %7688 = vst [vmem:[#allocation2] sm:$0xff] %v7424_v56  ;;  %v7507_v27 = vcombine.low %v7270_v32, %v7269_v4  ;;  %v7146_v3 = vadd.f32 %v23068_v6, %v7132_v2  ;;  %v7135_v16 = vadd.f32 %v19171_v22, %v23071_v8  ;;  %v7134_v20 = vadd.f32 %v7089_v59, %v23073_v53 }
 0x5aa   : > { %v7457_v10 = vcombine.low %v7449_v31, %v7456_v28  ;;  %v7465_v1 = vrot.slane %v7458_v57, %v20561_v25  ;;  %v7271_v12 = vcombine.high %v7269_v4, %v7269_v4  ;;  %v7137_v60 = vadd.f32 %v19174_v37, %v23081_v26  ;;  %v19177_v22 = vpop.f32.mrf.mxu1 }
 0x5ab   : > { %v7515_v11 = vrot.slane %v7507_v27, %v20561_v25  ;;  %v7238_v34 = vcombine.high %v7146_v3, %v7146_v3  ;;  %v7245_v45 = vrot.slane %v7146_v3, %v20561_v25  ;;  %v7149_v17 = vadd.f32 %v23068_v6, %v7135_v16 }
 0x5ac   : > { %v7473_v24 = vcombine.low %v7465_v1, %v7472_v50  ;;  %7690 = vst [vmem:[#allocation2 + $0x10] sm:$0xff] %v7457_v10  ;;  %v7148_v8 = vadd.f32 %v23068_v6, %v7134_v20  ;;  %v7151_v53 = vadd.f32 %v23068_v6, %v7137_v60  ;;  %v7136_v5 = vadd.f32 %v7099_v47, %v23083_v0  ;;  %v7109_v56 = vpop.f32.mrf.mxu1 }
 0x5ad   : > { %v7252_v29 = vrot.slane %v7238_v34, %v20561_v25  ;;  %v7253_v9 = vcombine.high %v7245_v45, %v7245_v45  ;;  %v7289_v51 = vcombine.high %v7149_v17, %v7149_v17  ;;  %v7296_v26 = vrot.slane %v7149_v17, %v20561_v25 }
 0x5ae   : > { %7691 = vst [vmem:[#allocation2 + $0x18] sm:$0x3f] %v7473_v24  ;;  %v7272_v52 = vcombine.high %v7148_v8, %v7148_v8  ;;  %v7279_v13 = vrot.slane %v7148_v8, %v20561_v25  ;;  %v7323_v48 = vcombine.high %v7151_v53, %v7151_v53  ;;  %v23137_v63 = vrot.slane %v7151_v53, %v20561_v25  ;;  %v19180_v17 = vpop.f32.mrf.mxu1 }
 0x5af   : > { %v7254_v14 = vcombine.high %v7252_v29, %v7252_v29  ;;  %v7475_v38 = vcombine.low %v7245_v45, %v7253_v9  ;;  %v7303_v43 = vrot.slane %v7289_v51, %v20561_v25  ;;  %v7304_v0 = vcombine.high %v7296_v26, %v7296_v26 }
 0x5b0   : > { %v7712_v49 = vld [vmem:[#allocation2] ss:$2 sm:$0x7f]  ;;  %v7728_v30 = vld [vmem:[#allocation2 + $0x1] ss:$2 sm:$0x7f]  ;;  %v7286_v50 = vrot.slane %v7272_v52, %v20561_v25  ;;  %v7287_v58 = vcombine.high %v7279_v13, %v7279_v13  ;;  %v7508_v41 = vcombine.low %v7271_v12, %v7279_v13  ;;  %v23142_v59 = vrot.slane %v7323_v48, %v20561_v25 }
 0x5b1   : > { %v7743_v36 = vmax.f32 %v7712_v49, %v7728_v30  ;;  %13449 = vst [vmem:[#allocation2 + $0x7] sm:$0x1] %v26405_v42  ;;  %v7489_v39 = vrot.slane %v7475_v38, %v20561_v25  ;;  %v7491_v40 = vcombine.low %v7252_v29, %v7254_v14  ;;  %v7305_v21 = vcombine.high %v7303_v43, %v7303_v43  ;;  %v7752_v18 = vld [vmem:[#allocation2 + $0x2] ss:$2 sm:$0x7f] }
 0x5b2   : > { %v7540_v54 = vcombine.low %v7296_v26, %v7304_v0  ;;  %v7288_v35 = vcombine.high %v7286_v50, %v7286_v50  ;;  %v7522_v2 = vrot.slane %v7508_v41, %v20561_v25  ;;  %v7524_v37 = vcombine.low %v7287_v58, %v7286_v50 }
 0x5b3   : > { %v23147_v31 = vmax.f32 %v7743_v36, %v7752_v18  ;;  %v7490_v4 = vcombine.low %v7482_v44, %v7489_v39  ;;  %v7498_v32 = vrot.slane %v7491_v40, %v20561_v25  ;;  %v7541_v28 = vcombine.low %v7303_v43, %v7305_v21 }
 0x5b4   : > { %v7548_v57 = vrot.slane %v7540_v54, %v20561_v25  ;;  %v7523_v27 = vcombine.low %v7515_v11, %v7522_v2  ;;  %v7531_v3 = vrot.slane %v7524_v37, %v20561_v25  ;;  %v7538_v16 = vrot.slane %v7288_v35, %v20561_v25  ;;  %v7119_v37 = vpop.f32.mrf.mxu1 }
 0x5b5   : > { %v7714_v20 = vld [vmem:[#allocation2 + $0x10] ss:$2 sm:$0x7f]  ;;  %v7730_v47 = vld [vmem:[#allocation2 + $0x11] ss:$2 sm:$0x7f]  ;;  %v7506_v10 = vcombine.low %v7498_v32, %v7505_v15  ;;  %v7555_v1 = vrot.slane %v7541_v28, %v20561_v25  ;;  %v7338_v12 = vcombine.high %v23137_v63, %v23137_v63  ;;  %v7150_v44 = vadd.f32 %v23068_v6, %v7136_v5 }
 0x5b6   : > { %7692 = vst [vmem:[#allocation2 + $0x20] sm:$0xff] %v7490_v4  ;;  %v7744_v60 = vmax.f32 %v7714_v20, %v7730_v47  ;;  %13450 = vst [vmem:[#allocation2 + $0x17] sm:$0x1] %v26405_v42  ;;  %v7539_v34 = vcombine.low %v7531_v3, %v7538_v16  ;;  %v7139_v11 = vadd.f32 %v19177_v22, %v23085_v62  ;;  %v7754_v24 = vld [vmem:[#allocation2 + $0x12] ss:$2 sm:$0x7f] }
 0x5b7   : > { %7694 = vst [vmem:[#allocation2 + $0x30] sm:$0xff] %v7523_v27  ;;  %v7138_v45 = vadd.f32 %v7109_v56, %v23087_v61  ;;  %7693 = vst [vmem:[#allocation2 + $0x28] sm:$0x3f] %v7506_v10  ;;  %v7556_v15 = vcombine.low %v7548_v57, %v7555_v1  ;;  %v7574_v8 = vcombine.low %v7338_v12, %v23142_v59 }
 0x5b8   : > { %v7306_v53 = vcombine.high %v7150_v44, %v7150_v44  ;;  %v7313_v29 = vrot.slane %v7150_v44, %v20561_v25  ;;  %v23162_v9 = vmax.f32 %v7744_v60, %v7754_v24  ;;  %7695 = vst [vmem:[#allocation2 + $0x38] sm:$0x3f] %v7539_v34  ;;  %v7153_v5 = vadd.f32 %v23068_v6, %v7139_v11 }
 0x5b9   : > { %v7152_v51 = vadd.f32 %v23068_v6, %v7138_v45  ;;  %v7339_v62 = vcombine.high %v23142_v59, %v23142_v59  ;;  %7696 = vst [vmem:[#allocation2 + $0x40] sm:$0xff] %v7556_v15  ;;  %v7588_v61 = vrot.slane %v7574_v8, %v20561_v25  ;;  %v7141_v13 = vadd.f32 %v19180_v17, %v23091_v33 }
 0x5ba   : > { %v7320_v26 = vrot.slane %v7306_v53, %v20561_v25  ;;  %v7321_v52 = vcombine.high %v7313_v29, %v7313_v29  ;;  %v7357_v48 = vcombine.high %v7153_v5, %v7153_v5  ;;  %v7364_v22 = vrot.slane %v7153_v5, %v20561_v25 }
 0x5bb   : > { %v7340_v14 = vcombine.high %v7152_v51, %v7152_v51  ;;  %v7347_v38 = vrot.slane %v7152_v51, %v20561_v25  ;;  %v7155_v30 = vadd.f32 %v23068_v6, %v7141_v13  ;;  %v7140_v12 = vadd.f32 %v7119_v37, %v23093_v7 }
 0x5bc   : > { %v7322_v43 = vcombine.high %v7320_v26, %v7320_v26  ;;  %v7557_v0 = vcombine.low %v7313_v29, %v7321_v52  ;;  %v7571_v49 = vrot.slane %v7320_v26, %v20561_v25  ;;  %v7371_v50 = vrot.slane %v7357_v48, %v20561_v25 }
 0x5bd   : > { %v7372_v58 = vcombine.high %v7364_v22, %v7364_v22  ;;  %v7354_v41 = vrot.slane %v7340_v14, %v20561_v25  ;;  %v7355_v59 = vcombine.high %v7347_v38, %v7347_v38  ;;  %v7590_v39 = vcombine.low %v7339_v62, %v7347_v38 }
 0x5be   : > { %v7564_v33 = vrot.slane %v7557_v0, %v20561_v25  ;;  %v7573_v36 = vcombine.low %v7322_v43, %v23137_v63  ;;  %v7391_v40 = vcombine.high %v7155_v30, %v7155_v30  ;;  %v7732_v21 = vld [vmem:[#allocation2 + $0x21] ss:$2 sm:$0x7f]  ;;  %v7373_v18 = vcombine.high %v7371_v50, %v7371_v50  ;;  %v7716_v20 = vld [vmem:[#allocation2 + $0x20] ss:$2 sm:$0x7f] }
 0x5bf   : > { %v7607_v54 = vcombine.low %v7364_v22, %v7372_v58  ;;  %v7356_v35 = vcombine.high %v7354_v41, %v7354_v41  ;;  %v7604_v2 = vrot.slane %v7355_v59, %v20561_v25  ;;  %13451 = vst [vmem:[#allocation2 + $0x27] sm:$0x1] %v26405_v42  ;;  %v7734_v56 = vld [vmem:[#allocation2 + $0x31] ss:$2 sm:$0x7f]  ;;  %v7597_v28 = vrot.slane %v7590_v39, %v20561_v25 }
 0x5c0   : > { %v7572_v4 = vcombine.low %v7564_v33, %v7571_v49  ;;  %v7581_v32 = vrot.slane %v7573_v36, %v20561_v25  ;;  %v7398_v57 = vrot.slane %v7155_v30, %v20561_v25  ;;  %13452 = vst [vmem:[#allocation2 + $0x37] sm:$0x1] %v26405_v42  ;;  %v7623_v27 = vcombine.low %v7371_v50, %v7373_v18  ;;  %v7718_v44 = vld [vmem:[#allocation2 + $0x30] ss:$2 sm:$0x7f] }
 0x5c1   : > { %v7621_v63 = vrot.slane %v7607_v54, %v20561_v25  ;;  %v7606_v3 = vcombine.low %v7354_v41, %v7356_v35  ;;  %v7405_v16 = vrot.slane %v7391_v40, %v20561_v25  ;;  %v7605_v10 = vcombine.low %v7597_v28, %v7604_v2  ;;  %v7756_v5 = vld [vmem:[#allocation2 + $0x22] ss:$2 sm:$0x7f]  ;;  %v7758_v13 = vld [vmem:[#allocation2 + $0x32] ss:$2 sm:$0x7f] }
 0x5c2   : > { %v7589_v47 = vcombine.low %v7581_v32, %v7588_v61  ;;  %7697 = vst [vmem:[#allocation2 + $0x48] sm:$0x3f] %v7572_v4  ;;  %v7406_v1 = vcombine.high %v7398_v57, %v7398_v57  ;;  %v7630_v11 = vrot.slane %v7623_v27, %v20561_v25  ;;  %v7775_v45 = vmax.f32 %v23147_v31, 0.0 }
 0x5c3   : > { %v7614_v60 = vrot.slane %v7606_v3, %v20561_v25  ;;  %v7407_v34 = vcombine.high %v7405_v16, %v7405_v16  ;;  %7699 = vst [vmem:[#allocation2 + $0x58] sm:$0x3f] %v7605_v10  ;;  %v7154_v24 = vadd.f32 %v23068_v6, %v7140_v12  ;;  %v7776_v15 = vmax.f32 %v23162_v9, 0.0 }
 0x5c4   : > { %7698 = vst [vmem:[#allocation2 + $0x50] sm:$0xff] %v7589_v47  ;;  %v7656_v17 = vcombine.low %v7406_v1, %v7405_v16  ;;  %v7745_v8 = vmax.f32 %v7716_v20, %v7732_v21  ;;  %v7791_v7 = vrot.slane %v7775_v45, 7  ;;  %v7746_v51 = vmax.f32 %v7718_v44, %v7734_v56 }
 0x5c5   : > { %v7622_v53 = vcombine.low %v7614_v60, %v7621_v63  ;;  %v7670_v29 = vrot.slane %v7407_v34, %v20561_v25  ;;  %v7374_v61 = vcombine.high %v7154_v24, %v7154_v24  ;;  %v7381_v26 = vrot.slane %v7154_v24, %v20561_v25 }
 0x5c6   : > { %v7663_v62 = vrot.slane %v7656_v17, %v20561_v25  ;;  %v7792_v52 = vrot.slane %v7776_v15, 7  ;;  %v7807_v48 = vsel %vm899_vm0, 0.0, %v7791_v7  ;;  %v23197_v6 = vmax.f32 %v7745_v8, %v7756_v5 }
 0x5c7   : > { %7700 = vst [vmem:[#allocation2 + $0x60] sm:$0xff] %v7622_v53  ;;  %v23201_v22 = vrot.slane %v23077_v46, %v23063_v23  ;;  %v23203_v14 = vmax.f32 %v7746_v51, %v7758_v13  ;;  %v7388_v43 = vrot.slane %v7374_v61, %v20561_v25  ;;  %v7389_v0 = vcombine.high %v7381_v26, %v7381_v26 }
 0x5c8   : > { %v7671_v38 = vcombine.low %v7663_v62, %v7670_v29  ;;  %v7637_v49 = vrot.slane %v7381_v26, %v20561_v25  ;;  %v7808_v30 = vsel %vm899_vm0, 0.0, %v7792_v52  ;;  %v7823_v50 = vcombine.high %v7807_v48, %v7807_v48 }
 0x5c9   : > { %v7830_v58 = vrot.slane %v7807_v48, %v23063_v23  ;;  %v7777_v41 = vmax.f32 %v23197_v6, 0.0  ;;  %v7390_v59 = vcombine.high %v7388_v43, %v7388_v43  ;;  %v7639_v46 = vcombine.low %v7389_v0, %v7388_v43  ;;  %v23211_v39 = vld [vmem:[#allocation2 + $0x41] ss:$2 sm:$0x7f] }
 0x5ca   : > { %7703 = vst [vmem:[#allocation2 + $0x78] sm:$0x3f] %v7671_v38  ;;  %v7638_v33 = vcombine.low %v7630_v11, %v7637_v49  ;;  %v7878_v36 = vrot.slane %v7808_v30, %v23063_v23  ;;  %v7837_v40 = vrot.slane %v7823_v50, %v23063_v23  ;;  %13453 = vst [vmem:[#allocation2 + $0x47] sm:$0x1] %v26405_v42 }
 0x5cb   : > { %v7838_v21 = vcombine.high %v7830_v58, %v7830_v58  ;;  %v7846_v18 = vrot.slane %v7830_v58, %v23063_v23  ;;  %v7793_v54 = vrot.slane %v7777_v41, 7  ;;  %v7640_v35 = vcombine.low %v7390_v59, %v7398_v57  ;;  %v23218_v4 = vld [vmem:[#allocation2 + $0x51] ss:$2 sm:$0x7f] }
 0x5cc   : > { %v7647_v2 = vrot.slane %v7639_v46, %v20561_v25  ;;  %7701 = vst [vmem:[#allocation2 + $0x68] sm:$0x3f] %v7638_v33  ;;  %v7886_v37 = vcombine.high %v7878_v36, %v7878_v36  ;;  %v7894_v56 = vrot.slane %v7878_v36, %v23063_v23  ;;  %v7839_v32 = vcombine.high %v7837_v40, %v7837_v40 }
 0x5cd   : > { %v23221_v28 = vrot.slane %v7837_v40, %v23063_v23  ;;  %v7860_v63 = vrot.slane %v7838_v21, %v23063_v23  ;;  %v7868_v27 = vcombine.high %v7846_v18, %v7846_v18  ;;  %13454 = vst [vmem:[#allocation2 + $0x57] sm:$0x1] %v26405_v42  ;;  %v7654_v3 = vrot.slane %v7640_v35, %v20561_v25 }
 0x5ce   : > { %v23227_v57 = vrot.slane %v7886_v37, %v23063_v23  ;;  %v23230_v16 = vsel %vm899_vm0, 0.0, %v7793_v54  ;;  %v7871_v20 = vcombine.high %v7808_v30, %v7808_v30  ;;  %v23233_v47 = vrot.slane %v7839_v32, %v23063_v23 }
 0x5cf   : > { %v7869_v10 = vcombine.high %v23221_v28, %v23221_v28  ;;  %v8697_v1 = vcombine.low %v7846_v18, %v7860_v63  ;;  %v17919_v12 = vcombine.high %v7846_v18, %v7860_v63  ;;  %v7655_v44 = vcombine.low %v7647_v2, %v7654_v3 }
 0x5d0   : > { %v7870_v60 = vcombine.high %v7860_v63, %v7860_v63  ;;  %v8247_v34 = vcombine.low %v7860_v63, %v7868_v27  ;;  %v7885_v25 = vrot.slane %v7871_v20, %v23063_v23  ;;  %v8699_v11 = vcombine.low %v23221_v28, %v23233_v47 }
 0x5d1   : > { %v8700_v45 = vcombine.low %v7869_v10, %v7894_v56  ;;  %v8707_v17 = vrot.slane %v8697_v1, %v23063_v23  ;;  %v23242_v24 = vrot.slane %v17919_v12, %v23063_v23  ;;  %7702 = vst [vmem:[#allocation2 + $0x70] sm:$0xff] %v7655_v44  ;;  %v8223_v15 = vcombine.high %v23233_v47, %v23233_v47 }
 0x5d2   : > { %v8248_v8 = vcombine.low %v7870_v60, %v23221_v28  ;;  %v8249_v53 = vcombine.low %v23233_v47, %v7869_v10  ;;  %v8257_v29 = vrot.slane %v8247_v34, %v23063_v23  ;;  %v23250_v7 = vrot.slane %v8699_v11, %v23063_v23  ;;  %v9177_v60 = vld [vmem:[#allocation6 + $0x178] sm:$0xff] }
 0x5d3   : > { %v8728_v5 = vrot.slane %v8700_v45, %v23063_v23  ;;  %v8729_v51 = vcombine.low %v8707_v17, %v23242_v24  ;;  %v7887_v62 = vcombine.high %v7885_v25, %v7885_v25  ;;  %v23254_v61 = vld [vmem:[#allocation2 + $0x61] ss:$2 sm:$0x7f]  ;;  %v8250_v26 = vcombine.low %v8223_v15, %v23227_v57 }
 0x5d4   : > { %v8264_v52 = vrot.slane %v8248_v8, %v23063_v23  ;;  %v8271_v13 = vrot.slane %v8249_v53, %v23063_v23  ;;  %v7901_v48 = vrot.slane %v7885_v25, %v23063_v23  ;;  %13455 = vst [vmem:[#allocation2 + $0x67] sm:$0x1] %v26405_v42  ;;  %v7919_v49 = vcombine.high %v23230_v16, %v23230_v16 }
 0x5d5   : > { %v8730_v38 = vcombine.low %v23250_v7, %v8728_v5  ;;  %v8737_v43 = vrot.slane %v8729_v51, %v23063_v23  ;;  %v23264_v0 = vrot.slane %v7887_v62, %v23063_v23  ;;  %v8278_v30 = vrot.slane %v8250_v26, %v23063_v23  ;;  %v7720_v62 = vld [vmem:[#allocation2 + $0x40] ss:$2 sm:$0x7f] }
 0x5d6   : > { %v8279_v50 = vcombine.low %v8257_v29, %v8264_v52  ;;  %v7926_v58 = vrot.slane %v23230_v16, %v23063_v23  ;;  %v17911_v41 = vcombine.high %v7894_v56, %v23227_v57  ;;  %v23275_v36 = vcombine.high %v7894_v56, %v7894_v56 }
 0x5d7   : > { %v8744_v59 = vrot.slane %v8730_v38, %v23063_v23  ;;  %v8297_v33 = vcombine.low %v7901_v48, %v23264_v0  ;;  %v17912_v46 = vcombine.high %v7901_v48, %v23264_v0  ;;  %v8280_v40 = vcombine.low %v8271_v13, %v8278_v30 }
 0x5d8   : > { %v8287_v21 = vrot.slane %v8279_v50, %v23063_v23  ;;  %v7934_v18 = vcombine.high %v7926_v58, %v7926_v58  ;;  %v7942_v54 = vrot.slane %v7926_v58, %v23063_v23  ;;  %v23279_v35 = vld [vmem:[#allocation2 + $0x71] ss:$2 sm:$0x7f]  ;;  %v8306_v37 = vrot.slane %v17911_v41, %v23063_v23 }
 0x5d9   : > { %v8745_v2 = vcombine.low %v8737_v43, %v8744_v59  ;;  %v8313_v32 = vrot.slane %v8297_v33, %v23063_v23  ;;  %v8320_v63 = vrot.slane %v17912_v46, %v23063_v23  ;;  %13456 = vst [vmem:[#allocation2 + $0x77] sm:$0x1] %v26405_v42  ;;  %v8294_v56 = vrot.slane %v8280_v40, %v23063_v23  ;;  %v9175_v43 = vld [vmem:[#allocation6 + $0x168] sm:$0xff]  ;;  %v9174_v40 = vld [vmem:[#allocation6 + $0x160] sm:$0xff] }
 0x5da   : > { %v7956_v27 = vrot.slane %v7934_v18, %v23063_v23  ;;  %v7964_v3 = vcombine.high %v7942_v54, %v7942_v54  ;;  %v7917_v16 = vcombine.high %v7901_v48, %v7901_v48  ;;  %v7918_v10 = vcombine.high %v23227_v57, %v23227_v57 }
 0x5db   : > { %19267 = vmatmul.mubr.f32.vlgmr.msra.gmra.mxu1 %v8745_v2  ;;  %v8328_v20 = vcombine.low %v8306_v37, %v8313_v32  ;;  %v8746_v1 = vcombine.low %v23227_v57, %v23275_v36  ;;  %v9179_v12 = vcombine.low %v23201_v22, %v23275_v36  ;;  %v8295_v44 = vcombine.low %v8287_v21, %v8294_v56  ;;  %v9176_v57 = vld [vmem:[#allocation6 + $0x170] sm:$0xff] }
 0x5dc   : > { %19269 = vmatprep.mubr.msk.f32.mxu1 %vm20312_vm8, %v26405_v42  ;;  %v8299_v34 = vcombine.low %v7956_v27, %v7964_v3  ;;  %v8748_v25 = vcombine.low %v23264_v0, %v7917_v16  ;;  %v8749_v11 = vcombine.low %v7942_v54, %v7956_v27  ;;  %v8747_v17 = vcombine.low %v7918_v10, %v7901_v48 }
 0x5dd   : > { %v8336_v45 = vrot.slane %v8328_v20, %v23063_v23  ;;  %v8756_v15 = vrot.slane %v8746_v1, %v23063_v23  ;;  %v7778_v8 = vmax.f32 %v23203_v14, 0.0  ;;  %19341 = vmatpush3.msra.mxu1 %v23021_v19  ;;  %19214 = vmatmul.mubr.f32.vlgmr.msra.gmra.mxu0 %v8295_v44  ;;  %v7933_v51 = vrot.slane %v7919_v49, %v23063_v23  ;;  %v9173_v1 = vld [vmem:[#allocation6 + $0x158] sm:$0xff]  ;;  %v7760_v44 = vld [vmem:[#allocation2 + $0x42] ss:$2 sm:$0x7f] }
 0x5de   : > { %v8327_v53 = vrot.slane %v8299_v34, %v23063_v23  ;;  %v23302_v29 = vrot.slane %v8748_v25, %v23063_v23  ;;  %v8777_v5 = vrot.slane %v8749_v11, %v23063_v23  ;;  %19288 = vmatpush3.msra.mxu0 %v9177_v60  ;;  %19216 = vmatprep.mubr.msk.f32.mxu0 %vm20312_vm8, %v26405_v42 }
 0x5df   : > { %v23309_v26 = vrot.slane %v8747_v17, %v23063_v23  ;;  %v7794_v19 = vrot.slane %v7778_v8, 7  ;;  %v7966_v52 = vcombine.high %v7956_v27, %v7956_v27  ;;  %v17920_v13 = vcombine.high %v7942_v54, %v7956_v27  ;;  %19289 = vmatprep.subr.mxu0 %v26405_v42  ;;  %19342 = vmatprep.subr.mxu1 %v26405_v42 }
 0x5e0   : > { %v8329_v48 = vcombine.low %v8320_v63, %v8327_v53  ;;  %v8779_v38 = vcombine.low %v23302_v29, %v8777_v5  ;;  %v7935_v30 = vcombine.high %v7933_v51, %v7933_v51  ;;  %v23314_v49 = vrot.slane %v7933_v51, %v23063_v23  ;;  %19290 = vmatpush3.msra.mxu0 %v9176_v57 }
 0x5e1   : > { %v8778_v50 = vcombine.low %v8756_v15, %v23309_v26  ;;  %v7810_v58 = vsel %vm899_vm0, 0.0, %v7794_v19  ;;  %v23319_v41 = vrot.slane %v17920_v13, %v23063_v23  ;;  %v7747_v59 = vmax.f32 %v7720_v62, %v23211_v39  ;;  %19291 = vmatprep.subr.mxu0 %v26405_v42  ;;  %v9172_v15 = vld [vmem:[#allocation6 + $0x150] sm:$0xff]  ;;  %v9171_v13 = vld [vmem:[#allocation6 + $0x148] sm:$0xff] }
 0x5e2   : > { %v8343_v33 = vrot.slane %v8329_v48, %v23063_v23  ;;  %v8793_v46 = vrot.slane %v8779_v38, %v23063_v23  ;;  %v23327_v21 = vrot.slane %v7935_v30, %v23063_v23  ;;  %v7965_v18 = vcombine.high %v23314_v49, %v23314_v49  ;;  %19292 = vmatpush3.msra.mxu0 %v9175_v43  ;;  %v23363_v48 = vld [vmem:[#allocation2 + $0x50] ss:$2 sm:$0x7f] }
 0x5e3   : > { %v8786_v54 = vrot.slane %v8778_v50, %v23063_v23  ;;  %v7967_v2 = vcombine.high %v7810_v58, %v7810_v58  ;;  %v7974_v39 = vrot.slane %v7810_v58, %v23063_v23  ;;  %v8345_v37 = vcombine.low %v7966_v52, %v23314_v49  ;;  %19293 = vmatprep.subr.mxu0 %v26405_v42  ;;  %v20101_v58 = vld [vmem:[#allocation6 + $0xf0] sm:$0xff] }
 0x5e4   : > { %v8344_v32 = vcombine.low %v8336_v45, %v8343_v33  ;;  %v8225_v63 = vcombine.high %v23327_v21, %v23327_v21  ;;  %v8346_v56 = vcombine.low %v23327_v21, %v7965_v18  ;;  %v8796_v27 = vcombine.low %v23314_v49, %v23327_v21  ;;  %19294 = vmatpush3.msra.mxu0 %v9174_v40 }
 0x5e5   : > { %v8794_v3 = vcombine.low %v8786_v54, %v8793_v46  ;;  %v7982_v16 = vcombine.high %v7974_v39, %v7974_v39  ;;  %v7990_v20 = vrot.slane %v7974_v39, %v23063_v23  ;;  %v8355_v10 = vrot.slane %v8345_v37, %v23063_v23  ;;  %19295 = vmatprep.subr.mxu0 %v26405_v42 }
 0x5e6   : > { %19217 = vmatmul.mubr.f32.gmra.mxu0 %v8344_v32  ;;  %v8362_v60 = vrot.slane %v8346_v56, %v23063_v23  ;;  %v23345_v34 = vrot.slane %v8796_v27, %v23063_v23  ;;  %v23347_v25 = vmax.f32 %v7747_v59, %v7760_v44  ;;  %v7981_v5 = vrot.slane %v7967_v2, %v23063_v23 }
 0x5e7   : > { %19270 = vmatmul.mubr.f32.gmra.mxu1 %v8794_v3  ;;  %19219 = vmatprep.mubr.msk.f32.mxu0 %vm20312_vm8, %v26405_v42  ;;  %v8004_v11 = vrot.slane %v7982_v16, %v23063_v23  ;;  %v23352_v45 = vcombine.high %v7990_v20, %v7990_v20  ;;  %v8797_v17 = vcombine.low %v7965_v18, %v7990_v20  ;;  %v9170_v18 = vld [vmem:[#allocation6 + $0x140] sm:$0xff]  ;;  %v9169_v3 = vld [vmem:[#allocation6 + $0x138] sm:$0xff] }
 0x5e8   : > { %19272 = vmatprep.mubr.msk.f32.mxu1 %vm20312_vm8, %v26405_v42  ;;  %v8377_v8 = vcombine.low %v8355_v10, %v8362_v60  ;;  %v8827_v57 = vcombine.low %v23319_v41, %v23345_v34  ;;  %19296 = vmatpush3.msra.mxu0 %v9173_v1  ;;  %v7779_v53 = vmax.f32 %v23347_v25, 0.0  ;;  %v7983_v50 = vcombine.high %v7981_v5, %v7981_v5 }
 0x5e9   : > { %v8347_v51 = vcombine.low %v8225_v63, %v8004_v11  ;;  %v17913_v62 = vcombine.high %v7990_v20, %v8004_v11  ;;  %v8798_v19 = vcombine.low %v8004_v11, %v23352_v45  ;;  %v8819_v52 = vrot.slane %v8797_v17, %v23063_v23  ;;  %19297 = vmatprep.subr.mxu0 %v26405_v42  ;;  %v9168_v17 = vld [vmem:[#allocation6 + $0x130] sm:$0xff] }
 0x5ea   : > { %v8385_v38 = vrot.slane %v8377_v8, %v23063_v23  ;;  %v8835_v43 = vrot.slane %v8827_v57, %v23063_v23  ;;  %19298 = vmatpush3.msra.mxu0 %v9172_v15  ;;  %v7795_v30 = vrot.slane %v7779_v53, 7  ;;  %19343 = vmatpush3.msra.mxu1 %v20101_v58  ;;  %v7997_v40 = vrot.slane %v7981_v5, %v23063_v23  ;;  %v9167_v58 = vld [vmem:[#allocation6 + $0x128] sm:$0xff] }
 0x5eb   : > { %v8369_v59 = vrot.slane %v8347_v51, %v23063_v23  ;;  %v8376_v33 = vrot.slane %v17913_v62, %v23063_v23  ;;  %v8826_v46 = vrot.slane %v8798_v19, %v23063_v23  ;;  %19299 = vmatprep.subr.mxu0 %v26405_v42  ;;  %v23374_v2 = vrot.slane %v7983_v50, %v23063_v23 }
 0x5ec   : > { %v7811_v54 = vsel %vm899_vm0, 0.0, %v7795_v30  ;;  %v8014_v39 = vcombine.high %v8004_v11, %v8004_v11  ;;  %19300 = vmatpush3.msra.mxu0 %v9171_v13  ;;  %v7748_v37 = vmax.f32 %v23363_v48, %v23218_v4  ;;  %19344 = vmatprep.subr.mxu1 %v26405_v42  ;;  %v8013_v10 = vcombine.high %v7997_v40, %v7997_v40 }
 0x5ed   : > { %v8378_v32 = vcombine.low %v8369_v59, %v8376_v33  ;;  %v8828_v63 = vcombine.low %v8819_v52, %v8826_v46  ;;  %v8015_v56 = vcombine.high %v7811_v54, %v7811_v54  ;;  %v8022_v27 = vrot.slane %v7811_v54, %v23063_v23  ;;  %19301 = vmatprep.subr.mxu0 %v26405_v42 }
 0x5ee   : > { %v8394_v16 = vcombine.low %v7997_v40, %v23374_v2  ;;  %v17914_v20 = vcombine.high %v7997_v40, %v23374_v2  ;;  %v8844_v1 = vcombine.low %v8014_v39, %v7997_v40  ;;  %19302 = vmatpush3.msra.mxu0 %v9170_v18  ;;  %v8845_v53 = vcombine.low %v23374_v2, %v8013_v10  ;;  %v7762_v40 = vld [vmem:[#allocation2 + $0x52] ss:$2 sm:$0x7f]  ;;  %v7724_v18 = vld [vmem:[#allocation2 + $0x60] ss:$2 sm:$0x7f] }
 0x5ef   : > { %v8392_v44 = vrot.slane %v8378_v32, %v23063_v23  ;;  %v8842_v4 = vrot.slane %v8828_v63, %v23063_v23  ;;  %v8029_v60 = vrot.slane %v8015_v56, %v23063_v23  ;;  %v8030_v11 = vcombine.high %v8022_v27, %v8022_v27  ;;  %19303 = vmatprep.subr.mxu0 %v26405_v42  ;;  %v9166_v56 = vld [vmem:[#allocation6 + $0x120] sm:$0xff] }
 0x5f0   : > { %v8038_v15 = vrot.slane %v8022_v27, %v23063_v23  ;;  %v8404_v8 = vrot.slane %v8394_v16, %v23063_v23  ;;  %v8411_v57 = vrot.slane %v17914_v20, %v23063_v23  ;;  %19304 = vmatpush3.msra.mxu0 %v9169_v3  ;;  %v23397_v48 = vrot.slane %v8844_v1, %v23063_v23  ;;  %v7726_v27 = vld [vmem:[#allocation2 + $0x70] ss:$2 sm:$0x7f] }
 0x5f1   : > { %v8393_v5 = vcombine.low %v8385_v38, %v8392_v44  ;;  %v8843_v51 = vcombine.low %v8835_v43, %v8842_v4  ;;  %v23392_v62 = vrot.slane %v8029_v60, %v23063_v23  ;;  %v8052_v19 = vrot.slane %v8030_v11, %v23063_v23  ;;  %19305 = vmatprep.subr.mxu0 %v26405_v42  ;;  %v9165_v11 = vld [vmem:[#allocation6 + $0x118] sm:$0xff] }
 0x5f2   : > { %v8060_v52 = vcombine.high %v8038_v15, %v8038_v15  ;;  %v8426_v13 = vcombine.low %v8404_v8, %v8411_v57  ;;  %v23400_v30 = vrot.slane %v8845_v53, %v23063_v23  ;;  %19306 = vmatpush3.msra.mxu0 %v9168_v17  ;;  %v23414_v63 = vmax.f32 %v7748_v37, %v7762_v40  ;;  %v20102_v17 = vld [vmem:[#allocation6 + $0xe8] sm:$0xff] }
 0x5f3   : > { %19220 = vmatmul.mubr.f32.gmra.mxu0 %v8393_v5  ;;  %19273 = vmatmul.mubr.f32.gmra.mxu1 %v8843_v51  ;;  %v8062_v38 = vcombine.high %v8052_v19, %v8052_v19  ;;  %v8846_v43 = vcombine.low %v8038_v15, %v8052_v19  ;;  %v17921_v50 = vcombine.high %v8038_v15, %v8052_v19  ;;  %v7764_v15 = vld [vmem:[#allocation2 + $0x62] ss:$2 sm:$0x7f] }
 0x5f4   : > { %19222 = vmatprep.mubr.msk.f32.mxu0 %vm20312_vm8, %v26405_v42  ;;  %19275 = vmatprep.mubr.msk.f32.mxu1 %vm20312_vm8, %v26405_v42  ;;  %v8396_v59 = vcombine.low %v8052_v19, %v8060_v52  ;;  %v8434_v33 = vrot.slane %v8426_v13, %v23063_v23  ;;  %v8876_v46 = vcombine.low %v23397_v48, %v23400_v30  ;;  %v7780_v37 = vmax.f32 %v23414_v63, 0.0  ;;  %v7766_v52 = vld [vmem:[#allocation2 + $0x72] ss:$2 sm:$0x7f] }
 0x5f5   : > { %v8397_v54 = vcombine.low %v8062_v38, %v23392_v62  ;;  %v8868_v39 = vrot.slane %v8846_v43, %v23063_v23  ;;  %v23412_v32 = vrot.slane %v17921_v50, %v23063_v23  ;;  %19307 = vmatprep.subr.mxu0 %v26405_v42  ;;  %v8031_v20 = vcombine.high %v8029_v60, %v8029_v60  ;;  %v9164_v13 = vld [vmem:[#allocation6 + $0x110] sm:$0xff] }
 0x5f6   : > { %v8418_v3 = vrot.slane %v8396_v59, %v23063_v23  ;;  %v8884_v16 = vrot.slane %v8876_v46, %v23063_v23  ;;  %v23421_v10 = vcombine.high %v23392_v62, %v23392_v62  ;;  %19308 = vmatpush3.msra.mxu0 %v9167_v58  ;;  %v7749_v4 = vmax.f32 %v7724_v18, %v23254_v61  ;;  %v9163_v58 = vld [vmem:[#allocation6 + $0x108] sm:$0xff]  ;;  %v20103_v59 = vld [vmem:[#allocation6 + $0xe0] sm:$0xff] }
 0x5f7   : > { %v8425_v1 = vrot.slane %v8397_v54, %v23063_v23  ;;  %v8877_v44 = vcombine.low %v8868_v39, %v23412_v32  ;;  %19309 = vmatprep.subr.mxu0 %v26405_v42  ;;  %19345 = vmatpush3.msra.mxu1 %v20102_v17  ;;  %v23429_v60 = vrot.slane %v8031_v20, %v23063_v23  ;;  %v7796_v51 = vrot.slane %v7780_v37, 7 }
 0x5f8   : > { %19310 = vmatpush3.msra.mxu0 %v9166_v56  ;;  %v7750_v8 = vmax.f32 %v7726_v27, %v23279_v35  ;;  %v17923_v57 = vcombine.high %v23221_v28, %v23233_v47  ;;  %v23438_v61 = vrot.slane %v9179_v12, %v23063_v23  ;;  %v23441_v19 = vmax.f32 %v7749_v4, %v7764_v15 }
 0x5f9   : > { %v8427_v53 = vcombine.low %v8418_v3, %v8425_v1  ;;  %v8891_v5 = vrot.slane %v8877_v44, %v23063_v23  ;;  %19311 = vmatprep.subr.mxu0 %v26405_v42  ;;  %19346 = vmatprep.subr.mxu1 %v26405_v42  ;;  %v8227_v28 = vcombine.high %v23429_v60, %v23429_v60  ;;  %v7812_v43 = vsel %vm899_vm0, 0.0, %v7796_v51  ;;  %v9162_v44 = vld [vmem:[#allocation6 + $0x100] sm:$0xff] }
 0x5fa   : > { %v8443_v47 = vcombine.low %v23429_v60, %v23421_v10  ;;  %v8893_v36 = vcombine.low %v23392_v62, %v23429_v60  ;;  %v23451_v35 = vmax.f32 %v7750_v8, %v7766_v52  ;;  %19312 = vmatpush3.msra.mxu0 %v9165_v11  ;;  %v7781_v50 = vmax.f32 %v23441_v19, 0.0  ;;  %19347 = vmatpush3.msra.mxu1 %v20103_v59 }
 0x5fb   : > { %v8441_v12 = vrot.slane %v8427_v53, %v23063_v23  ;;  %v8892_v38 = vcombine.low %v8884_v16, %v8891_v5  ;;  %19313 = vmatprep.subr.mxu0 %v26405_v42  ;;  %v8063_v46 = vcombine.high %v7812_v43, %v7812_v43  ;;  %v8070_v40 = vrot.slane %v7812_v43, %v23063_v23 }
 0x5fc   : > { %v8453_v18 = vrot.slane %v8443_v47, %v23063_v23  ;;  %v23460_v54 = vrot.slane %v8893_v36, %v23063_v23  ;;  %19314 = vmatpush3.msra.mxu0 %v9164_v13  ;;  %v7797_v56 = vrot.slane %v7781_v50, 7  ;;  %v7782_v27 = vmax.f32 %v23451_v35, 0.0  ;;  %19348 = vmatprep.subr.mxu1 %v26405_v42 }
 0x5fd   : > { %v8442_v39 = vcombine.low %v8434_v33, %v8441_v12  ;;  %19276 = vmatmul.mubr.f32.gmra.mxu1 %v8892_v38  ;;  %19315 = vmatprep.subr.mxu0 %v26405_v42  ;;  %v23465_v3 = vrot.slane %v17923_v57, %v23063_v23  ;;  %v8077_v16 = vrot.slane %v8063_v46, %v23063_v23 }
 0x5fe   : > { %19278 = vmatprep.mubr.msk.f32.mxu1 %vm20312_vm8, %v26405_v42  ;;  %v8078_v20 = vcombine.high %v8070_v40, %v8070_v40  ;;  %v8086_v1 = vrot.slane %v8070_v40, %v23063_v23  ;;  %19316 = vmatpush3.msra.mxu0 %v9163_v58  ;;  %v7813_v33 = vsel %vm899_vm0, 0.0, %v7797_v56  ;;  %v7798_v37 = vrot.slane %v7782_v27, 7  ;;  %v20104_v58 = vld [vmem:[#allocation6 + $0xd8] sm:$0xff] }
 0x5ff   : > { %19223 = vmatmul.mubr.f32.gmra.mxu0 %v8442_v39  ;;  %19317 = vmatprep.subr.mxu0 %v26405_v42  ;;  %v9194_v4 = vcombine.low %v23242_v24, %v23250_v7  ;;  %v9195_v11 = vcombine.low %v23465_v3, %v23438_v61  ;;  %v8079_v17 = vcombine.high %v8077_v16, %v8077_v16  ;;  %v20111_v3 = vld [vmem:[#allocation6 + $0xa0] sm:$0xff] }
 0x600   : > { %19225 = vmatprep.mubr.msk.f32.mxu0 %vm20312_vm8, %v26405_v42  ;;  %v8093_v15 = vrot.slane %v8077_v16, %v23063_v23  ;;  %v8100_v8 = vrot.slane %v8078_v20, %v23063_v23  ;;  %v23481_v57 = vcombine.high %v8086_v1, %v8086_v1  ;;  %v8894_v53 = vcombine.low %v23421_v10, %v8086_v1  ;;  %v20105_v20 = vld [vmem:[#allocation6 + $0xd0] sm:$0xff] }
 0x601   : > { %v8111_v5 = vcombine.high %v7813_v33, %v7813_v33  ;;  %v8118_v51 = vrot.slane %v7813_v33, %v23063_v23  ;;  %v23486_v52 = vsel %vm899_vm0, 0.0, %v7798_v37  ;;  %19318 = vmatpush3.msra.mxu0 %v9162_v44  ;;  %v23490_v13 = vrot.slane %v8079_v17, %v23063_v23  ;;  %19349 = vmatpush3.msra.mxu1 %v20104_v58  ;;  %v20107_v58 = vld [vmem:[#allocation6 + $0xc0] sm:$0xff] }
 0x602   : > { %v8444_v47 = vcombine.low %v8227_v28, %v8100_v8  ;;  %v17915_v36 = vcombine.high %v8086_v1, %v8100_v8  ;;  %v8110_v12 = vcombine.high %v8100_v8, %v8100_v8  ;;  %19393 = vmatprep.subr.mxu0 %v26405_v42  ;;  %v8895_v38 = vcombine.low %v8100_v8, %v23481_v57 }
 0x603   : > { %v8910_v10 = vrot.slane %v8894_v53, %v23063_v23  ;;  %v8125_v43 = vrot.slane %v8111_v5, %v23063_v23  ;;  %v8126_v50 = vcombine.high %v8118_v51, %v8118_v51  ;;  %v8446_v59 = vcombine.low %v8093_v15, %v23490_v13  ;;  %19350 = vmatprep.subr.mxu1 %v26405_v42 }
 0x604   : > { %v8460_v46 = vrot.slane %v8444_v47, %v23063_v23  ;;  %v8467_v40 = vrot.slane %v17915_v36, %v23063_v23  ;;  %v8896_v28 = vcombine.low %v8110_v12, %v8093_v15  ;;  %v8917_v39 = vrot.slane %v8895_v38, %v23063_v23  ;;  %19351 = vmatpush3.msra.mxu1 %v20105_v20  ;;  %v20108_v20 = vld [vmem:[#allocation6 + $0xb8] sm:$0xff] }
 0x605   : > { %v8925_v56 = vcombine.low %v23460_v54, %v8910_v10  ;;  %v8127_v27 = vcombine.high %v8125_v43, %v8125_v43  ;;  %v8134_v16 = vrot.slane %v8118_v51, %v23063_v23  ;;  %v8474_v1 = vrot.slane %v8446_v59, %v23063_v23  ;;  %19352 = vmatprep.subr.mxu1 %v26405_v42  ;;  %v20106_v51 = vld [vmem:[#allocation6 + $0xc8] sm:$0xff] }
 0x606   : > { %v8475_v44 = vcombine.low %v8453_v18, %v8460_v46  ;;  %v23505_v33 = vrot.slane %v8896_v28, %v23063_v23  ;;  %v23508_v37 = vrot.slane %v8125_v43, %v23063_v23  ;;  %v8148_v8 = vrot.slane %v8126_v50, %v23063_v23  ;;  %19353 = vmatpush3.msra.mxu1 %v20106_v51 }
 0x607   : > { %v8933_v17 = vrot.slane %v8925_v56, %v23063_v23  ;;  %v23514_v53 = vrot.slane %v8127_v27, %v23063_v23  ;;  %v8156_v5 = vcombine.high %v8134_v16, %v8134_v16  ;;  %v8476_v47 = vcombine.low %v8467_v40, %v8474_v1  ;;  %19354 = vmatprep.subr.mxu1 %v26405_v42 }
 0x608   : > { %v8483_v18 = vrot.slane %v8475_v44, %v23063_v23  ;;  %v8926_v36 = vcombine.low %v8917_v39, %v23505_v33  ;;  %v23520_v12 = vcombine.high %v23508_v37, %v23508_v37  ;;  %v8158_v38 = vcombine.high %v8148_v8, %v8148_v8  ;;  %19355 = vmatpush3.msra.mxu1 %v20107_v58 }
 0x609   : > { %v17916_v10 = vcombine.high %v8093_v15, %v23490_v13  ;;  %v8493_v43 = vcombine.low %v8148_v8, %v8156_v5  ;;  %v8109_v50 = vcombine.high %v8093_v15, %v8093_v15  ;;  %v8490_v59 = vrot.slane %v8476_v47, %v23063_v23  ;;  %19356 = vmatprep.subr.mxu1 %v26405_v42 }
 0x60a   : > { %v8940_v46 = vrot.slane %v8926_v36, %v23063_v23  ;;  %v8495_v40 = vcombine.low %v23514_v53, %v23520_v12  ;;  %v8943_v28 = vcombine.low %v8134_v16, %v8148_v8  ;;  %v8494_v39 = vcombine.low %v8158_v38, %v23508_v37  ;;  %19357 = vmatpush3.msra.mxu1 %v20108_v20 }
 0x60b   : > { %v8502_v56 = vrot.slane %v17916_v10, %v23063_v23  ;;  %v8509_v27 = vrot.slane %v8493_v43, %v23063_v23  ;;  %v8942_v15 = vcombine.low %v23490_v13, %v8109_v50  ;;  %v8491_v1 = vcombine.low %v8483_v18, %v8490_v59  ;;  %19358 = vmatprep.subr.mxu1 %v26405_v42  ;;  %v20109_v43 = vld [vmem:[#allocation6 + $0xb0] sm:$0xff] }
 0x60c   : > { %v8941_v44 = vcombine.low %v8933_v17, %v8940_v46  ;;  %v8523_v5 = vrot.slane %v8495_v40, %v23063_v23  ;;  %v17922_v51 = vcombine.high %v8134_v16, %v8148_v8  ;;  %v8516_v47 = vrot.slane %v8494_v39, %v23063_v23  ;;  %19359 = vmatpush3.msra.mxu1 %v20109_v43 }
 0x60d   : > { %v8524_v36 = vcombine.low %v8502_v56, %v8509_v27  ;;  %v8945_v38 = vcombine.low %v23508_v37, %v23514_v53  ;;  %v23539_v10 = vrot.slane %v8942_v15, %v23063_v23  ;;  %19226 = vmatmul.mubr.f32.gmra.mxu0 %v8491_v1  ;;  %v8959_v17 = vrot.slane %v8943_v28, %v23063_v23  ;;  %v20110_v15 = vld [vmem:[#allocation6 + $0xa8] sm:$0xff] }
 0x60e   : > { %19279 = vmatmul.mubr.f32.gmra.mxu1 %v8941_v44  ;;  %v23543_v18 = vrot.slane %v17922_v51, %v23063_v23  ;;  %v8159_v16 = vcombine.high %v23486_v52, %v23486_v52  ;;  %19228 = vmatprep.mubr.msk.f32.mxu0 %vm20312_vm8, %v26405_v42  ;;  %v8525_v8 = vcombine.low %v8516_v47, %v8523_v5 }
 0x60f   : > { %19281 = vmatprep.mubr.msk.f32.mxu1 %vm20312_vm8, %v26405_v42  ;;  %v8532_v50 = vrot.slane %v8524_v36, %v23063_v23  ;;  %v23553_v58 = vrot.slane %v8945_v38, %v23063_v23  ;;  %v8974_v59 = vcombine.low %v23539_v10, %v8959_v17  ;;  %v8166_v46 = vrot.slane %v23486_v52, %v23063_v23 }
 0x610   : > { %v8173_v40 = vrot.slane %v8159_v16, %v23063_v23  ;;  %v8229_v28 = vcombine.high %v23514_v53, %v23514_v53  ;;  %19360 = vmatprep.subr.mxu1 %v26405_v42  ;;  %v8539_v39 = vrot.slane %v8525_v8, %v23063_v23  ;;  %v23569_v27 = vrot.slane %v9194_v4, %v23063_v23 }
 0x611   : > { %v8975_v56 = vcombine.low %v23543_v18, %v23553_v58  ;;  %v23575_v52 = vrot.slane %v9195_v11, %v23063_v23  ;;  %19361 = vmatpush3.msra.mxu1 %v20110_v15  ;;  %v8982_v20 = vrot.slane %v8974_v59, %v23063_v23  ;;  %v8174_v1 = vcombine.high %v8166_v46, %v8166_v46 }
 0x612   : > { %v8175_v44 = vcombine.high %v8173_v40, %v8173_v40  ;;  %v8182_v5 = vrot.slane %v8166_v46, %v23063_v23  ;;  %19362 = vmatprep.subr.mxu1 %v26405_v42  ;;  %v8540_v51 = vcombine.low %v8532_v50, %v8539_v39  ;;  %v8189_v7 = vrot.slane %v8173_v40, %v23063_v23 }
 0x613   : > { %v8989_v24 = vrot.slane %v8975_v56, %v23063_v23  ;;  %v9210_v61 = vcombine.low %v23569_v27, %v23575_v52  ;;  %19363 = vmatpush3.msra.mxu1 %v20111_v3  ;;  %v8196_v4 = vrot.slane %v8174_v1, %v23063_v23  ;;  %v8224_v17 = vcombine.high %v23264_v0, %v23264_v0 }
 0x614   : > { %v23586_v11 = vrot.slane %v8175_v44, %v23063_v23  ;;  %v23588_v47 = vcombine.high %v8182_v5, %v8182_v5  ;;  %v8991_v36 = vcombine.low %v23520_v12, %v8182_v5  ;;  %19364 = vmatprep.subr.mxu1 %v26405_v42  ;;  %19229 = vmatmul.mubr.f32.gmra.mxu0 %v8540_v51 }
 0x615   : > { %v8990_v38 = vcombine.low %v8982_v20, %v8989_v24  ;;  %v8205_v43 = vcombine.high %v8189_v7, %v8189_v7  ;;  %v9219_v16 = vcombine.low %v23309_v26, %v23302_v29  ;;  %19231 = vmatprep.mubr.msk.f32.mxu0 %vm20312_vm8, %v26405_v42  ;;  %v8541_v8 = vcombine.low %v8229_v28, %v8196_v4 }
 0x616   : > { %v17917_v50 = vcombine.high %v8182_v5, %v8196_v4  ;;  %v8543_v59 = vcombine.low %v8189_v7, %v23586_v11  ;;  %v17918_v12 = vcombine.high %v8189_v7, %v23586_v11  ;;  %v8206_v46 = vcombine.high %v8196_v4, %v8196_v4  ;;  %v20112_v5 = vld [vmem:[#allocation6 + $0x98] sm:$0xff] }
 0x617   : > { %19282 = vmatmul.mubr.f32.gmra.mxu1 %v8990_v38  ;;  %v8992_v40 = vcombine.low %v8196_v4, %v23588_v47  ;;  %v8994_v39 = vcombine.low %v23586_v11, %v8205_v43  ;;  %v9001_v0 = vrot.slane %v8991_v36, %v23063_v23  ;;  %v8551_v29 = vrot.slane %v8541_v8, %v23063_v23  ;;  %v20113_v38 = vld [vmem:[#allocation6 + $0x90] sm:$0xff] }
 0x618   : > { %19284 = vmatprep.mubr.msk.f32.mxu1 %vm20312_vm8, %v26405_v42  ;;  %v8558_v26 = vrot.slane %v17917_v50, %v23063_v23  ;;  %v8565_v28 = vrot.slane %v8543_v59, %v23063_v23  ;;  %v8572_v56 = vrot.slane %v17918_v12, %v23063_v23  ;;  %v8993_v15 = vcombine.low %v8206_v46, %v8189_v7 }
 0x619   : > { %v9008_v20 = vrot.slane %v8992_v40, %v23063_v23  ;;  %v23611_v1 = vrot.slane %v8994_v39, %v23063_v23  ;;  %v9211_v44 = vcombine.low %v8224_v17, %v23201_v22  ;;  %19365 = vmatpush3.msra.mxu1 %v20112_v5  ;;  %v17924_v7 = vcombine.high %v23314_v49, %v23327_v21  ;;  %v20114_v49 = vld [vmem:[#allocation6 + $0x88] sm:$0xff]  ;;  %v20116_v5 = vld [vmem:[#allocation6 + $0x78] sm:$0xff] }
 0x61a   : > { %v8573_v51 = vcombine.low %v8551_v29, %v8558_v26  ;;  %v8574_v24 = vcombine.low %v8565_v28, %v8572_v56  ;;  %19366 = vmatprep.subr.mxu1 %v26405_v42  ;;  %v23616_v3 = vrot.slane %v8993_v15, %v23063_v23  ;;  %v9237_v8 = vcombine.low %v23201_v22, %v23352_v45 }
 0x61b   : > { %v9023_v4 = vcombine.low %v9001_v0, %v9008_v20  ;;  %v9218_v36 = vrot.slane %v9211_v44, %v23063_v23  ;;  %19367 = vmatpush3.msra.mxu1 %v20113_v38  ;;  %v8226_v50 = vcombine.high %v23374_v2, %v23374_v2  ;;  %v9227_v46 = vrot.slane %v9219_v16, %v23063_v23  ;;  %v20115_v0 = vld [vmem:[#allocation6 + $0x80] sm:$0xff] }
 0x61c   : > { %v8581_v43 = vrot.slane %v8573_v51, %v23063_v23  ;;  %v8588_v17 = vrot.slane %v8574_v24, %v23063_v23  ;;  %19368 = vmatprep.subr.mxu1 %v26405_v42  ;;  %v9024_v59 = vcombine.low %v23616_v3, %v23611_v1  ;;  %v9244_v39 = vrot.slane %v17924_v7, %v23063_v23 }
 0x61d   : > { %v9220_v12 = vcombine.low %v9218_v36, %v23319_v41  ;;  %19369 = vmatpush3.msra.mxu1 %v20114_v49  ;;  %v9031_v40 = vrot.slane %v9023_v4, %v23063_v23  ;;  %v9251_v41 = vrot.slane %v9237_v8, %v23063_v23  ;;  %v9269_v29 = vcombine.low %v8226_v50, %v23201_v22  ;;  %v20119_v4 = vld [vmem:[#allocation6 + $0x60] sm:$0xff] }
 0x61e   : > { %v8589_v21 = vcombine.low %v8581_v43, %v8588_v17  ;;  %19370 = vmatprep.subr.mxu1 %v26405_v42  ;;  %v9038_v45 = vrot.slane %v9024_v59, %v23063_v23  ;;  %v9252_v56 = vcombine.low %v23345_v34, %v9244_v39  ;;  %v17925_v15 = vcombine.high %v23392_v62, %v23429_v60  ;;  %v20121_v59 = vld [vmem:[#allocation6 + $0x50] sm:$0xff]  ;;  %v20124_v39 = vld [vmem:[#allocation6 + $0x38] sm:$0xff] }
 0x61f   : > { %v9234_v2 = vrot.slane %v9220_v12, %v23063_v23  ;;  %19371 = vmatpush3.msra.mxu1 %v20115_v0  ;;  %v9253_v28 = vcombine.low %v9251_v41, %v23397_v48  ;;  %v9276_v20 = vrot.slane %v9269_v29, %v23063_v23  ;;  %v9295_v44 = vcombine.low %v23201_v22, %v23481_v57 }
 0x620   : > { %19232 = vmatmul.mubr.f32.gmra.mxu0 %v8589_v21  ;;  %v9039_v26 = vcombine.low %v9031_v40, %v9038_v45  ;;  %19446 = vmatprep.subr.mxu1 %v26405_v42  ;;  %v8228_v48 = vcombine.high %v23490_v13, %v23490_v13  ;;  %v9278_v34 = vcombine.low %v23412_v32, %v23460_v54  ;;  %v20117_v32 = vld [vmem:[#allocation6 + $0x70] sm:$0xff]  ;;  %v20123_v45 = vld [vmem:[#allocation6 + $0x40] sm:$0xff] }
 0x621   : > { %19319 = vmatprep.mubr.msk.f32.mxu0 %vm20312_vm8, %v26405_v42  ;;  %v9235_v16 = vcombine.low %v9227_v46, %v9234_v2  ;;  %v9267_v62 = vrot.slane %v9253_v28, %v23063_v23  ;;  %v17926_v60 = vcombine.high %v23508_v37, %v23514_v53  ;;  %v8230_v27 = vcombine.high %v23586_v11, %v23586_v11  ;;  %v20128_v28 = vld [vmem:[#allocation6 + $0x18] sm:$0xff] }
 0x622   : > { %19285 = vmatmul.mubr.f32.gmra.mxu1 %v9039_v26  ;;  %v9260_v57 = vrot.slane %v9252_v56, %v23063_v23  ;;  %v9302_v13 = vrot.slane %v17925_v15, %v23063_v23  ;;  %v9277_v54 = vcombine.low %v23400_v30, %v9276_v20  ;;  %v9309_v52 = vrot.slane %v9295_v44, %v23063_v23  ;;  %v20129_v56 = vld [vmem:[#allocation6 + $0x10] sm:$0xff]  ;;  %v20130_v15 = vld [vmem:[#allocation6 + $0x8] sm:$0xff]  ;;  %v20131_v20 = vld [vmem:[#allocation6] sm:$0xff] }
 0x623   : > { %19372 = vmatprep.mubr.msk.f32.mxu1 %vm20312_vm8, %v26405_v42  ;;  %v9327_v37 = vcombine.low %v8228_v48, %v23201_v22  ;;  %v9292_v53 = vrot.slane %v9278_v34, %v23063_v23  ;;  %v9311_v51 = vcombine.low %v23505_v33, %v23539_v10  ;;  %v9342_v24 = vrot.slane %v17926_v60, %v23063_v23  ;;  %v20120_v10 = vld [vmem:[#allocation6 + $0x58] sm:$0xff] }
 0x624   : > { %19320 = vmatmul.mubr.f32.vlgmr.msra.gmra.mxu0 %v9210_v61  ;;  %v20118_v61 = vld [vmem:[#allocation6 + $0x68] sm:$0xff]  ;;  %v9268_v11 = vcombine.low %v9260_v57, %v9267_v62  ;;  %v9361_v30 = vcombine.low %v8230_v27, %v23201_v22  ;;  %v9285_v36 = vrot.slane %v9277_v54, %v23063_v23  ;;  %v9310_v7 = vcombine.low %v9302_v13, %v9309_v52 }
 0x625   : > { %19322 = vmatprep.mubr.msk.f32.mxu0 %vm20312_vm8, %v26405_v42  ;;  %19394 = vmatpush3.msra.mxu0 %v20116_v5  ;;  %v9335_v38 = vrot.slane %v9327_v37, %v23063_v23  ;;  %v9360_v33 = vcombine.low %v23201_v22, %v23588_v47  ;;  %v9325_v17 = vrot.slane %v9311_v51, %v23063_v23  ;;  %v20122_v47 = vld [vmem:[#allocation6 + $0x48] sm:$0xff] }
 0x626   : > { %19395 = vmatprep.subr.mxu0 %v26405_v42  ;;  %v9293_v43 = vcombine.low %v9285_v36, %v9292_v53  ;;  %v9344_v8 = vcombine.low %v23553_v58, %v9342_v24  ;;  %v9375_v50 = vrot.slane %v9361_v30, %v23063_v23  ;;  %v9318_v12 = vrot.slane %v9310_v7, %v23063_v23 }
 0x627   : > { %19396 = vmatpush3.msra.mxu0 %v20117_v32  ;;  %v9343_v49 = vcombine.low %v9335_v38, %v23543_v18  ;;  %v9368_v46 = vrot.slane %v9360_v33, %v23063_v23 }
 0x628   : > { %19323 = vmatmul.mubr.f32.gmra.mxu0 %v9235_v16  ;;  %19397 = vmatprep.subr.mxu0 %v26405_v42  ;;  %v9326_v21 = vcombine.low %v9318_v12, %v9325_v17  ;;  %v9358_v58 = vrot.slane %v9344_v8, %v23063_v23  ;;  %v9377_v40 = vcombine.low %v23611_v1, %v9375_v50  ;;  %v20125_v1 = vld [vmem:[#allocation6 + $0x30] sm:$0xff]  ;;  %v20127_v16 = vld [vmem:[#allocation6 + $0x20] sm:$0xff] }
 0x629   : > { %19325 = vmatprep.mubr.msk.f32.mxu0 %vm20312_vm8, %v26405_v42  ;;  %19398 = vmatpush3.msra.mxu0 %v20118_v61  ;;  %v9351_v18 = vrot.slane %v9343_v49, %v23063_v23  ;;  %v9376_v2 = vcombine.low %v9368_v46, %v23616_v3  ;;  %v20126_v3 = vld [vmem:[#allocation6 + $0x28] sm:$0xff]  ;;  %v23730_v46 = vld [vmem:[%s26338_s5] ss:$0 sm:$0xff] }
 0x62a   : > { %19399 = vmatprep.subr.mxu0 %v26405_v42  ;;  %v9391_v41 = vrot.slane %v9377_v40, %v23063_v23 }
 0x62b   : > { %19400 = vmatpush3.msra.mxu0 %v20119_v4  ;;  %v9359_v0 = vcombine.low %v9351_v18, %v9358_v58  ;;  %v9384_v29 = vrot.slane %v9376_v2, %v23063_v23 }
 0x62c   : > { %19326 = vmatmul.mubr.f32.gmra.mxu0 %v9268_v11  ;;  %19401 = vmatprep.subr.mxu0 %v26405_v42 }
 0x62d   : > { %19328 = vmatprep.mubr.msk.f32.mxu0 %vm20312_vm8, %v26405_v42  ;;  %19402 = vmatpush3.msra.mxu0 %v20120_v10  ;;  %v9392_v26 = vcombine.low %v9384_v29, %v9391_v41 }
 0x62e   : > { %19403 = vmatprep.subr.mxu0 %v26405_v42 }
 0x62f   : > { %19404 = vmatpush3.msra.mxu0 %v20121_v59 }
 0x630   : > { %19329 = vmatmul.mubr.f32.gmra.mxu0 %v9293_v43  ;;  %19405 = vmatprep.subr.mxu0 %v26405_v42 }
 0x631   : > { %19331 = vmatprep.mubr.msk.f32.mxu0 %vm20312_vm8, %v26405_v42  ;;  %19406 = vmatpush3.msra.mxu0 %v20122_v47 }
 0x632   : > { %19407 = vmatprep.subr.mxu0 %v26405_v42 }
 0x633   : > { %19408 = vmatpush3.msra.mxu0 %v20123_v45 }
 0x634   : > { %19332 = vmatmul.mubr.f32.gmra.mxu0 %v9326_v21  ;;  %19409 = vmatprep.subr.mxu0 %v26405_v42 }
 0x635   : > { %19334 = vmatprep.mubr.msk.f32.mxu0 %vm20312_vm8, %v26405_v42  ;;  %19410 = vmatpush3.msra.mxu0 %v20124_v39 }
 0x636   : > { %19411 = vmatprep.subr.mxu0 %v26405_v42 }
 0x637   : > { %19412 = vmatpush3.msra.mxu0 %v20125_v1 }
 0x638   : > { %19335 = vmatmul.mubr.f32.gmra.mxu0 %v9359_v0  ;;  %19413 = vmatprep.subr.mxu0 %v26405_v42 }
 0x639   : > { %19337 = vmatprep.mubr.msk.f32.mxu0 %vm20312_vm8, %v26405_v42  ;;  %19414 = vmatpush3.msra.mxu0 %v20126_v3 }
 0x63a   : > { %19415 = vmatprep.subr.mxu0 %v26405_v42 }
 0x63b   : > { %19416 = vmatpush3.msra.mxu0 %v20127_v16 }
 0x63c   : > { %19338 = vmatmul.mubr.f32.gmra.mxu0 %v9392_v26  ;;  %19417 = vmatprep.subr.mxu0 %v26405_v42 }
 0x63d   : > { %19418 = vmatpush3.msra.mxu0 %v20128_v28  ;;  %19425 = vmatprep.mubr.msk.f32.mxu0 %vm20312_vm8, %v26405_v42 }
 0x63e   : > { %19419 = vmatprep.subr.mxu0 %v26405_v42 }
 0x63f   : > { %19420 = vmatpush3.msra.mxu0 %v20129_v56 }
 0x640   : > { %19421 = vmatprep.subr.mxu0 %v26405_v42 }
 0x641   : > { %19422 = vmatpush3.msra.mxu0 %v20130_v15 }
 0x642   : > { %19423 = vmatprep.subr.mxu0 %v26405_v42 }
 0x643   : > { %19424 = vmatpush3.msra.mxu0 %v20131_v20 }
 0x644   : > { %19499 = vmatprep.subr.mxu0 %v26405_v42 }
 0x69b   : > { %v9113_v44 = vpop.f32.mrf.mxu1 }
 0x69d   : > { %v19268_v48 = vpop.f32.mrf.mxu1  ;;  %v8663_v34 = vpop.f32.mrf.mxu0 }
 0x69e   : > { %v9114_v5 = vadd.f32 %v9113_v44, %v8663_v34 }
 0x69f   : > { %v19215_v62 = vpop.f32.mrf.mxu0 }
 0x6a6   : > { %v8668_v60 = vpop.f32.mrf.mxu0 }
 0x6a7   : > { %v9118_v27 = vpop.f32.mrf.mxu1 }
 0x6a8   : > { %v9119_v57 = vadd.f32 %v9118_v27, %v8668_v60  ;;  %v19218_v13 = vpop.f32.mrf.mxu0 }
 0x6a9   : > { %v19271_v32 = vpop.f32.mrf.mxu1 }
 0x6b3   : > { %v8673_v54 = vpop.f32.mrf.mxu0  ;;  %v9123_v52 = vpop.f32.mrf.mxu1 }
 0x6b4   : > { %v9124_v37 = vadd.f32 %v9123_v52, %v8673_v54 }
 0x6b5   : > { %v19221_v53 = vpop.f32.mrf.mxu0  ;;  %v19274_v61 = vpop.f32.mrf.mxu1 }
 0x6bd   : > { %v9128_v11 = vpop.f32.mrf.mxu1 }
 0x6bf   : > { %v8678_v51 = vpop.f32.mrf.mxu0  ;;  %v19277_v24 = vpop.f32.mrf.mxu1 }
 0x6c0   : > { %v23719_v30 = vadd.f32 %v9128_v11, %v8678_v51 }
 0x6c1   : > { %v19224_v4 = vpop.f32.mrf.mxu0 }
 0x6cd   : > { %v8683_v36 = vpop.f32.mrf.mxu0 }
 0x6ce   : > { %v9133_v7 = vpop.f32.mrf.mxu1 }
 0x6cf   : > { %v23721_v38 = vadd.f32 %v9133_v7, %v8683_v36  ;;  %v19227_v33 = vpop.f32.mrf.mxu0 }
 0x6d0   : > { %v19280_v10 = vpop.f32.mrf.mxu1 }
 0x6d4   : > { %v8688_v43 = vpop.f32.mrf.mxu0 }
 0x6d6   : > { %v19230_v8 = vpop.f32.mrf.mxu0 }
 0x6d7   : > { %v9138_v17 = vpop.f32.mrf.mxu1 }
 0x6d8   : > { %v23723_v50 = vadd.f32 %v9138_v17, %v8688_v43 }
 0x6d9   : > { %v19283_v59 = vpop.f32.mrf.mxu1 }
 0x6e0   : > { %v8693_v12 = vpop.f32.mrf.mxu0 }
 0x6e2   : > { %v19233_v49 = vpop.f32.mrf.mxu0  ;;  %v9143_v47 = vpop.f32.mrf.mxu1 }
 0x6e3   : > { %v23725_v21 = vadd.f32 %v9143_v47, %v8693_v12 }
 0x6e4   : > { %v9466_v58 = vpop.f32.mrf.mxu0  ;;  %v19286_v40 = vpop.f32.mrf.mxu1 }
 0x6e5   : > { %v9500_v45 = vadd.f32 %v9466_v58, %v9114_v5 }
 0x6e6   : > { %v19321_v18 = vpop.f32.mrf.mxu0 }
 0x6e7   : > { %v9514_v2 = vadd.f32 %v23730_v46, %v9500_v45 }
 0x6e8   : > { %v9471_v39 = vpop.f32.mrf.mxu0 }
 0x6e9   : > { %v9528_v0 = vcombine.high %v9514_v2, %v9514_v2  ;;  %v9535_v41 = vrot.slane %v9514_v2, %v23063_v23  ;;  %v9501_v1 = vadd.f32 %v9471_v39, %v9119_v57 }
 0x6ea   : > { %v19324_v29 = vpop.f32.mrf.mxu0 }
 0x6eb   : > { %v9542_v3 = vrot.slane %v9528_v0, %v23063_v23  ;;  %v9543_v26 = vcombine.high %v9535_v41, %v9535_v41  ;;  %v9551_v16 = vrot.slane %v9535_v41, %v23063_v23  ;;  %v9515_v28 = vadd.f32 %v23730_v46, %v9501_v1 }
 0x6ec   : > { %v9476_v56 = vpop.f32.mrf.mxu0 }
 0x6ed   : > { %v9544_v15 = vcombine.high %v9542_v3, %v9542_v3  ;;  %v9558_v20 = vrot.slane %v9542_v3, %v23063_v23  ;;  %v9565_v44 = vrot.slane %v9543_v26, %v23063_v23  ;;  %v9573_v48 = vcombine.high %v9551_v16, %v9551_v16 }
 0x6ee   : > { %v9927_v34 = vmax.f32 %v9551_v16, 0.0  ;;  %v9577_v5 = vcombine.high %v9515_v28, %v9515_v28  ;;  %v9584_v62 = vrot.slane %v9515_v28, %v23063_v23  ;;  %v9502_v60 = vadd.f32 %v9476_v56, %v9124_v37  ;;  %v19327_v27 = vpop.f32.mrf.mxu0 }
 0x6ef   : > { %v9572_v57 = vrot.slane %v9544_v15, %v23063_v23  ;;  %v9574_v13 = vcombine.high %v9558_v20, %v9558_v20  ;;  %v9575_v32 = vcombine.high %v9565_v44, %v9565_v44  ;;  %v9928_v54 = vmax.f32 %v9565_v44, 0.0 }
 0x6f0   : > { %v9929_v52 = vmax.f32 %v9573_v48, 0.0  ;;  %v9931_v53 = vmax.f32 %v9558_v20, 0.0  ;;  %v10039_v61 = vcombine.low %v9927_v34, %v9927_v34  ;;  %v9591_v11 = vrot.slane %v9577_v5, %v23063_v23  ;;  %v9481_v51 = vpop.f32.mrf.mxu0 }
 0x6f1   : > { %v9576_v24 = vcombine.high %v9572_v57, %v9572_v57  ;;  %v9930_v4 = vmax.f32 %v9575_v32, 0.0  ;;  %v9932_v36 = vmax.f32 %v9572_v57, 0.0  ;;  %v9933_v7 = vmax.f32 %v9574_v13, 0.0 }
 0x6f2   : > { %v10040_v33 = vcombine.low %v9928_v54, %v9929_v52  ;;  %v10049_v10 = vrot.slane %v10039_v61, %v23063_v23  ;;  %v9592_v37 = vcombine.high %v9584_v62, %v9584_v62  ;;  %v9593_v43 = vcombine.high %v9591_v11, %v9591_v11  ;;  %v19330_v17 = vpop.f32.mrf.mxu0 }
 0x6f3   : > { %v9934_v8 = vmax.f32 %v9576_v24, 0.0  ;;  %v10041_v59 = vcombine.low %v9930_v4, %v9931_v53  ;;  %v10042_v12 = vcombine.low %v9932_v36, %v9933_v7  ;;  %v9600_v49 = vrot.slane %v9584_v62, %v23063_v23 }
 0x6f4   : > { %v10056_v47 = vrot.slane %v10040_v33, %v23063_v23  ;;  %v9607_v58 = vrot.slane %v9591_v11, %v23063_v23  ;;  %v9614_v40 = vrot.slane %v9592_v37, %v23063_v23  ;;  %v9621_v45 = vrot.slane %v9593_v43, %v23063_v23  ;;  %v23748_v18 = vpop.f32.mrf.mxu0 }
 0x6f5   : > { %v10063_v2 = vrot.slane %v10041_v59, %v23063_v23  ;;  %v10070_v39 = vrot.slane %v10042_v12, %v23063_v23  ;;  %v10088_v0 = vcombine.low %v9934_v8, %v9934_v8  ;;  %v9622_v41 = vcombine.high %v9600_v49, %v9600_v49 }
 0x6f6   : > { %v10071_v1 = vcombine.low %v10049_v10, %v10056_v47  ;;  %v9623_v29 = vcombine.high %v9607_v58, %v9607_v58  ;;  %v9624_v3 = vcombine.high %v9614_v40, %v9614_v40  ;;  %v9625_v26 = vcombine.high %v9621_v45, %v9621_v45  ;;  %v19333_v16 = vpop.f32.mrf.mxu0 }
 0x6f7   : > { %v10072_v28 = vcombine.low %v10063_v2, %v10070_v39  ;;  %v10098_v56 = vrot.slane %v10088_v0, %v23063_v23  ;;  %v9935_v15 = vmax.f32 %v9600_v49, 0.0  ;;  %v9936_v20 = vmax.f32 %v9614_v40, 0.0 }
 0x6f8   : > { %v10079_v44 = vrot.slane %v10071_v1, %v23063_v23  ;;  %v9937_v48 = vmax.f32 %v9622_v41, 0.0  ;;  %v9938_v34 = vmax.f32 %v9624_v3, 0.0  ;;  %v9939_v5 = vmax.f32 %v9607_v58, 0.0  ;;  %v23754_v62 = vpop.f32.mrf.mxu0 }
 0x6f9   : > { %v10086_v27 = vrot.slane %v10072_v28, %v23063_v23  ;;  %v9940_v57 = vmax.f32 %v9621_v45, 0.0  ;;  %v9941_v13 = vmax.f32 %v9623_v29, 0.0  ;;  %v10089_v32 = vcombine.low %v9935_v15, %v9936_v20 }
 0x6fa   : > { %v10090_v54 = vcombine.low %v9937_v48, %v9938_v34  ;;  %v9516_v52 = vadd.f32 %v23730_v46, %v9502_v60  ;;  %v9942_v53 = vmax.f32 %v9625_v26, 0.0  ;;  %v9503_v61 = vadd.f32 %v9481_v51, %v23719_v30  ;;  %v19336_v11 = vpop.f32.mrf.mxu0 }
 0x6fb   : > { %v10087_v24 = vcombine.low %v10079_v44, %v10086_v27  ;;  %v10091_v4 = vcombine.low %v9939_v5, %v9940_v57  ;;  %v10105_v36 = vrot.slane %v10089_v32, %v23063_v23  ;;  %v10137_v7 = vcombine.low %v9941_v13, %v9941_v13 }
 0x6fc   : > { %v10112_v33 = vrot.slane %v10090_v54, %v23063_v23  ;;  %v9626_v10 = vcombine.high %v9516_v52, %v9516_v52  ;;  %v9633_v37 = vrot.slane %v9516_v52, %v23063_v23  ;;  %v9517_v43 = vadd.f32 %v23730_v46, %v9503_v61  ;;  %v23763_v17 = vpop.f32.mrf.mxu0 }
 0x6fd   : > { %v10439_v60 = vsel %vm899_vm0, 0.0, %v10087_v24  ;;  %v10119_v8 = vrot.slane %v10091_v4, %v23063_v23  ;;  %v10120_v30 = vcombine.low %v10098_v56, %v10105_v36  ;;  %v10147_v51 = vrot.slane %v10137_v7, %v23063_v23 }
 0x6fe   : > { %v10455_v59 = vcombine.high %v10439_v60, %v10439_v60  ;;  %v10462_v12 = vrot.slane %v10439_v60, %v23063_v23  ;;  %v9640_v49 = vrot.slane %v9626_v10, %v23063_v23  ;;  %v9641_v47 = vcombine.high %v9633_v37, %v9633_v37  ;;  %v19339_v58 = vpop.f32.mrf.mxu0 }
 0x6ff   : > { %v10121_v40 = vcombine.low %v10112_v33, %v10119_v8  ;;  %v10128_v45 = vrot.slane %v10120_v30, %v23063_v23  ;;  %v9649_v2 = vrot.slane %v9633_v37, %v23063_v23  ;;  %v9675_v39 = vcombine.high %v9517_v43, %v9517_v43 }
 0x700   : > { %v10469_v0 = vrot.slane %v10455_v59, %v23063_v23  ;;  %v10470_v41 = vcombine.high %v10462_v12, %v10462_v12  ;;  %v23774_v1 = vrot.slane %v10462_v12, %v23063_v23  ;;  %v9642_v29 = vcombine.high %v9640_v49, %v9640_v49 }
 0x701   : > { %v10135_v3 = vrot.slane %v10121_v40, %v23063_v23  ;;  %v9656_v26 = vrot.slane %v9640_v49, %v23063_v23  ;;  %v9663_v16 = vrot.slane %v9641_v47, %v23063_v23  ;;  %v9671_v28 = vcombine.high %v9649_v2, %v9649_v2 }
 0x702   : > { %v10471_v56 = vcombine.high %v10469_v0, %v10469_v0  ;;  %v23780_v15 = vrot.slane %v10469_v0, %v23063_v23  ;;  %v23783_v20 = vrot.slane %v10470_v41, %v23063_v23  ;;  %v9670_v44 = vrot.slane %v9642_v29, %v23063_v23 }
 0x703   : > { %v10136_v48 = vcombine.low %v10128_v45, %v10135_v3  ;;  %v9672_v34 = vcombine.high %v9656_v26, %v9656_v26  ;;  %v9673_v5 = vcombine.high %v9663_v16, %v9663_v16  ;;  %v9943_v27 = vmax.f32 %v9649_v2, 0.0 }
 0x704   : > { %v23787_v57 = vrot.slane %v10471_v56, %v23063_v23  ;;  %v9674_v13 = vcombine.high %v9670_v44, %v9670_v44  ;;  %v9944_v32 = vmax.f32 %v9663_v16, 0.0  ;;  %v9945_v54 = vmax.f32 %v9671_v28, 0.0 }
 0x705   : > { %v23790_v52 = vsel %vm899_vm0, 0.0, %v10136_v48  ;;  %v9946_v61 = vmax.f32 %v9673_v5, 0.0  ;;  %v9947_v11 = vmax.f32 %v9656_v26, 0.0  ;;  %v9948_v24 = vmax.f32 %v9670_v44, 0.0 }
 0x706   : > { %v10503_v4 = vcombine.high %v23790_v52, %v23790_v52  ;;  %v10510_v36 = vrot.slane %v23790_v52, %v23063_v23  ;;  %v9949_v7 = vmax.f32 %v9672_v34, 0.0  ;;  %v9950_v33 = vmax.f32 %v9674_v13, 0.0 }
 0x707   : > { %v10138_v10 = vcombine.low %v9942_v53, %v9943_v27  ;;  %v10139_v37 = vcombine.low %v9944_v32, %v9945_v54  ;;  %v10140_v60 = vcombine.low %v9946_v61, %v9947_v11  ;;  %v10186_v8 = vcombine.low %v9948_v24, %v9948_v24 }
 0x708   : > { %v10518_v30 = vcombine.high %v10510_v36, %v10510_v36  ;;  %v23797_v59 = vrot.slane %v10510_v36, %v23063_v23  ;;  %v10187_v12 = vcombine.low %v9949_v7, %v9950_v33  ;;  %v9682_v49 = vrot.slane %v9517_v43, %v23063_v23 }
 0x709   : > { %v10154_v47 = vrot.slane %v10138_v10, %v23063_v23  ;;  %v10161_v58 = vrot.slane %v10139_v37, %v23063_v23  ;;  %v10168_v40 = vrot.slane %v10140_v60, %v23063_v23  ;;  %v10196_v45 = vrot.slane %v10186_v8, %v23063_v23 }
 0x70a   : > { %v23805_v53 = vrot.slane %v10518_v30, %v23063_v23  ;;  %v10203_v2 = vrot.slane %v10187_v12, %v23063_v23  ;;  %v9689_v0 = vrot.slane %v9675_v39, %v23063_v23  ;;  %v9690_v41 = vcombine.high %v9682_v49, %v9682_v49 }
 0x70b   : > { %v10169_v29 = vcombine.low %v10147_v51, %v10154_v47  ;;  %v10170_v3 = vcombine.low %v10161_v58, %v10168_v40  ;;  %v9698_v43 = vrot.slane %v9682_v49, %v23063_v23  ;;  %v9504_v26 = vadd.f32 %v23748_v18, %v23721_v38 }
 0x70c   : > { %v10218_v16 = vcombine.low %v10196_v45, %v10203_v2  ;;  %v9691_v28 = vcombine.high %v9689_v0, %v9689_v0  ;;  %v9705_v56 = vrot.slane %v9689_v0, %v23063_v23  ;;  %v9712_v44 = vrot.slane %v9690_v41, %v23063_v23 }
 0x70d   : > { %v10177_v48 = vrot.slane %v10169_v29, %v23063_v23  ;;  %v10184_v34 = vrot.slane %v10170_v3, %v23063_v23  ;;  %v9720_v5 = vcombine.high %v9698_v43, %v9698_v43  ;;  %v9951_v39 = vmax.f32 %v9698_v43, 0.0 }
 0x70e   : > { %v10226_v51 = vrot.slane %v10218_v16, %v23063_v23  ;;  %v9719_v27 = vrot.slane %v9691_v28, %v23063_v23  ;;  %v9721_v13 = vcombine.high %v9705_v56, %v9705_v56  ;;  %v9722_v32 = vcombine.high %v9712_v44, %v9712_v44 }
 0x70f   : > { %v10185_v54 = vcombine.low %v10177_v48, %v10184_v34  ;;  %v9952_v38 = vmax.f32 %v9712_v44, 0.0  ;;  %v9953_v18 = vmax.f32 %v9720_v5, 0.0  ;;  %v9955_v61 = vmax.f32 %v9705_v56, 0.0 }
 0x710   : > { %v9723_v11 = vcombine.high %v9719_v27, %v9719_v27  ;;  %v9954_v24 = vmax.f32 %v9722_v32, 0.0  ;;  %v9956_v36 = vmax.f32 %v9719_v27, 0.0  ;;  %v9957_v7 = vmax.f32 %v9721_v13, 0.0 }
 0x711   : > { %v23819_v33 = vsel %vm899_vm0, 0.0, %v10185_v54  ;;  %v10188_v10 = vcombine.low %v9951_v39, %v9952_v38  ;;  %v10235_v37 = vcombine.low %v9955_v61, %v9955_v61  ;;  %v9518_v60 = vadd.f32 %v23730_v46, %v9504_v26 }
 0x712   : > { %v10551_v8 = vcombine.high %v23819_v33, %v23819_v33  ;;  %v10189_v30 = vcombine.low %v9953_v18, %v9954_v24  ;;  %v10236_v12 = vcombine.low %v9956_v36, %v9957_v7  ;;  %v9958_v49 = vmax.f32 %v9723_v11, 0.0 }
 0x713   : > { %v10210_v47 = vrot.slane %v10188_v10, %v23063_v23  ;;  %v10245_v58 = vrot.slane %v10235_v37, %v23063_v23  ;;  %v9724_v40 = vcombine.high %v9518_v60, %v9518_v60  ;;  %v9731_v45 = vrot.slane %v9518_v60, %v23063_v23 }
 0x714   : > { %v10217_v2 = vrot.slane %v10189_v30, %v23063_v23  ;;  %v10252_v0 = vrot.slane %v10236_v12, %v23063_v23  ;;  %v9505_v41 = vadd.f32 %v23754_v62, %v23723_v50  ;;  %v9506_v29 = vadd.f32 %v23763_v17, %v23725_v21 }
 0x715   : > { %v9738_v3 = vrot.slane %v9724_v40, %v23063_v23  ;;  %v9739_v43 = vcombine.high %v9731_v45, %v9731_v45  ;;  %v9747_v26 = vrot.slane %v9731_v45, %v23063_v23  ;;  %v23837_v16 = vcombine.high %v23780_v15, %v23780_v15 }
 0x716   : > { %v10219_v28 = vcombine.low %v10210_v47, %v10217_v2  ;;  %v10267_v56 = vcombine.low %v10245_v58, %v10252_v0  ;;  %v9519_v44 = vadd.f32 %v23730_v46, %v9505_v41  ;;  %v9520_v48 = vadd.f32 %v23730_v46, %v9506_v29 }
 0x717   : > { %v9740_v34 = vcombine.high %v9738_v3, %v9738_v3  ;;  %v9754_v50 = vrot.slane %v9738_v3, %v23063_v23  ;;  %v9761_v21 = vrot.slane %v9739_v43, %v23063_v23  ;;  %v9769_v62 = vcombine.high %v9747_v26, %v9747_v26 }
 0x718   : > { %v10233_v17 = vrot.slane %v10219_v28, %v23063_v23  ;;  %v10275_v5 = vrot.slane %v10267_v56, %v23063_v23  ;;  %v9959_v39 = vmax.f32 %v9747_v26, 0.0  ;;  %v9773_v27 = vcombine.high %v9519_v44, %v9519_v44 }
 0x719   : > { %v9768_v13 = vrot.slane %v9740_v34, %v23063_v23  ;;  %v9770_v32 = vcombine.high %v9754_v50, %v9754_v50  ;;  %v9771_v54 = vcombine.high %v9761_v21, %v9761_v21  ;;  %v9960_v38 = vmax.f32 %v9761_v21, 0.0 }
 0x71a   : > { %v23846_v18 = vcombine.low %v10226_v51, %v10233_v17  ;;  %v9961_v46 = vmax.f32 %v9769_v62, 0.0  ;;  %v9963_v61 = vmax.f32 %v9754_v50, 0.0  ;;  %v10237_v11 = vcombine.low %v9958_v49, %v9959_v39 }
 0x71b   : > { %v9772_v24 = vcombine.high %v9768_v13, %v9768_v13  ;;  %v9962_v36 = vmax.f32 %v9771_v54, 0.0  ;;  %v9964_v7 = vmax.f32 %v9768_v13, 0.0  ;;  %v9965_v10 = vmax.f32 %v9770_v32, 0.0 }
 0x71c   : > { %v10238_v37 = vcombine.low %v9960_v38, %v9961_v46  ;;  %v10259_v60 = vrot.slane %v10237_v11, %v23063_v23  ;;  %v9780_v30 = vrot.slane %v9519_v44, %v23063_v23  ;;  %v9787_v12 = vrot.slane %v9773_v27, %v23063_v23 }
 0x71d   : > { %v9966_v47 = vmax.f32 %v9772_v24, 0.0  ;;  %v10284_v58 = vcombine.low %v9962_v36, %v9962_v36  ;;  %v10285_v40 = vcombine.low %v9963_v61, %v9964_v7  ;;  %v9822_v45 = vcombine.high %v9520_v48, %v9520_v48 }
 0x71e   : > { %v10266_v51 = vrot.slane %v10238_v37, %v23063_v23  ;;  %v9788_v2 = vcombine.high %v9780_v30, %v9780_v30  ;;  %v9789_v0 = vcombine.high %v9787_v12, %v9787_v12  ;;  %v9796_v49 = vrot.slane %v9780_v30, %v23063_v23 }
 0x71f   : > { %v10286_v41 = vcombine.low %v9965_v10, %v9966_v47  ;;  %v10294_v29 = vrot.slane %v10284_v58, %v23063_v23  ;;  %v10301_v3 = vrot.slane %v10285_v40, %v23063_v23  ;;  %v9803_v43 = vrot.slane %v9787_v12, %v23063_v23 }
 0x720   : > { %v10268_v26 = vcombine.low %v10259_v60, %v10266_v51  ;;  %v9810_v28 = vrot.slane %v9788_v2, %v23063_v23  ;;  %v9817_v56 = vrot.slane %v9789_v0, %v23063_v23  ;;  %v9818_v44 = vcombine.high %v9796_v49, %v9796_v49 }
 0x721   : > { %v10308_v34 = vrot.slane %v10286_v41, %v23063_v23  ;;  %v10316_v50 = vcombine.low %v10294_v29, %v10301_v3  ;;  %v9819_v21 = vcombine.high %v9803_v43, %v9803_v43  ;;  %v9967_v62 = vmax.f32 %v9796_v49, 0.0 }
 0x722   : > { %v10282_v17 = vrot.slane %v10268_v26, %v23063_v23  ;;  %v9820_v39 = vcombine.high %v9810_v28, %v9810_v28  ;;  %v9821_v27 = vcombine.high %v9817_v56, %v9817_v56  ;;  %v9968_v13 = vmax.f32 %v9810_v28, 0.0 }
 0x723   : > { %v10324_v32 = vrot.slane %v10316_v50, %v23063_v23  ;;  %v9969_v54 = vmax.f32 %v9818_v44, 0.0  ;;  %v9971_v38 = vmax.f32 %v9803_v43, 0.0  ;;  %v9972_v46 = vmax.f32 %v9817_v56, 0.0 }
 0x724   : > { %v10283_v61 = vcombine.low %v10275_v5, %v10282_v17  ;;  %v9970_v11 = vmax.f32 %v9820_v39, 0.0  ;;  %v9973_v24 = vmax.f32 %v9819_v21, 0.0  ;;  %v10287_v36 = vcombine.low %v9967_v62, %v9968_v13 }
 0x725   : > { %v10333_v7 = vcombine.low %v9969_v54, %v9969_v54  ;;  %v9829_v10 = vrot.slane %v9520_v48, %v23063_v23  ;;  %v9836_v37 = vrot.slane %v9822_v45, %v23063_v23  ;;  %v9974_v60 = vmax.f32 %v9821_v27, 0.0 }
 0x726   : > { %v23864_v30 = vsel %vm899_vm0, 0.0, %v10283_v61  ;;  %v10315_v12 = vrot.slane %v10287_v36, %v23063_v23  ;;  %v10334_v47 = vcombine.low %v9970_v11, %v9971_v38  ;;  %v10335_v58 = vcombine.low %v9972_v46, %v9973_v24 }
 0x727   : > { %v10647_v40 = vcombine.high %v23864_v30, %v23864_v30  ;;  %v10343_v5 = vrot.slane %v10333_v7, %v23063_v23  ;;  %v9837_v51 = vcombine.high %v9829_v10, %v9829_v10  ;;  %v9838_v2 = vcombine.high %v9836_v37, %v9836_v37 }
 0x728   : > { %v10317_v0 = vcombine.low %v10308_v34, %v10315_v12  ;;  %v10350_v48 = vrot.slane %v10334_v47, %v23063_v23  ;;  %v10357_v45 = vrot.slane %v10335_v58, %v23063_v23  ;;  %v9845_v49 = vrot.slane %v9829_v10, %v23063_v23 }
 0x729   : > { %v9852_v41 = vrot.slane %v9836_v37, %v23063_v23  ;;  %v9859_v29 = vrot.slane %v9837_v51, %v23063_v23  ;;  %v9866_v3 = vrot.slane %v9838_v2, %v23063_v23  ;;  %v11297_v43 = vcombine.low %v23774_v1, %v23783_v20 }
 0x72a   : > { %v10331_v26 = vrot.slane %v10317_v0, %v23063_v23  ;;  %v10365_v28 = vcombine.low %v10343_v5, %v10350_v48  ;;  %v9867_v56 = vcombine.high %v9845_v49, %v9845_v49  ;;  %v9975_v44 = vmax.f32 %v9845_v49, 0.0 }
 0x72b   : > { %v9868_v34 = vcombine.high %v9852_v41, %v9852_v41  ;;  %v9869_v50 = vcombine.high %v9859_v29, %v9859_v29  ;;  %v9870_v21 = vcombine.high %v9866_v3, %v9866_v3  ;;  %v9976_v62 = vmax.f32 %v9859_v29, 0.0 }
 0x72c   : > { %v23879_v17 = vcombine.low %v10324_v32, %v10331_v26  ;;  %v10373_v39 = vrot.slane %v10365_v28, %v23063_v23  ;;  %v9977_v27 = vmax.f32 %v9867_v56, 0.0  ;;  %v9979_v13 = vmax.f32 %v9852_v41, 0.0 }
 0x72d   : > { %v9978_v54 = vmax.f32 %v9869_v50, 0.0  ;;  %v9980_v38 = vmax.f32 %v9866_v3, 0.0  ;;  %v9981_v46 = vmax.f32 %v9868_v34, 0.0  ;;  %v9982_v61 = vmax.f32 %v9870_v21, 0.0 }
 0x72e   : > { %v10336_v11 = vcombine.low %v9974_v60, %v9975_v44  ;;  %v10382_v24 = vcombine.low %v9976_v62, %v9976_v62  ;;  %v17936_v36 = vcombine.high %v23774_v1, %v23783_v20  ;;  %v11299_v7 = vcombine.low %v23780_v15, %v23787_v57 }
 0x72f   : > { %v10383_v10 = vcombine.low %v9977_v27, %v9978_v54  ;;  %v10384_v37 = vcombine.low %v9979_v13, %v9980_v38  ;;  %v10385_v32 = vcombine.low %v9981_v46, %v9982_v61  ;;  %v11300_v12 = vcombine.low %v23837_v16, %v23797_v59 }
 0x730   : > { %v10364_v47 = vrot.slane %v10336_v11, %v23063_v23  ;;  %v10392_v58 = vrot.slane %v10382_v24, %v23063_v23  ;;  %v11307_v5 = vrot.slane %v11297_v43, %v23063_v23  ;;  %v23892_v60 = vrot.slane %v17936_v36, %v23063_v23 }
 0x731   : > { %v10399_v51 = vrot.slane %v10383_v10, %v23063_v23  ;;  %v10406_v2 = vrot.slane %v10384_v37, %v23063_v23  ;;  %v10413_v0 = vrot.slane %v10385_v32, %v23063_v23  ;;  %v23898_v48 = vrot.slane %v11299_v7, %v23063_v23 }
 0x732   : > { %v10366_v49 = vcombine.low %v10357_v45, %v10364_v47  ;;  %v11328_v41 = vrot.slane %v11300_v12, %v23063_v23  ;;  %v11329_v29 = vcombine.low %v11307_v5, %v23892_v60  ;;  %v10500_v3 = vcombine.high %v23774_v1, %v23774_v1 }
 0x733   : > { %v10414_v43 = vcombine.low %v10392_v58, %v10399_v51  ;;  %v10415_v26 = vcombine.low %v10406_v2, %v10413_v0  ;;  %v10502_v28 = vcombine.high %v23783_v20, %v23783_v20  ;;  %v10839_v56 = vcombine.high %v23787_v57, %v23787_v57 }
 0x734   : > { %v10380_v44 = vrot.slane %v10366_v49, %v23063_v23  ;;  %v11330_v34 = vcombine.low %v23898_v48, %v11328_v41  ;;  %v11337_v45 = vrot.slane %v11329_v29, %v23063_v23  ;;  %v10847_v50 = vcombine.low %v23783_v20, %v10500_v3 }
 0x735   : > { %v10422_v21 = vrot.slane %v10414_v43, %v23063_v23  ;;  %v10429_v1 = vrot.slane %v10415_v26, %v23063_v23  ;;  %v10848_v62 = vcombine.low %v10502_v28, %v23780_v15  ;;  %v10849_v27 = vcombine.low %v23787_v57, %v23837_v16 }
 0x736   : > { %v10381_v13 = vcombine.low %v10373_v39, %v10380_v44  ;;  %v11344_v54 = vrot.slane %v11330_v34, %v23063_v23  ;;  %v10850_v38 = vcombine.low %v10839_v56, %v23805_v53  ;;  %v10857_v46 = vrot.slane %v10847_v50, %v23063_v23 }
 0x737   : > { %v23920_v61 = vcombine.low %v10422_v21, %v10429_v1  ;;  %v10864_v20 = vrot.slane %v10848_v62, %v23063_v23  ;;  %v10871_v11 = vrot.slane %v10849_v27, %v23063_v23  ;;  %v10517_v24 = vrot.slane %v10503_v4, %v23063_v23 }
 0x738   : > { %v23929_v16 = vsel %vm899_vm0, 0.0, %v10381_v13  ;;  %v11345_v39 = vcombine.low %v11337_v45, %v11344_v54  ;;  %v10878_v36 = vrot.slane %v10850_v38, %v23063_v23  ;;  %v10558_v7 = vrot.slane %v23819_v33, %v23063_v23  ;;  %v20132_v38 = vld [vmem:[#allocation6 + $0x178] sm:$0xff] }
 0x739   : > { %v10743_v10 = vcombine.high %v23929_v16, %v23929_v16  ;;  %v10879_v37 = vcombine.low %v10857_v46, %v10864_v20  ;;  %v10519_v32 = vcombine.high %v10517_v24, %v10517_v24  ;;  %v10533_v12 = vrot.slane %v10517_v24, %v23063_v23 }
 0x73a   : > { %19426 = vmatmul.mubr.f32.vlgmr.msra.gmra.mxu0 %v11345_v39  ;;  %v10880_v47 = vcombine.low %v10871_v11, %v10878_v36  ;;  %v10566_v52 = vcombine.high %v10558_v7, %v10558_v7  ;;  %v10574_v4 = vrot.slane %v10558_v7, %v23063_v23  ;;  %v17928_v58 = vcombine.high %v23797_v59, %v23805_v53 }
 0x73b   : > { %v10887_v5 = vrot.slane %v10879_v37, %v23063_v23  ;;  %19428 = vmatprep.mubr.msk.f32.mxu0 %vm20312_vm8, %v26405_v42  ;;  %v23944_v51 = vrot.slane %v10519_v32, %v23063_v23  ;;  %v23948_v2 = vcombine.high %v23797_v59, %v23797_v59  ;;  %v10549_v0 = vcombine.high %v10533_v12, %v10533_v12  ;;  %v20133_v32 = vld [vmem:[#allocation6 + $0x170] sm:$0xff] }
 0x73c   : > { %v10894_v49 = vrot.slane %v10880_v47, %v23063_v23  ;;  %v10588_v41 = vrot.slane %v10566_v52, %v23063_v23  ;;  %v10596_v29 = vcombine.high %v10574_v4, %v10574_v4  ;;  %v10906_v3 = vrot.slane %v17928_v58, %v23063_v23 }
 0x73d   : > { %v10897_v43 = vcombine.low %v10533_v12, %v23944_v51  ;;  %v17929_v26 = vcombine.high %v10533_v12, %v23944_v51  ;;  %v10550_v28 = vcombine.high %v23805_v53, %v23805_v53  ;;  %v11346_v56 = vcombine.low %v23805_v53, %v23948_v2 }
 0x73e   : > { %v10895_v59 = vcombine.low %v10887_v5, %v10894_v49  ;;  %v10899_v44 = vcombine.low %v10588_v41, %v10596_v29  ;;  %v11348_v34 = vcombine.low %v23944_v51, %v10549_v0  ;;  %v11349_v45 = vcombine.low %v10574_v4, %v10588_v41  ;;  %v20134_v49 = vld [vmem:[#allocation6 + $0x168] sm:$0xff] }
 0x73f   : > { %v10913_v50 = vrot.slane %v10897_v43, %v23063_v23  ;;  %v10920_v21 = vrot.slane %v17929_v26, %v23063_v23  ;;  %v11347_v1 = vcombine.low %v10550_v28, %v10533_v12  ;;  %v11356_v62 = vrot.slane %v11346_v56, %v23063_v23 }
 0x740   : > { %19373 = vmatmul.mubr.f32.vlgmr.msra.gmra.mxu1 %v10895_v59  ;;  %v10927_v27 = vrot.slane %v10899_v44, %v23063_v23  ;;  %v23965_v13 = vrot.slane %v11348_v34, %v23063_v23  ;;  %v11377_v53 = vrot.slane %v11349_v45, %v23063_v23  ;;  %v11748_v54 = vcombine.low %v23201_v22, %v23948_v2  ;;  %v20135_v59 = vld [vmem:[#allocation6 + $0x160] sm:$0xff] }
 0x741   : > { %19447 = vmatpush3.msra.mxu1 %v20132_v38  ;;  %19375 = vmatprep.mubr.msk.f32.mxu1 %vm20312_vm8, %v26405_v42  ;;  %v10928_v46 = vcombine.low %v10906_v3, %v10913_v50  ;;  %v23973_v20 = vrot.slane %v11347_v1, %v23063_v23  ;;  %v10442_v11 = vsel %vm899_vm0, 0.0, %v23846_v18  ;;  %v10565_v24 = vrot.slane %v10551_v8, %v23063_v23 }
 0x742   : > { %19448 = vmatprep.subr.mxu1 %v26405_v42  ;;  %v10929_v39 = vcombine.low %v10920_v21, %v10927_v27  ;;  %v11379_v36 = vcombine.low %v23965_v13, %v11377_v53  ;;  %v10598_v7 = vcombine.high %v10588_v41, %v10588_v41  ;;  %v10599_v37 = vcombine.high %v10442_v11, %v10442_v11 }
 0x743   : > { %19449 = vmatpush3.msra.mxu1 %v20133_v32  ;;  %v10936_v12 = vrot.slane %v10928_v46, %v23063_v23  ;;  %v11378_v47 = vcombine.low %v11356_v62, %v23973_v20  ;;  %v10567_v52 = vcombine.high %v10565_v24, %v10565_v24  ;;  %v23986_v18 = vrot.slane %v10565_v24, %v23063_v23 }
 0x744   : > { %19450 = vmatprep.subr.mxu1 %v26405_v42  ;;  %v10943_v33 = vrot.slane %v10929_v39, %v23063_v23  ;;  %v11393_v8 = vrot.slane %v11379_v36, %v23063_v23  ;;  %v10606_v58 = vrot.slane %v10442_v11, %v23063_v23  ;;  %v17937_v5 = vcombine.high %v10574_v4, %v10588_v41 }
 0x745   : > { %v11386_v0 = vrot.slane %v11378_v47, %v23063_v23  ;;  %19451 = vmatpush3.msra.mxu1 %v20134_v49  ;;  %v23994_v29 = vrot.slane %v10567_v52, %v23063_v23  ;;  %v10597_v3 = vcombine.high %v23986_v18, %v23986_v18  ;;  %v10945_v43 = vcombine.low %v10598_v7, %v23986_v18  ;;  %v20136_v7 = vld [vmem:[#allocation6 + $0x158] sm:$0xff] }
 0x746   : > { %v10944_v26 = vcombine.low %v10936_v12, %v10943_v33  ;;  %19452 = vmatprep.subr.mxu1 %v26405_v42  ;;  %v10614_v28 = vcombine.high %v10606_v58, %v10606_v58  ;;  %v10622_v56 = vrot.slane %v10606_v58, %v23063_v23  ;;  %v24002_v4 = vrot.slane %v17937_v5, %v23063_v23  ;;  %v20137_v58 = vld [vmem:[#allocation6 + $0x150] sm:$0xff] }
 0x747   : > { %v11394_v41 = vcombine.low %v11386_v0, %v11393_v8  ;;  %19453 = vmatpush3.msra.mxu1 %v20135_v59  ;;  %v10841_v44 = vcombine.high %v23994_v29, %v23994_v29  ;;  %v10946_v34 = vcombine.low %v23994_v29, %v10597_v3  ;;  %v10955_v45 = vrot.slane %v10945_v43, %v23063_v23 }
 0x748   : > { %19376 = vmatmul.mubr.f32.gmra.mxu1 %v10944_v26  ;;  %19454 = vmatprep.subr.mxu1 %v26405_v42  ;;  %v10636_v50 = vrot.slane %v10614_v28, %v23063_v23  ;;  %v24010_v21 = vcombine.high %v10622_v56, %v10622_v56  ;;  %v11396_v1 = vcombine.low %v23986_v18, %v23994_v29 }
 0x749   : > { %19429 = vmatmul.mubr.f32.gmra.mxu0 %v11394_v41  ;;  %19378 = vmatprep.mubr.msk.f32.mxu1 %vm20312_vm8, %v26405_v42  ;;  %v10962_v62 = vrot.slane %v10946_v34, %v23063_v23  ;;  %v11397_v27 = vcombine.low %v10597_v3, %v10622_v56  ;;  %v10613_v53 = vrot.slane %v10599_v37, %v23063_v23  ;;  %v20138_v34 = vld [vmem:[#allocation6 + $0x148] sm:$0xff] }
 0x74a   : > { %19431 = vmatprep.mubr.msk.f32.mxu0 %vm20312_vm8, %v26405_v42  ;;  %v10947_v38 = vcombine.low %v10841_v44, %v10636_v50  ;;  %v17930_v46 = vcombine.high %v10622_v56, %v10636_v50  ;;  %v11398_v11 = vcombine.low %v10636_v50, %v24010_v21  ;;  %v24022_v24 = vrot.slane %v11396_v1, %v23063_v23 }
 0x74b   : > { %v10977_v39 = vcombine.low %v10955_v45, %v10962_v62  ;;  %v11419_v36 = vrot.slane %v11397_v27, %v23063_v23  ;;  %19455 = vmatpush3.msra.mxu1 %v20136_v7  ;;  %v10615_v32 = vcombine.high %v10613_v53, %v10613_v53  ;;  %v10629_v12 = vrot.slane %v10613_v53, %v23063_v23 }
 0x74c   : > { %v10969_v37 = vrot.slane %v10947_v38, %v23063_v23  ;;  %v10976_v47 = vrot.slane %v17930_v46, %v23063_v23  ;;  %v11426_v52 = vrot.slane %v11398_v11, %v23063_v23  ;;  %v11427_v33 = vcombine.low %v24002_v4, %v24022_v24  ;;  %19456 = vmatprep.subr.mxu1 %v26405_v42  ;;  %v20139_v46 = vld [vmem:[#allocation6 + $0x140] sm:$0xff] }
 0x74d   : > { %v10985_v8 = vrot.slane %v10977_v39, %v23063_v23  ;;  %19457 = vmatpush3.msra.mxu1 %v20137_v58  ;;  %v24034_v5 = vrot.slane %v10615_v32, %v23063_v23  ;;  %v10654_v0 = vrot.slane %v23864_v30, %v23063_v23  ;;  %v10661_v49 = vrot.slane %v10647_v40, %v23063_v23 }
 0x74e   : > { %v10978_v3 = vcombine.low %v10969_v37, %v10976_v47  ;;  %v11428_v43 = vcombine.low %v11419_v36, %v11426_v52  ;;  %v11435_v26 = vrot.slane %v11427_v33, %v23063_v23  ;;  %19458 = vmatprep.subr.mxu1 %v26405_v42  ;;  %v10645_v28 = vcombine.high %v10629_v12, %v10629_v12  ;;  %v20140_v52 = vld [vmem:[#allocation6 + $0x138] sm:$0xff] }
 0x74f   : > { %v10662_v56 = vcombine.high %v10654_v0, %v10654_v0  ;;  %v10670_v41 = vrot.slane %v10654_v0, %v23063_v23  ;;  %v24046_v59 = vrot.slane %v10661_v49, %v23063_v23  ;;  %v10994_v44 = vcombine.low %v10629_v12, %v24034_v5  ;;  %19459 = vmatpush3.msra.mxu1 %v20138_v34 }
 0x750   : > { %v10992_v30 = vrot.slane %v10978_v3, %v23063_v23  ;;  %v11442_v40 = vrot.slane %v11428_v43, %v23063_v23  ;;  %v17931_v45 = vcombine.high %v10629_v12, %v24034_v5  ;;  %v10646_v1 = vcombine.high %v10636_v50, %v10636_v50  ;;  %19460 = vmatprep.subr.mxu1 %v26405_v42 }
 0x751   : > { %v10684_v62 = vrot.slane %v10662_v56, %v23063_v23  ;;  %v10692_v27 = vcombine.high %v10670_v41, %v10670_v41  ;;  %v11004_v53 = vrot.slane %v10994_v44, %v23063_v23  ;;  %v11445_v38 = vcombine.low %v24034_v5, %v10645_v28  ;;  %19461 = vmatpush3.msra.mxu1 %v20139_v46 }
 0x752   : > { %v10993_v11 = vcombine.low %v10985_v8, %v10992_v30  ;;  %v11443_v39 = vcombine.low %v11435_v26, %v11442_v40  ;;  %v11011_v36 = vrot.slane %v17931_v45, %v23063_v23  ;;  %v11444_v7 = vcombine.low %v10646_v1, %v10629_v12  ;;  %19462 = vmatprep.subr.mxu1 %v26405_v42  ;;  %v20141_v40 = vld [vmem:[#allocation6 + $0x130] sm:$0xff] }
 0x753   : > { %v10694_v32 = vcombine.high %v10684_v62, %v10684_v62  ;;  %v10996_v50 = vcombine.low %v10684_v62, %v10692_v27  ;;  %v11446_v37 = vcombine.low %v10670_v41, %v10684_v62  ;;  %v17938_v47 = vcombine.high %v10670_v41, %v10684_v62  ;;  %19463 = vmatpush3.msra.mxu1 %v20140_v52 }
 0x754   : > { %19379 = vmatmul.mubr.f32.gmra.mxu1 %v10993_v11  ;;  %19432 = vmatmul.mubr.f32.gmra.mxu0 %v11443_v39  ;;  %v11026_v33 = vcombine.low %v11004_v53, %v11011_v36  ;;  %v24059_v58 = vrot.slane %v11444_v7, %v23063_v23  ;;  %v24062_v8 = vrot.slane %v11445_v38, %v23063_v23  ;;  %v10444_v12 = vsel %vm899_vm0, 0.0, %v23879_v17  ;;  %v20142_v11 = vld [vmem:[#allocation6 + $0x128] sm:$0xff] }
 0x755   : > { %19381 = vmatprep.mubr.msk.f32.mxu1 %vm20312_vm8, %v26405_v42  ;;  %19434 = vmatprep.mubr.msk.f32.mxu0 %vm20312_vm8, %v26405_v42  ;;  %v10997_v0 = vcombine.low %v10694_v32, %v24046_v59  ;;  %v11018_v3 = vrot.slane %v10996_v50, %v23063_v23  ;;  %v11468_v43 = vrot.slane %v11446_v37, %v23063_v23 }
 0x756   : > { %v11034_v26 = vrot.slane %v11026_v33, %v23063_v23  ;;  %v24075_v28 = vrot.slane %v17938_v47, %v23063_v23  ;;  %v11476_v17 = vcombine.low %v24059_v58, %v24062_v8  ;;  %v10663_v56 = vcombine.high %v10661_v49, %v10661_v49  ;;  %19464 = vmatprep.subr.mxu1 %v26405_v42  ;;  %v20143_v33 = vld [vmem:[#allocation6 + $0x120] sm:$0xff] }
 0x757   : > { %v11025_v41 = vrot.slane %v10997_v0, %v23063_v23  ;;  %v10693_v44 = vcombine.high %v24046_v59, %v24046_v59  ;;  %v10695_v34 = vcombine.high %v10444_v12, %v10444_v12  ;;  %v10702_v30 = vrot.slane %v10444_v12, %v23063_v23  ;;  %19465 = vmatpush3.msra.mxu1 %v20141_v40 }
 0x758   : > { %v11477_v45 = vcombine.low %v11468_v43, %v24075_v28  ;;  %v11484_v1 = vrot.slane %v11476_v17, %v23063_v23  ;;  %v24087_v62 = vrot.slane %v10663_v56, %v23063_v23  ;;  %19466 = vmatprep.subr.mxu1 %v26405_v42  ;;  %v10750_v49 = vrot.slane %v23929_v16, %v23063_v23 }
 0x759   : > { %v11027_v27 = vcombine.low %v11018_v3, %v11025_v41  ;;  %v10709_v53 = vrot.slane %v10695_v34, %v23063_v23  ;;  %v10710_v38 = vcombine.high %v10702_v30, %v10702_v30  ;;  %v10718_v46 = vrot.slane %v10702_v30, %v23063_v23  ;;  %19467 = vmatpush3.msra.mxu1 %v20142_v11  ;;  %v20144_v30 = vld [vmem:[#allocation6 + $0x118] sm:$0xff] }
 0x75a   : > { %v11491_v39 = vrot.slane %v11477_v45, %v23063_v23  ;;  %v10843_v36 = vcombine.high %v24087_v62, %v24087_v62  ;;  %v11043_v7 = vcombine.low %v24087_v62, %v10693_v44  ;;  %v11493_v32 = vcombine.low %v24046_v59, %v24087_v62  ;;  %19468 = vmatprep.subr.mxu1 %v26405_v42 }
 0x75b   : > { %v11041_v50 = vrot.slane %v11027_v27, %v23063_v23  ;;  %v10711_v37 = vcombine.high %v10709_v53, %v10709_v53  ;;  %v24103_v47 = vrot.slane %v10709_v53, %v23063_v23  ;;  %v10732_v52 = vrot.slane %v10710_v38, %v23063_v23  ;;  %19469 = vmatpush3.msra.mxu1 %v20143_v33 }
 0x75c   : > { %v11492_v12 = vcombine.low %v11484_v1, %v11491_v39  ;;  %v11053_v0 = vrot.slane %v11043_v7, %v23063_v23  ;;  %v24107_v3 = vcombine.high %v10718_v46, %v10718_v46  ;;  %v11494_v43 = vcombine.low %v10693_v44, %v10718_v46  ;;  %19470 = vmatprep.subr.mxu1 %v26405_v42 }
 0x75d   : > { %v11042_v17 = vcombine.low %v11034_v26, %v11041_v50  ;;  %v24111_v56 = vrot.slane %v10711_v37, %v23063_v23  ;;  %v11044_v41 = vcombine.low %v10843_v36, %v10732_v52  ;;  %v17932_v34 = vcombine.high %v10718_v46, %v10732_v52  ;;  %19471 = vmatpush3.msra.mxu1 %v20144_v30 }
 0x75e   : > { %19435 = vmatmul.mubr.f32.gmra.mxu0 %v11492_v12  ;;  %v10742_v40 = vcombine.high %v10732_v52, %v10732_v52  ;;  %v11495_v45 = vcombine.low %v10732_v52, %v24107_v3  ;;  %v24115_v1 = vrot.slane %v11493_v32, %v23063_v23  ;;  %v11510_v27 = vrot.slane %v11494_v43, %v23063_v23  ;;  %v20145_v43 = vld [vmem:[#allocation6 + $0x110] sm:$0xff] }
 0x75f   : > { %19382 = vmatmul.mubr.f32.gmra.mxu1 %v11042_v17  ;;  %19437 = vmatprep.mubr.msk.f32.mxu0 %vm20312_vm8, %v26405_v42  ;;  %v11046_v26 = vcombine.low %v24103_v47, %v24111_v56  ;;  %v11060_v44 = vrot.slane %v11044_v41, %v23063_v23  ;;  %v11067_v53 = vrot.slane %v17932_v34, %v23063_v23  ;;  %v24126_v38 = vsel %vm899_vm0, 0.0, %v23920_v61 }
 0x760   : > { %19384 = vmatprep.mubr.msk.f32.mxu1 %vm20312_vm8, %v26405_v42  ;;  %v11496_v46 = vcombine.low %v10742_v40, %v24103_v47  ;;  %v11517_v11 = vrot.slane %v11495_v45, %v23063_v23  ;;  %v11525_v39 = vcombine.low %v24115_v1, %v11510_v27  ;;  %v10757_v36 = vrot.slane %v10743_v10, %v23063_v23  ;;  %v20146_v40 = vld [vmem:[#allocation6 + $0x108] sm:$0xff] }
 0x761   : > { %v11074_v7 = vrot.slane %v11046_v26, %v23063_v23  ;;  %v11075_v32 = vcombine.low %v11053_v0, %v11060_v44  ;;  %v10758_v50 = vcombine.high %v10750_v49, %v10750_v49  ;;  %v10766_v61 = vrot.slane %v10750_v49, %v23063_v23  ;;  %19472 = vmatprep.subr.mxu1 %v26405_v42 }
 0x762   : > { %v24141_v37 = vrot.slane %v11496_v46, %v23063_v23  ;;  %v11533_v52 = vrot.slane %v11525_v39, %v23063_v23  ;;  %v10759_v33 = vcombine.high %v10757_v36, %v10757_v36  ;;  %v24145_v12 = vrot.slane %v10757_v36, %v23063_v23  ;;  %19473 = vmatpush3.msra.mxu1 %v20145_v43  ;;  %v20147_v36 = vld [vmem:[#allocation6 + $0x100] sm:$0xff] }
 0x763   : > { %v11076_v16 = vcombine.low %v11067_v53, %v11074_v7  ;;  %v11083_v10 = vrot.slane %v11075_v32, %v23063_v23  ;;  %v10780_v0 = vrot.slane %v10758_v50, %v23063_v23  ;;  %v10788_v17 = vcombine.high %v10766_v61, %v10766_v61  ;;  %19474 = vmatprep.subr.mxu1 %v26405_v42 }
 0x764   : > { %v11526_v49 = vcombine.low %v11517_v11, %v24141_v37  ;;  %v24152_v41 = vrot.slane %v10759_v33, %v23063_v23  ;;  %v24156_v34 = vcombine.high %v24145_v12, %v24145_v12  ;;  %v17933_v30 = vcombine.high %v24103_v47, %v24111_v56  ;;  %19475 = vmatpush3.msra.mxu1 %v20146_v40 }
 0x765   : > { %v11090_v45 = vrot.slane %v11076_v16, %v23063_v23  ;;  %v10790_v27 = vcombine.high %v10780_v0, %v10780_v0  ;;  %v11093_v26 = vcombine.low %v10780_v0, %v10788_v17  ;;  %v10741_v44 = vcombine.high %v24103_v47, %v24103_v47  ;;  %19476 = vmatprep.subr.mxu1 %v26405_v42 }
 0x766   : > { %v11540_v53 = vrot.slane %v11526_v49, %v23063_v23  ;;  %v11095_v46 = vcombine.low %v24152_v41, %v24156_v34  ;;  %v11102_v11 = vrot.slane %v17933_v30, %v23063_v23  ;;  %v11543_v39 = vcombine.low %v10766_v61, %v10780_v0  ;;  %19477 = vmatpush3.msra.mxu1 %v20147_v36 }
 0x767   : > { %v11091_v7 = vcombine.low %v11083_v10, %v11090_v45  ;;  %v11094_v32 = vcombine.low %v10790_v27, %v24145_v12  ;;  %v11109_v50 = vrot.slane %v11093_v26, %v23063_v23  ;;  %v11542_v33 = vcombine.low %v24111_v56, %v10741_v44  ;;  %19540 = vmatprep.subr.mxu1 %v26405_v42 }
 0x768   : > { %v11541_v47 = vcombine.low %v11533_v52, %v11540_v53  ;;  %v11123_v43 = vrot.slane %v11095_v46, %v23063_v23  ;;  %v17939_v16 = vcombine.high %v10766_v61, %v10780_v0  ;;  %v11545_v17 = vcombine.low %v24145_v12, %v24152_v41 }
 0x769   : > { %19385 = vmatmul.mubr.f32.gmra.mxu1 %v11091_v7  ;;  %v11116_v49 = vrot.slane %v11094_v32, %v23063_v23  ;;  %v11124_v30 = vcombine.low %v11102_v11, %v11109_v50  ;;  %v24177_v10 = vrot.slane %v11542_v33, %v23063_v23  ;;  %v11559_v40 = vrot.slane %v11543_v39, %v23063_v23 }
 0x76a   : > { %19438 = vmatmul.mubr.f32.gmra.mxu0 %v11541_v47  ;;  %19387 = vmatprep.mubr.msk.f32.mxu1 %vm20312_vm8, %v26405_v42  ;;  %v24183_v52 = vrot.slane %v17939_v16, %v23063_v23  ;;  %v24186_v61 = vrot.slane %v11545_v17, %v23063_v23  ;;  %v10791_v0 = vcombine.high %v24126_v38, %v24126_v38 }
 0x76b   : > { %19440 = vmatprep.mubr.msk.f32.mxu0 %vm20312_vm8, %v26405_v42  ;;  %v11125_v45 = vcombine.low %v11116_v49, %v11123_v43  ;;  %v11132_v27 = vrot.slane %v11124_v30, %v23063_v23  ;;  %v11574_v26 = vcombine.low %v24177_v10, %v11559_v40  ;;  %v10798_v44 = vrot.slane %v24126_v38, %v23063_v23 }
 0x76c   : > { %v11575_v53 = vcombine.low %v24183_v52, %v24186_v61  ;;  %v10805_v46 = vrot.slane %v10791_v0, %v23063_v23  ;;  %v10845_v11 = vcombine.high %v24152_v41, %v24152_v41  ;;  %v17940_v39 = vcombine.high %v23780_v15, %v23787_v57 }
 0x76d   : > { %v11139_v36 = vrot.slane %v11125_v45, %v23063_v23  ;;  %v11582_v7 = vrot.slane %v11574_v26, %v23063_v23  ;;  %v10806_v32 = vcombine.high %v10798_v44, %v10798_v44  ;;  %v10814_v50 = vrot.slane %v10798_v44, %v23063_v23 }
 0x76e   : > { %v11589_v38 = vrot.slane %v11575_v53, %v23063_v23  ;;  %v10807_v33 = vcombine.high %v10805_v46, %v10805_v46  ;;  %v10821_v47 = vrot.slane %v10805_v46, %v23063_v23  ;;  %v11755_v43 = vrot.slane %v17940_v39, %v23063_v23 }
 0x76f   : > { %v11140_v16 = vcombine.low %v11132_v27, %v11139_v36  ;;  %v10828_v17 = vrot.slane %v10806_v32, %v23063_v23  ;;  %v24210_v49 = vcombine.high %v10814_v50, %v10814_v50  ;;  %v11591_v15 = vcombine.low %v24156_v34, %v10814_v50 }
 0x770   : > { %v11590_v57 = vcombine.low %v11582_v7, %v11589_v38  ;;  %v24214_v30 = vrot.slane %v10807_v33, %v23063_v23  ;;  %v10837_v40 = vcombine.high %v10821_v47, %v10821_v47  ;;  %v11762_v0 = vrot.slane %v11748_v54, %v23063_v23 }
 0x771   : > { %19388 = vmatmul.mubr.f32.gmra.mxu1 %v11140_v16  ;;  %v11141_v45 = vcombine.low %v10845_v11, %v10828_v17  ;;  %v17934_v26 = vcombine.high %v10814_v50, %v10828_v17  ;;  %v10838_v27 = vcombine.high %v10828_v17, %v10828_v17  ;;  %v11592_v44 = vcombine.low %v10828_v17, %v24210_v49 }
 0x772   : > { %19441 = vmatmul.mubr.f32.gmra.mxu0 %v11590_v57  ;;  %19390 = vmatprep.mubr.msk.f32.mxu1 %vm20312_vm8, %v26405_v42  ;;  %v11143_v34 = vcombine.low %v10821_v47, %v24214_v30  ;;  %v17935_v53 = vcombine.high %v10821_v47, %v24214_v30  ;;  %v11594_v46 = vcombine.low %v24214_v30, %v10837_v40 }
 0x773   : > { %19443 = vmatprep.mubr.msk.f32.mxu0 %vm20312_vm8, %v26405_v42  ;;  %v11151_v2 = vrot.slane %v11141_v45, %v23063_v23  ;;  %v11158_v54 = vrot.slane %v17934_v26, %v23063_v23  ;;  %v11593_v11 = vcombine.low %v10838_v27, %v10821_v47  ;;  %v11601_v39 = vrot.slane %v11591_v15, %v23063_v23 }
 0x774   : > { %v11165_v36 = vrot.slane %v11143_v34, %v23063_v23  ;;  %v11172_v7 = vrot.slane %v17935_v53, %v23063_v23  ;;  %v11608_v32 = vrot.slane %v11592_v44, %v23063_v23  ;;  %v24235_v50 = vrot.slane %v11594_v46, %v23063_v23 }
 0x775   : > { %v11173_v38 = vcombine.low %v11151_v2, %v11158_v54  ;;  %v24238_v33 = vrot.slane %v11593_v11, %v23063_v23  ;;  %v11763_v16 = vcombine.low %v23892_v60, %v23898_v48  ;;  %v11764_v17 = vcombine.low %v11755_v43, %v11762_v0 }
 0x776   : > { %v11174_v47 = vcombine.low %v11165_v36, %v11172_v7  ;;  %v11623_v57 = vcombine.low %v11601_v39, %v11608_v32  ;;  %v10840_v15 = vcombine.high %v23944_v51, %v23944_v51  ;;  %v11788_v40 = vcombine.low %v23973_v20, %v23965_v13 }
 0x777   : > { %v11181_v45 = vrot.slane %v11173_v38, %v23063_v23  ;;  %v11624_v26 = vcombine.low %v24238_v33, %v24235_v50  ;;  %v11771_v27 = vrot.slane %v11763_v16, %v23063_v23  ;;  %v11778_v44 = vrot.slane %v11764_v17, %v23063_v23 }
 0x778   : > { %v11188_v60 = vrot.slane %v11174_v47, %v23063_v23  ;;  %v11631_v48 = vrot.slane %v11623_v57, %v23063_v23  ;;  %v11780_v43 = vcombine.low %v10840_v15, %v23201_v22  ;;  %v11796_v51 = vrot.slane %v11788_v40, %v23063_v23 }
 0x779   : > { %v11638_v0 = vrot.slane %v11624_v26, %v23063_v23  ;;  %v11779_v13 = vcombine.low %v11771_v27, %v11778_v44  ;;  %v17941_v20 = vcombine.high %v23986_v18, %v23994_v29  ;;  %v11806_v34 = vcombine.low %v23201_v22, %v24010_v21 }
 0x77a   : > { %v11189_v53 = vcombine.low %v11181_v45, %v11188_v60  ;;  %v11787_v46 = vrot.slane %v11780_v43, %v23063_v23  ;;  %v10842_v2 = vcombine.high %v24034_v5, %v24034_v5  ;;  %v11847_v54 = vcombine.low %v24075_v28, %v24115_v1 }
 0x77b   : > { %v11639_v11 = vcombine.low %v11631_v48, %v11638_v0  ;;  %v11813_v39 = vrot.slane %v17941_v20, %v23063_v23  ;;  %v11820_v36 = vrot.slane %v11806_v34, %v23063_v23  ;;  %v17942_v18 = vcombine.high %v24046_v59, %v24087_v62 }
 0x77c   : > { %19391 = vmatmul.mubr.f32.gmra.mxu1 %v11189_v53  ;;  %v11789_v29 = vcombine.low %v11787_v46, %v24002_v4  ;;  %v11838_v21 = vcombine.low %v10842_v2, %v23201_v22  ;;  %v11861_v7 = vrot.slane %v11847_v54, %v23063_v23  ;;  %v11864_v5 = vcombine.low %v23201_v22, %v24107_v3  ;;  %v13785_v46 = vld [vmem:[#allocation6 + $0xf8] sm:$0xff]  ;;  %v13784_v54 = vld [vmem:[#allocation6 + $0xf0] sm:$0xff] }
 0x77d   : > { %19444 = vmatmul.mubr.f32.gmra.mxu0 %v11639_v11  ;;  %19478 = vmatprep.mubr.msk.f32.mxu1 %vm20312_vm8, %v26405_v42  ;;  %v11821_v28 = vcombine.low %v24022_v24, %v11813_v39  ;;  %v11822_v1 = vcombine.low %v11820_v36, %v24059_v58  ;;  %v11871_v59 = vrot.slane %v17942_v18, %v23063_v23  ;;  %v13761_v2 = vld [vmem:[#allocation6 + $0x78] sm:$0xff]  ;;  %v13760_v11 = vld [vmem:[#allocation6 + $0x70] sm:$0xff]  ;;  %v13783_v36 = vld [vmem:[#allocation6 + $0xe8] sm:$0xff] }
 0x77e   : > { %v11803_v62 = vrot.slane %v11789_v29, %v23063_v23  ;;  %v11845_v4 = vrot.slane %v11838_v21, %v23063_v23  ;;  %v11878_v32 = vrot.slane %v11864_v5, %v23063_v23  ;;  %v11880_v38 = vcombine.low %v24141_v37, %v24177_v10  ;;  %19531 = vmatprep.mubr.msk.f32.mxu0 %vm20312_vm8, %v26405_v42  ;;  %v13759_v29 = vld [vmem:[#allocation6 + $0x68] sm:$0xff] }
 0x77f   : > { %v11829_v3 = vrot.slane %v11821_v28, %v23063_v23  ;;  %v11836_v24 = vrot.slane %v11822_v1, %v23063_v23  ;;  %v10844_v58 = vcombine.high %v24111_v56, %v24111_v56  ;;  %v17943_v16 = vcombine.high %v24145_v12, %v24152_v41  ;;  %19500 = vmatpush3.msra.mxu0 %v13785_v46  ;;  %v13758_v28 = vld [vmem:[#allocation6 + $0x60] sm:$0xff]  ;;  %v13781_v1 = vld [vmem:[#allocation6 + $0xd8] sm:$0xff] }
 0x780   : > { %19479 = vmatmul.mubr.f32.vlgmr.msra.gmra.mxu1 %v11779_v13  ;;  %v11804_v17 = vcombine.low %v11796_v51, %v11803_v62  ;;  %v11846_v47 = vcombine.low %v24062_v8, %v11845_v4  ;;  %v11879_v57 = vcombine.low %v11871_v59, %v11878_v32  ;;  %v11894_v37 = vrot.slane %v11880_v38, %v23063_v23  ;;  %v13757_v59 = vld [vmem:[#allocation6 + $0x58] sm:$0xff]  ;;  %v13780_v62 = vld [vmem:[#allocation6 + $0xd0] sm:$0xff]  ;;  %v13779_v32 = vld [vmem:[#allocation6 + $0xc8] sm:$0xff] }
 0x781   : > { %19481 = vmatprep.mubr.msk.f32.mxu1 %vm20312_vm8, %v26405_v42  ;;  %v11837_v10 = vcombine.low %v11829_v3, %v11836_v24  ;;  %v11896_v15 = vcombine.low %v10844_v58, %v23201_v22  ;;  %v11911_v40 = vrot.slane %v17943_v16, %v23063_v23  ;;  %v10846_v12 = vcombine.high %v24214_v30, %v24214_v30  ;;  %v13756_v4 = vld [vmem:[#allocation6 + $0x50] sm:$0xff]  ;;  %v13755_v38 = vld [vmem:[#allocation6 + $0x48] sm:$0xff]  ;;  %v13778_v3 = vld [vmem:[#allocation6 + $0xc0] sm:$0xff] }
 0x782   : > { %v11854_v56 = vrot.slane %v11846_v47, %v23063_v23  ;;  %v11887_v45 = vrot.slane %v11879_v57, %v23063_v23  ;;  %19501 = vmatprep.subr.mxu0 %v26405_v42  ;;  %19541 = vmatpush3.msra.mxu1 %v13761_v2  ;;  %v13754_v24 = vld [vmem:[#allocation6 + $0x40] sm:$0xff]  ;;  %v13777_v58 = vld [vmem:[#allocation6 + $0xb8] sm:$0xff]  ;;  %v13776_v57 = vld [vmem:[#allocation6 + $0xb0] sm:$0xff] }
 0x783   : > { %v11904_v8 = vrot.slane %v11896_v15, %v23063_v23  ;;  %v11913_v41 = vcombine.low %v24186_v61, %v11911_v40  ;;  %v11930_v48 = vcombine.low %v10846_v12, %v23201_v22  ;;  %v11929_v61 = vcombine.low %v23201_v22, %v24210_v49  ;;  %19502 = vmatpush3.msra.mxu0 %v13784_v54  ;;  %v13753_v16 = vld [vmem:[#allocation6 + $0x38] sm:$0xff]  ;;  %v13775_v40 = vld [vmem:[#allocation6 + $0xa8] sm:$0xff]  ;;  %v13750_v12 = vld [vmem:[#allocation6 + $0x20] sm:$0xff] }
 0x784   : > { %19482 = vmatmul.mubr.f32.gmra.mxu1 %v11804_v17  ;;  %v11862_v26 = vcombine.low %v11854_v56, %v11861_v7  ;;  %v11895_v27 = vcombine.low %v11887_v45, %v11894_v37  ;;  %19542 = vmatprep.subr.mxu1 %v26405_v42  ;;  %v13782_v7 = vld [vmem:[#allocation6 + $0xe0] sm:$0xff]  ;;  %v13752_v37 = vld [vmem:[#allocation6 + $0x30] sm:$0xff]  ;;  %v13751_v56 = vld [vmem:[#allocation6 + $0x28] sm:$0xff] }
 0x785   : > { %19484 = vmatprep.mubr.msk.f32.mxu1 %vm20312_vm8, %v26405_v42  ;;  %v11912_v44 = vcombine.low %v11904_v8, %v24183_v52  ;;  %v11927_v60 = vrot.slane %v11913_v41, %v23063_v23  ;;  %v11944_v51 = vrot.slane %v11930_v48, %v23063_v23  ;;  %v11937_v52 = vrot.slane %v11929_v61, %v23063_v23  ;;  %v13774_v45 = vld [vmem:[#allocation6 + $0xa0] sm:$0xff]  ;;  %v13773_v8 = vld [vmem:[#allocation6 + $0x98] sm:$0xff] }
 0x786   : > { %19503 = vmatprep.subr.mxu0 %v26405_v42  ;;  %19543 = vmatpush3.msra.mxu1 %v13760_v11  ;;  %v13749_v41 = vld [vmem:[#allocation6 + $0x18] sm:$0xff]  ;;  %v13770_v61 = vld [vmem:[#allocation6 + $0x80] sm:$0xff]  ;;  %v12600_v11 = vrot.slane %v23197_v6, %v23063_v23 }
 0x787   : > { %v11920_v43 = vrot.slane %v11912_v44, %v23063_v23  ;;  %v11946_v0 = vcombine.low %v24235_v50, %v11944_v51  ;;  %v11945_v13 = vcombine.low %v11937_v52, %v24238_v33  ;;  %19504 = vmatpush3.msra.mxu0 %v13783_v36  ;;  %19544 = vmatprep.subr.mxu1 %v26405_v42  ;;  %v13746_v52 = vld [vmem:[#allocation6] sm:$0xff] }
 0x788   : > { %19485 = vmatmul.mubr.f32.gmra.mxu1 %v11837_v10  ;;  %19505 = vmatprep.subr.mxu0 %v26405_v42  ;;  %v12593_v36 = vcombine.high %v23197_v6, %v23197_v6 }
 0x789   : > { %19487 = vmatprep.mubr.msk.f32.mxu1 %vm20312_vm8, %v26405_v42  ;;  %v11928_v30 = vcombine.low %v11920_v43, %v11927_v60  ;;  %v11960_v20 = vrot.slane %v11946_v0, %v23063_v23  ;;  %v11953_v22 = vrot.slane %v11945_v13, %v23063_v23  ;;  %19545 = vmatpush3.msra.mxu1 %v13759_v29  ;;  %v13771_v60 = vld [vmem:[#allocation6 + $0x88] sm:$0xff] }
 0x78a   : > { %19506 = vmatpush3.msra.mxu0 %v13782_v7  ;;  %19546 = vmatprep.subr.mxu1 %v26405_v42  ;;  %v13747_v43 = vld [vmem:[#allocation6 + $0x8] sm:$0xff]  ;;  %v12497_v0 = vcombine.high %v23147_v31, %v23147_v31  ;;  %v12504_v13 = vrot.slane %v23147_v31, %v23063_v23 }
 0x78b   : > { %v11961_v49 = vcombine.low %v11953_v22, %v11960_v20  ;;  %19507 = vmatprep.subr.mxu0 %v26405_v42  ;;  %19547 = vmatpush3.msra.mxu1 %v13758_v28  ;;  %v12545_v22 = vcombine.high %v23162_v9, %v23162_v9 }
 0x78c   : > { %19488 = vmatmul.mubr.f32.gmra.mxu1 %v11862_v26  ;;  %19508 = vmatpush3.msra.mxu0 %v13781_v1  ;;  %v13772_v26 = vld [vmem:[#allocation6 + $0x90] sm:$0xff]  ;;  %v12511_v46 = vrot.slane %v12497_v0, %v23063_v23  ;;  %v12512_v54 = vcombine.high %v12504_v13, %v12504_v13  ;;  %v24395_v7 = vrot.slane %v12504_v13, %v23063_v23 }
 0x78d   : > { %19490 = vmatprep.mubr.msk.f32.mxu1 %vm20312_vm8, %v26405_v42  ;;  %19548 = vmatprep.subr.mxu1 %v26405_v42  ;;  %v12559_v31 = vrot.slane %v12545_v22, %v23063_v23  ;;  %v12608_v1 = vcombine.high %v12600_v11, %v12600_v11  ;;  %v12737_v13 = vcombine.high %v23414_v63, %v23414_v63 }
 0x78e   : > { %19509 = vmatprep.subr.mxu0 %v26405_v42  ;;  %19549 = vmatpush3.msra.mxu1 %v13757_v59  ;;  %v12648_v59 = vrot.slane %v23203_v14, %v23063_v23 }
 0x78f   : > { %19510 = vmatpush3.msra.mxu0 %v13780_v62  ;;  %19550 = vmatprep.subr.mxu1 %v26405_v42  ;;  %v12561_v6 = vcombine.high %v12559_v31, %v12559_v31 }
 0x790   : > { %19491 = vmatmul.mubr.f32.gmra.mxu1 %v11895_v27  ;;  %19511 = vmatprep.subr.mxu0 %v26405_v42  ;;  %v13748_v27 = vld [vmem:[#allocation6 + $0x10] sm:$0xff] }
 0x791   : > { %19493 = vmatprep.mubr.msk.f32.mxu1 %vm20312_vm8, %v26405_v42  ;;  %19551 = vmatpush3.msra.mxu1 %v13756_v4  ;;  %v24411_v4 = vrot.slane %v12559_v31, %v23063_v23 }
 0x792   : > { %19512 = vmatpush3.msra.mxu0 %v13779_v32  ;;  %19552 = vmatprep.subr.mxu1 %v26405_v42  ;;  %v12607_v32 = vrot.slane %v12593_v36, %v23063_v23 }
 0x793   : > { %19513 = vmatprep.subr.mxu0 %v26405_v42  ;;  %19553 = vmatpush3.msra.mxu1 %v13755_v38  ;;  %v12641_v38 = vcombine.high %v23203_v14, %v23203_v14 }
 0x794   : > { %19494 = vmatmul.mubr.f32.gmra.mxu1 %v11928_v30  ;;  %19514 = vmatpush3.msra.mxu0 %v13778_v3 }
 0x795   : > { %19496 = vmatprep.mubr.msk.f32.mxu1 %vm20312_vm8, %v26405_v42  ;;  %19554 = vmatprep.subr.mxu1 %v26405_v42 }
 0x796   : > { %19515 = vmatprep.subr.mxu0 %v26405_v42  ;;  %19555 = vmatpush3.msra.mxu1 %v13754_v24 }
 0x797   : > { %19516 = vmatpush3.msra.mxu0 %v13777_v58  ;;  %19556 = vmatprep.subr.mxu1 %v26405_v42  ;;  %v24422_v58 = vrot.slane %v12600_v11, %v23063_v23 }
 0x798   : > { %19497 = vmatmul.mubr.f32.gmra.mxu1 %v11961_v49  ;;  %19517 = vmatprep.subr.mxu0 %v26405_v42 }
 0x799   : > { %19572 = vmatprep.mubr.msk.f32.mxu1 %vm20312_vm8, %v26405_v42  ;;  %19557 = vmatpush3.msra.mxu1 %v13753_v16  ;;  %v12696_v16 = vrot.slane %v23347_v25, %v23063_v23 }
 0x79a   : > { %19518 = vmatpush3.msra.mxu0 %v13776_v57  ;;  %19558 = vmatprep.subr.mxu1 %v26405_v42 }
 0x79b   : > { %19519 = vmatprep.subr.mxu0 %v26405_v42  ;;  %19559 = vmatpush3.msra.mxu1 %v13752_v37 }
 0x79c   : > { %19520 = vmatpush3.msra.mxu0 %v13775_v40  ;;  %19560 = vmatprep.subr.mxu1 %v26405_v42 }
 0x79d   : > { %19521 = vmatprep.subr.mxu0 %v26405_v42  ;;  %19561 = vmatpush3.msra.mxu1 %v13751_v56 }
 0x79e   : > { %19522 = vmatpush3.msra.mxu0 %v13774_v45  ;;  %19562 = vmatprep.subr.mxu1 %v26405_v42 }
 0x79f   : > { %19523 = vmatprep.subr.mxu0 %v26405_v42  ;;  %19563 = vmatpush3.msra.mxu1 %v13750_v12  ;;  %v24440_v12 = vrot.slane %v12608_v1, %v23063_v23 }
 0x7a0   : > { %19524 = vmatpush3.msra.mxu0 %v13773_v8  ;;  %19564 = vmatprep.subr.mxu1 %v26405_v42  ;;  %v12656_v8 = vcombine.high %v12648_v59, %v12648_v59 }
 0x7a1   : > { %19525 = vmatprep.subr.mxu0 %v26405_v42  ;;  %19565 = vmatpush3.msra.mxu1 %v13749_v41  ;;  %v24443_v41 = vrot.slane %v12561_v6, %v23063_v23  ;;  %v12751_v6 = vrot.slane %v12737_v13, %v23063_v23 }
 0x7a2   : > { %19526 = vmatpush3.msra.mxu0 %v13772_v26  ;;  %19566 = vmatprep.subr.mxu1 %v26405_v42  ;;  %v24464_v22 = vrot.slane %v12656_v8, %v23063_v23 }
 0x7a3   : > { %19527 = vmatprep.subr.mxu0 %v26405_v42  ;;  %19567 = vmatpush3.msra.mxu1 %v13748_v27  ;;  %v12609_v27 = vcombine.high %v12607_v32, %v12607_v32  ;;  %v12753_v1 = vcombine.high %v12751_v6, %v12751_v6 }
 0x7a4   : > { %19528 = vmatpush3.msra.mxu0 %v13771_v60  ;;  %19568 = vmatprep.subr.mxu1 %v26405_v42 }
 0x7a5   : > { %19529 = vmatprep.subr.mxu0 %v26405_v42  ;;  %19569 = vmatpush3.msra.mxu1 %v13747_v43 }
 0x7a6   : > { %19530 = vmatpush3.msra.mxu0 %v13770_v61  ;;  %19570 = vmatprep.subr.mxu1 %v26405_v42  ;;  %v12744_v61 = vrot.slane %v23414_v63, %v23063_v23  ;;  %v12833_v63 = vcombine.high %v23451_v35, %v23451_v35 }
 0x7a7   : > { %19571 = vmatpush3.msra.mxu1 %v13746_v52  ;;  %19581 = vmatprep.subr.mxu0 %v26405_v42  ;;  %v24458_v52 = vrot.slane %v12648_v59, %v23063_v23 }
 0x7a8   : > { %19622 = vmatprep.subr.mxu1 %v26405_v42 }
 0x7fa   : > { %v24328_v50 = vpop.f32.mrf.mxu0 }
 0x7fc   : > { %v19427_v34 = vpop.f32.mrf.mxu0 }
 0x7fd   : > { %v12552_v34 = vrot.slane %v23162_v9, %v23063_v23  ;;  %v24398_v9 = vrot.slane %v12511_v46, %v23063_v23 }
 0x7ff   : > { %v12560_v29 = vcombine.high %v12552_v34, %v12552_v34  ;;  %v24404_v28 = vrot.slane %v12552_v34, %v23063_v23  ;;  %v12543_v14 = vcombine.high %v24398_v9, %v24398_v9  ;;  %v24467_v34 = vrot.slane %v12696_v16, %v23063_v23 }
 0x800   : > { %v24330_v33 = vpop.f32.mrf.mxu1 }
 0x801   : > { %v24419_v24 = vrot.slane %v12560_v29, %v23063_v23  ;;  %v12752_v29 = vcombine.high %v12744_v61, %v12744_v61 }
 0x802   : > { %v19374_v53 = vpop.f32.mrf.mxu1 }
 0x808   : > { %v24334_v39 = vpop.f32.mrf.mxu1 }
 0x809   : > { %v24337_v18 = vpop.f32.mrf.mxu0 }
 0x80a   : > { %v19377_v21 = vpop.f32.mrf.mxu1 }
 0x80b   : > { %v19430_v5 = vpop.f32.mrf.mxu0  ;;  %v12513_v21 = vcombine.high %v12511_v46, %v12511_v46  ;;  %v12792_v46 = vrot.slane %v23441_v19, %v23063_v23 }
 0x80c   : > { %v24401_v5 = vrot.slane %v12512_v54, %v23063_v23 }
 0x80d   : > { %v24427_v37 = vrot.slane %v12513_v21, %v23063_v23  ;;  %v24524_v42 = vrot.slane %v12792_v46, %v23063_v23  ;;  %v24556_v21 = vrot.slane %v12753_v1, %v23063_v23 }
 0x80e   : > { %v12544_v56 = vcombine.high %v24401_v5, %v24401_v5 }
 0x814   : > { %v24350_v17 = vpop.f32.mrf.mxu1  ;;  %v24352_v47 = vpop.f32.mrf.mxu0 }
 0x816   : > { %v19380_v10 = vpop.f32.mrf.mxu1  ;;  %v19433_v15 = vpop.f32.mrf.mxu0 }
 0x817   : > { %v12542_v10 = vcombine.high %v24395_v7, %v24395_v7  ;;  %v12689_v15 = vcombine.high %v23347_v25, %v23347_v25  ;;  %v12655_v25 = vrot.slane %v12641_v38, %v23063_v23 }
 0x819   : > { %v12703_v0 = vrot.slane %v12689_v15, %v23063_v23  ;;  %v12657_v11 = vcombine.high %v12655_v25, %v12655_v25  ;;  %v24481_v31 = vrot.slane %v12655_v25, %v23063_v23  ;;  %v12800_v15 = vcombine.high %v12792_v46, %v12792_v46 }
 0x81a   : > { %v12847_v25 = vrot.slane %v12833_v63, %v23063_v23  ;;  %v24521_v63 = vrot.slane %v12751_v6, %v23063_v23 }
 0x81b   : > { %v12705_v59 = vcombine.high %v12703_v0, %v12703_v0  ;;  %v24502_v8 = vrot.slane %v12703_v0, %v23063_v23  ;;  %v11714_v0 = vadd.f32 %v24328_v50, %v24330_v33 }
 0x81c   : > { %v12849_v6 = vcombine.high %v12847_v25, %v12847_v25 }
 0x81e   : > { %v24364_v44 = vpop.f32.mrf.mxu0  ;;  %v24571_v54 = vrot.slane %v12849_v6, %v23063_v23 }
 0x81f   : > { %v24367_v48 = vpop.f32.mrf.mxu1 }
 0x820   : > { %v19436_v30 = vpop.f32.mrf.mxu0 }
 0x821   : > { %v19383_v51 = vpop.f32.mrf.mxu1  ;;  %v12704_v30 = vcombine.high %v12696_v16, %v12696_v16  ;;  %v24513_v16 = vrot.slane %v12752_v29, %v23063_v23 }
 0x822   : > { %v24455_v51 = vrot.slane %v12607_v32, %v23063_v23 }
 0x823   : > { %v24484_v36 = vrot.slane %v12704_v30, %v23063_v23 }
 0x829   : > { %v24380_v20 = vpop.f32.mrf.mxu1 }
 0x82a   : > { %v24384_v49 = vpop.f32.mrf.mxu0 }
 0x82b   : > { %v19386_v53 = vpop.f32.mrf.mxu1 }
 0x82c   : > { %v19439_v2 = vpop.f32.mrf.mxu0  ;;  %v12785_v53 = vcombine.high %v23441_v19, %v23441_v19  ;;  %v12840_v19 = vrot.slane %v23451_v35, %v23063_v23 }
 0x82d   : > { %v24474_v2 = vrot.slane %v12609_v27, %v23063_v23  ;;  %v24505_v27 = vrot.slane %v12744_v61, %v23063_v23  ;;  %v24518_v61 = vrot.slane %v12705_v59, %v23063_v23 }
 0x82e   : > { %v24539_v46 = vrot.slane %v12840_v19, %v23063_v23 }
 0x831   : > { %v24408_v62 = vpop.f32.mrf.mxu1 }
 0x832   : > { %v24416_v3 = vpop.f32.mrf.mxu0 }
 0x833   : > { %v19389_v57 = vpop.f32.mrf.mxu1 }
 0x834   : > { %v19442_v40 = vpop.f32.mrf.mxu0  ;;  %v12799_v57 = vrot.slane %v12785_v53, %v23063_v23  ;;  %v24530_v53 = vrot.slane %v12800_v15, %v23063_v23 }
 0x835   : > { %v24499_v40 = vrot.slane %v12657_v11, %v23063_v23  ;;  %v12848_v11 = vcombine.high %v12840_v19, %v12840_v19 }
 0x836   : > { %v12801_v13 = vcombine.high %v12799_v57, %v12799_v57  ;;  %v24527_v29 = vrot.slane %v12799_v57, %v23063_v23  ;;  %v24542_v57 = vrot.slane %v12847_v25, %v23063_v23 }
 0x837   : > { %v24545_v15 = vrot.slane %v12848_v11, %v23063_v23 }
 0x838   : > { %v24561_v11 = vrot.slane %v12801_v13, %v23063_v23  ;;  %v11724_v13 = vadd.f32 %v24352_v47, %v24350_v17  ;;  %v24586_v17 = vadd.f32 %v24364_v44, %v24367_v48  ;;  %v24590_v47 = vadd.f32 %v24384_v49, %v24380_v20 }
 0x83c   : > { %v11293_v32 = vpop.f32.mrf.mxu1 }
 0x83d   : > { %v11743_v35 = vpop.f32.mrf.mxu0 }
 0x83e   : > { %v19392_v30 = vpop.f32.mrf.mxu1 }
 0x83f   : > { %v19445_v38 = vpop.f32.mrf.mxu0 }
 0x840   : > { %v12035_v30 = vpop.f32.mrf.mxu1 }
 0x841   : > { %v12069_v50 = vadd.f32 %v12035_v30, %v11714_v0  ;;  %v11719_v0 = vadd.f32 %v24337_v18, %v24334_v39  ;;  %v24552_v30 = vld [vmem:[%s26338_s5] ss:$0 sm:$0xff] }
 0x842   : > { %v19480_v38 = vpop.f32.mrf.mxu1 }
 0x843   : > { %v12076_v38 = vadd.f32 %v24552_v30, %v12069_v50 }
 0x844   : > { %v12040_v25 = vpop.f32.mrf.mxu1 }
 0x845   : > { %v12090_v50 = vcombine.high %v12076_v38, %v12076_v38  ;;  %v12097_v1 = vrot.slane %v12076_v38, %v23063_v23  ;;  %v12070_v33 = vadd.f32 %v12040_v25, %v11719_v0  ;;  %v24596_v25 = vadd.f32 %v11743_v35, %v11293_v32 }
 0x846   : > { %v19483_v19 = vpop.f32.mrf.mxu1 }
 0x847   : > { %v12104_v43 = vrot.slane %v12090_v50, %v23063_v23  ;;  %v12105_v38 = vcombine.high %v12097_v1, %v12097_v1  ;;  %v12113_v0 = vrot.slane %v12097_v1, %v23063_v23  ;;  %v12077_v6 = vadd.f32 %v24552_v30, %v12070_v33 }
 0x848   : > { %v24594_v19 = vadd.f32 %v24416_v3, %v24408_v62  ;;  %v12045_v50 = vpop.f32.mrf.mxu1 }
 0x849   : > { %v12106_v18 = vcombine.high %v12104_v43, %v12104_v43  ;;  %v12120_v1 = vrot.slane %v12104_v43, %v23063_v23  ;;  %v12127_v33 = vrot.slane %v12105_v38, %v23063_v23  ;;  %v12135_v39 = vcombine.high %v12113_v0, %v12113_v0 }
 0x84a   : > { %v12937_v44 = vadd.f32 %v24395_v7, %v12113_v0  ;;  %v12139_v48 = vcombine.high %v12077_v6, %v12077_v6  ;;  %v12146_v59 = vrot.slane %v12077_v6, %v23063_v23  ;;  %v12071_v20 = vadd.f32 %v12045_v50, %v11724_v13  ;;  %v19486_v49 = vpop.f32.mrf.mxu1 }
 0x84b   : > { %v12134_v26 = vrot.slane %v12106_v18, %v23063_v23  ;;  %v12136_v62 = vcombine.high %v12120_v1, %v12120_v1  ;;  %v12137_v3 = vcombine.high %v12127_v33, %v12127_v33  ;;  %v12938_v32 = vadd.f32 %v24401_v5, %v12127_v33 }
 0x84c   : > { %v12939_v43 = vadd.f32 %v12542_v10, %v12135_v39  ;;  %v12941_v35 = vadd.f32 %v24398_v9, %v12120_v1  ;;  %v12153_v38 = vrot.slane %v12139_v48, %v23063_v23  ;;  %v12154_v0 = vcombine.high %v12146_v59, %v12146_v59  ;;  %v12050_v60 = vpop.f32.mrf.mxu1 }
 0x84d   : > { %v12138_v45 = vcombine.high %v12134_v26, %v12134_v26  ;;  %v12940_v13 = vadd.f32 %v12544_v56, %v12137_v3  ;;  %v12942_v18 = vadd.f32 %v24427_v37, %v12134_v26  ;;  %v12943_v6 = vadd.f32 %v12543_v14, %v12136_v62 }
 0x84e   : > { %v13049_v50 = vcombine.low %v12937_v44, %v12938_v32  ;;  %v12155_v7 = vcombine.high %v12153_v38, %v12153_v38  ;;  %v12162_v10 = vrot.slane %v12146_v59, %v23063_v23  ;;  %v12169_v39 = vrot.slane %v12153_v38, %v23063_v23  ;;  %v19489_v1 = vpop.f32.mrf.mxu1 }
 0x84f   : > { %v13050_v33 = vcombine.low %v12939_v43, %v12940_v13  ;;  %v13051_v48 = vcombine.low %v12941_v35, %v12942_v18  ;;  %v13079_v49 = vrot.slane %v12943_v6, %v23063_v23  ;;  %v12176_v5 = vrot.slane %v12154_v0, %v23063_v23 }
 0x850   : > { %v13058_v56 = vrot.slane %v13049_v50, %v23063_v23  ;;  %v12183_v37 = vrot.slane %v12155_v7, %v23063_v23  ;;  %v12184_v26 = vcombine.high %v12162_v10, %v12162_v10  ;;  %v12185_v9 = vcombine.high %v12169_v39, %v12169_v39  ;;  %v12055_v14 = vpop.f32.mrf.mxu1 }
 0x851   : > { %v13065_v44 = vrot.slane %v13050_v33, %v23063_v23  ;;  %v13072_v59 = vrot.slane %v13051_v48, %v23063_v23  ;;  %v12186_v62 = vcombine.high %v12176_v5, %v12176_v5  ;;  %v12944_v3 = vadd.f32 %v24404_v28, %v12138_v45 }
 0x852   : > { %v12187_v32 = vcombine.high %v12183_v37, %v12183_v37  ;;  %v12945_v43 = vadd.f32 %v24419_v24, %v12162_v10  ;;  %v26576_v35 = vcombine.high %v24404_v28, %v24404_v28  ;;  %v26577_v0 = vcombine.high %v24419_v24, %v24419_v24  ;;  %v19492_v18 = vpop.f32.mrf.mxu1 }
 0x853   : > { %v13080_v6 = vcombine.low %v13058_v56, %v13065_v44  ;;  %v13081_v50 = vcombine.low %v13072_v59, %v13079_v49  ;;  %v12948_v7 = vadd.f32 %v24411_v4, %v12186_v62  ;;  %v12949_v1 = vadd.f32 %v24443_v41, %v12169_v39 }
 0x854   : > { %v12946_v38 = vadd.f32 %v26576_v35, %v12176_v5  ;;  %v12947_v13 = vadd.f32 %v26577_v0, %v12184_v26  ;;  %v26578_v45 = vcombine.high %v24411_v4, %v24411_v4  ;;  %v12951_v10 = vadd.f32 %v24422_v58, %v12185_v9  ;;  %v12060_v5 = vpop.f32.mrf.mxu1 }
 0x855   : > { %v12952_v28 = vadd.f32 %v24440_v12, %v12187_v32  ;;  %v13097_v48 = vcombine.low %v12944_v3, %v12945_v43  ;;  %v13088_v24 = vrot.slane %v13080_v6, %v23063_v23  ;;  %v13095_v26 = vrot.slane %v13081_v50, %v23063_v23 }
 0x856   : > { %v12950_v33 = vadd.f32 %v26578_v45, %v12183_v37  ;;  %v13098_v56 = vcombine.low %v12946_v38, %v12947_v13  ;;  %v13099_v49 = vcombine.low %v12948_v7, %v12949_v1  ;;  %v12078_v4 = vadd.f32 %v24552_v30, %v12071_v20  ;;  %v19495_v37 = vpop.f32.mrf.mxu1 }
 0x857   : > { %v13106_v44 = vrot.slane %v13097_v48, %v23063_v23  ;;  %v13145_v39 = vcombine.low %v12951_v10, %v12952_v28  ;;  %v13096_v59 = vcombine.low %v13088_v24, %v13095_v26  ;;  %v12072_v3 = vadd.f32 %v12050_v60, %v24586_v17 }
 0x858   : > { %v13127_v41 = vrot.slane %v12950_v33, %v23063_v23  ;;  %v13113_v9 = vrot.slane %v13098_v56, %v23063_v23  ;;  %v13120_v62 = vrot.slane %v13099_v49, %v23063_v23  ;;  %v12188_v32 = vcombine.high %v12078_v4, %v12078_v4  ;;  %v24652_v0 = vpop.f32.mrf.mxu1 }
 0x859   : > { %v12195_v43 = vrot.slane %v12078_v4, %v23063_v23  ;;  %v24649_v35 = vrot.slane %v13145_v39, %v23063_v23  ;;  %v12073_v38 = vadd.f32 %v12055_v14, %v24590_v47  ;;  %13441 = vst [vmem:[#allocation2] sm:$0x7f] %v13096_v59  ;;  %v12079_v18 = vadd.f32 %v24552_v30, %v12072_v3 }
 0x85a   : > { %v13128_v20 = vcombine.low %v13106_v44, %v13113_v9  ;;  %v13129_v13 = vcombine.low %v13120_v62, %v13127_v41  ;;  %v24656_v6 = vadd.f32 %v12060_v5, %v24594_v19  ;;  %v12202_v60 = vrot.slane %v12188_v32, %v23063_v23  ;;  %v19498_v1 = vpop.f32.mrf.mxu1 }
 0x85b   : > { %v12203_v17 = vcombine.high %v12195_v43, %v12195_v43  ;;  %v12211_v50 = vrot.slane %v12195_v43, %v23063_v23  ;;  %v24661_v7 = vadd.f32 %v24552_v30, %v12073_v38  ;;  %v12237_v45 = vcombine.high %v12079_v18, %v12079_v18 }
 0x85c   : > { %v13136_v47 = vrot.slane %v13128_v20, %v23063_v23  ;;  %v13143_v14 = vrot.slane %v13129_v13, %v23063_v23  ;;  %v12244_v33 = vrot.slane %v12079_v18, %v23063_v23  ;;  %v12204_v10 = vcombine.high %v12202_v60, %v12202_v60 }
 0x85d   : > { %v12218_v19 = vrot.slane %v12202_v60, %v23063_v23  ;;  %v12225_v28 = vrot.slane %v12203_v17, %v23063_v23  ;;  %v12233_v48 = vcombine.high %v12211_v50, %v12211_v50  ;;  %v26579_v24 = vcombine.high %v24422_v58, %v24422_v58 }
 0x85e   : > { %v13144_v5 = vcombine.low %v13136_v47, %v13143_v14  ;;  %v12251_v56 = vrot.slane %v12237_v45, %v23063_v23  ;;  %v12252_v49 = vcombine.high %v12244_v33, %v12244_v33  ;;  %v12232_v44 = vrot.slane %v12204_v10, %v23063_v23 }
 0x85f   : > { %v12953_v26 = vadd.f32 %v26579_v24, %v12211_v50  ;;  %v12234_v41 = vcombine.high %v12218_v19, %v12218_v19  ;;  %v12235_v39 = vcombine.high %v12225_v28, %v12225_v28  ;;  %v26580_v4 = vcombine.high %v24440_v12, %v24440_v12 }
 0x860   : > { %13442 = vst [vmem:[#allocation2 + $0x10] sm:$0x7f] %v13144_v5  ;;  %v12955_v59 = vadd.f32 %v24455_v51, %v12233_v48  ;;  %v26581_v9 = vcombine.high %v24455_v51, %v24455_v51  ;;  %v12253_v58 = vcombine.high %v12251_v56, %v12251_v56  ;;  %v12260_v3 = vrot.slane %v12244_v33, %v23063_v23  ;;  %v24681_v32 = vld [vmem:[#allocation2 + $0x1] ss:$2 sm:$0x7] }
 0x861   : > { %v12954_v37 = vadd.f32 %v26580_v4, %v12225_v28  ;;  %v12236_v43 = vcombine.high %v12232_v44, %v12232_v44  ;;  %v12956_v38 = vadd.f32 %v24474_v2, %v12235_v39  ;;  %v12958_v20 = vadd.f32 %v24458_v52, %v12232_v44 }
 0x862   : > { %v12957_v62 = vadd.f32 %v26581_v9, %v12218_v19  ;;  %v12959_v12 = vadd.f32 %v24464_v22, %v12234_v41  ;;  %v26582_v13 = vmov 0.0   ;;  %v12267_v51 = vrot.slane %v12251_v56, %v23063_v23 }
 0x863   : > { %16717 = vst [vmem:[#allocation2 + $0x3] sm:$0x1] %v26582_v13  ;;  %v13146_v18 = vcombine.low %v12953_v26, %v12954_v37  ;;  %v12274_v17 = vrot.slane %v12252_v49, %v23063_v23  ;;  %v13147_v50 = vcombine.low %v12955_v59, %v12956_v38  ;;  %v12281_v47 = vrot.slane %v12253_v58, %v23063_v23 }
 0x864   : > { %v13175_v60 = vrot.slane %v12957_v62, %v23063_v23  ;;  %v13193_v1 = vcombine.low %v12958_v20, %v12959_v12  ;;  %v12282_v14 = vcombine.high %v12260_v3, %v12260_v3  ;;  %v12283_v45 = vcombine.high %v12267_v51, %v12267_v51 }
 0x865   : > { %v13161_v2 = vrot.slane %v13146_v18, %v23063_v23  ;;  %v12284_v33 = vcombine.high %v12274_v17, %v12274_v17  ;;  %v26583_v10 = vcombine.high %v24458_v52, %v24458_v52  ;;  %v13168_v28 = vrot.slane %v13147_v50, %v23063_v23 }
 0x866   : > { %v12285_v48 = vcombine.high %v12281_v47, %v12281_v47  ;;  %v26584_v5 = vcombine.high %v24464_v22, %v24464_v22  ;;  %v12962_v26 = vadd.f32 %v24481_v31, %v12274_v17  ;;  %v12963_v49 = vadd.f32 %v24499_v40, %v12282_v14 }
 0x867   : > { %v12960_v19 = vadd.f32 %v26583_v10, %v12236_v43  ;;  %v13176_v56 = vcombine.low %v24649_v35, %v13161_v2  ;;  %v26585_v44 = vcombine.high %v24481_v31, %v24481_v31  ;;  %v12965_v52 = vadd.f32 %v24467_v34, %v12267_v51  ;;  %v24706_v39 = vld [vmem:[#allocation2 + $0x11] ss:$2 sm:$0x7] }
 0x868   : > { %v12961_v24 = vadd.f32 %v26584_v5, %v12260_v3  ;;  %v13177_v4 = vcombine.low %v13168_v28, %v13175_v60  ;;  %v12966_v37 = vadd.f32 %v24484_v36, %v12281_v47  ;;  %v26586_v22 = vcombine.high %v24467_v34, %v24467_v34  ;;  %16718 = vst [vmem:[#allocation2 + $0x13] sm:$0x1] %v26582_v13 }
 0x869   : > { %v12964_v41 = vadd.f32 %v26585_v44, %v12284_v33  ;;  %v26587_v35 = vcombine.high %v24484_v36, %v24484_v36  ;;  %v13184_v31 = vrot.slane %v13176_v56, %v23063_v23  ;;  %v13195_v62 = vcombine.low %v12962_v26, %v12963_v49 }
 0x86a   : > { %v12967_v59 = vadd.f32 %v26586_v22, %v12283_v45  ;;  %v13194_v40 = vcombine.low %v12960_v19, %v12961_v24  ;;  %v13202_v58 = vrot.slane %v13193_v1, %v23063_v23  ;;  %v13191_v3 = vrot.slane %v13177_v4, %v23063_v23 }
 0x86b   : > { %v12968_v9 = vadd.f32 %v26587_v35, %v12285_v48  ;;  %v13223_v43 = vrot.slane %v12964_v41, %v23063_v23  ;;  %v13241_v38 = vcombine.low %v12965_v52, %v12966_v37  ;;  %v13216_v12 = vrot.slane %v13195_v62, %v23063_v23 }
 0x86c   : > { %v13209_v34 = vrot.slane %v13194_v40, %v23063_v23  ;;  %v12286_v36 = vcombine.high %v24661_v7, %v24661_v7  ;;  %v12293_v18 = vrot.slane %v24661_v7, %v23063_v23  ;;  %v13192_v60 = vcombine.low %v13184_v31, %v13191_v3 }
 0x86d   : > { %v13242_v20 = vcombine.low %v12967_v59, %v12968_v9  ;;  %v13250_v51 = vrot.slane %v13241_v38, %v23063_v23  ;;  %v12081_v50 = vadd.f32 %v24552_v30, %v24656_v6  ;;  %v13225_v47 = vcombine.low %v13216_v12, %v13223_v43 }
 0x86e   : > { %v13224_v1 = vcombine.low %v13202_v58, %v13209_v34  ;;  %v12300_v14 = vrot.slane %v12286_v36, %v23063_v23  ;;  %v12301_v2 = vcombine.high %v12293_v18, %v12293_v18  ;;  %13443 = vst [vmem:[#allocation2 + $0x20] sm:$0x7f] %v13192_v60  ;;  %v12309_v33 = vrot.slane %v12293_v18, %v23063_v23 }
 0x86f   : > { %v13257_v17 = vrot.slane %v13242_v20, %v23063_v23  ;;  %v12335_v10 = vcombine.high %v12081_v50, %v12081_v50  ;;  %v12342_v7 = vrot.slane %v12081_v50, %v23063_v23  ;;  %v13239_v28 = vrot.slane %v13225_v47, %v23063_v23 }
 0x870   : > { %v13232_v19 = vrot.slane %v13224_v1, %v23063_v23  ;;  %v12302_v48 = vcombine.high %v12300_v14, %v12300_v14  ;;  %v12316_v5 = vrot.slane %v12300_v14, %v23063_v23  ;;  %v12323_v24 = vrot.slane %v12301_v2, %v23063_v23 }
 0x871   : > { %v13272_v45 = vcombine.low %v13250_v51, %v13257_v17  ;;  %v12331_v26 = vcombine.high %v12309_v33, %v12309_v33  ;;  %v12969_v56 = vadd.f32 %v24502_v8, %v12309_v33  ;;  %v26588_v22 = vcombine.high %v24502_v8, %v24502_v8 }
 0x872   : > { %v13240_v49 = vcombine.low %v13232_v19, %v13239_v28  ;;  %v12330_v44 = vrot.slane %v12302_v48, %v23063_v23  ;;  %v12332_v41 = vcombine.high %v12316_v5, %v12316_v5  ;;  %v12973_v52 = vadd.f32 %v24513_v16, %v12316_v5 }
 0x873   : > { %v13280_v6 = vrot.slane %v13272_v45, %v23063_v23  ;;  %v12333_v4 = vcombine.high %v12323_v24, %v12323_v24  ;;  %v12970_v37 = vadd.f32 %v24518_v61, %v12323_v24  ;;  %v12971_v59 = vadd.f32 %v26588_v22, %v12331_v26  ;;  %v13458_v22 = vld [vmem:[#allocation2 + $0x10] ss:$2 sm:$0x7] }
 0x874   : > { %v12349_v35 = vrot.slane %v12335_v10, %v23063_v23  ;;  %13444 = vst [vmem:[#allocation2 + $0x30] sm:$0x7f] %v13240_v49  ;;  %v12334_v9 = vcombine.high %v12330_v44, %v12330_v44  ;;  %v26589_v31 = vcombine.high %v24505_v27, %v24505_v27  ;;  %v26590_v62 = vcombine.high %v24513_v16, %v24513_v16 }
 0x875   : > { %v12350_v3 = vcombine.high %v12342_v7, %v12342_v7  ;;  %v12972_v43 = vadd.f32 %v24505_v27, %v12333_v4  ;;  %v13243_v61 = vcombine.low %v12969_v56, %v12970_v37  ;;  %v13271_v38 = vrot.slane %v12971_v59, %v23063_v23  ;;  %v24754_v20 = vld [vmem:[#allocation2 + $0x21] ss:$2 sm:$0x7] }
 0x876   : > { %v12974_v40 = vadd.f32 %v26589_v31, %v12330_v44  ;;  %v12975_v58 = vadd.f32 %v26590_v62, %v12332_v41  ;;  %v12351_v8 = vcombine.high %v12349_v35, %v12349_v35  ;;  %v12358_v12 = vrot.slane %v12342_v7, %v23063_v23  ;;  %16719 = vst [vmem:[#allocation2 + $0x23] sm:$0x1] %v26582_v13  ;;  %v13457_v44 = vld [vmem:[#allocation2] ss:$2 sm:$0x7] }
 0x877   : > { %v12365_v36 = vrot.slane %v12349_v35, %v23063_v23  ;;  %v12372_v18 = vrot.slane %v12350_v3, %v23063_v23  ;;  %v13264_v16 = vrot.slane %v13243_v61, %v23063_v23  ;;  %v13289_v60 = vcombine.low %v12972_v43, %v12973_v52 }
 0x878   : > { %v13290_v34 = vcombine.low %v12974_v40, %v12975_v58  ;;  %v12379_v27 = vrot.slane %v12351_v8, %v23063_v23  ;;  %v12976_v51 = vadd.f32 %v24521_v63, %v12334_v9  ;;  %v12380_v50 = vcombine.high %v12358_v12, %v12358_v12  ;;  %v13484_v8 = vld [vmem:[#allocation2 + $0x12] ss:$2 sm:$0x7] }
 0x879   : > { %v12381_v1 = vcombine.high %v12365_v36, %v12365_v36  ;;  %v12382_v47 = vcombine.high %v12372_v18, %v12372_v18  ;;  %v13273_v14 = vcombine.low %v13264_v16, %v13271_v38  ;;  %v13298_v2 = vrot.slane %v13289_v60, %v23063_v23  ;;  %v13482_v38 = vld [vmem:[#allocation2 + $0x2] ss:$2 sm:$0x7] }
 0x87a   : > { %v13305_v17 = vrot.slane %v13290_v34, %v23063_v23  ;;  %v12383_v45 = vcombine.high %v12379_v27, %v12379_v27  ;;  %v12977_v33 = vadd.f32 %v24556_v21, %v12358_v12  ;;  %v26591_v10 = vcombine.high %v24521_v63, %v24521_v63  ;;  %v13486_v16 = vld [vmem:[#allocation2 + $0x22] ss:$2 sm:$0x7] }
 0x87b   : > { %v12979_v19 = vadd.f32 %v24524_v42, %v12380_v50  ;;  %v12980_v28 = vadd.f32 %v24530_v53, %v12382_v47  ;;  %v26592_v48 = vcombine.high %v24524_v42, %v24524_v42  ;;  %v13287_v24 = vrot.slane %v13273_v14, %v23063_v23  ;;  %v13468_v63 = vld [vmem:[#allocation2 + $0x31] ss:$2 sm:$0x7]  ;;  %v13459_v42 = vld [vmem:[#allocation2 + $0x20] ss:$2 sm:$0x7] }
 0x87c   : > { %v12978_v7 = vadd.f32 %v26591_v10, %v12372_v18  ;;  %v13320_v26 = vcombine.low %v13298_v2, %v13305_v17  ;;  %v26593_v56 = vcombine.high %v24530_v53, %v24530_v53  ;;  %v12983_v21 = vadd.f32 %v24527_v29, %v12381_v1  ;;  %16720 = vst [vmem:[#allocation2 + $0x33] sm:$0x1] %v26582_v13  ;;  %v13460_v31 = vld [vmem:[#allocation2 + $0x30] ss:$2 sm:$0x7] }
 0x87d   : > { %v12981_v5 = vadd.f32 %v26592_v48, %v12365_v36  ;;  %v12984_v41 = vadd.f32 %v24561_v11, %v12383_v45  ;;  %v13291_v52 = vcombine.low %v12976_v51, %v12977_v33  ;;  %v13337_v37 = vcombine.low %v12979_v19, %v12980_v28 }
 0x87e   : > { %v12982_v49 = vadd.f32 %v26593_v56, %v12379_v27  ;;  %v13319_v4 = vrot.slane %v12978_v7, %v23063_v23  ;;  %v13288_v59 = vcombine.low %v13280_v6, %v13287_v24  ;;  %v13328_v35 = vrot.slane %v13320_v26, %v23063_v23 }
 0x87f   : > { %v12075_v53 = vadd.f32 %v24652_v0, %v24596_v25  ;;  %v13312_v40 = vrot.slane %v13291_v52, %v23063_v23  ;;  %v13339_v62 = vcombine.low %v12983_v21, %v12984_v41  ;;  %v13346_v11 = vrot.slane %v13337_v37, %v23063_v23 }
 0x880   : > { %v13338_v9 = vcombine.low %v12981_v5, %v12982_v49  ;;  %v13473_v58 = vmax.f32 %v13457_v44, %v24681_v32  ;;  %13445 = vst [vmem:[#allocation2 + $0x40] sm:$0x7f] %v13288_v59  ;;  %v13474_v6 = vmax.f32 %v13458_v22, %v24706_v39  ;;  %v13475_v61 = vmax.f32 %v13459_v42, %v24754_v20 }
 0x881   : > { %v12082_v43 = vadd.f32 %v24552_v30, %v12075_v53  ;;  %v13321_v25 = vcombine.low %v13312_v40, %v13319_v4  ;;  %v13360_v0 = vrot.slane %v13339_v62, %v23063_v23  ;;  %v13476_v12 = vmax.f32 %v13460_v31, %v13468_v63  ;;  %v13488_v30 = vld [vmem:[#allocation2 + $0x32] ss:$2 sm:$0x7] }
 0x882   : > { %v13353_v3 = vrot.slane %v13338_v9, %v23063_v23  ;;  %v24793_v34 = vmax.f32 %v13473_v58, %v13482_v38  ;;  %v24796_v60 = vmax.f32 %v13474_v6, %v13484_v8  ;;  %v24799_v20 = vmax.f32 %v13475_v61, %v13486_v16 }
 0x883   : > { %v12384_v32 = vcombine.high %v12082_v43, %v12082_v43  ;;  %v12391_v18 = vrot.slane %v12082_v43, %v23063_v23  ;;  %v13335_v39 = vrot.slane %v13321_v25, %v23063_v23  ;;  %v24802_v51 = vmax.f32 %v13476_v12, %v13488_v30 }
 0x884   : > { %v13368_v36 = vcombine.low %v13346_v11, %v13353_v3  ;;  %26594 = vst [vmem:[#allocation20_spill] sm:$0xff] %v24796_v60  ;;  %26595 = vst [vmem:[#allocation13_spill] sm:$0xff] %v24799_v20  ;;  %v13505_v27 = vmax.f32 %v24793_v34, 0.0  ;;  %v13506_v2 = vmax.f32 %v24796_v60, 0.0  ;;  %v13507_v45 = vmax.f32 %v24799_v20, 0.0 }
 0x885   : > { %26596 = vst [vmem:[#allocation16_spill] sm:$0xff] %v24802_v51  ;;  %v12398_v17 = vrot.slane %v12384_v32, %v23063_v23  ;;  %v12399_v50 = vcombine.high %v12391_v18, %v12391_v18  ;;  %v12407_v1 = vrot.slane %v12391_v18, %v23063_v23  ;;  %v13336_v14 = vcombine.low %v13328_v35, %v13335_v39 }
 0x886   : > { %v13376_v47 = vrot.slane %v13368_v36, %v23063_v23  ;;  %v13521_v33 = vrot.slane %v13505_v27, 7  ;;  %v26597_v48 = vcombine.high %v24527_v29, %v24527_v29  ;;  %v13522_v24 = vrot.slane %v13506_v2, 7 }
 0x887   : > { %v12400_v10 = vcombine.high %v12398_v17, %v12398_v17  ;;  %v12414_v7 = vrot.slane %v12398_v17, %v23063_v23  ;;  %v12421_v19 = vrot.slane %v12399_v50, %v23063_v23  ;;  %v12429_v28 = vcombine.high %v12407_v1, %v12407_v1  ;;  %13446 = vst [vmem:[#allocation2 + $0x50] sm:$0x7f] %v13336_v14  ;;  %v24817_v41 = vld [vmem:[#allocation2 + $0x41] ss:$2 sm:$0x7] }
 0x888   : > { %v12985_v5 = vadd.f32 %v26597_v48, %v12407_v1  ;;  %v13523_v26 = vrot.slane %v13507_v45, 7  ;;  %v13537_v56 = vsel %vm899_vm0, 0.0, %v13521_v33  ;;  %v26598_v4 = vcombine.high %v24545_v15, %v24545_v15  ;;  %16721 = vst [vmem:[#allocation2 + $0x43] sm:$0x1] %v26582_v13 }
 0x889   : > { %v12428_v49 = vrot.slane %v12400_v10, %v23063_v23  ;;  %v12430_v21 = vcombine.high %v12414_v7, %v12414_v7  ;;  %v12431_v44 = vcombine.high %v12421_v19, %v12421_v19  ;;  %v12986_v63 = vadd.f32 %v24539_v46, %v12421_v19 }
 0x88a   : > { %v12987_v52 = vadd.f32 %v24545_v15, %v12429_v28  ;;  %v12989_v37 = vadd.f32 %v26598_v4, %v12414_v7  ;;  %v13367_v29 = vrot.slane %v12985_v5, %v23063_v23  ;;  %v13538_v22 = vsel %vm899_vm0, 0.0, %v13522_v24 }
 0x88b   : > { %v12432_v42 = vcombine.high %v12428_v49, %v12428_v49  ;;  %v26599_v59 = vcombine.high %v24539_v46, %v24539_v46  ;;  %v12990_v9 = vadd.f32 %v24542_v57, %v12428_v49  ;;  %v12991_v53 = vadd.f32 %v24571_v54, %v12430_v21  ;;  %v13461_v49 = vld [vmem:[#allocation2 + $0x40] ss:$2 sm:$0x7] }
 0x88c   : > { %v13369_v31 = vcombine.low %v13360_v0, %v13367_v29  ;;  %v13385_v40 = vcombine.low %v12986_v63, %v12987_v52  ;;  %v13539_v15 = vsel %vm899_vm0, 0.0, %v13523_v26  ;;  %v24833_v62 = vsel %vm13545_vm9, %v13537_v56, 0.0 }
 0x88d   : > { %v12988_v35 = vadd.f32 %v26599_v59, %v12431_v44  ;;  %v26600_v11 = vcombine.high %v24542_v57, %v24542_v57  ;;  %v13387_v43 = vcombine.low %v12990_v9, %v12991_v53  ;;  %v24839_v46 = vsel %vm13545_vm9, %v13538_v22, 0.0 }
 0x88e   : > { %v13383_v6 = vrot.slane %v13369_v31, %v23063_v23  ;;  %v13394_v54 = vrot.slane %v13385_v40, %v23063_v23  ;;  %v24844_v61 = vsel %vm13545_vm9, %v13539_v15, 0.0  ;;  %v13568_v38 = vrot.slane %v24833_v62, %v23063_v23  ;;  %v13470_v12 = vld [vmem:[#allocation2 + $0x51] ss:$2 sm:$0x7] }
 0x88f   : > { %v12992_v58 = vadd.f32 %v26600_v11, %v12432_v42  ;;  %v13386_v3 = vcombine.low %v12988_v35, %v12989_v37  ;;  %v13408_v57 = vrot.slane %v13387_v43, %v23063_v23  ;;  %v13591_v8 = vrot.slane %v24839_v46, %v23063_v23  ;;  %16722 = vst [vmem:[#allocation2 + $0x53] sm:$0x1] %v26582_v13  ;;  %v13462_v4 = vld [vmem:[#allocation2 + $0x50] ss:$2 sm:$0x7] }
 0x890   : > { %v13384_v36 = vcombine.low %v13376_v47, %v13383_v6  ;;  %v13569_v32 = vcombine.high %v13568_v38, %v13568_v38  ;;  %v24854_v18 = vrot.slane %v13568_v38, %v23063_v23  ;;  %v13614_v16 = vrot.slane %v24844_v61, %v23063_v23  ;;  %v13490_v31 = vld [vmem:[#allocation2 + $0x42] ss:$2 sm:$0x7] }
 0x891   : > { %v13401_v25 = vrot.slane %v13386_v3, %v23063_v23  ;;  %v13415_v0 = vrot.slane %v12992_v58, %v23063_v23  ;;  %v13592_v27 = vcombine.high %v13591_v8, %v13591_v8  ;;  %v13599_v17 = vrot.slane %v13591_v8, %v23063_v23 }
 0x892   : > { %13447 = vst [vmem:[#allocation2 + $0x60] sm:$0x7f] %v13384_v36  ;;  %v24861_v50 = vrot.slane %v13569_v32, %v23063_v23  ;;  %v13584_v1 = vcombine.high %v24854_v18, %v24854_v18  ;;  %v13615_v47 = vcombine.high %v13614_v16, %v13614_v16  ;;  %v24866_v14 = vrot.slane %v13614_v16, %v23063_v23 }
 0x893   : > { %v13416_v30 = vcombine.low %v13394_v54, %v13401_v25  ;;  %v13417_v39 = vcombine.low %v13408_v57, %v13415_v0  ;;  %v24871_v33 = vrot.slane %v13592_v27, %v23063_v23  ;;  %v24873_v10 = vcombine.high %v13599_v17, %v13599_v17  ;;  %v13492_v54 = vld [vmem:[#allocation2 + $0x52] ss:$2 sm:$0x7] }
 0x894   : > { %v24876_v7 = vrot.slane %v13615_v47, %v23063_v23  ;;  %v24880_v19 = vcombine.high %v24866_v14, %v24866_v14  ;;  %v13762_v28 = vcombine.high %v24861_v50, %v24861_v50  ;;  %v13786_v48 = vcombine.low %v24861_v50, %v13584_v1 }
 0x895   : > { %v13424_v2 = vrot.slane %v13416_v30, %v23063_v23  ;;  %v13431_v45 = vrot.slane %v13417_v39, %v23063_v23  ;;  %v17944_v24 = vcombine.high %v13599_v17, %v24871_v33  ;;  %v14016_v26 = vcombine.low %v24854_v18, %v24861_v50 }
 0x896   : > { %v14017_v56 = vcombine.low %v13584_v1, %v13599_v17  ;;  %v13787_v21 = vcombine.low %v13762_v28, %v24871_v33  ;;  %v13789_v44 = vcombine.low %v24876_v7, %v24880_v19  ;;  %v13796_v63 = vrot.slane %v13786_v48, %v23063_v23 }
 0x897   : > { %v13432_v5 = vcombine.low %v13424_v2, %v13431_v45  ;;  %v14018_v52 = vcombine.low %v24871_v33, %v24873_v10  ;;  %v13810_v37 = vrot.slane %v17944_v24, %v23063_v23  ;;  %v14019_v29 = vcombine.low %v24866_v14, %v24876_v7  ;;  %v24921_v45 = vld [vmem:[#allocation6 + $0x178] sm:$0xff] }
 0x898   : > { %v14026_v22 = vrot.slane %v14016_v26, %v23063_v23  ;;  %v14033_v42 = vrot.slane %v14017_v56, %v23063_v23  ;;  %v13803_v59 = vrot.slane %v13787_v21, %v23063_v23  ;;  %v13817_v35 = vrot.slane %v13789_v44, %v23063_v23 }
 0x899   : > { %13448 = vst [vmem:[#allocation2 + $0x70] sm:$0x7f] %v13432_v5  ;;  %v14040_v9 = vrot.slane %v14018_v52, %v23063_v23  ;;  %v13477_v53 = vmax.f32 %v13461_v49, %v24817_v41  ;;  %v14047_v40 = vrot.slane %v14019_v29, %v23063_v23  ;;  %v13478_v11 = vmax.f32 %v13462_v4, %v13470_v12  ;;  %v13463_v3 = vld [vmem:[#allocation2 + $0x60] ss:$2 sm:$0x7] }
 0x89a   : > { %v14048_v15 = vcombine.low %v14026_v22, %v14033_v42  ;;  %v13508_v58 = vmax.f32 %v24802_v51, 0.0  ;;  %v13818_v43 = vcombine.low %v13796_v63, %v13803_v59  ;;  %v13819_v6 = vcombine.low %v13810_v37, %v13817_v35  ;;  %v13471_v57 = vld [vmem:[#allocation2 + $0x61] ss:$2 sm:$0x7]  ;;  %v24932_v63 = vld [vmem:[#allocation6 + $0x170] sm:$0xff] }
 0x89b   : > { %v24905_v38 = vmax.f32 %v13477_v53, %v13490_v31  ;;  %v13764_v25 = vcombine.high %v24876_v7, %v24876_v7  ;;  %v14049_v0 = vcombine.low %v14040_v9, %v14047_v40  ;;  %v24910_v8 = vmax.f32 %v13478_v11, %v13492_v54  ;;  %16723 = vst [vmem:[#allocation2 + $0x63] sm:$0x1] %v26582_v13  ;;  %v13494_v1 = vld [vmem:[#allocation2 + $0x62] ss:$2 sm:$0x7]  ;;  %v24946_v53 = vld [vmem:[#allocation6 + $0x168] sm:$0xff] }
 0x89c   : > { %v14056_v41 = vrot.slane %v14048_v15, %v23063_v23  ;;  %v13524_v36 = vrot.slane %v13508_v58, 7  ;;  %v13826_v12 = vrot.slane %v13818_v43, %v23063_v23  ;;  %v13833_v32 = vrot.slane %v13819_v6, %v23063_v23  ;;  %v24967_v54 = vld [vmem:[#allocation6 + $0x160] sm:$0xff] }
 0x89d   : > { %26601 = vst [vmem:[#allocation15_spill] sm:$0xff] %v24905_v38  ;;  %26602 = vst [vmem:[#allocation22_spill] sm:$0xff] %v24910_v8  ;;  %v13509_v16 = vmax.f32 %v24905_v38, 0.0  ;;  %v13479_v30 = vmax.f32 %v13463_v3, %v13471_v57  ;;  %v14063_v39 = vrot.slane %v14049_v0, %v23063_v23  ;;  %v13510_v27 = vmax.f32 %v24910_v8, 0.0 }
 0x89e   : > { %v13540_v17 = vsel %vm899_vm0, 0.0, %v13524_v36  ;;  %v13834_v2 = vcombine.low %v13826_v12, %v13833_v32  ;;  %v14246_v44 = vcombine.high %v24833_v62, %v24833_v62  ;;  %v14261_v29 = vcombine.high %v24839_v46, %v24839_v46 }
 0x89f   : > { %v13525_v28 = vrot.slane %v13509_v16, 7  ;;  %v24924_v48 = vsel %vm13545_vm9, %v13540_v17, 0.0  ;;  %v24926_v24 = vmax.f32 %v13479_v30, %v13494_v1  ;;  %v14064_v26 = vcombine.low %v14056_v41, %v14063_v39 }
 0x8a0   : > { %v13464_v5 = vld [vmem:[#allocation2 + $0x70] ss:$2 sm:$0x7]  ;;  %v13526_v56 = vrot.slane %v13510_v27, 7  ;;  %v13637_v49 = vrot.slane %v24924_v48, %v23063_v23  ;;  %19532 = vmatmul.mubr.f32.vlgmr.msra.gmra.mxu0 %v13834_v2  ;;  %v24987_v27 = vld [vmem:[#allocation6 + $0x158] sm:$0xff]  ;;  %v14268_v62 = vrot.slane %v14261_v29, %v23063_v23 }
 0x8a1   : > { %26603 = vst [vmem:[#allocation25_spill] sm:$0xff] %v24926_v24  ;;  %v13472_v21 = vld [vmem:[#allocation2 + $0x71] ss:$2 sm:$0x7]  ;;  %v13541_v52 = vsel %vm899_vm0, 0.0, %v13525_v28  ;;  %v13511_v37 = vmax.f32 %v24926_v24, 0.0  ;;  %19573 = vmatmul.mubr.f32.vlgmr.msra.gmra.mxu1 %v14064_v26  ;;  %19582 = vmatpush3.msra.mxu0 %v24921_v45 }
 0x8a2   : > { %v13480_v4 = vmax.f32 %v13464_v5, %v13472_v21  ;;  %16724 = vst [vmem:[#allocation2 + $0x73] sm:$0x1] %v26582_v13  ;;  %v13542_v22 = vsel %vm899_vm0, 0.0, %v13526_v56  ;;  %v24942_v42 = vsel %vm13545_vm9, %v13541_v52, 0.0  ;;  %v13638_v59 = vcombine.high %v13637_v49, %v13637_v49  ;;  %19583 = vmatprep.subr.mxu0 %v26582_v13  ;;  %19575 = vmatprep.mubr.msk.f32.mxu1 %vm20312_vm8, %v26582_v13  ;;  %v20149_v56 = vld [vmem:[#allocation6 + $0xf8] sm:$0xff] }
 0x8a3   : > { %v13645_v35 = vrot.slane %v13637_v49, %v23063_v23  ;;  %v13496_v9 = vld [vmem:[#allocation2 + $0x72] ss:$2 sm:$0x7]  ;;  %v24951_v31 = vsel %vm13545_vm9, %v13542_v22, 0.0  ;;  %v13660_v40 = vrot.slane %v24942_v42, %v23063_v23  ;;  %v13527_v11 = vrot.slane %v13511_v37, 7  ;;  %19584 = vmatpush3.msra.mxu0 %v24932_v63  ;;  %19534 = vmatprep.mubr.msk.f32.mxu0 %vm20312_vm8, %v26582_v13 }
 0x8a4   : > { %v24955_v15 = vmax.f32 %v13480_v4, %v13496_v9  ;;  %v24959_v58 = vrot.slane %v13638_v59, %v23063_v23  ;;  %v13683_v43 = vrot.slane %v24951_v31, %v23063_v23  ;;  %19585 = vmatprep.subr.mxu0 %v26582_v13  ;;  %19623 = vmatpush3.msra.mxu1 %v20149_v56  ;;  %v25008_v4 = vld [vmem:[#allocation6 + $0x150] sm:$0xff] }
 0x8a5   : > { %v24961_v3 = vcombine.high %v13645_v35, %v13645_v35  ;;  %v14065_v6 = vcombine.low %v24880_v19, %v13645_v35  ;;  %v13661_v57 = vcombine.high %v13660_v40, %v13660_v40  ;;  %v24970_v0 = vrot.slane %v13660_v40, %v23063_v23  ;;  %19586 = vmatpush3.msra.mxu0 %v24946_v53 }
 0x8a6   : > { %26604 = vst [vmem:[#allocation14_spill] sm:$0xff] %v24955_v15  ;;  %v13512_v41 = vmax.f32 %v24955_v15, 0.0  ;;  %v13543_v36 = vsel %vm899_vm0, 0.0, %v13527_v11  ;;  %v13684_v12 = vcombine.high %v13683_v43, %v13683_v43  ;;  %v13691_v19 = vrot.slane %v13683_v43, %v23063_v23  ;;  %19587 = vmatprep.subr.mxu0 %v26582_v13  ;;  %19624 = vmatprep.subr.mxu1 %v26582_v13 }
 0x8a7   : > { %v14066_v32 = vcombine.low %v24959_v58, %v24961_v3  ;;  %v14075_v16 = vrot.slane %v14065_v6, %v23063_v23  ;;  %v24983_v30 = vrot.slane %v13661_v57, %v23063_v23  ;;  %v13676_v39 = vcombine.high %v24970_v0, %v24970_v0  ;;  %19588 = vmatpush3.msra.mxu0 %v24967_v54  ;;  %v25020_v6 = vld [vmem:[#allocation6 + $0x148] sm:$0xff] }
 0x8a8   : > { %v13835_v17 = vcombine.low %v13764_v25, %v24959_v58  ;;  %v17945_v1 = vcombine.high %v13645_v35, %v24959_v58  ;;  %v24997_v28 = vrot.slane %v13684_v12, %v23063_v23  ;;  %v13528_v5 = vrot.slane %v13512_v41, 7  ;;  %19589 = vmatprep.subr.mxu0 %v26582_v13 }
 0x8a9   : > { %v14082_v2 = vrot.slane %v14066_v32, %v23063_v23  ;;  %v25000_v26 = vsel %vm13545_vm9, %v13543_v36, 0.0  ;;  %v14067_v25 = vcombine.low %v24970_v0, %v24983_v30  ;;  %v14068_v49 = vcombine.low %v13676_v39, %v13691_v19  ;;  %19590 = vmatpush3.msra.mxu0 %v24987_v27  ;;  %v20150_v32 = vld [vmem:[#allocation6 + $0xf0] sm:$0xff] }
 0x8aa   : > { %v13766_v21 = vcombine.high %v24983_v30, %v24983_v30  ;;  %v13837_v52 = vcombine.low %v24983_v30, %v13676_v39  ;;  %v13845_v22 = vrot.slane %v13835_v17, %v23063_v23  ;;  %v13852_v59 = vrot.slane %v17945_v1, %v23063_v23  ;;  %19591 = vmatprep.subr.mxu0 %v26582_v13  ;;  %v25031_v17 = vld [vmem:[#allocation6 + $0x140] sm:$0xff] }
 0x8ab   : > { %v14097_v37 = vcombine.low %v14075_v16, %v14082_v2  ;;  %v13544_v35 = vsel %vm899_vm0, 0.0, %v13528_v5  ;;  %v14089_v9 = vrot.slane %v14067_v25, %v23063_v23  ;;  %v14096_v40 = vrot.slane %v14068_v49, %v23063_v23  ;;  %19592 = vmatpush3.msra.mxu0 %v25008_v4  ;;  %19625 = vmatpush3.msra.mxu1 %v20150_v32 }
 0x8ac   : > { %v13838_v11 = vcombine.low %v13766_v21, %v24997_v28  ;;  %v13859_v43 = vrot.slane %v13837_v52, %v23063_v23  ;;  %v13867_v41 = vcombine.low %v13845_v22, %v13852_v59  ;;  %v25025_v36 = vsel %vm13545_vm9, %v13544_v35, 0.0  ;;  %19593 = vmatprep.subr.mxu0 %v26582_v13  ;;  %v25046_v59 = vld [vmem:[#allocation6 + $0x138] sm:$0xff]  ;;  %19626 = vmatprep.subr.mxu1 %v26582_v13 }
 0x8ad   : > { %v14105_v57 = vrot.slane %v14097_v37, %v23063_v23  ;;  %v13706_v12 = vrot.slane %v25000_v26, %v23063_v23  ;;  %v14098_v16 = vcombine.low %v14089_v9, %v14096_v40  ;;  %v13729_v1 = vrot.slane %v25025_v36, %v23063_v23  ;;  %19594 = vmatpush3.msra.mxu0 %v25020_v6 }
 0x8ae   : > { %v13866_v39 = vrot.slane %v13838_v11, %v23063_v23  ;;  %v17946_v2 = vcombine.high %v13691_v19, %v24997_v28  ;;  %v13875_v5 = vrot.slane %v13867_v41, %v23063_v23  ;;  %v25041_v49 = vcombine.high %v13691_v19, %v13691_v19  ;;  %19595 = vmatprep.subr.mxu0 %v26582_v13 }
 0x8af   : > { %v13707_v56 = vcombine.high %v13706_v12, %v13706_v12  ;;  %v25039_v25 = vrot.slane %v13706_v12, %v23063_v23  ;;  %v14112_v21 = vrot.slane %v14098_v16, %v23063_v23  ;;  %v13730_v37 = vcombine.high %v13729_v1, %v13729_v1  ;;  %19596 = vmatpush3.msra.mxu0 %v25031_v17 }
 0x8b0   : > { %v13868_v52 = vcombine.low %v13859_v43, %v13866_v39  ;;  %v13737_v22 = vrot.slane %v13729_v1, %v23063_v23  ;;  %v13894_v19 = vrot.slane %v17946_v2, %v23063_v23  ;;  %v14114_v40 = vcombine.low %v24997_v28, %v25041_v49  ;;  %19597 = vmatprep.subr.mxu0 %v26582_v13 }
 0x8b1   : > { %v25050_v35 = vrot.slane %v13707_v56, %v23063_v23  ;;  %v13722_v9 = vcombine.high %v25039_v25, %v25039_v25  ;;  %v14113_v11 = vcombine.low %v14105_v57, %v14112_v21  ;;  %v25060_v41 = vrot.slane %v13730_v37, %v23063_v23  ;;  %19598 = vmatpush3.msra.mxu0 %v25046_v59 }
 0x8b2   : > { %v13882_v43 = vrot.slane %v13868_v52, %v23063_v23  ;;  %v25062_v12 = vcombine.high %v13737_v22, %v13737_v22  ;;  %v14124_v21 = vrot.slane %v14114_v40, %v23063_v23  ;;  %v25074_v52 = vld [vmem:[#allocation6 + $0x130] sm:$0xff]  ;;  %19599 = vmatprep.subr.mxu0 %v26582_v13  ;;  %v25085_v40 = vld [vmem:[#allocation6 + $0x128] sm:$0xff]  ;;  %v14275_v46 = vrot.slane %v14268_v62, %v23063_v23 }
 0x8b3   : > { %v13768_v32 = vcombine.high %v25050_v35, %v25050_v35  ;;  %v13885_v16 = vcombine.low %v25050_v35, %v13722_v9  ;;  %v14115_v39 = vcombine.low %v25039_v25, %v25050_v35  ;;  %v14116_v1 = vcombine.low %v13722_v9, %v13737_v22  ;;  %19576 = vmatmul.mubr.f32.gmra.mxu1 %v14113_v11  ;;  %v25140_v62 = vld [vmem:[#allocation6 + $0x108] sm:$0xff] }
 0x8b4   : > { %v13883_v57 = vcombine.low %v13875_v5, %v13882_v43  ;;  %v17947_v2 = vcombine.high %v13737_v22, %v25060_v41  ;;  %v14117_v56 = vcombine.low %v25060_v41, %v25062_v12  ;;  %19578 = vmatprep.mubr.msk.f32.mxu1 %vm20312_vm8, %v26582_v13  ;;  %v14253_v43 = vrot.slane %v14246_v44, %v23063_v23 }
 0x8b5   : > { %v13886_v37 = vcombine.low %v13768_v32, %v25060_v41  ;;  %v13901_v9 = vrot.slane %v13885_v16, %v23063_v23  ;;  %v14131_v47 = vrot.slane %v14115_v39, %v23063_v23  ;;  %v14138_v5 = vrot.slane %v14116_v1, %v23063_v23  ;;  %19600 = vmatpush3.msra.mxu0 %v25074_v52 }
 0x8b6   : > { %19535 = vmatmul.mubr.f32.gmra.mxu0 %v13883_v57  ;;  %v13915_v22 = vrot.slane %v17947_v2, %v23063_v23  ;;  %v14145_v11 = vrot.slane %v14117_v56, %v23063_v23  ;;  %19601 = vmatprep.subr.mxu0 %v26582_v13  ;;  %v25096_v57 = vld [vmem:[#allocation6 + $0x120] sm:$0xff]  ;;  %v14260_v2 = vrot.slane %v14253_v43, %v23063_v23 }
 0x8b7   : > { %19537 = vmatprep.mubr.msk.f32.mxu0 %vm20312_vm8, %v26582_v13  ;;  %v13908_v32 = vrot.slane %v13886_v37, %v23063_v23  ;;  %v13916_v16 = vcombine.low %v13894_v19, %v13901_v9  ;;  %v14146_v39 = vcombine.low %v14124_v21, %v14131_v47  ;;  %v17948_v44 = vcombine.high %v24854_v18, %v24861_v50  ;;  %v25112_v9 = vld [vmem:[#allocation6 + $0x118] sm:$0xff] }
 0x8b8   : > { %v14147_v1 = vcombine.low %v14138_v5, %v14145_v11  ;;  %19602 = vmatpush3.msra.mxu0 %v25085_v40  ;;  %v17949_v19 = vcombine.high %v24866_v14, %v24876_v7  ;;  %v14383_v18 = vcombine.low %v14260_v2, %v24873_v10  ;;  %v14276_v7 = vcombine.high %v24844_v61, %v24844_v61 }
 0x8b9   : > { %v13917_v56 = vcombine.low %v13908_v32, %v13915_v22  ;;  %v13924_v47 = vrot.slane %v13916_v16, %v23063_v23  ;;  %v14154_v21 = vrot.slane %v14146_v39, %v23063_v23  ;;  %19603 = vmatprep.subr.mxu0 %v26582_v13  ;;  %v14392_v29 = vrot.slane %v17948_v44, %v23063_v23  ;;  %v25130_v16 = vld [vmem:[#allocation6 + $0x110] sm:$0xff] }
 0x8ba   : > { %v14161_v37 = vrot.slane %v14147_v1, %v23063_v23  ;;  %19604 = vmatpush3.msra.mxu0 %v25096_v57  ;;  %v14413_v14 = vrot.slane %v17949_v19, %v23063_v23  ;;  %v26605_v22 = vcombine.high %v24871_v33, %v24871_v33  ;;  %v14399_v10 = vrot.slane %v14383_v18, %v23063_v23 }
 0x8bb   : > { %v13931_v50 = vrot.slane %v13917_v56, %v23063_v23  ;;  %19605 = vmatprep.subr.mxu0 %v26582_v13  ;;  %v14291_v43 = vcombine.high %v24924_v48, %v24924_v48  ;;  %v13765_v61 = vcombine.high %v24959_v58, %v24959_v58  ;;  %v14283_v39 = vrot.slane %v14276_v7, %v23063_v23 }
 0x8bc   : > { %v14162_v5 = vcombine.low %v14154_v21, %v14161_v37  ;;  %v14384_v11 = vcombine.low %v26605_v22, %v14275_v46  ;;  %19606 = vmatpush3.msra.mxu0 %v25112_v9  ;;  %v14306_v1 = vcombine.high %v24942_v42, %v24942_v42  ;;  %v14414_v2 = vcombine.low %v14392_v29, %v14399_v10  ;;  %v25154_v37 = vld [vmem:[#allocation6 + $0x100] sm:$0xff] }
 0x8bd   : > { %v13932_v32 = vcombine.low %v13924_v47, %v13931_v50  ;;  %19607 = vmatprep.subr.mxu0 %v26582_v13  ;;  %v14298_v48 = vrot.slane %v14291_v43, %v23063_v23  ;;  %v14290_v44 = vrot.slane %v14283_v39, %v23063_v23  ;;  %v17950_v56 = vcombine.high %v24970_v0, %v24983_v30 }
 0x8be   : > { %19579 = vmatmul.mubr.f32.gmra.mxu1 %v14162_v5  ;;  %v14406_v33 = vrot.slane %v14384_v11, %v23063_v23  ;;  %v14313_v58 = vrot.slane %v14306_v1, %v23063_v23  ;;  %v13767_v42 = vcombine.high %v24997_v28, %v24997_v28  ;;  %19608 = vmatpush3.msra.mxu0 %v25130_v16 }
 0x8bf   : > { %19538 = vmatmul.mubr.f32.gmra.mxu0 %v13932_v32  ;;  %v14422_v19 = vrot.slane %v14414_v2, %v23063_v23  ;;  %v14305_v21 = vrot.slane %v14298_v48, %v23063_v23  ;;  %19609 = vmatprep.subr.mxu0 %v26582_v13  ;;  %v14431_v0 = vcombine.low %v14290_v44, %v24961_v3  ;;  %v20151_v32 = vld [vmem:[#allocation6 + $0xe8] sm:$0xff] }
 0x8c0   : > { %19613 = vmatprep.mubr.msk.f32.mxu0 %vm20312_vm8, %v26582_v13  ;;  %v14415_v47 = vcombine.low %v14406_v33, %v14413_v14  ;;  %v14320_v46 = vrot.slane %v14313_v58, %v23063_v23  ;;  %v13769_v30 = vcombine.high %v25060_v41, %v25060_v41  ;;  %v14321_v28 = vcombine.high %v24951_v31, %v24951_v31  ;;  %v20152_v33 = vld [vmem:[#allocation6 + $0x78] sm:$0xff] }
 0x8c1   : > { %19610 = vmatpush3.msra.mxu0 %v25140_v62  ;;  %v14432_v50 = vcombine.low %v13765_v61, %v14305_v21  ;;  %v14336_v29 = vcombine.high %v25000_v26, %v25000_v26  ;;  %v14351_v14 = vcombine.high %v25025_v36, %v25025_v36  ;;  %v14441_v41 = vrot.slane %v14431_v0, %v23063_v23  ;;  %v20155_v0 = vld [vmem:[#allocation6 + $0x68] sm:$0xff] }
 0x8c2   : > { %v14429_v18 = vrot.slane %v14415_v47, %v23063_v23  ;;  %19611 = vmatprep.subr.mxu0 %v26582_v13  ;;  %v14434_v3 = vcombine.low %v14320_v46, %v25041_v49  ;;  %v14328_v7 = vrot.slane %v14321_v28, %v23063_v23  ;;  %v17951_v31 = vcombine.high %v25039_v25, %v25050_v35  ;;  %v20153_v47 = vld [vmem:[#allocation6 + $0x70] sm:$0xff] }
 0x8c3   : > { %19612 = vmatpush3.msra.mxu0 %v25154_v37  ;;  %v14448_v22 = vrot.slane %v14432_v50, %v23063_v23  ;;  %v14343_v26 = vrot.slane %v14336_v29, %v23063_v23  ;;  %v14358_v36 = vrot.slane %v14351_v14, %v23063_v23  ;;  %v14455_v11 = vrot.slane %v17950_v56, %v23063_v23  ;;  %v20158_v14 = vld [vmem:[#allocation6 + $0x60] sm:$0xff] }
 0x8c4   : > { %v14430_v5 = vcombine.low %v14422_v19, %v14429_v18  ;;  %v14462_v49 = vrot.slane %v14434_v3, %v23063_v23  ;;  %v14335_v10 = vrot.slane %v14328_v7, %v23063_v23  ;;  %19663 = vmatprep.subr.mxu0 %v26582_v13  ;;  %19627 = vmatpush3.msra.mxu1 %v20151_v32  ;;  %v20157_v18 = vld [vmem:[#allocation6 + $0xd0] sm:$0xff]  ;;  %v20160_v7 = vld [vmem:[#allocation6 + $0xc8] sm:$0xff] }
 0x8c5   : > { %v14463_v25 = vcombine.low %v14441_v41, %v14448_v22  ;;  %v14350_v35 = vrot.slane %v14343_v26, %v23063_v23  ;;  %v14365_v43 = vrot.slane %v14358_v36, %v23063_v23  ;;  %v14497_v1 = vrot.slane %v17951_v31, %v23063_v23  ;;  %19628 = vmatprep.subr.mxu1 %v26582_v13  ;;  %v20159_v41 = vld [vmem:[#allocation6 + $0x58] sm:$0xff]  ;;  %v20161_v31 = vld [vmem:[#allocation6 + $0xc0] sm:$0xff]  ;;  %v20164_v26 = vld [vmem:[#allocation6 + $0x48] sm:$0xff] }
 0x8c6   : > { %19614 = vmatmul.mubr.f32.vlgmr.msra.gmra.mxu0 %v14430_v5  ;;  %v14464_v61 = vcombine.low %v14455_v11, %v14462_v49  ;;  %v14480_v39 = vcombine.low %v13767_v42, %v14335_v10  ;;  %v20154_v42 = vld [vmem:[#allocation6 + $0xe0] sm:$0xff]  ;;  %v20162_v5 = vld [vmem:[#allocation6 + $0x50] sm:$0xff]  ;;  %v20163_v22 = vld [vmem:[#allocation6 + $0xb8] sm:$0xff]  ;;  %19654 = vmatprep.mubr.msk.f32.mxu1 %vm20312_vm8, %v26582_v13 }
 0x8c7   : > { %19616 = vmatprep.mubr.msk.f32.mxu0 %vm20312_vm8, %v26582_v13  ;;  %19664 = vmatpush3.msra.mxu0 %v20152_v33  ;;  %v14482_v2 = vcombine.low %v14350_v35, %v25062_v12  ;;  %v14483_v48 = vcombine.low %v13769_v30, %v14365_v43  ;;  %v14471_v44 = vrot.slane %v14463_v25, %v23063_v23  ;;  %v20156_v30 = vld [vmem:[#allocation6 + $0xd8] sm:$0xff]  ;;  %v20165_v36 = vld [vmem:[#allocation6 + $0xb0] sm:$0xff]  ;;  %v20166_v11 = vld [vmem:[#allocation6 + $0x40] sm:$0xff] }
 0x8c8   : > { %19665 = vmatprep.subr.mxu0 %v26582_v13  ;;  %v14478_v58 = vrot.slane %v14464_v61, %v23063_v23  ;;  %v14490_v56 = vrot.slane %v14480_v39, %v23063_v23  ;;  %19629 = vmatpush3.msra.mxu1 %v20154_v42  ;;  %v20167_v49 = vld [vmem:[#allocation6 + $0xa8] sm:$0xff]  ;;  %v20168_v10 = vld [vmem:[#allocation6 + $0x38] sm:$0xff]  ;;  %v20169_v25 = vld [vmem:[#allocation6 + $0xa0] sm:$0xff] }
 0x8c9   : > { %19666 = vmatpush3.msra.mxu0 %v20153_v47  ;;  %v14504_v19 = vrot.slane %v14482_v2, %v23063_v23  ;;  %v14511_v21 = vrot.slane %v14483_v48, %v23063_v23  ;;  %19630 = vmatprep.subr.mxu1 %v26582_v13  ;;  %v20170_v35 = vld [vmem:[#allocation6 + $0x30] sm:$0xff]  ;;  %v20171_v43 = vld [vmem:[#allocation6 + $0x98] sm:$0xff]  ;;  %v20172_v32 = vld [vmem:[#allocation6 + $0x28] sm:$0xff] }
 0x8ca   : > { %19667 = vmatprep.subr.mxu0 %v26582_v13  ;;  %v14479_v12 = vcombine.low %v14471_v44, %v14478_v58  ;;  %v14512_v46 = vcombine.low %v14490_v56, %v14497_v1  ;;  %19631 = vmatpush3.msra.mxu1 %v20156_v30  ;;  %v20173_v61 = vld [vmem:[#allocation6 + $0x90] sm:$0xff]  ;;  %v20174_v39 = vld [vmem:[#allocation6 + $0x20] sm:$0xff]  ;;  %v20175_v1 = vld [vmem:[#allocation6 + $0x88] sm:$0xff] }
 0x8cb   : > { %19668 = vmatpush3.msra.mxu0 %v20155_v0  ;;  %v14513_v28 = vcombine.low %v14504_v19, %v14511_v21  ;;  %19632 = vmatprep.subr.mxu1 %v26582_v13  ;;  %v20176_v33 = vld [vmem:[#allocation6 + $0x18] sm:$0xff]  ;;  %v20177_v2 = vld [vmem:[#allocation6 + $0x80] sm:$0xff]  ;;  %v20178_v48 = vld [vmem:[#allocation6 + $0x10] sm:$0xff] }
 0x8cc   : > { %19669 = vmatprep.subr.mxu0 %v26582_v13  ;;  %19617 = vmatmul.mubr.f32.gmra.mxu0 %v14479_v12  ;;  %v14520_v50 = vrot.slane %v14512_v46, %v23063_v23  ;;  %v20179_v44 = vld [vmem:[#allocation6 + $0x8] sm:$0xff]  ;;  %v20180_v58 = vld [vmem:[#allocation6] sm:$0xff] }
 0x8cd   : > { %19633 = vmatpush3.msra.mxu1 %v20157_v18  ;;  %19619 = vmatprep.mubr.msk.f32.mxu0 %vm20312_vm8, %v26582_v13  ;;  %v14527_v29 = vrot.slane %v14513_v28, %v23063_v23 }
 0x8ce   : > { %19670 = vmatpush3.msra.mxu0 %v20158_v14  ;;  %19634 = vmatprep.subr.mxu1 %v26582_v13 }
 0x8cf   : > { %19671 = vmatprep.subr.mxu0 %v26582_v13  ;;  %v14528_v3 = vcombine.low %v14520_v50, %v14527_v29  ;;  %19635 = vmatpush3.msra.mxu1 %v20160_v7 }
 0x8d0   : > { %19672 = vmatpush3.msra.mxu0 %v20159_v41  ;;  %19636 = vmatprep.subr.mxu1 %v26582_v13 }
 0x8d1   : > { %19673 = vmatprep.subr.mxu0 %v26582_v13  ;;  %19620 = vmatmul.mubr.f32.gmra.mxu0 %v14528_v3  ;;  %v25239_v3 = vld [vmem:[%s26338_s5] ss:$0 sm:$0xff] }
 0x8d2   : > { %19637 = vmatpush3.msra.mxu1 %v20161_v31  ;;  %19674 = vmatpush3.msra.mxu0 %v20162_v5  ;;  %26606 = vst [vmem:[#allocation27_spill] sm:$0xff] %v25239_v3 }
 0x8d3   : > { %19638 = vmatprep.subr.mxu1 %v26582_v13  ;;  %19675 = vmatprep.subr.mxu0 %v26582_v13 }
 0x8d4   : > { %19639 = vmatpush3.msra.mxu1 %v20163_v22  ;;  %19676 = vmatpush3.msra.mxu0 %v20164_v26 }
 0x8d5   : > { %19640 = vmatprep.subr.mxu1 %v26582_v13  ;;  %19677 = vmatprep.subr.mxu0 %v26582_v13 }
 0x8d6   : > { %19641 = vmatpush3.msra.mxu1 %v20165_v36  ;;  %19678 = vmatpush3.msra.mxu0 %v20166_v11 }
 0x8d7   : > { %19642 = vmatprep.subr.mxu1 %v26582_v13  ;;  %19679 = vmatprep.subr.mxu0 %v26582_v13 }
 0x8d8   : > { %19643 = vmatpush3.msra.mxu1 %v20167_v49  ;;  %19680 = vmatpush3.msra.mxu0 %v20168_v10 }
 0x8d9   : > { %19644 = vmatprep.subr.mxu1 %v26582_v13  ;;  %19681 = vmatprep.subr.mxu0 %v26582_v13 }
 0x8da   : > { %19645 = vmatpush3.msra.mxu1 %v20169_v25  ;;  %19682 = vmatpush3.msra.mxu0 %v20170_v35 }
 0x8db   : > { %19646 = vmatprep.subr.mxu1 %v26582_v13  ;;  %19683 = vmatprep.subr.mxu0 %v26582_v13 }
 0x8dc   : > { %19647 = vmatpush3.msra.mxu1 %v20171_v43  ;;  %19684 = vmatpush3.msra.mxu0 %v20172_v32 }
 0x8dd   : > { %19648 = vmatprep.subr.mxu1 %v26582_v13  ;;  %19685 = vmatprep.subr.mxu0 %v26582_v13 }
 0x8de   : > { %19649 = vmatpush3.msra.mxu1 %v20173_v61  ;;  %19686 = vmatpush3.msra.mxu0 %v20174_v39 }
 0x8df   : > { %19650 = vmatprep.subr.mxu1 %v26582_v13  ;;  %19687 = vmatprep.subr.mxu0 %v26582_v13 }
 0x8e0   : > { %19651 = vmatpush3.msra.mxu1 %v20175_v1  ;;  %19688 = vmatpush3.msra.mxu0 %v20176_v33 }
 0x8e1   : > { %19652 = vmatprep.subr.mxu1 %v26582_v13  ;;  %19689 = vmatprep.subr.mxu0 %v26582_v13 }
 0x8e2   : > { %19653 = vmatpush3.msra.mxu1 %v20177_v2  ;;  %19690 = vmatpush3.msra.mxu0 %v20178_v48 }
 0x8e3   : > { %19691 = vmatprep.subr.mxu0 %v26582_v13  ;;  %19695 = vmatprep.mubr.msk.f32.mxu0 %vm20312_vm8, %v26582_v13 }
 0x8e4   : > { %19692 = vmatpush3.msra.mxu0 %v20179_v44  ;;  %19704 = vmatprep.subr.mxu1 %v26582_v13 }
 0x8e5   : > { %19693 = vmatprep.subr.mxu0 %v26582_v13 }
 0x8e6   : > { %19694 = vmatpush3.msra.mxu0 %v20180_v58 }
 0x8e7   : > { %19745 = vmatprep.subr.mxu0 %v26582_v13 }
 0x960   : > { %v14002_v56 = vpop.f32.mrf.mxu0 }
 0x961   : > { %v14232_v47 = vpop.f32.mrf.mxu1 }
 0x962   : > { %v19533_v42 = vpop.f32.mrf.mxu0  ;;  %v14233_v29 = vadd.f32 %v14232_v47, %v14002_v56 }
 0x963   : > { %v19574_v19 = vpop.f32.mrf.mxu1 }
 0x973   : > { %v14237_v21 = vpop.f32.mrf.mxu1 }
 0x975   : > { %v19577_v46 = vpop.f32.mrf.mxu1 }
 0x976   : > { %v14007_v12 = vpop.f32.mrf.mxu0 }
 0x977   : > { %v14238_v26 = vadd.f32 %v14237_v21, %v14007_v12 }
 0x978   : > { %v19536_v0 = vpop.f32.mrf.mxu0 }
 0x97e   : > { %v25232_v30 = vpop.f32.mrf.mxu1 }
 0x97f   : > { %v25234_v28 = vpop.f32.mrf.mxu0 }
 0x980   : > { %v19580_v18 = vpop.f32.mrf.mxu1 }
 0x981   : > { %v19539_v50 = vpop.f32.mrf.mxu0 }
 0x986   : > { %v14598_v14 = vpop.f32.mrf.mxu0 }
 0x987   : > { %v14612_v41 = vadd.f32 %v14598_v14, %v14233_v29 }
 0x988   : > { %v19615_v7 = vpop.f32.mrf.mxu0 }
 0x989   : > { %v14622_v31 = vadd.f32 %v25239_v3, %v14612_v41 }
 0x98b   : > { %v14628_v5 = vcombine.high %v14622_v31, %v14622_v31  ;;  %v14635_v22 = vrot.slane %v14622_v31, %v23063_v23 }
 0x98c   : > { %v14603_v10 = vpop.f32.mrf.mxu0 }
 0x98d   : > { %v14642_v36 = vrot.slane %v14628_v5, %v23063_v23  ;;  %v14643_v11 = vcombine.high %v14635_v22, %v14635_v22  ;;  %v14651_v49 = vrot.slane %v14635_v22, %v23063_v23  ;;  %v14613_v25 = vadd.f32 %v14603_v10, %v14238_v26 }
 0x98e   : > { %v19618_v39 = vpop.f32.mrf.mxu0 }
 0x98f   : > { %v14644_v35 = vcombine.high %v14642_v36, %v14642_v36  ;;  %v14658_v43 = vrot.slane %v14642_v36, %v23063_v23  ;;  %v14665_v32 = vrot.slane %v14643_v11, %v23063_v23  ;;  %v14673_v61 = vcombine.high %v14651_v49, %v14651_v49 }
 0x990   : > { %v14799_v1 = vmax.f32 %v14651_v49, 0.0  ;;  %v14623_v33 = vadd.f32 %v25239_v3, %v14613_v25 }
 0x991   : > { %v14672_v2 = vrot.slane %v14644_v35, %v23063_v23  ;;  %v14674_v48 = vcombine.high %v14658_v43, %v14658_v43  ;;  %v14675_v44 = vcombine.high %v14665_v32, %v14665_v32  ;;  %v14800_v58 = vmax.f32 %v14665_v32, 0.0  ;;  %v25249_v21 = vpop.f32.mrf.mxu0 }
 0x992   : > { %v14801_v56 = vmax.f32 %v14673_v61, 0.0  ;;  %v14803_v47 = vmax.f32 %v14658_v43, 0.0  ;;  %v14847_v42 = vcombine.low %v14799_v1, %v14799_v1  ;;  %v14677_v19 = vcombine.high %v14623_v33, %v14623_v33 }
 0x993   : > { %v14676_v12 = vcombine.high %v14672_v2, %v14672_v2  ;;  %v14802_v46 = vmax.f32 %v14675_v44, 0.0  ;;  %v14804_v0 = vmax.f32 %v14672_v2, 0.0  ;;  %v14805_v18 = vmax.f32 %v14674_v48, 0.0  ;;  %v19621_v7 = vpop.f32.mrf.mxu0 }
 0x994   : > { %v14848_v50 = vcombine.low %v14800_v58, %v14801_v56  ;;  %v14855_v29 = vrot.slane %v14847_v42, %v23063_v23  ;;  %v14684_v14 = vrot.slane %v14623_v33, %v23063_v23  ;;  %v14691_v41 = vrot.slane %v14677_v19, %v23063_v23 }
 0x995   : > { %v14871_v31 = vcombine.low %v14802_v46, %v14802_v46  ;;  %v14872_v5 = vcombine.low %v14803_v47, %v14804_v0  ;;  %v14895_v22 = vcombine.low %v14805_v18, %v14805_v18  ;;  %v14806_v26 = vmax.f32 %v14676_v12, 0.0 }
 0x996   : > { %v14862_v36 = vrot.slane %v14848_v50, %v23063_v23  ;;  %v14692_v11 = vcombine.high %v14684_v14, %v14684_v14  ;;  %v14693_v49 = vcombine.high %v14691_v41, %v14691_v41  ;;  %v14700_v10 = vrot.slane %v14684_v14, %v23063_v23 }
 0x997   : > { %v14879_v25 = vrot.slane %v14871_v31, %v23063_v23  ;;  %v14886_v35 = vrot.slane %v14872_v5, %v23063_v23  ;;  %v14903_v43 = vrot.slane %v14895_v22, %v23063_v23  ;;  %v14707_v32 = vrot.slane %v14691_v41, %v23063_v23 }
 0x998   : > { %v14863_v61 = vcombine.low %v14855_v29, %v14862_v36  ;;  %v14714_v39 = vrot.slane %v14692_v11, %v23063_v23  ;;  %v14721_v1 = vrot.slane %v14693_v49, %v23063_v23  ;;  %v14722_v33 = vcombine.high %v14700_v10, %v14700_v10 }
 0x999   : > { %v14887_v2 = vcombine.low %v14879_v25, %v14886_v35  ;;  %v14723_v48 = vcombine.high %v14707_v32, %v14707_v32  ;;  %v14807_v44 = vmax.f32 %v14700_v10, 0.0  ;;  %v14811_v58 = vmax.f32 %v14707_v32, 0.0 }
 0x99a   : > { %v14870_v56 = vrot.slane %v14863_v61, %v23063_v23  ;;  %v14724_v47 = vcombine.high %v14714_v39, %v14714_v39  ;;  %v14725_v42 = vcombine.high %v14721_v1, %v14721_v1  ;;  %v14808_v19 = vmax.f32 %v14714_v39, 0.0 }
 0x99b   : > { %v14894_v12 = vrot.slane %v14887_v2, %v23063_v23  ;;  %v14809_v46 = vmax.f32 %v14722_v33, 0.0  ;;  %v14812_v0 = vmax.f32 %v14721_v1, 0.0  ;;  %v14813_v18 = vmax.f32 %v14723_v48, 0.0 }
 0x99c   : > { %v15047_v50 = vsel %vm899_vm0, 0.0, %v14870_v56  ;;  %v14810_v29 = vmax.f32 %v14724_v47, 0.0  ;;  %v14814_v14 = vmax.f32 %v14725_v42, 0.0  ;;  %v14896_v41 = vcombine.low %v14806_v26, %v14807_v44 }
 0x99d   : > { %v15048_v7 = vsel %vm899_vm0, 0.0, %v14894_v12  ;;  %v15055_v31 = vsel %vm13545_vm9, %v15047_v50, 0.0  ;;  %v14919_v5 = vcombine.low %v14808_v19, %v14808_v19  ;;  %v14943_v22 = vcombine.low %v14811_v58, %v14811_v58 }
 0x99e   : > { %v15056_v36 = vsel %vm13545_vm9, %v15048_v7, 0.0  ;;  %v15077_v11 = vrot.slane %v15055_v31, %v23063_v23  ;;  %v15723_v49 = vcombine.high %v15055_v31, %v15055_v31  ;;  %v14910_v10 = vrot.slane %v14896_v41, %v23063_v23 }
 0x99f   : > { %v15100_v25 = vrot.slane %v15056_v36, %v23063_v23  ;;  %v15738_v35 = vcombine.high %v15056_v36, %v15056_v36  ;;  %v14920_v32 = vcombine.low %v14809_v46, %v14810_v29  ;;  %v14927_v61 = vrot.slane %v14919_v5, %v23063_v23 }
 0x9a0   : > { %v15078_v26 = vcombine.high %v15077_v11, %v15077_v11  ;;  %v25273_v39 = vrot.slane %v15077_v11, %v23063_v23  ;;  %v15730_v1 = vrot.slane %v15723_v49, %v23063_v23  ;;  %v14911_v33 = vcombine.low %v14903_v43, %v14910_v10 }
 0x9a1   : > { %v15101_v2 = vcombine.high %v15100_v25, %v15100_v25  ;;  %v25277_v48 = vrot.slane %v15100_v25, %v23063_v23  ;;  %v25280_v44 = vrot.slane %v15738_v35, %v23063_v23  ;;  %v14934_v58 = vrot.slane %v14920_v32, %v23063_v23 }
 0x9a2   : > { %v14243_v56 = vadd.f32 %v25232_v30, %v25234_v28  ;;  %v25286_v47 = vrot.slane %v15078_v26, %v23063_v23  ;;  %v25290_v42 = vcombine.high %v25273_v39, %v25273_v39  ;;  %v14918_v43 = vrot.slane %v14911_v33, %v23063_v23 }
 0x9a3   : > { %v25294_v19 = vrot.slane %v15101_v2, %v23063_v23  ;;  %v25298_v12 = vcombine.high %v25277_v48, %v25277_v48  ;;  %v15737_v46 = vrot.slane %v15730_v1, %v23063_v23  ;;  %v14935_v50 = vcombine.low %v14927_v61, %v14934_v58 }
 0x9a4   : > { %v14944_v28 = vcombine.low %v14812_v0, %v14813_v18  ;;  %v14967_v29 = vcombine.low %v14814_v14, %v14814_v14  ;;  %v15049_v41 = vsel %vm899_vm0, 0.0, %v14918_v43  ;;  %v14951_v31 = vrot.slane %v14943_v22, %v23063_v23 }
 0x9a5   : > { %v14942_v7 = vrot.slane %v14935_v50, %v23063_v23  ;;  %v25307_v5 = vsel %vm13545_vm9, %v15049_v41, 0.0  ;;  %v14614_v36 = vadd.f32 %v25249_v21, %v14243_v56  ;;  %v25311_v11 = vcombine.low %v15737_v46, %v25298_v12 }
 0x9a6   : > { %v14958_v49 = vrot.slane %v14944_v28, %v23063_v23  ;;  %v14975_v10 = vrot.slane %v14967_v29, %v23063_v23  ;;  %v15123_v0 = vrot.slane %v25307_v5, %v23063_v23  ;;  %v15255_v21 = vcombine.high %v25286_v47, %v25286_v47 }
 0x9a7   : > { %v15050_v18 = vsel %vm899_vm0, 0.0, %v14942_v7  ;;  %v14624_v22 = vadd.f32 %v25239_v3, %v14614_v36  ;;  %v15263_v2 = vcombine.low %v25286_v47, %v25290_v42  ;;  %v17953_v36 = vcombine.high %v25277_v48, %v25294_v19 }
 0x9a8   : > { %v14959_v25 = vcombine.low %v14951_v31, %v14958_v49  ;;  %v25324_v35 = vsel %vm13545_vm9, %v15050_v18, 0.0  ;;  %v15124_v32 = vcombine.high %v15123_v0, %v15123_v0  ;;  %v25327_v61 = vrot.slane %v15123_v0, %v23063_v23 }
 0x9a9   : > { %v25331_v26 = vrot.slane %v25324_v35, %v23063_v23  ;;  %v14726_v1 = vcombine.high %v14624_v22, %v14624_v22  ;;  %v14733_v33 = vrot.slane %v14624_v22, %v23063_v23  ;;  %v15264_v41 = vcombine.low %v15255_v21, %v25294_v19 }
 0x9aa   : > { %v14966_v58 = vrot.slane %v14959_v25, %v23063_v23  ;;  %v25338_v56 = vrot.slane %v15124_v32, %v23063_v23  ;;  %v25342_v43 = vcombine.high %v25327_v61, %v25327_v61  ;;  %v15287_v32 = vrot.slane %v17953_v36, %v23063_v23 }
 0x9ab   : > { %v14740_v50 = vrot.slane %v14726_v1, %v23063_v23  ;;  %v14741_v28 = vcombine.high %v14733_v33, %v14733_v33  ;;  %v14749_v29 = vrot.slane %v14733_v33, %v23063_v23  ;;  %v15273_v33 = vrot.slane %v15263_v2, %v23063_v23 }
 0x9ac   : > { %v15051_v7 = vsel %vm899_vm0, 0.0, %v14966_v58  ;;  %v15266_v49 = vcombine.low %v25338_v56, %v25342_v43 }
 0x9ad   : > { %v25357_v0 = vsel %vm13545_vm9, %v15051_v7, 0.0  ;;  %v14742_v18 = vcombine.high %v14740_v50, %v14740_v50  ;;  %v14756_v22 = vrot.slane %v14740_v50, %v23063_v23  ;;  %v14763_v25 = vrot.slane %v14741_v28, %v23063_v23 }
 0x9ae   : > { %v25363_v21 = vrot.slane %v25357_v0, %v23063_v23  ;;  %v14771_v1 = vcombine.high %v14749_v29, %v14749_v29  ;;  %v14815_v30 = vmax.f32 %v14749_v29, 0.0  ;;  %v15280_v28 = vrot.slane %v15264_v41, %v23063_v23 }
 0x9af   : > { %v14770_v58 = vrot.slane %v14742_v18, %v23063_v23  ;;  %v14772_v46 = vcombine.high %v14756_v22, %v14756_v22  ;;  %v14773_v7 = vcombine.high %v14763_v25, %v14763_v25  ;;  %v14816_v14 = vmax.f32 %v14763_v25, 0.0 }
 0x9b0   : > { %v14817_v31 = vmax.f32 %v14771_v1, 0.0  ;;  %v14819_v50 = vmax.f32 %v14756_v22, 0.0  ;;  %v15294_v2 = vrot.slane %v15266_v49, %v23063_v23  ;;  %v15295_v60 = vcombine.low %v15273_v33, %v15280_v28 }
 0x9b1   : > { %v14774_v55 = vcombine.high %v14770_v58, %v14770_v58  ;;  %v14818_v15 = vmax.f32 %v14773_v7, 0.0  ;;  %v14820_v24 = vmax.f32 %v14770_v58, 0.0  ;;  %v14821_v8 = vmax.f32 %v14772_v46, 0.0 }
 0x9b2   : > { %v14968_v3 = vcombine.low %v14815_v30, %v14816_v14  ;;  %v14991_v38 = vcombine.low %v14817_v31, %v14817_v31  ;;  %v15296_v25 = vcombine.low %v15287_v32, %v15294_v2  ;;  %v15493_v41 = vcombine.low %v25273_v39, %v25286_v47 }
 0x9b3   : > { %v14822_v51 = vmax.f32 %v14774_v55, 0.0  ;;  %v14992_v18 = vcombine.low %v14818_v15, %v14819_v50  ;;  %v15015_v20 = vcombine.low %v14820_v24, %v14820_v24  ;;  %v15303_v31 = vrot.slane %v15295_v60, %v23063_v23 }
 0x9b4   : > { %v14982_v29 = vrot.slane %v14968_v3, %v23063_v23  ;;  %v14999_v22 = vrot.slane %v14991_v38, %v23063_v23  ;;  %v15310_v55 = vrot.slane %v15296_v25, %v23063_v23  ;;  %v15494_v24 = vcombine.low %v25290_v42, %v25277_v48 }
 0x9b5   : > { %v15006_v46 = vrot.slane %v14992_v18, %v23063_v23  ;;  %v15016_v30 = vcombine.low %v14821_v8, %v14822_v51  ;;  %v15023_v14 = vrot.slane %v15015_v20, %v23063_v23  ;;  %v15495_v38 = vcombine.low %v25294_v19, %v25298_v12 }
 0x9b6   : > { %v14983_v36 = vcombine.low %v14975_v10, %v14982_v29  ;;  %v15496_v49 = vcombine.low %v25327_v61, %v25338_v56  ;;  %v15503_v51 = vrot.slane %v15493_v41, %v23063_v23  ;;  %v15170_v60 = vcombine.high %v25363_v21, %v25363_v21 }
 0x9b7   : > { %v15007_v15 = vcombine.low %v14999_v22, %v15006_v46  ;;  %v15030_v3 = vrot.slane %v15016_v30, %v23063_v23  ;;  %v15311_v8 = vcombine.low %v15303_v31, %v15310_v55  ;;  %v15510_v10 = vrot.slane %v15494_v24, %v23063_v23 }
 0x9b8   : > { %v14990_v20 = vrot.slane %v14983_v36, %v23063_v23  ;;  %v15517_v12 = vrot.slane %v15495_v38, %v23063_v23  ;;  %v15524_v32 = vrot.slane %v15496_v49, %v23063_v23  ;;  %v15154_v58 = vrot.slane %v25331_v26, %v23063_v23 }
 0x9b9   : > { %v15014_v48 = vrot.slane %v15007_v15, %v23063_v23  ;;  %v15031_v42 = vcombine.low %v15023_v14, %v15030_v3  ;;  %19655 = vmatmul.mubr.f32.vlgmr.msra.gmra.mxu1 %v15311_v8  ;;  %v15525_v33 = vcombine.low %v15503_v51, %v15510_v10  ;;  %v25400_v7 = vrot.slane %v25363_v21, %v23063_v23 }
 0x9ba   : > { %v15052_v1 = vsel %vm899_vm0, 0.0, %v14990_v20  ;;  %v15526_v18 = vcombine.low %v15517_v12, %v15524_v32  ;;  %19705 = vmatpush3.msra.mxu1 %v24921_v45  ;;  %19657 = vmatprep.mubr.msk.f32.mxu1 %vm20312_vm8, %v26582_v13  ;;  %v26607_v25 = vcombine.high %v25331_v26, %v25331_v26  ;;  %v25435_v26 = vrot.slane %v15170_v60, %v23063_v23 }
 0x9bb   : > { %v15038_v50 = vrot.slane %v15031_v42, %v23063_v23  ;;  %v15053_v28 = vsel %vm899_vm0, 0.0, %v15014_v48  ;;  %v25405_v2 = vsel %vm13545_vm9, %v15052_v1, 0.0  ;;  %19706 = vmatprep.subr.mxu1 %v26582_v13  ;;  %v15533_v30 = vrot.slane %v15525_v33, %v23063_v23 }
 0x9bc   : > { %v25411_v29 = vsel %vm13545_vm9, %v15053_v28, 0.0  ;;  %v15192_v21 = vrot.slane %v25405_v2, %v23063_v23  ;;  %v15798_v22 = vcombine.high %v25405_v2, %v25405_v2  ;;  %v25422_v41 = vrot.slane %v26607_v25, %v23063_v23  ;;  %19707 = vmatpush3.msra.mxu1 %v24932_v63 }
 0x9bd   : > { %v15054_v45 = vsel %vm899_vm0, 0.0, %v15038_v50  ;;  %v15215_v46 = vrot.slane %v25411_v29, %v23063_v23  ;;  %v15540_v14 = vrot.slane %v15526_v18, %v23063_v23  ;;  %19708 = vmatprep.subr.mxu1 %v26582_v13  ;;  %v15185_v55 = vcombine.high %v25400_v7, %v25400_v7 }
 0x9be   : > { %v25431_v31 = vsel %vm13545_vm9, %v15054_v45, 0.0  ;;  %v15193_v36 = vcombine.high %v15192_v21, %v15192_v21  ;;  %v15257_v63 = vcombine.high %v25338_v56, %v25338_v56  ;;  %19709 = vmatpush3.msra.mxu1 %v24946_v53  ;;  %v15259_v49 = vcombine.high %v25435_v26, %v25435_v26 }
 0x9bf   : > { %v15216_v24 = vcombine.high %v15215_v46, %v15215_v46  ;;  %v25440_v38 = vrot.slane %v15215_v46, %v23063_v23  ;;  %v15541_v15 = vcombine.low %v15533_v30, %v15540_v14  ;;  %v17954_v51 = vcombine.high %v15154_v58, %v25422_v41  ;;  %19710 = vmatprep.subr.mxu1 %v26582_v13 }
 0x9c0   : > { %v25446_v3 = vrot.slane %v15193_v36, %v23063_v23  ;;  %v15314_v60 = vcombine.low %v25435_v26, %v15185_v55  ;;  %v15312_v20 = vcombine.low %v15257_v63, %v25422_v41  ;;  %v25454_v8 = vcombine.high %v15154_v58, %v15154_v58  ;;  %19711 = vmatpush3.msra.mxu1 %v24967_v54 }
 0x9c1   : > { %19696 = vmatmul.mubr.f32.vlgmr.msra.gmra.mxu0 %v15541_v15  ;;  %v15200_v10 = vrot.slane %v15192_v21, %v23063_v23  ;;  %v15542_v53 = vcombine.low %v25342_v43, %v15154_v58  ;;  %v15329_v42 = vrot.slane %v17954_v51, %v23063_v23  ;;  %v15544_v32 = vcombine.low %v25400_v7, %v25435_v26 }
 0x9c2   : > { %19698 = vmatprep.mubr.msk.f32.mxu0 %vm20312_vm8, %v26582_v13  ;;  %v15315_v48 = vcombine.low %v15259_v49, %v25446_v3  ;;  %v15336_v12 = vrot.slane %v15314_v60, %v23063_v23  ;;  %v15322_v1 = vrot.slane %v15312_v20, %v23063_v23  ;;  %v15543_v33 = vcombine.low %v25422_v41, %v25454_v8 }
 0x9c3   : > { %v15545_v50 = vcombine.low %v15185_v55, %v15200_v10  ;;  %v15552_v43 = vrot.slane %v15542_v53, %v23063_v23  ;;  %v15566_v28 = vrot.slane %v15544_v32, %v23063_v23  ;;  %19712 = vmatprep.subr.mxu1 %v26582_v13  ;;  %v25474_v18 = vrot.slane %v15216_v24, %v23063_v23 }
 0x9c4   : > { %v15343_v58 = vrot.slane %v15315_v48, %v23063_v23  ;;  %v15231_v21 = vcombine.high %v25440_v38, %v25440_v38  ;;  %v15344_v25 = vcombine.low %v15322_v1, %v15329_v42  ;;  %v15559_v45 = vrot.slane %v15543_v33, %v23063_v23  ;;  %19713 = vmatpush3.msra.mxu1 %v24987_v27 }
 0x9c5   : > { %v15573_v46 = vrot.slane %v15545_v50, %v23063_v23  ;;  %v15238_v54 = vrot.slane %v25431_v31, %v23063_v23  ;;  %v15813_v30 = vcombine.high %v25411_v29, %v25411_v29  ;;  %v17955_v36 = vcombine.high %v15200_v10, %v25446_v3  ;;  %19714 = vmatprep.subr.mxu1 %v26582_v13 }
 0x9c6   : > { %v15345_v14 = vcombine.low %v15336_v12, %v15343_v58  ;;  %v15362_v55 = vcombine.low %v25474_v18, %v15231_v21  ;;  %v15574_v24 = vcombine.low %v15552_v43, %v15559_v45  ;;  %v15261_v49 = vcombine.high %v25474_v18, %v25474_v18  ;;  %19715 = vmatpush3.msra.mxu1 %v25008_v4 }
 0x9c7   : > { %v15575_v15 = vcombine.low %v15566_v28, %v15573_v46  ;;  %v15239_v63 = vcombine.high %v15238_v54, %v15238_v54  ;;  %v15352_v27 = vrot.slane %v15344_v25, %v23063_v23  ;;  %v15246_v60 = vrot.slane %v15238_v54, %v23063_v23  ;;  %19716 = vmatprep.subr.mxu1 %v26582_v13 }
 0x9c8   : > { %v15359_v51 = vrot.slane %v15345_v14, %v23063_v23  ;;  %v15378_v20 = vrot.slane %v15362_v55, %v23063_v23  ;;  %v15582_v53 = vrot.slane %v15574_v24, %v23063_v23  ;;  %v25501_v12 = vcombine.high %v15200_v10, %v15200_v10  ;;  %19717 = vmatpush3.msra.mxu1 %v25020_v6 }
 0x9c9   : > { %v15589_v48 = vrot.slane %v15575_v15, %v23063_v23  ;;  %v25499_v42 = vrot.slane %v15239_v63, %v23063_v23  ;;  %v15371_v32 = vrot.slane %v17955_v36, %v23063_v23  ;;  %v25505_v1 = vcombine.high %v15246_v60, %v15246_v60  ;;  %19718 = vmatprep.subr.mxu1 %v26582_v13 }
 0x9ca   : > { %v15360_v4 = vcombine.low %v15352_v27, %v15359_v51  ;;  %v15592_v33 = vcombine.low %v25440_v38, %v25474_v18  ;;  %v15591_v10 = vcombine.low %v25446_v3, %v25501_v12  ;;  %19719 = vmatpush3.msra.mxu1 %v25031_v17  ;;  %v15593_v28 = vcombine.low %v15231_v21, %v15246_v60 }
 0x9cb   : > { %v15590_v50 = vcombine.low %v15582_v53, %v15589_v48  ;;  %v15363_v43 = vcombine.low %v15261_v49, %v25499_v42  ;;  %v17956_v58 = vcombine.high %v15246_v60, %v25499_v42  ;;  %v15393_v6 = vcombine.low %v15371_v32, %v15378_v20  ;;  %19720 = vmatprep.subr.mxu1 %v26582_v13 }
 0x9cc   : > { %19658 = vmatmul.mubr.f32.gmra.mxu1 %v15360_v4  ;;  %v15594_v25 = vcombine.low %v25499_v42, %v25505_v1  ;;  %v15608_v45 = vrot.slane %v15592_v33, %v23063_v23  ;;  %v15601_v14 = vrot.slane %v15591_v10, %v23063_v23  ;;  %v15615_v17 = vrot.slane %v15593_v28, %v23063_v23 }
 0x9cd   : > { %19699 = vmatmul.mubr.f32.gmra.mxu0 %v15590_v50  ;;  %19660 = vmatprep.mubr.msk.f32.mxu1 %vm20312_vm8, %v26582_v13  ;;  %v15385_v46 = vrot.slane %v15363_v43, %v23063_v23  ;;  %v15392_v54 = vrot.slane %v17956_v58, %v23063_v23  ;;  %v15256_v36 = vcombine.high %v25294_v19, %v25294_v19 }
 0x9ce   : > { %19701 = vmatprep.mubr.msk.f32.mxu0 %vm20312_vm8, %v26582_v13  ;;  %v15622_v21 = vrot.slane %v15594_v25, %v23063_v23  ;;  %v15623_v24 = vcombine.low %v15601_v14, %v15608_v45  ;;  %19721 = vmatpush3.msra.mxu1 %v25046_v59  ;;  %v17957_v15 = vcombine.high %v25273_v39, %v25286_v47 }
 0x9cf   : > { %v15394_v55 = vcombine.low %v15385_v46, %v15392_v54  ;;  %v17958_v63 = vcombine.high %v25327_v61, %v25338_v56  ;;  %v15401_v49 = vrot.slane %v15393_v6, %v23063_v23  ;;  %19722 = vmatprep.subr.mxu1 %v26582_v13  ;;  %v26608_v51 = vrot.slane %v25280_v44, %v23063_v23 }
 0x9d0   : > { %v15624_v27 = vcombine.low %v15615_v17, %v15622_v21  ;;  %v15860_v19 = vrot.slane %v25311_v11, %v23063_v23  ;;  %v15631_v20 = vrot.slane %v15623_v24, %v23063_v23  ;;  %19723 = vmatpush3.msra.mxu1 %v25074_v52  ;;  %v15258_v47 = vcombine.high %v25422_v41, %v25422_v41 }
 0x9d1   : > { %v15845_v60 = vcombine.low %v15256_v36, %v26608_v51  ;;  %v15408_v59 = vrot.slane %v15394_v55, %v23063_v23  ;;  %v15874_v39 = vrot.slane %v17958_v63, %v23063_v23  ;;  %19724 = vmatprep.subr.mxu1 %v26582_v13  ;;  %v26609_v11 = vcombine.high %v25307_v5, %v25307_v5  ;;  %v25628_v51 = vld [vmem:[#allocation6 + $0xf8] sm:$0xff] }
 0x9d2   : > { %v15638_v61 = vrot.slane %v15624_v27, %v23063_v23  ;;  %v26610_v52 = vcombine.high %v25324_v35, %v25324_v35  ;;  %19725 = vmatpush3.msra.mxu1 %v25085_v40  ;;  %v15853_v41 = vrot.slane %v17957_v15, %v23063_v23  ;;  %v26611_v4 = vcombine.high %v25357_v0, %v25357_v0 }
 0x9d3   : > { %v15867_v44 = vrot.slane %v15845_v60, %v23063_v23  ;;  %v15760_v56 = vrot.slane %v26609_v11, %v23063_v23  ;;  %v15409_v48 = vcombine.low %v15401_v49, %v15408_v59  ;;  %v17959_v33 = vcombine.high %v25400_v7, %v25435_v26  ;;  %19726 = vmatprep.subr.mxu1 %v26582_v13  ;;  %v25630_v60 = vld [vmem:[#allocation6 + $0x78] sm:$0xff]  ;;  %v25636_v59 = vld [vmem:[#allocation6 + $0x70] sm:$0xff] }
 0x9d4   : > { %v15775_v53 = vrot.slane %v26610_v52, %v23063_v23  ;;  %v15790_v32 = vrot.slane %v26611_v4, %v23063_v23  ;;  %v15639_v5 = vcombine.low %v15631_v20, %v15638_v61  ;;  %v15875_v40 = vcombine.low %v15853_v41, %v15860_v19  ;;  %19727 = vmatpush3.msra.mxu1 %v25096_v57  ;;  %v25632_v19 = vld [vmem:[#allocation6 + $0xf0] sm:$0xff]  ;;  %v25640_v20 = vld [vmem:[#allocation6 + $0xe8] sm:$0xff]  ;;  %v25650_v61 = vld [vmem:[#allocation6 + $0x60] sm:$0xff] }
 0x9d5   : > { %v15876_v50 = vcombine.low %v15867_v44, %v15874_v39  ;;  %v15767_v35 = vrot.slane %v15760_v56, %v23063_v23  ;;  %19661 = vmatmul.mubr.f32.gmra.mxu1 %v15409_v48  ;;  %v15916_v7 = vrot.slane %v17959_v33, %v23063_v23  ;;  %19728 = vmatprep.subr.mxu1 %v26582_v13  ;;  %v25642_v39 = vld [vmem:[#allocation6 + $0x68] sm:$0xff]  ;;  %v25656_v44 = vld [vmem:[#allocation6 + $0xd8] sm:$0xff]  ;;  %v25664_v56 = vld [vmem:[#allocation6 + $0xd0] sm:$0xff] }
 0x9d6   : > { %v15782_v43 = vrot.slane %v15775_v53, %v23063_v23  ;;  %v15797_v58 = vrot.slane %v15790_v32, %v23063_v23  ;;  %19702 = vmatmul.mubr.f32.gmra.mxu0 %v15639_v5  ;;  %19736 = vmatprep.mubr.msk.f32.mxu1 %vm20312_vm8, %v26582_v13  ;;  %v15260_v6 = vcombine.high %v25446_v3, %v25446_v3  ;;  %v25658_v11 = vld [vmem:[#allocation6 + $0x58] sm:$0xff]  ;;  %v25666_v52 = vld [vmem:[#allocation6 + $0x50] sm:$0xff]  ;;  %v25672_v53 = vld [vmem:[#allocation6 + $0xc8] sm:$0xff] }
 0x9d7   : > { %v15892_v0 = vcombine.low %v15767_v35, %v25454_v8  ;;  %v15805_v57 = vrot.slane %v15798_v22, %v23063_v23  ;;  %19729 = vmatpush3.msra.mxu1 %v25112_v9  ;;  %v15890_v8 = vrot.slane %v15876_v50, %v23063_v23  ;;  %v15828_v9 = vcombine.high %v25431_v31, %v25431_v31  ;;  %v25674_v48 = vld [vmem:[#allocation6 + $0x48] sm:$0xff]  ;;  %v25680_v41 = vld [vmem:[#allocation6 + $0xc0] sm:$0xff]  ;;  %v25688_v32 = vld [vmem:[#allocation6 + $0xb8] sm:$0xff] }
 0x9d8   : > { %v15893_v10 = vcombine.low %v15258_v47, %v15782_v43  ;;  %v15895_v26 = vcombine.low %v15797_v58, %v25501_v12  ;;  %v15820_v12 = vrot.slane %v15813_v30, %v23063_v23  ;;  %19730 = vmatprep.subr.mxu1 %v26582_v13  ;;  %v17960_v22 = vcombine.high %v25440_v38, %v25474_v18  ;;  %v25648_v47 = vld [vmem:[#allocation6 + $0xe0] sm:$0xff]  ;;  %v25690_v33 = vld [vmem:[#allocation6 + $0x38] sm:$0xff]  ;;  %v25696_v5 = vld [vmem:[#allocation6 + $0xb0] sm:$0xff] }
 0x9d9   : > { %v15902_v28 = vrot.slane %v15892_v0, %v23063_v23  ;;  %v15812_v2 = vrot.slane %v15805_v57, %v23063_v23  ;;  %19731 = vmatpush3.msra.mxu1 %v25130_v16  ;;  %v15883_v45 = vrot.slane %v15875_v40, %v23063_v23  ;;  %v15262_v29 = vcombine.high %v25499_v42, %v25499_v42  ;;  %v25682_v4 = vld [vmem:[#allocation6 + $0x40] sm:$0xff]  ;;  %v25698_v50 = vld [vmem:[#allocation6 + $0x30] sm:$0xff]  ;;  %v25704_v35 = vld [vmem:[#allocation6 + $0xa8] sm:$0xff] }
 0x9da   : > { %v15909_v25 = vrot.slane %v15893_v10, %v23063_v23  ;;  %v15923_v3 = vrot.slane %v15895_v26, %v23063_v23  ;;  %19777 = vmatprep.mubr.msk.f32.mxu0 %vm20312_vm8, %v26582_v13  ;;  %19732 = vmatprep.subr.mxu1 %v26582_v13  ;;  %v15827_v54 = vrot.slane %v15820_v12, %v23063_v23  ;;  %v25706_v43 = vld [vmem:[#allocation6 + $0x28] sm:$0xff]  ;;  %v25712_v40 = vld [vmem:[#allocation6 + $0xa0] sm:$0xff]  ;;  %v25720_v0 = vld [vmem:[#allocation6 + $0x98] sm:$0xff] }
 0x9db   : > { %v15835_v31 = vrot.slane %v15828_v9, %v23063_v23  ;;  %v15941_v14 = vcombine.low %v15260_v6, %v15812_v2  ;;  %19733 = vmatpush3.msra.mxu1 %v25140_v62  ;;  %v15891_v16 = vcombine.low %v15883_v45, %v15890_v8  ;;  %v15958_v18 = vrot.slane %v17960_v22, %v23063_v23  ;;  %v25714_v58 = vld [vmem:[#allocation6 + $0x20] sm:$0xff]  ;;  %v25722_v10 = vld [vmem:[#allocation6 + $0x18] sm:$0xff]  ;;  %v25730_v26 = vld [vmem:[#allocation6 + $0x10] sm:$0xff] }
 0x9dc   : > { %v15924_v46 = vcombine.low %v15902_v28, %v15909_v25  ;;  %v15925_v30 = vcombine.low %v15916_v7, %v15923_v3  ;;  %19734 = vmatprep.subr.mxu1 %v26582_v13  ;;  %v15943_v21 = vcombine.low %v15827_v54, %v25505_v1  ;;  %19746 = vmatpush3.msra.mxu0 %v25628_v51  ;;  %v25728_v7 = vld [vmem:[#allocation6 + $0x90] sm:$0xff]  ;;  %v25736_v6 = vld [vmem:[#allocation6 + $0x88] sm:$0xff]  ;;  %v25744_v8 = vld [vmem:[#allocation6 + $0x80] sm:$0xff] }
 0x9dd   : > { %v15842_v17 = vrot.slane %v15835_v31, %v23063_v23  ;;  %v15951_v36 = vrot.slane %v15941_v14, %v23063_v23  ;;  %19735 = vmatpush3.msra.mxu1 %v25154_v37  ;;  %26612 = vst [vmem:[#allocation17_spill] sm:$0xff] %v25636_v59  ;;  %19747 = vmatprep.subr.mxu0 %v26582_v13  ;;  %26613 = vst [vmem:[#allocation24_spill] sm:$0xff] %v25642_v39  ;;  %v25738_v57 = vld [vmem:[#allocation6 + $0x8] sm:$0xff]  ;;  %v25746_v28 = vld [vmem:[#allocation6] sm:$0xff] }
 0x9de   : > { %v15932_v38 = vrot.slane %v15924_v46, %v23063_v23  ;;  %v15939_v42 = vrot.slane %v15925_v30, %v23063_v23  ;;  %19737 = vmatmul.mubr.f32.vlgmr.msra.gmra.mxu1 %v15891_v16  ;;  %19780 = vmatprep.subr.mxu1 %v26582_v13  ;;  %v15965_v24 = vrot.slane %v15943_v21, %v23063_v23  ;;  %v26628_v16 = vld [vmem:[#allocation20_spill] sm:$0xff] }
 0x9df   : > { %v15944_v55 = vcombine.low %v15262_v29, %v15842_v17  ;;  %19739 = vmatprep.mubr.msk.f32.mxu1 %vm20312_vm8, %v26582_v13  ;;  %v15973_v63 = vcombine.low %v15951_v36, %v15958_v18  ;;  %19781 = vmatpush3.msra.mxu1 %v25630_v60  ;;  %26614 = vst [vmem:[#allocation19_spill] sm:$0xff] %v25650_v61  ;;  %26615 = vst [vmem:[#allocation18_spill] sm:$0xff] %v25658_v11  ;;  %v26629_v18 = vld [vmem:[#allocation13_spill] sm:$0xff]  ;;  %v26630_v17 = vld [vmem:[#allocation16_spill] sm:$0xff] }
 0x9e0   : > { %v15940_v62 = vcombine.low %v15932_v38, %v15939_v42  ;;  %19782 = vmatprep.subr.mxu1 %v26582_v13  ;;  %19748 = vmatpush3.msra.mxu0 %v25632_v19  ;;  %26616 = vst [vmem:[#allocation26_spill] sm:$0xff] %v25666_v52  ;;  %26617 = vst [vmem:[#allocation23_spill] sm:$0xff] %v25674_v48  ;;  %v16267_v14 = vrot.slane %v24793_v34, %v23063_v23 }
 0x9e1   : > { %v15972_v15 = vrot.slane %v15944_v55, %v23063_v23  ;;  %v15981_v37 = vrot.slane %v15973_v63, %v23063_v23  ;;  %19783 = vmatpush3.msra.mxu1 %v25636_v59  ;;  %19749 = vmatprep.subr.mxu0 %v26582_v13  ;;  %26618 = vst [vmem:[#allocation21_spill] sm:$0xff] %v25682_v4  ;;  %26619 = vst [vmem:[#allocation28_spill] sm:$0xff] %v25690_v33 }
 0x9e2   : > { %19740 = vmatmul.mubr.f32.gmra.mxu1 %v15940_v62  ;;  %19784 = vmatprep.subr.mxu1 %v26582_v13  ;;  %26620 = vst [vmem:[#allocation29_spill] sm:$0xff] %v25698_v50  ;;  %26621 = vst [vmem:[#allocation30_spill] sm:$0xff] %v25706_v43  ;;  %v16290_v38 = vrot.slane %v26628_v16, %v23063_v23  ;;  %v16313_v42 = vrot.slane %v26629_v18, %v23063_v23 }
 0x9e3   : > { %v15974_v49 = vcombine.low %v15965_v24, %v15972_v15  ;;  %19742 = vmatprep.mubr.msk.f32.mxu1 %vm20312_vm8, %v26582_v13  ;;  %19750 = vmatpush3.msra.mxu0 %v25640_v20  ;;  %26622 = vst [vmem:[#allocation31_spill] sm:$0xff] %v25714_v58  ;;  %26623 = vst [vmem:[#allocation32_spill] sm:$0xff] %v25722_v10  ;;  %v16336_v21 = vrot.slane %v26630_v17, %v23063_v23 }
 0x9e4   : > { %19785 = vmatpush3.msra.mxu1 %v25642_v39  ;;  %19751 = vmatprep.subr.mxu0 %v26582_v13  ;;  %26624 = vst [vmem:[#allocation33_spill] sm:$0xff] %v25730_v26  ;;  %26625 = vst [vmem:[#allocation34_spill] sm:$0xff] %v25738_v57  ;;  %v16268_v55 = vcombine.high %v16267_v14, %v16267_v14  ;;  %v16275_v62 = vrot.slane %v16267_v14, %v23063_v23 }
 0x9e5   : > { %v15988_v1 = vrot.slane %v15974_v49, %v23063_v23  ;;  %19786 = vmatprep.subr.mxu1 %v26582_v13  ;;  %19752 = vmatpush3.msra.mxu0 %v25648_v47  ;;  %26626 = vst [vmem:[#allocation35_spill] sm:$0xff] %v25744_v8  ;;  %26627 = vst [vmem:[#allocation36_spill] sm:$0xff] %v25746_v28  ;;  %v16291_v15 = vcombine.high %v16290_v38, %v16290_v38  ;;  %v26631_v49 = vld [vmem:[#allocation15_spill] sm:$0xff] }
 0x9e6   : > { %19787 = vmatpush3.msra.mxu1 %v25650_v61  ;;  %19753 = vmatprep.subr.mxu0 %v26582_v13  ;;  %v16298_v63 = vrot.slane %v16290_v38, %v23063_v23  ;;  %v16359_v34 = vrot.slane %v26631_v49, %v23063_v23  ;;  %v25779_v38 = vrot.slane %v16336_v21, %v23063_v23  ;;  %v26633_v49 = vld [vmem:[#allocation22_spill] sm:$0xff] }
 0x9e7   : > { %v15989_v27 = vcombine.low %v15981_v37, %v15988_v1  ;;  %19788 = vmatprep.subr.mxu1 %v26582_v13  ;;  %19754 = vmatpush3.msra.mxu0 %v25656_v44  ;;  %v16314_v1 = vcombine.high %v16313_v42, %v16313_v42 }
 0x9e8   : > { %19789 = vmatpush3.msra.mxu1 %v25658_v11  ;;  %19755 = vmatprep.subr.mxu0 %v26582_v13  ;;  %v16306_v14 = vcombine.high %v16298_v63, %v16298_v63  ;;  %v16360_v18 = vcombine.high %v16359_v34, %v16359_v34 }
 0x9e9   : > { %19743 = vmatmul.mubr.f32.gmra.mxu1 %v15989_v27  ;;  %19790 = vmatprep.subr.mxu1 %v26582_v13  ;;  %v25773_v27 = vrot.slane %v16313_v42, %v23063_v23 }
 0x9ea   : > { %19812 = vmatprep.mubr.msk.f32.mxu1 %vm20312_vm8, %v26582_v13  ;;  %19756 = vmatpush3.msra.mxu0 %v25664_v56 }
 0x9eb   : > { %19791 = vmatpush3.msra.mxu1 %v25666_v52  ;;  %19757 = vmatprep.subr.mxu0 %v26582_v13 }
 0x9ec   : > { %19792 = vmatprep.subr.mxu1 %v26582_v13  ;;  %19758 = vmatpush3.msra.mxu0 %v25672_v53 }
 0x9ed   : > { %19793 = vmatpush3.msra.mxu1 %v25674_v48  ;;  %19759 = vmatprep.subr.mxu0 %v26582_v13 }
 0x9ee   : > { %19794 = vmatprep.subr.mxu1 %v26582_v13  ;;  %19760 = vmatpush3.msra.mxu0 %v25680_v41 }
 0x9ef   : > { %19795 = vmatpush3.msra.mxu1 %v25682_v4  ;;  %19761 = vmatprep.subr.mxu0 %v26582_v13 }
 0x9f0   : > { %19796 = vmatprep.subr.mxu1 %v26582_v13  ;;  %19762 = vmatpush3.msra.mxu0 %v25688_v32 }
 0x9f1   : > { %19797 = vmatpush3.msra.mxu1 %v25690_v33  ;;  %19763 = vmatprep.subr.mxu0 %v26582_v13 }
 0x9f2   : > { %19798 = vmatprep.subr.mxu1 %v26582_v13  ;;  %19764 = vmatpush3.msra.mxu0 %v25696_v5 }
 0x9f3   : > { %19799 = vmatpush3.msra.mxu1 %v25698_v50  ;;  %19765 = vmatprep.subr.mxu0 %v26582_v13 }
 0x9f4   : > { %19800 = vmatprep.subr.mxu1 %v26582_v13  ;;  %19766 = vmatpush3.msra.mxu0 %v25704_v35 }
 0x9f5   : > { %19801 = vmatpush3.msra.mxu1 %v25706_v43  ;;  %19767 = vmatprep.subr.mxu0 %v26582_v13 }
 0x9f6   : > { %19802 = vmatprep.subr.mxu1 %v26582_v13  ;;  %19768 = vmatpush3.msra.mxu0 %v25712_v40 }
 0x9f7   : > { %19803 = vmatpush3.msra.mxu1 %v25714_v58  ;;  %19769 = vmatprep.subr.mxu0 %v26582_v13 }
 0x9f8   : > { %19804 = vmatprep.subr.mxu1 %v26582_v13  ;;  %19770 = vmatpush3.msra.mxu0 %v25720_v0 }
 0x9f9   : > { %19805 = vmatpush3.msra.mxu1 %v25722_v10  ;;  %19771 = vmatprep.subr.mxu0 %v26582_v13 }
 0x9fa   : > { %19806 = vmatprep.subr.mxu1 %v26582_v13  ;;  %19772 = vmatpush3.msra.mxu0 %v25728_v7 }
 0x9fb   : > { %19807 = vmatpush3.msra.mxu1 %v25730_v26  ;;  %19773 = vmatprep.subr.mxu0 %v26582_v13 }
 0x9fc   : > { %19808 = vmatprep.subr.mxu1 %v26582_v13  ;;  %19774 = vmatpush3.msra.mxu0 %v25736_v6 }
 0x9fd   : > { %19809 = vmatpush3.msra.mxu1 %v25738_v57  ;;  %19775 = vmatprep.subr.mxu0 %v26582_v13 }
 0x9fe   : > { %19810 = vmatprep.subr.mxu1 %v26582_v13  ;;  %19776 = vmatpush3.msra.mxu0 %v25744_v8 }
 0x9ff   : > { %19811 = vmatpush3.msra.mxu1 %v25746_v28  ;;  %19815 = vmatprep.subr.mxu0 %v26582_v13 }
 0xa00   : > { %19850 = vmatprep.subr.mxu1 %v26582_v13 }
 0xa79   : > { %v15479_v25 = vpop.f32.mrf.mxu1 }
 0xa7b   : > { %v19656_v12 = vpop.f32.mrf.mxu1 }
 0xa81   : > { %v15709_v3 = vpop.f32.mrf.mxu0 }
 0xa82   : > { %v15710_v36 = vadd.f32 %v15709_v3, %v15479_v25  ;;  %v16282_v3 = vrot.slane %v16268_v55, %v23063_v23  ;;  %v16367_v55 = vrot.slane %v16359_v34, %v23063_v23  ;;  %v16352_v34 = vcombine.high %v25779_v38, %v25779_v38 }
 0xa83   : > { %v19697_v2 = vpop.f32.mrf.mxu0 }
 0xa84   : > { %v16337_v2 = vcombine.high %v16336_v21, %v16336_v21  ;;  %v16375_v58 = vcombine.high %v16367_v55, %v16367_v55 }
 0xa8c   : > { %v15484_v9 = vpop.f32.mrf.mxu1 }
 0xa8d   : > { %v15714_v22 = vpop.f32.mrf.mxu0 }
 0xa8e   : > { %v19659_v45 = vpop.f32.mrf.mxu1 }
 0xa8f   : > { %v19700_v46 = vpop.f32.mrf.mxu0  ;;  %v15715_v45 = vadd.f32 %v15714_v22, %v15484_v9  ;;  %v16329_v9 = vcombine.high %v25773_v27, %v25773_v27  ;;  %v16351_v22 = vrot.slane %v16337_v2, %v23063_v23  ;;  %v16374_v2 = vrot.slane %v16360_v18, %v23063_v23 }
 0xa90   : > { %v26632_v46 = vld [vmem:[#allocation27_spill] sm:$0xff] }
 0xa95   : > { %v25756_v29 = vpop.f32.mrf.mxu1 }
 0xa96   : > { %v25758_v30 = vpop.f32.mrf.mxu0 }
 0xa97   : > { %v19662_v54 = vpop.f32.mrf.mxu1 }
 0xa98   : > { %v19703_v31 = vpop.f32.mrf.mxu0  ;;  %v16283_v54 = vcombine.high %v16275_v62, %v16275_v62 }
 0xa99   : > { %v16305_v31 = vrot.slane %v16291_v15, %v23063_v23 }
 0xa9e   : > { %v16059_v24 = vpop.f32.mrf.mxu1 }
 0xa9f   : > { %v16073_v37 = vadd.f32 %v16059_v24, %v15710_v36  ;;  %v16328_v36 = vrot.slane %v16314_v1, %v23063_v23  ;;  %v25796_v1 = vld [vmem:[%s26338_s5] ss:$0 sm:$0xff] }
 0xaa0   : > { %v19738_v12 = vpop.f32.mrf.mxu1 }
 0xaa1   : > { %v16076_v25 = vadd.f32 %v26632_v46, %v16073_v37  ;;  %v25789_v37 = vrot.slane %v26633_v49, %v23063_v23 }
 0xaa2   : > { %v16064_v16 = vpop.f32.mrf.mxu1 }
 0xaa3   : > { %v16082_v17 = vcombine.high %v16076_v25, %v16076_v25  ;;  %v16089_v42 = vrot.slane %v16076_v25, %v23063_v23  ;;  %v16074_v24 = vadd.f32 %v16064_v16, %v15715_v45  ;;  %v26634_v25 = vld [vmem:[#allocation25_spill] sm:$0xff] }
 0xaa4   : > { %v19741_v15 = vpop.f32.mrf.mxu1  ;;  %v25804_v16 = vrot.slane %v26634_v25, %v23063_v23 }
 0xaa5   : > { %v16096_v21 = vrot.slane %v16082_v17, %v23063_v23  ;;  %v16097_v12 = vcombine.high %v16089_v42, %v16089_v42  ;;  %v16105_v46 = vrot.slane %v16089_v42, %v23063_v23  ;;  %v16077_v45 = vadd.f32 %v25796_v1, %v16074_v24  ;;  %v26635_v17 = vld [vmem:[#allocation14_spill] sm:$0xff] }
 0xaa6   : > { %v25808_v15 = vrot.slane %v26635_v17, %v23063_v23 }
 0xaa7   : > { %v16098_v42 = vcombine.high %v16096_v21, %v16096_v21  ;;  %v16112_v49 = vrot.slane %v16096_v21, %v23063_v23  ;;  %v16119_v28 = vrot.slane %v16097_v12, %v23063_v23  ;;  %v16127_v57 = vcombine.high %v16105_v46, %v16105_v46 }
 0xaa8   : > { %v16469_v24 = vadd.f32 %v16275_v62, %v16105_v46  ;;  %v16131_v26 = vcombine.high %v16077_v45, %v16077_v45  ;;  %v16138_v10 = vrot.slane %v16077_v45, %v23063_v23 }
 0xaa9   : > { %v16069_v18 = vpop.f32.mrf.mxu1  ;;  %v16126_v43 = vrot.slane %v16098_v42, %v23063_v23  ;;  %v16128_v25 = vcombine.high %v16112_v49, %v16112_v49  ;;  %v16129_v50 = vcombine.high %v16119_v28, %v16119_v28  ;;  %v16470_v33 = vadd.f32 %v16282_v3, %v16119_v28 }
 0xaaa   : > { %v16471_v4 = vadd.f32 %v16283_v54, %v16127_v57  ;;  %v16473_v17 = vadd.f32 %v16305_v31, %v16112_v49  ;;  %v16145_v48 = vrot.slane %v16131_v26, %v23063_v23  ;;  %v16146_v52 = vcombine.high %v16138_v10, %v16138_v10 }
 0xaab   : > { %v19744_v21 = vpop.f32.mrf.mxu1  ;;  %v16130_v11 = vcombine.high %v16126_v43, %v16126_v43  ;;  %v16472_v12 = vadd.f32 %v16298_v63, %v16129_v50  ;;  %v16474_v61 = vadd.f32 %v16306_v14, %v16126_v43  ;;  %v16475_v62 = vadd.f32 %v25773_v27, %v16128_v25 }
 0xaac   : > { %v16517_v46 = vcombine.low %v16469_v24, %v16470_v33  ;;  %v16531_v45 = vrot.slane %v16471_v4, %v23063_v23  ;;  %v16147_v39 = vcombine.high %v16145_v48, %v16145_v48  ;;  %v16154_v42 = vrot.slane %v16138_v10, %v23063_v23 }
 0xaad   : > { %v16476_v59 = vadd.f32 %v16328_v36, %v16130_v11  ;;  %v16540_v8 = vcombine.low %v16472_v12, %v16473_v17  ;;  %v16554_v57 = vrot.slane %v16474_v61, %v23063_v23  ;;  %v16161_v28 = vrot.slane %v16145_v48, %v23063_v23 }
 0xaae   : > { %v16524_v26 = vrot.slane %v16517_v46, %v23063_v23  ;;  %v16168_v3 = vrot.slane %v16146_v52, %v23063_v23  ;;  %v16175_v50 = vrot.slane %v16147_v39, %v23063_v23  ;;  %v16176_v43 = vcombine.high %v16154_v42, %v16154_v42 }
 0xaaf   : > { %v16547_v33 = vrot.slane %v16540_v8, %v23063_v23  ;;  %v16563_v63 = vcombine.low %v16475_v62, %v16476_v59  ;;  %v16177_v4 = vcombine.high %v16161_v28, %v16161_v28  ;;  %v16477_v27 = vadd.f32 %v16329_v9, %v16154_v42 }
 0xab0   : > { %v15720_v11 = vadd.f32 %v25758_v30, %v25756_v29  ;;  %v16532_v10 = vcombine.low %v16524_v26, %v16531_v45  ;;  %v16178_v54 = vcombine.high %v16168_v3, %v16168_v3  ;;  %v16478_v61 = vadd.f32 %v25779_v38, %v16168_v3 }
 0xab1   : > { %v16555_v48 = vcombine.low %v16547_v33, %v16554_v57  ;;  %v16479_v31 = vadd.f32 %v16351_v22, %v16176_v43  ;;  %v16481_v14 = vadd.f32 %v16367_v55, %v16161_v28  ;;  %v16482_v36 = vadd.f32 %v16374_v2, %v16175_v50 }
 0xab2   : > { %17961 = vst.sshfl [vmem:[#allocation2] sm:$0x15 pattern:$0x73625140] %v16532_v10  ;;  %v16480_v52 = vadd.f32 %v16352_v34, %v16178_v54  ;;  %v16483_v39 = vadd.f32 %v16375_v58, %v16177_v4  ;;  %v16570_v49 = vrot.slane %v16563_v63, %v23063_v23  ;;  %v16577_v59 = vrot.slane %v16477_v27, %v23063_v23 }
 0xab3   : > { %17962 = vst.sshfl [vmem:[#allocation2 + $0x10] sm:$0x15 pattern:$0x73625140] %v16555_v48  ;;  %v16586_v8 = vcombine.low %v16478_v61, %v16479_v31  ;;  %v16609_v9 = vcombine.low %v16481_v14, %v16482_v36  ;;  %v16075_v24 = vadd.f32 %v16069_v18, %v15720_v11  ;;  %v16383_v29 = vcombine.high %v25789_v37, %v25789_v37 }
 0xab4   : > { %v16578_v30 = vcombine.low %v16570_v49, %v16577_v59  ;;  %v16600_v38 = vrot.slane %v16480_v52, %v23063_v23  ;;  %v16390_v22 = vrot.slane %v25789_v37, %v23063_v23  ;;  %v16406_v58 = vcombine.high %v25804_v16, %v25804_v16 }
 0xab5   : > { %v16593_v55 = vrot.slane %v16586_v8, %v23063_v23  ;;  %v16616_v34 = vrot.slane %v16609_v9, %v23063_v23  ;;  %v16623_v2 = vrot.slane %v16483_v39, %v23063_v23  ;;  %v16078_v18 = vadd.f32 %v25796_v1, %v16075_v24 }
 0xab6   : > { %v16179_v25 = vcombine.high %v16175_v50, %v16175_v50  ;;  %17963 = vst.sshfl [vmem:[#allocation2 + $0x20] sm:$0x15 pattern:$0x73625140] %v16578_v30  ;;  %v16413_v17 = vrot.slane %v25804_v16, %v23063_v23  ;;  %v16429_v21 = vcombine.high %v25808_v15, %v25808_v15  ;;  %v16397_v45 = vrot.slane %v16383_v29, %v23063_v23 }
 0xab7   : > { %v16601_v37 = vcombine.low %v16593_v55, %v16600_v38  ;;  %v16624_v12 = vcombine.low %v16616_v34, %v16623_v2  ;;  %v16180_v62 = vcombine.high %v16078_v18, %v16078_v18  ;;  %v16187_v46 = vrot.slane %v16078_v18, %v23063_v23 }
 0xab8   : > { %v16398_v42 = vcombine.high %v16390_v22, %v16390_v22  ;;  %v16436_v57 = vrot.slane %v25808_v15, %v23063_v23  ;;  %v16420_v26 = vrot.slane %v16406_v58, %v23063_v23  ;;  %v16421_v43 = vcombine.high %v16413_v17, %v16413_v17 }
 0xab9   : > { %17964 = vst.sshfl [vmem:[#allocation2 + $0x30] sm:$0x15 pattern:$0x73625140] %v16601_v37  ;;  %v16194_v1 = vrot.slane %v16180_v62, %v23063_v23  ;;  %v16195_v28 = vcombine.high %v16187_v46, %v16187_v46  ;;  %v16203_v16 = vrot.slane %v16187_v46, %v23063_v23  ;;  %v16443_v33 = vrot.slane %v16429_v21, %v23063_v23 }
 0xaba   : > { %17965 = vst.sshfl [vmem:[#allocation2 + $0x40] sm:$0x15 pattern:$0x73625140] %v16624_v12  ;;  %v16484_v63 = vadd.f32 %v16390_v22, %v16179_v25  ;;  %v16444_v31 = vcombine.high %v16436_v57, %v16436_v57 }
 0xabb   : > { %v16725_v3 = vld [vmem:[#allocation2] ss:$2 sm:$0x1]  ;;  %v16733_v50 = vld [vmem:[#allocation2 + $0x1] ss:$2 sm:$0x1]  ;;  %v16196_v10 = vcombine.high %v16194_v1, %v16194_v1  ;;  %v16210_v15 = vrot.slane %v16194_v1, %v23063_v23  ;;  %v16217_v54 = vrot.slane %v16195_v28, %v23063_v23  ;;  %v16225_v61 = vcombine.high %v16203_v16, %v16203_v16 }
 0xabc   : > { %v16726_v4 = vld [vmem:[#allocation2 + $0x10] ss:$2 sm:$0x1]  ;;  %v16734_v27 = vld [vmem:[#allocation2 + $0x11] ss:$2 sm:$0x1]  ;;  %v16741_v11 = vmax.f32 %v16725_v3, %v16733_v50  ;;  %v16485_v14 = vadd.f32 %v16397_v45, %v16203_v16 }
 0xabd   : > { %v16749_v48 = vld [vmem:[#allocation2 + $0x2] ss:$2 sm:$0x1]  ;;  %v16742_v36 = vmax.f32 %v16726_v4, %v16734_v27  ;;  %v16224_v39 = vrot.slane %v16196_v10, %v23063_v23  ;;  %v16226_v49 = vcombine.high %v16210_v15, %v16210_v15  ;;  %v16227_v59 = vcombine.high %v16217_v54, %v16217_v54  ;;  %v16727_v9 = vld [vmem:[#allocation2 + $0x20] ss:$2 sm:$0x1] }
 0xabe   : > { %v25854_v52 = vmax.f32 %v16741_v11, %v16749_v48  ;;  %v16486_v8 = vadd.f32 %v16398_v42, %v16217_v54  ;;  %v16735_v24 = vld [vmem:[#allocation2 + $0x21] ss:$2 sm:$0x1]  ;;  %v16487_v29 = vadd.f32 %v16413_v17, %v16225_v61  ;;  %v16489_v30 = vadd.f32 %v16421_v43, %v16210_v15  ;;  %v16750_v18 = vld [vmem:[#allocation2 + $0x12] ss:$2 sm:$0x1] }
 0xabf   : > { %v16632_v38 = vcombine.low %v16484_v63, %v16485_v14  ;;  %v16743_v22 = vmax.f32 %v16727_v9, %v16735_v24  ;;  %v16228_v58 = vcombine.high %v16224_v39, %v16224_v39  ;;  %v16488_v55 = vadd.f32 %v16420_v26, %v16227_v59  ;;  %v16751_v25 = vld [vmem:[#allocation2 + $0x22] ss:$2 sm:$0x1] }
 0xac0   : > { %v16490_v34 = vadd.f32 %v16436_v57, %v16224_v39  ;;  %v16491_v2 = vadd.f32 %v16443_v33, %v16226_v49  ;;  %v16646_v37 = vrot.slane %v16486_v8, %v23063_v23  ;;  %v16728_v12 = vld [vmem:[#allocation2 + $0x30] ss:$2 sm:$0x1]  ;;  %v25859_v46 = vmax.f32 %v16742_v36, %v16750_v18  ;;  %v16736_v1 = vld [vmem:[#allocation2 + $0x31] ss:$2 sm:$0x1] }
 0xac1   : > { %v16639_v21 = vrot.slane %v16632_v38, %v23063_v23  ;;  %v16729_v62 = vld [vmem:[#allocation2 + $0x40] ss:$2 sm:$0x1]  ;;  %v16492_v45 = vadd.f32 %v16444_v31, %v16228_v58  ;;  %v16655_v42 = vcombine.low %v16487_v29, %v16488_v55  ;;  %v16737_v28 = vld [vmem:[#allocation2 + $0x41] ss:$2 sm:$0x1]  ;;  %v25861_v16 = vmax.f32 %v16743_v22, %v16751_v25 }
 0xac2   : > { %v16678_v17 = vcombine.low %v16490_v34, %v16491_v2  ;;  %v16669_v57 = vrot.slane %v16489_v30, %v23063_v23  ;;  %v16744_v3 = vmax.f32 %v16728_v12, %v16736_v1  ;;  %v16745_v50 = vmax.f32 %v16729_v62, %v16737_v28  ;;  %v16752_v43 = vld [vmem:[#allocation2 + $0x32] ss:$2 sm:$0x1]  ;;  %v16753_v27 = vld [vmem:[#allocation2 + $0x42] ss:$2 sm:$0x1] }
 0xac3   : > { %v16647_v26 = vcombine.low %v16639_v21, %v16646_v37  ;;  %v16662_v33 = vrot.slane %v16655_v42, %v23063_v23  ;;  %v16692_v4 = vrot.slane %v16492_v45, %v23063_v23  ;;  %v16765_v11 = vmax.f32 %v25854_v52, 0.0 }
 0xac4   : > { %v16685_v63 = vrot.slane %v16678_v17, %v23063_v23  ;;  %v25868_v10 = vmax.f32 %v16744_v3, %v16752_v43  ;;  %v25870_v15 = vmax.f32 %v16745_v50, %v16753_v27  ;;  %v16766_v54 = vmax.f32 %v25859_v46, 0.0 }
 0xac5   : > { %17966 = vst.sshfl [vmem:[#allocation2 + $0x50] sm:$0x15 pattern:$0x73625140] %v16647_v26  ;;  %v16767_v61 = vmax.f32 %v25861_v16, 0.0  ;;  %v16670_v48 = vcombine.low %v16662_v33, %v16669_v57  ;;  %v16781_v14 = vrot.slane %v16765_v11, 7 }
 0xac6   : > { %v16693_v31 = vcombine.low %v16685_v63, %v16692_v4  ;;  %v16768_v36 = vmax.f32 %v25868_v10, 0.0  ;;  %v16769_v39 = vmax.f32 %v25870_v15, 0.0  ;;  %v16782_v49 = vrot.slane %v16766_v54, 7 }
 0xac7   : > { %v16783_v59 = vrot.slane %v16767_v61, 7  ;;  %17967 = vst.sshfl [vmem:[#allocation2 + $0x60] sm:$0x15 pattern:$0x73625140] %v16670_v48  ;;  %v16797_v8 = vsel %vm899_vm0, 0.0, %v16781_v14 }
 0xac8   : > { %17968 = vst.sshfl [vmem:[#allocation2 + $0x70] sm:$0x15 pattern:$0x73625140] %v16693_v31  ;;  %v16784_v9 = vrot.slane %v16768_v36, 7  ;;  %v16785_v24 = vrot.slane %v16769_v39, 7 }
 0xac9   : > { %v16798_v29 = vsel %vm899_vm0, 0.0, %v16782_v49  ;;  %v16799_v30 = vsel %vm899_vm0, 0.0, %v16783_v59  ;;  %v25880_v38 = vsel %vm16805_vm10, %v16797_v8, 0.0 }
 0xaca   : > { %v25883_v22 = vsel %vm16805_vm10, %v16798_v29, 0.0  ;;  %v25886_v58 = vsel %vm16805_vm10, %v16799_v30, 0.0  ;;  %v16800_v55 = vsel %vm899_vm0, 0.0, %v16784_v9  ;;  %v16801_v34 = vsel %vm899_vm0, 0.0, %v16785_v24 }
 0xacb   : > { %v16854_v2 = vrot.slane %v25880_v38, 1  ;;  %v16857_v18 = vrot.slane %v25886_v58, 7  ;;  %v25893_v12 = vsel %vm16805_vm10, %v16800_v55, 0.0  ;;  %v25896_v45 = vsel %vm16805_vm10, %v16801_v34, 0.0 }
 0xacc   : > { %v16730_v25 = vld [vmem:[#allocation2 + $0x50] ss:$2 sm:$0x1]  ;;  %v16738_v21 = vld [vmem:[#allocation2 + $0x51] ss:$2 sm:$0x1] }
 0xacd   : > { %v16746_v37 = vmax.f32 %v16730_v25, %v16738_v21  ;;  %v16754_v62 = vld [vmem:[#allocation2 + $0x52] ss:$2 sm:$0x1]  ;;  %v16859_v42 = vrot.slane %v25893_v12, 6  ;;  %v16943_v17 = vrot.slane %v25883_v22, 7  ;;  %v16856_v57 = vsel %vm16855_vm11, %v25883_v22, %v16854_v2 }
 0xace   : > { %v16731_v1 = vld [vmem:[#allocation2 + $0x60] ss:$2 sm:$0x1]  ;;  %v16739_v3 = vld [vmem:[#allocation2 + $0x61] ss:$2 sm:$0x1]  ;;  %v16858_v43 = vsel %vm900_vm1, %v16857_v18, %v16856_v57 }
 0xacf   : > { %v16732_v28 = vld [vmem:[#allocation2 + $0x70] ss:$2 sm:$0x1]  ;;  %v25900_v26 = vmax.f32 %v16746_v37, %v16754_v62  ;;  %v16740_v50 = vld [vmem:[#allocation2 + $0x71] ss:$2 sm:$0x1]  ;;  %v16747_v33 = vmax.f32 %v16731_v1, %v16739_v3  ;;  %v16944_v11 = vsel %vm16855_vm11, %v16943_v17, %v25880_v38  ;;  %v16861_v39 = vsel %vm16860_vm12, %v16859_v42, %v16858_v43 }
 0xad0   : > { %v16748_v63 = vmax.f32 %v16732_v28, %v16740_v50  ;;  %v16755_v4 = vld [vmem:[#allocation2 + $0x62] ss:$2 sm:$0x1]  ;;  %v16862_v27 = vrot.slane %v25896_v45, 5  ;;  %v16945_v48 = vrot.slane %v25886_v58, 6  ;;  %v16947_v31 = vrot.slane %v25893_v12, 5 }
 0xad1   : > { %v16756_v54 = vld [vmem:[#allocation2 + $0x72] ss:$2 sm:$0x1]  ;;  %v16770_v61 = vmax.f32 %v25900_v26, 0.0  ;;  %v25911_v14 = vmax.f32 %v16747_v33, %v16755_v4  ;;  %v16949_v49 = vrot.slane %v25896_v45, 4 }
 0xad2   : > { %v25913_v36 = vmax.f32 %v16748_v63, %v16756_v54  ;;  %v16946_v8 = vsel %vm900_vm1, %v16945_v48, %v16944_v11  ;;  %v16863_v55 = vsel %vm902_vm2, %v16862_v27, %v16861_v39  ;;  %v25945_v27 = vld [vmem:[#allocation6 + $0x178] sm:$0xff]  ;;  %v25955_v48 = vld [vmem:[#allocation6 + $0x168] sm:$0xff] }
 0xad3   : > { %v16786_v59 = vrot.slane %v16770_v61, 7  ;;  %v16771_v9 = vmax.f32 %v25911_v14, 0.0  ;;  %v16948_v29 = vsel %vm16860_vm12, %v16947_v31, %v16946_v8  ;;  %v25949_v61 = vld [vmem:[#allocation6 + $0x170] sm:$0xff]  ;;  %v25961_v31 = vld [vmem:[#allocation6 + $0x160] sm:$0xff]  ;;  %v25967_v39 = vld [vmem:[#allocation6 + $0x158] sm:$0xff] }
 0xad4   : > { %v16772_v24 = vmax.f32 %v25913_v36, 0.0  ;;  %v16950_v25 = vsel %vm902_vm2, %v16949_v49, %v16948_v29  ;;  %v25980_v49 = vld [vmem:[#allocation6 + $0x148] sm:$0xff] }
 0xad5   : > { %v16802_v30 = vsel %vm899_vm0, 0.0, %v16786_v59  ;;  %v16787_v34 = vrot.slane %v16771_v9, 7 }
 0xad6   : > { %v16788_v2 = vrot.slane %v16772_v24, 7  ;;  %v25924_v18 = vsel %vm16805_vm10, %v16802_v30, 0.0 }
 0xad7   : > { %v16864_v21 = vrot.slane %v25924_v18, 4  ;;  %v16951_v37 = vrot.slane %v25924_v18, 3  ;;  %v16803_v62 = vsel %vm899_vm0, 0.0, %v16787_v34  ;;  %v26640_v34 = vld [vmem:[#allocation18_spill] sm:$0xff] }
 0xad8   : > { %v16804_v42 = vsel %vm899_vm0, 0.0, %v16788_v2  ;;  %v25932_v17 = vsel %vm16805_vm10, %v16803_v62, 0.0  ;;  %v26641_v2 = vld [vmem:[#allocation26_spill] sm:$0xff] }
 0xad9   : > { %v25935_v1 = vsel %vm16805_vm10, %v16804_v42, 0.0  ;;  %v16866_v28 = vsel %vm16865_vm13, %v16864_v21, %v16863_v55  ;;  %v16952_v57 = vsel %vm16865_vm13, %v16951_v37, %v16950_v25  ;;  %v16867_v3 = vrot.slane %v25932_v17, 3  ;;  %v26637_v55 = vld [vmem:[#allocation17_spill] sm:$0xff]  ;;  %v26644_v21 = vld [vmem:[#allocation28_spill] sm:$0xff]  ;;  %v26646_v62 = vld [vmem:[#allocation30_spill] sm:$0xff] }
 0xada   : > { %v16869_v50 = vrot.slane %v25935_v1, 2  ;;  %v16953_v43 = vrot.slane %v25932_v17, 2  ;;  %v16955_v33 = vrot.slane %v25935_v1, 1  ;;  %v17054_v9 = vrot.slane %v25932_v17, 4  ;;  %v26643_v25 = vld [vmem:[#allocation21_spill] sm:$0xff]  ;;  %v26647_v42 = vld [vmem:[#allocation31_spill] sm:$0xff] }
 0xadb   : > { %v16868_v63 = vsel %vm904_vm3, %v16867_v3, %v16866_v28  ;;  %v17056_v29 = vrot.slane %v25935_v1, 3  ;;  %v26645_v37 = vld [vmem:[#allocation29_spill] sm:$0xff]  ;;  %v26648_v17 = vld [vmem:[#allocation32_spill] sm:$0xff]  ;;  %v26650_v28 = vld [vmem:[#allocation34_spill] sm:$0xff] }
 0xadc   : > { %v16954_v4 = vsel %vm904_vm3, %v16953_v43, %v16952_v57  ;;  %v16871_v11 = vsel %vm16870_vm14, %v16869_v50, %v16868_v63  ;;  %v26649_v1 = vld [vmem:[#allocation33_spill] sm:$0xff]  ;;  %v26651_v57 = vld [vmem:[#allocation36_spill] sm:$0xff] }
 0xadd   : > { %v16956_v54 = vsel %vm16870_vm14, %v16955_v33, %v16954_v4  ;;  %19778 = vmatmul.mubr.f32.vlgmr.msra.gmra.mxu0 %v16871_v11  ;;  %v26099_v11 = vld [vmem:[%s26338_s5] ss:$0 sm:$0xff] }
 0xade   : > { %19813 = vmatmul.mubr.f32.vlgmr.msra.gmra.mxu1 %v16956_v54  ;;  %19816 = vmatpush3.msra.mxu0 %v25945_v27 }
 0xadf   : > { %19847 = vmatprep.mubr.msk.f32.mxu0 %vm20312_vm8, %v26582_v13  ;;  %19817 = vmatprep.subr.mxu0 %v26582_v13 }
 0xae0   : > { %19851 = vmatpush3.msra.mxu1 %v25628_v51  ;;  %19818 = vmatpush3.msra.mxu0 %v25949_v61  ;;  %v25973_v51 = vld [vmem:[#allocation6 + $0x150] sm:$0xff] }
 0xae1   : > { %19852 = vmatprep.subr.mxu1 %v26582_v13  ;;  %19819 = vmatprep.subr.mxu0 %v26582_v13 }
 0xae2   : > { %19853 = vmatpush3.msra.mxu1 %v25632_v19  ;;  %19820 = vmatpush3.msra.mxu0 %v25955_v48  ;;  %v17045_v19 = vrot.slane %v25883_v22, 1 }
 0xae3   : > { %19854 = vmatprep.subr.mxu1 %v26582_v13  ;;  %19821 = vmatprep.subr.mxu0 %v26582_v13 }
 0xae4   : > { %19855 = vmatpush3.msra.mxu1 %v25640_v20  ;;  %19822 = vmatpush3.msra.mxu0 %v25961_v31  ;;  %v17044_v20 = vrot.slane %v25880_v38, 2  ;;  %v17048_v38 = vrot.slane %v25893_v12, 7  ;;  %v17050_v12 = vrot.slane %v25896_v45, 6 }
 0xae5   : > { %19856 = vmatprep.subr.mxu1 %v26582_v13  ;;  %19823 = vmatprep.subr.mxu0 %v26582_v13 }
 0xae6   : > { %19857 = vmatpush3.msra.mxu1 %v25648_v47  ;;  %19824 = vmatpush3.msra.mxu0 %v25967_v39  ;;  %v25987_v47 = vld [vmem:[#allocation6 + $0x140] sm:$0xff]  ;;  %v17046_v22 = vsel %vm16855_vm11, %v17045_v19, %v17044_v20 }
 0xae7   : > { %19858 = vmatprep.subr.mxu1 %v26582_v13  ;;  %19825 = vmatprep.subr.mxu0 %v26582_v13  ;;  %v17047_v59 = vsel %vm900_vm1, %v25886_v58, %v17046_v22  ;;  %v17052_v58 = vrot.slane %v25924_v18, 5  ;;  %v26642_v18 = vld [vmem:[#allocation23_spill] sm:$0xff] }
 0xae8   : > { %19859 = vmatpush3.msra.mxu1 %v25656_v44  ;;  %19826 = vmatpush3.msra.mxu0 %v25973_v51  ;;  %v25994_v44 = vld [vmem:[#allocation6 + $0x138] sm:$0xff]  ;;  %v17049_v8 = vsel %vm16860_vm12, %v17048_v38, %v17047_v59 }
 0xae9   : > { %19860 = vmatprep.subr.mxu1 %v26582_v13  ;;  %19827 = vmatprep.subr.mxu0 %v26582_v13  ;;  %v17051_v45 = vsel %vm902_vm2, %v17050_v12, %v17049_v8 }
 0xaea   : > { %19861 = vmatpush3.msra.mxu1 %v25664_v56  ;;  %19828 = vmatpush3.msra.mxu0 %v25980_v49  ;;  %v26001_v56 = vld [vmem:[#allocation6 + $0x130] sm:$0xff]  ;;  %v17053_v24 = vsel %vm16865_vm13, %v17052_v58, %v17051_v45 }
 0xaeb   : > { %19862 = vmatprep.subr.mxu1 %v26582_v13  ;;  %19829 = vmatprep.subr.mxu0 %v26582_v13  ;;  %v17055_v30 = vsel %vm904_vm3, %v17054_v9, %v17053_v24  ;;  %v26652_v58 = vld [vmem:[#allocation12_spill] sm:$0xff] }
 0xaec   : > { %19863 = vmatpush3.msra.mxu1 %v25672_v53  ;;  %19830 = vmatpush3.msra.mxu0 %v25987_v47  ;;  %v26009_v53 = vld [vmem:[#allocation6 + $0x128] sm:$0xff]  ;;  %v17214_v45 = vsub.s32 0, %v26652_v58 }
 0xaed   : > { %19864 = vmatprep.subr.mxu1 %v26582_v13  ;;  %19831 = vmatprep.subr.mxu0 %v26582_v13 }
 0xaee   : > { %19865 = vmatpush3.msra.mxu1 %v25680_v41  ;;  %19832 = vmatpush3.msra.mxu0 %v25994_v44  ;;  %v26017_v41 = vld [vmem:[#allocation6 + $0x120] sm:$0xff] }
 0xaef   : > { %19866 = vmatprep.subr.mxu1 %v26582_v13  ;;  %19833 = vmatprep.subr.mxu0 %v26582_v13 }
 0xaf0   : > { %19867 = vmatpush3.msra.mxu1 %v25688_v32  ;;  %19834 = vmatpush3.msra.mxu0 %v26001_v56  ;;  %v26024_v32 = vld [vmem:[#allocation6 + $0x118] sm:$0xff] }
 0xaf1   : > { %19868 = vmatprep.subr.mxu1 %v26582_v13  ;;  %19835 = vmatprep.subr.mxu0 %v26582_v13 }
 0xaf2   : > { %19869 = vmatpush3.msra.mxu1 %v25696_v5  ;;  %19836 = vmatpush3.msra.mxu0 %v26009_v53  ;;  %v26031_v5 = vld [vmem:[#allocation6 + $0x110] sm:$0xff] }
 0xaf3   : > { %19870 = vmatprep.subr.mxu1 %v26582_v13  ;;  %19837 = vmatprep.subr.mxu0 %v26582_v13 }
 0xaf4   : > { %19871 = vmatpush3.msra.mxu1 %v25704_v35  ;;  %19838 = vmatpush3.msra.mxu0 %v26017_v41  ;;  %v26039_v35 = vld [vmem:[#allocation6 + $0x108] sm:$0xff] }
 0xaf5   : > { %19872 = vmatprep.subr.mxu1 %v26582_v13  ;;  %19839 = vmatprep.subr.mxu0 %v26582_v13 }
 0xaf6   : > { %19873 = vmatpush3.msra.mxu1 %v25712_v40  ;;  %19840 = vmatpush3.msra.mxu0 %v26024_v32  ;;  %v26046_v40 = vld [vmem:[#allocation6 + $0x100] sm:$0xff] }
 0xaf7   : > { %19874 = vmatprep.subr.mxu1 %v26582_v13  ;;  %19841 = vmatprep.subr.mxu0 %v26582_v13 }
 0xaf8   : > { %19875 = vmatpush3.msra.mxu1 %v25720_v0  ;;  %19842 = vmatpush3.msra.mxu0 %v26031_v5  ;;  %v17057_v0 = vsel %vm16870_vm14, %v17056_v29, %v17055_v30 }
 0xaf9   : > { %19876 = vmatprep.subr.mxu1 %v26582_v13  ;;  %19843 = vmatprep.subr.mxu0 %v26582_v13 }
 0xafa   : > { %19877 = vmatpush3.msra.mxu1 %v25728_v7  ;;  %19844 = vmatpush3.msra.mxu0 %v26039_v35  ;;  %v26636_v7 = vld [vmem:[#allocation35_spill] sm:$0xff] }
 0xafb   : > { %19878 = vmatprep.subr.mxu1 %v26582_v13  ;;  %19845 = vmatprep.subr.mxu0 %v26582_v13 }
 0xafc   : > { %19879 = vmatpush3.msra.mxu1 %v25736_v6  ;;  %19846 = vmatpush3.msra.mxu0 %v26046_v40  ;;  %v26638_v6 = vld [vmem:[#allocation24_spill] sm:$0xff] }
 0xafd   : > { %19880 = vmatprep.subr.mxu1 %v26582_v13  ;;  %19848 = vmatmul.mubr.f32.vlgmr.msra.gmra.mxu0 %v17057_v0 }
 0xafe   : > { %19885 = vmatprep.subr.mxu0 %v26582_v13  ;;  %19881 = vmatpush3.msra.mxu1 %v26636_v7 }
 0xaff   : > { %19886 = vmatpush3.msra.mxu0 %v25630_v60  ;;  %19882 = vmatprep.mubr.msk.f32.mxu1 %vm20312_vm8, %v26582_v13  ;;  %v26639_v60 = vld [vmem:[#allocation19_spill] sm:$0xff] }
 0xb00   : > { %19887 = vmatprep.subr.mxu0 %v26582_v13  ;;  %19917 = vmatprep.mubr.msk.f32.mxu0 %vm20312_vm8, %v26582_v13 }
 0xb01   : > { %19888 = vmatpush3.msra.mxu0 %v26637_v55  ;;  %19920 = vmatprep.subr.mxu1 %v26582_v13 }
 0xb02   : > { %19889 = vmatprep.subr.mxu0 %v26582_v13 }
 0xb03   : > { %19890 = vmatpush3.msra.mxu0 %v26638_v6 }
 0xb04   : > { %19891 = vmatprep.subr.mxu0 %v26582_v13 }
 0xb05   : > { %19892 = vmatpush3.msra.mxu0 %v26639_v60 }
 0xb06   : > { %19893 = vmatprep.subr.mxu0 %v26582_v13 }
 0xb07   : > { %19894 = vmatpush3.msra.mxu0 %v26640_v34 }
 0xb08   : > { %19895 = vmatprep.subr.mxu0 %v26582_v13 }
 0xb09   : > { %19896 = vmatpush3.msra.mxu0 %v26641_v2 }
 0xb0a   : > { %19897 = vmatprep.subr.mxu0 %v26582_v13 }
 0xb0b   : > { %19898 = vmatpush3.msra.mxu0 %v26642_v18 }
 0xb0c   : > { %19899 = vmatprep.subr.mxu0 %v26582_v13 }
 0xb0d   : > { %19900 = vmatpush3.msra.mxu0 %v26643_v25 }
 0xb0e   : > { %19901 = vmatprep.subr.mxu0 %v26582_v13 }
 0xb0f   : > { %19902 = vmatpush3.msra.mxu0 %v26644_v21 }
 0xb10   : > { %19903 = vmatprep.subr.mxu0 %v26582_v13 }
 0xb11   : > { %19904 = vmatpush3.msra.mxu0 %v26645_v37 }
 0xb12   : > { %19905 = vmatprep.subr.mxu0 %v26582_v13 }
 0xb13   : > { %19906 = vmatpush3.msra.mxu0 %v26646_v62 }
 0xb14   : > { %19907 = vmatprep.subr.mxu0 %v26582_v13 }
 0xb15   : > { %19908 = vmatpush3.msra.mxu0 %v26647_v42 }
 0xb16   : > { %19909 = vmatprep.subr.mxu0 %v26582_v13 }
 0xb17   : > { %19910 = vmatpush3.msra.mxu0 %v26648_v17 }
 0xb18   : > { %19911 = vmatprep.subr.mxu0 %v26582_v13 }
 0xb19   : > { %19912 = vmatpush3.msra.mxu0 %v26649_v1 }
 0xb1a   : > { %19913 = vmatprep.subr.mxu0 %v26582_v13 }
 0xb1b   : > { %19914 = vmatpush3.msra.mxu0 %v26650_v28 }
 0xb1c   : > { %19915 = vmatprep.subr.mxu0 %v26582_v13 }
 0xb1d   : > { %19916 = vmatpush3.msra.mxu0 %v26651_v57 }
 0xb1e   : > { %19955 = vmatprep.subr.mxu0 %v26582_v13 }
 0xb9d   : > { %v16939_v3 = vpop.f32.mrf.mxu0 }
 0xb9e   : > { %v17024_v50 = vpop.f32.mrf.mxu1 }
 0xb9f   : > { %v19779_v43 = vpop.f32.mrf.mxu0  ;;  %v17025_v63 = vadd.f32 %v17024_v50, %v16939_v3 }
 0xba0   : > { %v19814_v33 = vpop.f32.mrf.mxu1 }
 0xbbd   : > { %v17125_v4 = vpop.f32.mrf.mxu0 }
 0xbbe   : > { %v17129_v54 = vadd.f32 %v17125_v4, %v17025_v63 }
 0xbbf   : > { %v19849_v19 = vpop.f32.mrf.mxu0 }
 0xbc0   : > { %v17137_v20 = vadd.f32 %v26099_v11, %v17129_v54 }
 0xbc2   : > { %v17139_v22 = vcombine.high %v17137_v20, %v17137_v20  ;;  %v17146_v38 = vrot.slane %v17137_v20, %v23063_v23 }
 0xbc4   : > { %v17153_v59 = vrot.slane %v17139_v22, %v23063_v23  ;;  %v17154_v12 = vcombine.high %v17146_v38, %v17146_v38  ;;  %v17162_v8 = vrot.slane %v17146_v38, %v23063_v23 }
 0xbc6   : > { %v17155_v9 = vcombine.high %v17153_v59, %v17153_v59  ;;  %v17169_v24 = vrot.slane %v17153_v59, %v23063_v23  ;;  %v17176_v29 = vrot.slane %v17154_v12, %v23063_v23  ;;  %v17184_v30 = vcombine.high %v17162_v8, %v17162_v8 }
 0xbc7   : > { %v17196_v0 = vmax.f32 %v17162_v8, 0.0 }
 0xbc8   : > { %v17183_v7 = vrot.slane %v17155_v9, %v23063_v23  ;;  %v17185_v55 = vcombine.high %v17169_v24, %v17169_v24  ;;  %v17186_v6 = vcombine.high %v17176_v29, %v17176_v29  ;;  %v17197_v60 = vmax.f32 %v17176_v29, 0.0 }
 0xbc9   : > { %v17198_v34 = vmax.f32 %v17184_v30, 0.0  ;;  %v17200_v2 = vmax.f32 %v17169_v24, 0.0  ;;  %v17215_v18 = vrot.slane %v17196_v0, %v17214_v45 }
 0xbca   : > { %v17187_v25 = vcombine.high %v17183_v7, %v17183_v7  ;;  %v17199_v21 = vmax.f32 %v17186_v6, 0.0  ;;  %v17201_v37 = vmax.f32 %v17183_v7, 0.0  ;;  %v17202_v62 = vmax.f32 %v17185_v55, 0.0 }
 0xbcb   : > { %v17219_v42 = vrot.slane %v17197_v60, %v17214_v45  ;;  %v17223_v17 = vrot.slane %v17198_v34, %v17214_v45  ;;  %v17231_v1 = vrot.slane %v17200_v2, %v17214_v45  ;;  %v17252_v28 = vsel %vm899_vm0, 0.0, %v17215_v18 }
 0xbcc   : > { %v17203_v57 = vmax.f32 %v17187_v25, 0.0  ;;  %v17227_v3 = vrot.slane %v17199_v21, %v17214_v45  ;;  %v17235_v50 = vrot.slane %v17201_v37, %v17214_v45  ;;  %v17239_v43 = vrot.slane %v17202_v62, %v17214_v45 }
 0xbcd   : > { %v17253_v33 = vsel %vm899_vm0, 0.0, %v17219_v42  ;;  %v17254_v63 = vsel %vm899_vm0, 0.0, %v17223_v17  ;;  %v17260_v4 = vsel %vm16805_vm10, %v17252_v28, 0.0  ;;  %v17256_v20 = vsel %vm899_vm0, 0.0, %v17231_v1 }
 0xbce   : > { %v17243_v54 = vrot.slane %v17203_v57, %v17214_v45  ;;  %v17255_v19 = vsel %vm899_vm0, 0.0, %v17227_v3  ;;  %v17257_v22 = vsel %vm899_vm0, 0.0, %v17235_v50  ;;  %v17261_v38 = vsel %vm16805_vm10, %v17253_v33, 0.0 }
 0xbcf   : > { %v17262_v59 = vsel %vm16805_vm10, %v17254_v63, 0.0  ;;  %v26119_v12 = vsel %vm16805_vm10, %v17255_v19, 0.0  ;;  %v17258_v8 = vsel %vm899_vm0, 0.0, %v17239_v43  ;;  %v17276_v58 = vrot.slane %v17260_v4, 1 }
 0xbd0   : > { %v17278_v9 = vrot.slane %v17262_v59, 7  ;;  %v17361_v24 = vrot.slane %v17261_v38, 7  ;;  %v26123_v45 = vsel %vm16805_vm10, %v17256_v20, 0.0  ;;  %v17280_v29 = vrot.slane %v26119_v12, 6 }
 0xbd1   : > { %v17363_v30 = vrot.slane %v17262_v59, 6  ;;  %v17277_v0 = vsel %vm16855_vm11, %v17261_v38, %v17276_v58  ;;  %v17365_v55 = vrot.slane %v26119_v12, 5  ;;  %v17259_v6 = vsel %vm899_vm0, 0.0, %v17243_v54 }
 0xbd2   : > { %v17362_v7 = vsel %vm16855_vm11, %v17361_v24, %v17260_v4  ;;  %v26131_v60 = vsel %vm16805_vm10, %v17257_v22, 0.0  ;;  %v26134_v34 = vsel %vm16805_vm10, %v17258_v8, 0.0  ;;  %v26137_v2 = vsel %vm16805_vm10, %v17259_v6, 0.0  ;;  %v17606_v24 = vld [vmem:[%s26339_s6 + $0x38] sm:$0xff]  ;;  %v17599_v6 = vld [vmem:[%s26339_s6] sm:$0xff] }
 0xbd3   : > { %v17279_v18 = vsel %vm900_vm1, %v17278_v9, %v17277_v0  ;;  %v17282_v25 = vrot.slane %v26123_v45, 5  ;;  %v17284_v37 = vrot.slane %v26131_v60, 4  ;;  %v17364_v62 = vsel %vm900_vm1, %v17363_v30, %v17362_v7  ;;  %v17607_v9 = vld [vmem:[%s26339_s6 + $0x40] sm:$0xff]  ;;  %v17602_v0 = vld [vmem:[%s26339_s6 + $0x18] sm:$0xff]  ;;  %v17601_v7 = vld [vmem:[%s26339_s6 + $0x10] sm:$0xff] }
 0xbd4   : > { %v17281_v21 = vsel %vm16860_vm12, %v17280_v29, %v17279_v18  ;;  %v17286_v17 = vrot.slane %v26134_v34, 3  ;;  %v17366_v1 = vsel %vm16860_vm12, %v17365_v55, %v17364_v62  ;;  %v17367_v28 = vrot.slane %v26123_v45, 4  ;;  %v17604_v29 = vld [vmem:[%s26339_s6 + $0x28] sm:$0xff]  ;;  %v17603_v30 = vld [vmem:[%s26339_s6 + $0x20] sm:$0xff] }
 0xbd5   : > { %v17283_v42 = vsel %vm902_vm2, %v17282_v25, %v17281_v21  ;;  %v17288_v3 = vrot.slane %v26137_v2, 2  ;;  %v17369_v50 = vrot.slane %v26131_v60, 3  ;;  %v17371_v63 = vrot.slane %v26134_v34, 2  ;;  %v17600_v55 = vld [vmem:[%s26339_s6 + $0x8] sm:$0xff] }
 0xbd6   : > { %v17285_v57 = vsel %vm16865_vm13, %v17284_v37, %v17283_v42  ;;  %v17368_v33 = vsel %vm902_vm2, %v17367_v28, %v17366_v1  ;;  %v17373_v20 = vrot.slane %v26137_v2, 1  ;;  %v17446_v58 = vrot.slane %v17260_v4, 2  ;;  %v17614_v4 = vld [vmem:[%s26339_s6 + $0x78] sm:$0xff] }
 0xbd7   : > { %v17287_v43 = vsel %vm904_vm3, %v17286_v17, %v17285_v57  ;;  %v17370_v19 = vsel %vm16865_vm13, %v17369_v50, %v17368_v33 }
 0xbd8   : > { %v17289_v54 = vsel %vm16870_vm14, %v17288_v3, %v17287_v43  ;;  %v17372_v22 = vsel %vm904_vm3, %v17371_v63, %v17370_v19 }
 0xbd9   : > { %19883 = vmatmul.mubr.f32.vlgmr.msra.gmra.mxu1 %v17289_v54  ;;  %v17374_v8 = vsel %vm16870_vm14, %v17373_v20, %v17372_v22 }
 0xbda   : > { %19921 = vmatpush3.msra.mxu1 %v25945_v27  ;;  %19952 = vmatprep.mubr.msk.f32.mxu1 %vm20312_vm8, %v26582_v13  ;;  %v17447_v27 = vrot.slane %v17261_v38, 1  ;;  %v17610_v38 = vld [vmem:[%s26339_s6 + $0x58] sm:$0xff] }
 0xbdb   : > { %19918 = vmatmul.mubr.f32.vlgmr.msra.gmra.mxu0 %v17374_v8  ;;  %19922 = vmatprep.subr.mxu1 %v26582_v13 }
 0xbdc   : > { %19923 = vmatpush3.msra.mxu1 %v25949_v61  ;;  %19987 = vmatprep.mubr.msk.f32.mxu0 %vm20312_vm8, %v26582_v13  ;;  %v17448_v61 = vsel %vm16855_vm11, %v17447_v27, %v17446_v58 }
 0xbdd   : > { %19924 = vmatprep.subr.mxu1 %v26582_v13  ;;  %19956 = vmatpush3.msra.mxu0 %v17614_v4 }
 0xbde   : > { %19925 = vmatpush3.msra.mxu1 %v25955_v48  ;;  %v17450_v48 = vrot.slane %v26119_v12, 7  ;;  %19957 = vmatprep.subr.mxu0 %v26582_v13  ;;  %v17608_v12 = vld [vmem:[%s26339_s6 + $0x48] sm:$0xff] }
 0xbdf   : > { %19926 = vmatprep.subr.mxu1 %v26582_v13 }
 0xbe0   : > { %19927 = vmatpush3.msra.mxu1 %v25961_v31  ;;  %v17449_v31 = vsel %vm900_vm1, %v17262_v59, %v17448_v61  ;;  %v17609_v59 = vld [vmem:[%s26339_s6 + $0x50] sm:$0xff] }
 0xbe1   : > { %19928 = vmatprep.subr.mxu1 %v26582_v13 }
 0xbe2   : > { %19929 = vmatpush3.msra.mxu1 %v25967_v39  ;;  %v17451_v39 = vsel %vm16860_vm12, %v17450_v48, %v17449_v31 }
 0xbe3   : > { %19930 = vmatprep.subr.mxu1 %v26582_v13 }
 0xbe4   : > { %19931 = vmatpush3.msra.mxu1 %v25973_v51  ;;  %v17452_v51 = vrot.slane %v26123_v45, 6  ;;  %v17605_v45 = vld [vmem:[%s26339_s6 + $0x30] sm:$0xff] }
 0xbe5   : > { %19932 = vmatprep.subr.mxu1 %v26582_v13 }
 0xbe6   : > { %19933 = vmatpush3.msra.mxu1 %v25980_v49  ;;  %v17453_v49 = vsel %vm902_vm2, %v17452_v51, %v17451_v39 }
 0xbe7   : > { %19934 = vmatprep.subr.mxu1 %v26582_v13 }
 0xbe8   : > { %19935 = vmatpush3.msra.mxu1 %v25987_v47  ;;  %v17454_v47 = vrot.slane %v26131_v60, 5 }
 0xbe9   : > { %19936 = vmatprep.subr.mxu1 %v26582_v13 }
 0xbea   : > { %19937 = vmatpush3.msra.mxu1 %v25994_v44  ;;  %v17455_v44 = vsel %vm16865_vm13, %v17454_v47, %v17453_v49 }
 0xbeb   : > { %19938 = vmatprep.subr.mxu1 %v26582_v13 }
 0xbec   : > { %19939 = vmatpush3.msra.mxu1 %v26001_v56  ;;  %v17456_v56 = vrot.slane %v26134_v34, 4 }
 0xbed   : > { %19940 = vmatprep.subr.mxu1 %v26582_v13 }
 0xbee   : > { %19941 = vmatpush3.msra.mxu1 %v26009_v53  ;;  %v17457_v53 = vsel %vm904_vm3, %v17456_v56, %v17455_v44 }
 0xbef   : > { %19942 = vmatprep.subr.mxu1 %v26582_v13 }
 0xbf0   : > { %19943 = vmatpush3.msra.mxu1 %v26017_v41  ;;  %v17458_v41 = vrot.slane %v26137_v2, 3 }
 0xbf1   : > { %19944 = vmatprep.subr.mxu1 %v26582_v13 }
 0xbf2   : > { %19945 = vmatpush3.msra.mxu1 %v26024_v32  ;;  %v17459_v32 = vsel %vm16870_vm14, %v17458_v41, %v17457_v53 }
 0xbf3   : > { %19946 = vmatprep.subr.mxu1 %v26582_v13 }
 0xbf4   : > { %19947 = vmatpush3.msra.mxu1 %v26031_v5  ;;  %v17613_v5 = vld [vmem:[%s26339_s6 + $0x70] sm:$0xff] }
 0xbf5   : > { %19948 = vmatprep.subr.mxu1 %v26582_v13  ;;  %19958 = vmatpush3.msra.mxu0 %v17613_v5 }
 0xbf6   : > { %19949 = vmatpush3.msra.mxu1 %v26039_v35  ;;  %19959 = vmatprep.subr.mxu0 %v26582_v13  ;;  %v17612_v35 = vld [vmem:[%s26339_s6 + $0x68] sm:$0xff] }
 0xbf7   : > { %19950 = vmatprep.subr.mxu1 %v26582_v13  ;;  %19960 = vmatpush3.msra.mxu0 %v17612_v35 }
 0xbf8   : > { %19951 = vmatpush3.msra.mxu1 %v26046_v40  ;;  %v17611_v40 = vld [vmem:[%s26339_s6 + $0x60] sm:$0xff]  ;;  %19961 = vmatprep.subr.mxu0 %v26582_v13 }
 0xbf9   : > { %19953 = vmatmul.mubr.f32.vlgmr.msra.gmra.mxu1 %v17459_v32  ;;  %19962 = vmatpush3.msra.mxu0 %v17611_v40 }
 0xbfa   : > { %19963 = vmatprep.subr.mxu0 %v26582_v13 }
 0xbfb   : > { %19964 = vmatpush3.msra.mxu0 %v17610_v38 }
 0xbfc   : > { %19965 = vmatprep.subr.mxu0 %v26582_v13 }
 0xbfd   : > { %19966 = vmatpush3.msra.mxu0 %v17609_v59 }
 0xbfe   : > { %19967 = vmatprep.subr.mxu0 %v26582_v13 }
 0xbff   : > { %19968 = vmatpush3.msra.mxu0 %v17608_v12 }
 0xc00   : > { %19969 = vmatprep.subr.mxu0 %v26582_v13 }
 0xc01   : > { %19970 = vmatpush3.msra.mxu0 %v17607_v9 }
 0xc02   : > { %19971 = vmatprep.subr.mxu0 %v26582_v13 }
 0xc03   : > { %19972 = vmatpush3.msra.mxu0 %v17606_v24 }
 0xc04   : > { %19973 = vmatprep.subr.mxu0 %v26582_v13 }
 0xc05   : > { %19974 = vmatpush3.msra.mxu0 %v17605_v45 }
 0xc06   : > { %19975 = vmatprep.subr.mxu0 %v26582_v13 }
 0xc07   : > { %19976 = vmatpush3.msra.mxu0 %v17604_v29 }
 0xc08   : > { %19977 = vmatprep.subr.mxu0 %v26582_v13 }
 0xc09   : > { %19978 = vmatpush3.msra.mxu0 %v17603_v30 }
 0xc0a   : > { %19979 = vmatprep.subr.mxu0 %v26582_v13 }
 0xc0b   : > { %19980 = vmatpush3.msra.mxu0 %v17602_v0 }
 0xc0c   : > { %19981 = vmatprep.subr.mxu0 %v26582_v13 }
 0xc0d   : > { %19982 = vmatpush3.msra.mxu0 %v17601_v7 }
 0xc0e   : > { %19983 = vmatprep.subr.mxu0 %v26582_v13 }
 0xc0f   : > { %19984 = vmatpush3.msra.mxu0 %v17600_v55 }
 0xc10   : > { %19985 = vmatprep.subr.mxu0 %v26582_v13 }
 0xc11   : > { %19986 = vmatpush3.msra.mxu0 %v17599_v6 }
 0xc99   : > { %v17357_v60 = vpop.f32.mrf.mxu1 }
 0xc9b   : > { %v17442_v34 = vpop.f32.mrf.mxu0  ;;  %v19884_v2 = vpop.f32.mrf.mxu1 }
 0xc9c   : > { %v17443_v25 = vadd.f32 %v17442_v34, %v17357_v60 }
 0xc9d   : > { %v19919_v18 = vpop.f32.mrf.mxu0 }
 0xcb9   : > { %v17527_v21 = vpop.f32.mrf.mxu1 }
 0xcba   : > { %v17531_v37 = vadd.f32 %v17527_v21, %v17443_v25 }
 0xcbb   : > { %v19954_v62 = vpop.f32.mrf.mxu1 }
 0xcbc   : > { %v17532_v42 = vadd.f32 %v26099_v11, %v17531_v37 }
 0xcbe   : > { %v17534_v17 = vcombine.high %v17532_v42, %v17532_v42  ;;  %v17541_v1 = vrot.slane %v17532_v42, %v23063_v23 }
 0xcc0   : > { %v17548_v28 = vrot.slane %v17534_v17, %v23063_v23  ;;  %v17549_v57 = vcombine.high %v17541_v1, %v17541_v1  ;;  %v17557_v3 = vrot.slane %v17541_v1, %v23063_v23 }
 0xcc2   : > { %v17550_v13 = vcombine.high %v17548_v28, %v17548_v28  ;;  %v17564_v50 = vrot.slane %v17548_v28, %v23063_v23  ;;  %v17571_v43 = vrot.slane %v17549_v57, %v23063_v23  ;;  %v17579_v33 = vcombine.high %v17557_v3, %v17557_v3 }
 0xcc3   : > { %v17591_v20 = vadd.f32 %v17557_v3, %v25854_v52 }
 0xcc4   : > { %v17578_v63 = vrot.slane %v17550_v13, %v23063_v23  ;;  %v17580_v54 = vcombine.high %v17564_v50, %v17564_v50  ;;  %v17581_v19 = vcombine.high %v17571_v43, %v17571_v43  ;;  %v17592_v11 = vadd.f32 %v17571_v43, %v25859_v46 }
 0xcc5   : > { %v17593_v22 = vadd.f32 %v17579_v33, %v25861_v16  ;;  %v17595_v58 = vadd.f32 %v17564_v50, %v25870_v15 }
 0xcc6   : > { %v17582_v8 = vcombine.high %v17578_v63, %v17578_v63  ;;  %v17594_v27 = vadd.f32 %v17581_v19, %v25868_v10  ;;  %v17596_v61 = vadd.f32 %v17578_v63, %v25900_v26  ;;  %v17630_v48 = vcombine.low %v17591_v20, %v17592_v11 }
 0xcc7   : > { %v17597_v31 = vadd.f32 %v17580_v54, %v25911_v14 }
 0xcc8   : > { %v17598_v39 = vadd.f32 %v17582_v8, %v25913_v36  ;;  %v17631_v51 = vcombine.low %v17593_v22, %v17594_v27  ;;  %v17632_v46 = vcombine.low %v17595_v58, %v17596_v61  ;;  %v17640_v52 = vrot.slane %v17630_v48, %v23063_v23  ;;  %v17970_v36 = vld [vmem:[%s26340_s7] ss:$0 sm:$0xff] }
 0xcca   : > { %v17633_v49 = vcombine.low %v17597_v31, %v17598_v39  ;;  %v17647_v16 = vrot.slane %v17631_v51, %v23063_v23  ;;  %v17654_v10 = vrot.slane %v17632_v46, %v23063_v23 }
 0xccc   : > { %v17661_v15 = vrot.slane %v17633_v49, %v23063_v23  ;;  %v17662_v47 = vcombine.low %v17640_v52, %v17647_v16 }
 0xcce   : > { %v17663_v26 = vcombine.low %v17654_v10, %v17661_v15  ;;  %v17670_v44 = vrot.slane %v17662_v47, %v23063_v23 }
 0xcd0   : > { %v17677_v14 = vrot.slane %v17663_v26, %v23063_v23 }
 0xcd2   : > { %v17678_v56 = vcombine.low %v17670_v44, %v17677_v14 }
 0xcd4   : > { %19988 = vmatmul.mubr.f32.vlgmr.msra.gmra.mxu0 %v17678_v56 }
 0xd94   : > { %v17746_v53 = vpop.f32.mrf.mxu0 }
 0xd95   : > { %v17747_v41 = vadd.f32 %v17970_v36, %v17746_v53 }
 0xd96   : > { %v19989_v23 = vpop.f32.mrf.mxu0 }
 0xd97   : > { %17750 = vst [vmem:[%s329_s19] sm:$0xff] %v17747_v41 }
 0xd98   : > { %20247 = shalt.err (!%p20244_p3)
}
 0xd99   : > { %s20248_s12 = scalar_lea.hbm %s26298_s22, 128  ;;  %s20252_s18 = scalar_lea.hbm %s26341_s8, 256 }
 0xd9a   : > { %p20249_p2 = scmp.ne.s32.totalorder %s26298_s22, %s20248_s12  ;;  %p20253_p7 = scmp.lt.s32.totalorder %s26298_s22, %s26341_s8 }
 0xd9b   : > { %p20254_p6 = scmp.lt.s32.totalorder %s20252_s18, %s20248_s12 }
 0xd9c   : > { %p20250_p4 = pnand %p20249_p2, %p20398_p5 }
 0xd9d   : > { %p20255_p9 = por %p20254_p6, %p20253_p7 }
 0xd9e   : > { %p20251_p13 = pneg %p20250_p4 }
 0xda0   : > { %p20256_p10 = pnand %p20255_p9, %p20251_p13 }
 0xda2   : > { %20259 = shalt.err (!%p20256_p10)
}
 0xda3   : > { %19998 = dma.vmem_to_hbm [thread:$0]  (%p20398_p5), %s17766_s17, 128, %s26298_s22, %s17752_s23  }
 0xda4 PF: > { %p20015_p12 = scmp.ge.s32.totalorder %s20302_s30, 2  ;;  %s17777_s21 = sand.u32 1, %s20290_s27  }
 0xda5   : > { %p26653_p8 = scmp.ne.s32.totalorder %s26432_s16, 0  ;;  %s17778_s24 = scalar_lea.sflag [#allocation5], %s17777_s21 }
 0xda7   : > { %p20008_p11 = pnand %p20015_p12, %p26653_p8 }
 0xda9   : > { %p20009_p0 = pneg %p20008_p11 }
 0xdab   : > { %20285 = dma.done.wait (%p20009_p0), %s17778_s24, 128  }
 0xdac   : > { %20287 = vsyncadd (%p20009_p0), %s17778_s24, 4294967168  ;;  %p20_p1 = scmp.ge.s32.totalorder %s20385_s11, 4   ;;  %s26654_s27 = smov %s20294_s28 }
 0xdad   : > { %s26655_s28 = smov %s20298_s29  ;;  %s26656_s29 = smov %s20396_s14 }
 0xdae   : > { %s26657_s30 = smov %s20385_s11  ;;  %22 = sbr.rel (!%p20_p1) target bundleno = 5 (0x5), region = 131 }
 0xdb3   :  { %17783 = vsyncpa [#allocation4], 1 }
 0xdb4   :  { %17785 = vsyncpa [#allocation4 + $0x1], 1 }
 0xdb5   :  { %17786 = vsyncpa [#allocation7], 1 }
 0xdb6   :  { %17787 = vsyncpa [#allocation5], 1 }
 0xdb7   :  { %17789 = vsyncpa [#allocation5 + $0x1], 1 }

</bundles_post_ra>
